<compile_context>
chip_gen: v7x
topology: tpu7x:2x2x1
jax: 0.10.0
libtpu: 0.0.40
codegen_flags: <defaults>
</compile_context>

<pallas_src>
import functools

import jax
import jax.numpy as jnp
import numpy as np
from jax import lax
from jax.experimental import pallas as pl
from jax.experimental.pallas import tpu as pltpu


def _rcab_kernel(x_ref, w1_ref, b1_ref, w2_ref, b2_ref, wd_ref, bd_ref,
                 wu_ref, bu_ref, o_ref, pad_ref, col_ref, body_ref,
                 *, H, W, C, res_scale):
    f32 = jnp.float32
    bf16 = jnp.bfloat16

    # Re-zero only the 1-pixel border of the bf16 pad scratch.  The interior is
    # fully rewritten before every conv.  Done every step (a few KiB of stores)
    # so the kernel stays correct when the batch axis is sharded across
    # TensorCores (each core owns its own scratch under "parallel" semantics).
    pad_ref[0:1, :, :] = jnp.zeros((1, W + 2, C), bf16)
    pad_ref[H + 1:H + 2, :, :] = jnp.zeros((1, W + 2, C), bf16)
    pad_ref[:, 0:1, :] = jnp.zeros((H + 2, 1, C), bf16)
    pad_ref[:, W + 1:W + 2, :] = jnp.zeros((H + 2, 1, C), bf16)

    def conv3x3(w_ref, b_ref):
        # dw-only (3-tap) im2col: one shifted window read per dw (3 reads of the
        # bf16 pad instead of 9 f32 reads + 9 casts), written lane-aligned into
        # the ((H+2)*W, 3C) column buffer.
        for dw in range(3):
            col_ref[:, dw * C:(dw + 1) * C] = (
                pad_ref[:, dw:dw + W, :].reshape((H + 2) * W, C))
        # Three accumulating MXU matmuls with K = 3C, one per kernel row dh.
        # Slice starts dh*W are static multiples of 8 (W % 8 == 0), so the lhs
        # row slices stay sublane-aligned (pl.multiple_of only needed if these
        # ever become dynamic row-tile starts).
        acc = None
        for dh in range(3):
            part = jnp.dot(col_ref[dh * W:dh * W + H * W, :],
                           w_ref[dh * 3 * C:(dh + 1) * 3 * C, :],
                           preferred_element_type=f32)
            acc = part if acc is None else acc + part
        return acc + b_ref[...]                                    # (H*W, C) f32

    # --- conv1: 3x3, padding=1, + bias, ReLU ---------------------------------
    pad_ref[1:H + 1, 1:W + 1, :] = x_ref[0].astype(bf16)           # single cast
    h1 = jnp.maximum(conv3x3(w1_ref, b1_ref), 0.0)                 # (H*W, C) f32

    # --- conv2: 3x3, padding=1, + bias ---------------------------------------
    pad_ref[1:H + 1, 1:W + 1, :] = h1.reshape(H, W, C).astype(bf16)
    acc2 = conv3x3(w2_ref, b2_ref)                                 # (H*W, C) f32

    # Channel-attention mean taken while acc2 is still in vregs (saves a full
    # (H*W, C) f32 VMEM re-read); acc2 is then staged to body_ref so it does
    # not occupy vregs across the attention section.
    y = jnp.mean(acc2, axis=0, keepdims=True)                      # (1, C)
    body_ref[...] = acc2

    # --- channel attention: 1x1 -> ReLU -> 1x1 -> sigmoid ---------------------
    z = jnp.maximum(
        jnp.dot(y, wd_ref[...], preferred_element_type=f32) + bd_ref[...], 0.0)
    z = jax.nn.sigmoid(
        jnp.dot(z, wu_ref[...], preferred_element_type=f32) + bu_ref[...])
    scale = z * f32(res_scale)                                     # fold res_scale into (1, C)

    # --- residual: body * sigmoid * res_scale + x -----------------------------
    # x is re-read late from its f32 ref (never from the bf16 pad buffer), so it
    # neither occupies vregs across the convs nor loses precision.
    out = body_ref[...] * scale + x_ref[0].reshape(H * W, C)
    o_ref[...] = out.reshape(1, H, W, C).astype(o_ref.dtype)


def rcab_pallas_nhwc(x_nhwc, params, *, res_scale):
    """Core NHWC entry point (no layout transposes).  x_nhwc: (B, H, W, C)."""
    w1, b1, w2, b2, wd, bd, wu, bu = params
    B, H, W, C = x_nhwc.shape
    Cr = wd.shape[1]
    assert W % 8 == 0 and C % 128 == 0, "lane/sublane-dense layout assumed"

    # Weights pre-reshaped for the im2col matmuls ((kh, kw, cin) row order that
    # matches the dw*C + cin column layout within each dh block) and cast to
    # bf16 (MXU-native); biases reshaped to broadcastable rows.
    w1r = w1.reshape(9 * C, C).astype(jnp.bfloat16)
    w2r = w2.reshape(9 * C, C).astype(jnp.bfloat16)
    b1r = b1.reshape(1, C)
    b2r = b2.reshape(1, C)
    bdr = bd.reshape(1, Cr)
    bur = bu.reshape(1, C)

    kernel = functools.partial(_rcab_kernel, H=H, W=W, C=C, res_scale=res_scale)

    def full(shape):  # grid-invariant operand: constant index_map -> no re-DMA
        # (pipeline_mode=pl.Buffered(1) would reclaim the second weight buffer;
        #  left at the default here since total scratch is only ~0.5 MiB.)
        return pl.BlockSpec(shape, lambda b: (0,) * len(shape))

    return pl.pallas_call(
        kernel,
        out_shape=jax.ShapeDtypeStruct((B, H, W, C), x_nhwc.dtype),
        grid_spec=pltpu.PrefetchScalarGridSpec(
            num_scalar_prefetch=0,
            grid=(B,),
            in_specs=[
                pl.BlockSpec((1, H, W, C), lambda b: (b, 0, 0, 0)),  # x
                full((9 * C, C)),   # w1 (bf16, im2col layout)
                full((1, C)),       # b1
                full((9 * C, C)),   # w2
                full((1, C)),       # b2
                full((C, Cr)),      # wd
                full((1, Cr)),      # bd
                full((Cr, C)),      # wu
                full((1, C)),       # bu
            ],
            out_specs=pl.BlockSpec((1, H, W, C), lambda b: (b, 0, 0, 0)),
            scratch_shapes=[
                pltpu.VMEM((H + 2, W + 2, C), jnp.bfloat16),        # padded act (bf16)
                pltpu.VMEM(((H + 2) * W, 3 * C), jnp.bfloat16),     # 3-tap im2col
                pltpu.VMEM((H * W, C), jnp.float32),                # conv2 staging
            ],
        ),
        compiler_params=pltpu.CompilerParams(
            dimension_semantics=("parallel",)),                    # megacore batch split
    )(x_nhwc, w1r, b1r, w2r, b2r, wd, bdr, wu, bur)


def rcab_pallas(x_nchw, params, *, res_scale):
    """NCHW wrapper mirroring the PyTorch module's layout.

    In a real network keep activations NHWC and call rcab_pallas_nhwc directly:
    each transpose here is a full extra HBM read+write of the activation, which
    roughly triples the block's HBM traffic."""
    x_nhwc = jnp.transpose(x_nchw, (0, 2, 3, 1))
    out_nhwc = rcab_pallas_nhwc(x_nhwc, params, res_scale=res_scale)
    return jnp.transpose(out_nhwc, (0, 3, 1, 2))


def rcab_reference(x_nchw, params, *, res_scale):
    """Pure-JAX f32 reference (NHWC convs) mirroring the PyTorch forward."""
    w1, b1, w2, b2, wd, bd, wu, bu = params
    x = jnp.transpose(x_nchw, (0, 2, 3, 1))
    dn = ("NHWC", "HWIO", "NHWC")
    h = lax.conv_general_dilated(x, w1, (1, 1), "SAME", dimension_numbers=dn) + b1
    h = jnp.maximum(h, 0.0)
    h = lax.conv_general_dilated(h, w2, (1, 1), "SAME", dimension_numbers=dn) + b2
    y = jnp.mean(h, axis=(1, 2), keepdims=True)                    # (B,1,1,C)
    z = jnp.maximum(jnp.einsum("bijc,cr->bijr", y, wd) + bd, 0.0)
    z = jax.nn.sigmoid(jnp.einsum("bijr,rc->bijc", z, wu) + bu)
    out = (h * z) * res_scale + x
    return jnp.transpose(out, (0, 3, 1, 2))


def make_params(key, C, reduction):
    Cr = C // reduction
    ks = jax.random.split(key, 8)
    scale = 0.05
    w1 = scale * jax.random.normal(ks[0], (3, 3, C, C), jnp.float32)
    b1 = scale * jax.random.normal(ks[1], (C,), jnp.float32)
    w2 = scale * jax.random.normal(ks[2], (3, 3, C, C), jnp.float32)
    b2 = scale * jax.random.normal(ks[3], (C,), jnp.float32)
    wd = scale * jax.random.normal(ks[4], (C, Cr), jnp.float32)
    bd = scale * jax.random.normal(ks[5], (Cr,), jnp.float32)
    wu = scale * jax.random.normal(ks[6], (Cr, C), jnp.float32)
    bu = scale * jax.random.normal(ks[7], (C,), jnp.float32)
    return (w1, b1, w2, b2, wd, bd, wu, bu)


if __name__ == "__main__":
    # C=128 keeps the channel/lane axis fully dense (unmasked stores, full MXU N)
    # and W=16 keeps all in-kernel row slices sublane-aligned.
    B, C, H, W = 2, 128, 16, 16
    reduction = 16
    res_scale = 0.1

    key = jax.random.PRNGKey(0)
    kx, kp = jax.random.split(key)
    x = jax.random.normal(kx, (B, C, H, W), jnp.float32)
    params = make_params(kp, C, reduction)

    out = jax.block_until_ready(rcab_pallas(x, params, res_scale=res_scale))
    ref = jax.block_until_ready(rcab_reference(x, params, res_scale=res_scale))

    # bf16 MXU operands with f32 accumulation vs. a pure-f32 reference.
    np.testing.assert_allclose(np.asarray(out), np.asarray(ref),
                               rtol=2e-2, atol=2e-2)
    print("KERNEL_OK")
</pallas_src>

<mosaic_0001>
module attributes {stable_mosaic.version = 11 : i64} {
  func.func @_rcab_kernel(%arg0: i32, %arg1: memref<1x16x16x128xf32, #tpu.memory_space<vmem>>, %arg2: memref<1152x128xbf16, #tpu.memory_space<vmem>>, %arg3: memref<1x128xf32, #tpu.memory_space<vmem>>, %arg4: memref<1152x128xbf16, #tpu.memory_space<vmem>>, %arg5: memref<1x128xf32, #tpu.memory_space<vmem>>, %arg6: memref<128x8xf32, #tpu.memory_space<vmem>>, %arg7: memref<1x8xf32, #tpu.memory_space<vmem>>, %arg8: memref<8x128xf32, #tpu.memory_space<vmem>>, %arg9: memref<1x128xf32, #tpu.memory_space<vmem>>, %arg10: memref<1x16x16x128xf32, #tpu.memory_space<vmem>>, %arg11: memref<18x18x128xbf16, #tpu.memory_space<vmem>>, %arg12: memref<288x384xbf16, #tpu.memory_space<vmem>>, %arg13: memref<256x128xf32, #tpu.memory_space<vmem>>) attributes {dimension_semantics = [#tpu.dimension_semantics<parallel>], iteration_bounds = array<i64: 2>, scalar_prefetch = 0 : i64, scratch_operands = 3 : i64, tpu.core_type = #tpu.core_type<tc>, window_params = [{transform_indices = @transform_0, window_bounds = array<i64: 1, 16, 16, 128>}, {pipeline_mode = #tpu.pipeline_mode<synchronous>, transform_indices = @transform_1, window_bounds = array<i64: 1152, 128>}, {pipeline_mode = #tpu.pipeline_mode<synchronous>, transform_indices = @transform_2, window_bounds = array<i64: 1, 128>}, {pipeline_mode = #tpu.pipeline_mode<synchronous>, transform_indices = @transform_3, window_bounds = array<i64: 1152, 128>}, {pipeline_mode = #tpu.pipeline_mode<synchronous>, transform_indices = @transform_4, window_bounds = array<i64: 1, 128>}, {pipeline_mode = #tpu.pipeline_mode<synchronous>, transform_indices = @transform_5, window_bounds = array<i64: 128, 8>}, {pipeline_mode = #tpu.pipeline_mode<synchronous>, transform_indices = @transform_6, window_bounds = array<i64: 1, 8>}, {pipeline_mode = #tpu.pipeline_mode<synchronous>, transform_indices = @transform_7, window_bounds = array<i64: 8, 128>}, {pipeline_mode = #tpu.pipeline_mode<synchronous>, transform_indices = @transform_8, window_bounds = array<i64: 1, 128>}, {transform_indices = @transform_9, window_bounds = array<i64: 1, 16, 16, 128>}]} {
    %cst = arith.constant 0.000000e+00 : bf16
    %0 = vector.broadcast %cst : bf16 to vector<1x18x128xbf16>
    %c0 = arith.constant 0 : index
    %c0_0 = arith.constant 0 : index
    %c0_1 = arith.constant 0 : index
    %1 = vector.load %arg11[%c0, %c0_0, %c0_1] : memref<18x18x128xbf16, #tpu.memory_space<vmem>>, vector<1x18x128xbf16>
    tpu.vector_store %arg11[%c0, %c0_0, %c0_1], %0 {strides = array<i32>} : memref<18x18x128xbf16, #tpu.memory_space<vmem>>, vector<1x18x128xbf16>,
    %cst_2 = arith.constant 0.000000e+00 : bf16
    %2 = vector.broadcast %cst_2 : bf16 to vector<1x18x128xbf16>
    %c17 = arith.constant 17 : index
    %c0_3 = arith.constant 0 : index
    %c0_4 = arith.constant 0 : index
    %3 = vector.load %arg11[%c17, %c0_3, %c0_4] : memref<18x18x128xbf16, #tpu.memory_space<vmem>>, vector<1x18x128xbf16>
    tpu.vector_store %arg11[%c17, %c0_3, %c0_4], %2 {strides = array<i32>} : memref<18x18x128xbf16, #tpu.memory_space<vmem>>, vector<1x18x128xbf16>,
    %cst_5 = arith.constant 0.000000e+00 : bf16
    %4 = vector.broadcast %cst_5 : bf16 to vector<18x1x128xbf16>
    %c0_6 = arith.constant 0 : index
    %c0_7 = arith.constant 0 : index
    %c0_8 = arith.constant 0 : index
    %5 = vector.load %arg11[%c0_6, %c0_7, %c0_8] : memref<18x18x128xbf16, #tpu.memory_space<vmem>>, vector<18x1x128xbf16>
    tpu.vector_store %arg11[%c0_6, %c0_7, %c0_8], %4 {strides = array<i32>} : memref<18x18x128xbf16, #tpu.memory_space<vmem>>, vector<18x1x128xbf16>,
    %cst_9 = arith.constant 0.000000e+00 : bf16
    %6 = vector.broadcast %cst_9 : bf16 to vector<18x1x128xbf16>
    %c0_10 = arith.constant 0 : index
    %c17_11 = arith.constant 17 : index
    %c0_12 = arith.constant 0 : index
    %7 = vector.load %arg11[%c0_10, %c17_11, %c0_12] : memref<18x18x128xbf16, #tpu.memory_space<vmem>>, vector<18x1x128xbf16>
    tpu.vector_store %arg11[%c0_10, %c17_11, %c0_12], %6 {strides = array<i32>} : memref<18x18x128xbf16, #tpu.memory_space<vmem>>, vector<18x1x128xbf16>,
    %c0_13 = arith.constant 0 : index
    %c0_14 = arith.constant 0 : index
    %c0_15 = arith.constant 0 : index
    %c0_16 = arith.constant 0 : index
    %8 = vector.load %arg1[%c0_13, %c0_14, %c0_15, %c0_16] : memref<1x16x16x128xf32, #tpu.memory_space<vmem>>, vector<1x16x16x128xf32>
    %9 = vector.shape_cast %8 : vector<1x16x16x128xf32> to vector<16x16x128xf32>
    %10 = arith.truncf %9 : vector<16x16x128xf32> to vector<16x16x128xbf16>
    %c1 = arith.constant 1 : index
    %c1_17 = arith.constant 1 : index
    %c0_18 = arith.constant 0 : index
    %11 = vector.load %arg11[%c1, %c1_17, %c0_18] : memref<18x18x128xbf16, #tpu.memory_space<vmem>>, vector<16x16x128xbf16>
    tpu.vector_store %arg11[%c1, %c1_17, %c0_18], %10 {strides = array<i32>} : memref<18x18x128xbf16, #tpu.memory_space<vmem>>, vector<16x16x128xbf16>,
    %c0_19 = arith.constant 0 : index
    %c0_20 = arith.constant 0 : index
    %c0_21 = arith.constant 0 : index
    %12 = vector.load %arg11[%c0_19, %c0_20, %c0_21] : memref<18x18x128xbf16, #tpu.memory_space<vmem>>, vector<18x16x128xbf16>
    %13 = vector.shape_cast %12 : vector<18x16x128xbf16> to vector<288x128xbf16>
    %c0_22 = arith.constant 0 : index
    %c0_23 = arith.constant 0 : index
    %14 = vector.load %arg12[%c0_22, %c0_23] : memref<288x384xbf16, #tpu.memory_space<vmem>>, vector<288x128xbf16>
    tpu.vector_store %arg12[%c0_22, %c0_23], %13 {strides = array<i32>} : memref<288x384xbf16, #tpu.memory_space<vmem>>, vector<288x128xbf16>,
    %c0_24 = arith.constant 0 : index
    %c1_25 = arith.constant 1 : index
    %c0_26 = arith.constant 0 : index
    %15 = vector.load %arg11[%c0_24, %c1_25, %c0_26] : memref<18x18x128xbf16, #tpu.memory_space<vmem>>, vector<18x16x128xbf16>
    %16 = vector.shape_cast %15 : vector<18x16x128xbf16> to vector<288x128xbf16>
    %c0_27 = arith.constant 0 : index
    %c128 = arith.constant 128 : index
    %17 = vector.load %arg12[%c0_27, %c128] : memref<288x384xbf16, #tpu.memory_space<vmem>>, vector<288x128xbf16>
    tpu.vector_store %arg12[%c0_27, %c128], %16 {strides = array<i32>} : memref<288x384xbf16, #tpu.memory_space<vmem>>, vector<288x128xbf16>,
    %c0_28 = arith.constant 0 : index
    %c2 = arith.constant 2 : index
    %c0_29 = arith.constant 0 : index
    %18 = vector.load %arg11[%c0_28, %c2, %c0_29] : memref<18x18x128xbf16, #tpu.memory_space<vmem>>, vector<18x16x128xbf16>
    %19 = vector.shape_cast %18 : vector<18x16x128xbf16> to vector<288x128xbf16>
    %c0_30 = arith.constant 0 : index
    %c256 = arith.constant 256 : index
    %20 = vector.load %arg12[%c0_30, %c256] : memref<288x384xbf16, #tpu.memory_space<vmem>>, vector<288x128xbf16>
    tpu.vector_store %arg12[%c0_30, %c256], %19 {strides = array<i32>} : memref<288x384xbf16, #tpu.memory_space<vmem>>, vector<288x128xbf16>,
    %c0_31 = arith.constant 0 : index
    %c0_32 = arith.constant 0 : index
    %21 = vector.load %arg12[%c0_31, %c0_32] : memref<288x384xbf16, #tpu.memory_space<vmem>>, vector<256x384xbf16>
    %c0_33 = arith.constant 0 : index
    %c0_34 = arith.constant 0 : index
    %22 = vector.load %arg2[%c0_33, %c0_34] : memref<1152x128xbf16, #tpu.memory_space<vmem>>, vector<384x128xbf16>
    %cst_35 = arith.constant dense<0.000000e+00> : vector<256x128xf32>
    %23 = tpu.matmul %21, %22, %cst_35 {dimension_numbers = #tpu.dot_dimension_numbers<[1], [0], [0], [1], [0, 0, 1, 1], [], []>} : vector<256x384xbf16>, vector<384x128xbf16>, vector<256x128xf32> -> vector<256x128xf32>
    %c16 = arith.constant 16 : index
    %c0_36 = arith.constant 0 : index
    %24 = vector.load %arg12[%c16, %c0_36] : memref<288x384xbf16, #tpu.memory_space<vmem>>, vector<256x384xbf16>
    %c384 = arith.constant 384 : index
    %c0_37 = arith.constant 0 : index
    %25 = vector.load %arg2[%c384, %c0_37] : memref<1152x128xbf16, #tpu.memory_space<vmem>>, vector<384x128xbf16>
    %cst_38 = arith.constant dense<0.000000e+00> : vector<256x128xf32>
    %26 = tpu.matmul %24, %25, %cst_38 {dimension_numbers = #tpu.dot_dimension_numbers<[1], [0], [0], [1], [0, 0, 1, 1], [], []>} : vector<256x384xbf16>, vector<384x128xbf16>, vector<256x128xf32> -> vector<256x128xf32>
    %27 = arith.addf %23, %26 : vector<256x128xf32>
    %c32 = arith.constant 32 : index
    %c0_39 = arith.constant 0 : index
    %28 = vector.load %arg12[%c32, %c0_39] : memref<288x384xbf16, #tpu.memory_space<vmem>>, vector<256x384xbf16>
    %c768 = arith.constant 768 : index
    %c0_40 = arith.constant 0 : index
    %29 = vector.load %arg2[%c768, %c0_40] : memref<1152x128xbf16, #tpu.memory_space<vmem>>, vector<384x128xbf16>
    %cst_41 = arith.constant dense<0.000000e+00> : vector<256x128xf32>
    %30 = tpu.matmul %28, %29, %cst_41 {dimension_numbers = #tpu.dot_dimension_numbers<[1], [0], [0], [1], [0, 0, 1, 1], [], []>} : vector<256x384xbf16>, vector<384x128xbf16>, vector<256x128xf32> -> vector<256x128xf32>
    %31 = arith.addf %27, %30 : vector<256x128xf32>
    %c0_42 = arith.constant 0 : index
    %c0_43 = arith.constant 0 : index
    %32 = vector.load %arg3[%c0_42, %c0_43] : memref<1x128xf32, #tpu.memory_space<vmem>>, vector<1x128xf32>
    %33 = vector.broadcast %32 : vector<1x128xf32> to vector<256x128xf32>
    %34 = arith.addf %31, %33 : vector<256x128xf32>
    %cst_44 = arith.constant 0.000000e+00 : f32
    %35 = vector.broadcast %cst_44 : f32 to vector<256x128xf32>
    %36 = arith.maximumf %34, %35 : vector<256x128xf32>
    %37 = vector.shape_cast %36 : vector<256x128xf32> to vector<16x16x128xf32>
    %38 = arith.truncf %37 : vector<16x16x128xf32> to vector<16x16x128xbf16>
    %c1_45 = arith.constant 1 : index
    %c1_46 = arith.constant 1 : index
    %c0_47 = arith.constant 0 : index
    %39 = vector.load %arg11[%c1_45, %c1_46, %c0_47] : memref<18x18x128xbf16, #tpu.memory_space<vmem>>, vector<16x16x128xbf16>
    tpu.vector_store %arg11[%c1_45, %c1_46, %c0_47], %38 {strides = array<i32>} : memref<18x18x128xbf16, #tpu.memory_space<vmem>>, vector<16x16x128xbf16>,
    %c0_48 = arith.constant 0 : index
    %c0_49 = arith.constant 0 : index
    %c0_50 = arith.constant 0 : index
    %40 = vector.load %arg11[%c0_48, %c0_49, %c0_50] : memref<18x18x128xbf16, #tpu.memory_space<vmem>>, vector<18x16x128xbf16>
    %41 = vector.shape_cast %40 : vector<18x16x128xbf16> to vector<288x128xbf16>
    %c0_51 = arith.constant 0 : index
    %c0_52 = arith.constant 0 : index
    %42 = vector.load %arg12[%c0_51, %c0_52] : memref<288x384xbf16, #tpu.memory_space<vmem>>, vector<288x128xbf16>
    tpu.vector_store %arg12[%c0_51, %c0_52], %41 {strides = array<i32>} : memref<288x384xbf16, #tpu.memory_space<vmem>>, vector<288x128xbf16>,
    %c0_53 = arith.constant 0 : index
    %c1_54 = arith.constant 1 : index
    %c0_55 = arith.constant 0 : index
    %43 = vector.load %arg11[%c0_53, %c1_54, %c0_55] : memref<18x18x128xbf16, #tpu.memory_space<vmem>>, vector<18x16x128xbf16>
    %44 = vector.shape_cast %43 : vector<18x16x128xbf16> to vector<288x128xbf16>
    %c0_56 = arith.constant 0 : index
    %c128_57 = arith.constant 128 : index
    %45 = vector.load %arg12[%c0_56, %c128_57] : memref<288x384xbf16, #tpu.memory_space<vmem>>, vector<288x128xbf16>
    tpu.vector_store %arg12[%c0_56, %c128_57], %44 {strides = array<i32>} : memref<288x384xbf16, #tpu.memory_space<vmem>>, vector<288x128xbf16>,
    %c0_58 = arith.constant 0 : index
    %c2_59 = arith.constant 2 : index
    %c0_60 = arith.constant 0 : index
    %46 = vector.load %arg11[%c0_58, %c2_59, %c0_60] : memref<18x18x128xbf16, #tpu.memory_space<vmem>>, vector<18x16x128xbf16>
    %47 = vector.shape_cast %46 : vector<18x16x128xbf16> to vector<288x128xbf16>
    %c0_61 = arith.constant 0 : index
    %c256_62 = arith.constant 256 : index
    %48 = vector.load %arg12[%c0_61, %c256_62] : memref<288x384xbf16, #tpu.memory_space<vmem>>, vector<288x128xbf16>
    tpu.vector_store %arg12[%c0_61, %c256_62], %47 {strides = array<i32>} : memref<288x384xbf16, #tpu.memory_space<vmem>>, vector<288x128xbf16>,
    %c0_63 = arith.constant 0 : index
    %c0_64 = arith.constant 0 : index
    %49 = vector.load %arg12[%c0_63, %c0_64] : memref<288x384xbf16, #tpu.memory_space<vmem>>, vector<256x384xbf16>
    %c0_65 = arith.constant 0 : index
    %c0_66 = arith.constant 0 : index
    %50 = vector.load %arg4[%c0_65, %c0_66] : memref<1152x128xbf16, #tpu.memory_space<vmem>>, vector<384x128xbf16>
    %cst_67 = arith.constant dense<0.000000e+00> : vector<256x128xf32>
    %51 = tpu.matmul %49, %50, %cst_67 {dimension_numbers = #tpu.dot_dimension_numbers<[1], [0], [0], [1], [0, 0, 1, 1], [], []>} : vector<256x384xbf16>, vector<384x128xbf16>, vector<256x128xf32> -> vector<256x128xf32>
    %c16_68 = arith.constant 16 : index
    %c0_69 = arith.constant 0 : index
    %52 = vector.load %arg12[%c16_68, %c0_69] : memref<288x384xbf16, #tpu.memory_space<vmem>>, vector<256x384xbf16>
    %c384_70 = arith.constant 384 : index
    %c0_71 = arith.constant 0 : index
    %53 = vector.load %arg4[%c384_70, %c0_71] : memref<1152x128xbf16, #tpu.memory_space<vmem>>, vector<384x128xbf16>
    %cst_72 = arith.constant dense<0.000000e+00> : vector<256x128xf32>
    %54 = tpu.matmul %52, %53, %cst_72 {dimension_numbers = #tpu.dot_dimension_numbers<[1], [0], [0], [1], [0, 0, 1, 1], [], []>} : vector<256x384xbf16>, vector<384x128xbf16>, vector<256x128xf32> -> vector<256x128xf32>
    %55 = arith.addf %51, %54 : vector<256x128xf32>
    %c32_73 = arith.constant 32 : index
    %c0_74 = arith.constant 0 : index
    %56 = vector.load %arg12[%c32_73, %c0_74] : memref<288x384xbf16, #tpu.memory_space<vmem>>, vector<256x384xbf16>
    %c768_75 = arith.constant 768 : index
    %c0_76 = arith.constant 0 : index
    %57 = vector.load %arg4[%c768_75, %c0_76] : memref<1152x128xbf16, #tpu.memory_space<vmem>>, vector<384x128xbf16>
    %cst_77 = arith.constant dense<0.000000e+00> : vector<256x128xf32>
    %58 = tpu.matmul %56, %57, %cst_77 {dimension_numbers = #tpu.dot_dimension_numbers<[1], [0], [0], [1], [0, 0, 1, 1], [], []>} : vector<256x384xbf16>, vector<384x128xbf16>, vector<256x128xf32> -> vector<256x128xf32>
    %59 = arith.addf %55, %58 : vector<256x128xf32>
    %c0_78 = arith.constant 0 : index
    %c0_79 = arith.constant 0 : index
    %60 = vector.load %arg5[%c0_78, %c0_79] : memref<1x128xf32, #tpu.memory_space<vmem>>, vector<1x128xf32>
    %61 = vector.broadcast %60 : vector<1x128xf32> to vector<256x128xf32>
    %62 = arith.addf %59, %61 : vector<256x128xf32>
    %cst_80 = arith.constant dense<0.000000e+00> : vector<128xf32>
    %63 = vector.multi_reduction <add>, %62, %cst_80 [0] : vector<256x128xf32> to vector<128xf32>
    %64 = vector.shape_cast %63 : vector<128xf32> to vector<1x128xf32>
    %cst_81 = arith.constant 2.560000e+02 : f32
    %65 = vector.broadcast %cst_81 : f32 to vector<1x128xf32>
    %66 = arith.divf %64, %65 : vector<1x128xf32>
    %c0_82 = arith.constant 0 : index
    %c0_83 = arith.constant 0 : index
    %67 = vector.load %arg13[%c0_82, %c0_83] : memref<256x128xf32, #tpu.memory_space<vmem>>, vector<256x128xf32>
    tpu.vector_store %arg13[%c0_82, %c0_83], %62 {strides = array<i32>} : memref<256x128xf32, #tpu.memory_space<vmem>>, vector<256x128xf32>,
    %c0_84 = arith.constant 0 : index
    %c0_85 = arith.constant 0 : index
    %68 = vector.load %arg6[%c0_84, %c0_85] : memref<128x8xf32, #tpu.memory_space<vmem>>, vector<128x8xf32>
    %cst_86 = arith.constant dense<0.000000e+00> : vector<1x8xf32>
    %69 = tpu.matmul %66, %68, %cst_86 {dimension_numbers = #tpu.dot_dimension_numbers<[1], [0], [0], [1], [0, 0, 1, 1], [], []>} : vector<1x128xf32>, vector<128x8xf32>, vector<1x8xf32> -> vector<1x8xf32>
    %c0_87 = arith.constant 0 : index
    %c0_88 = arith.constant 0 : index
    %70 = vector.load %arg7[%c0_87, %c0_88] : memref<1x8xf32, #tpu.memory_space<vmem>>, vector<1x8xf32>
    %71 = arith.addf %69, %70 : vector<1x8xf32>
    %cst_89 = arith.constant 0.000000e+00 : f32
    %72 = vector.broadcast %cst_89 : f32 to vector<1x8xf32>
    %73 = arith.maximumf %71, %72 : vector<1x8xf32>
    %c0_90 = arith.constant 0 : index
    %c0_91 = arith.constant 0 : index
    %74 = vector.load %arg8[%c0_90, %c0_91] : memref<8x128xf32, #tpu.memory_space<vmem>>, vector<8x128xf32>
    %cst_92 = arith.constant dense<0.000000e+00> : vector<1x128xf32>
    %75 = tpu.matmul %73, %74, %cst_92 {dimension_numbers = #tpu.dot_dimension_numbers<[1], [0], [0], [1], [0, 0, 1, 1], [], []>} : vector<1x8xf32>, vector<8x128xf32>, vector<1x128xf32> -> vector<1x128xf32>
    %c0_93 = arith.constant 0 : index
    %c0_94 = arith.constant 0 : index
    %76 = vector.load %arg9[%c0_93, %c0_94] : memref<1x128xf32, #tpu.memory_space<vmem>>, vector<1x128xf32>
    %77 = arith.addf %75, %76 : vector<1x128xf32>
    %78 = arith.negf %77 : vector<1x128xf32>
    %79 = math.exp %78 : vector<1x128xf32>
    %cst_95 = arith.constant 1.000000e+00 : f32
    %80 = vector.broadcast %cst_95 : f32 to vector<1x128xf32>
    %81 = arith.addf %80, %79 : vector<1x128xf32>
    %82 = arith.divf %80, %81 : vector<1x128xf32>
    %cst_96 = arith.constant 1.000000e-01 : f32
    %83 = vector.broadcast %cst_96 : f32 to vector<1x128xf32>
    %84 = arith.mulf %82, %83 : vector<1x128xf32>
    %c0_97 = arith.constant 0 : index
    %c0_98 = arith.constant 0 : index
    %85 = vector.load %arg13[%c0_97, %c0_98] : memref<256x128xf32, #tpu.memory_space<vmem>>, vector<256x128xf32>
    %86 = vector.broadcast %84 : vector<1x128xf32> to vector<256x128xf32>
    %87 = arith.mulf %85, %86 : vector<256x128xf32>
    %c0_99 = arith.constant 0 : index
    %c0_100 = arith.constant 0 : index
    %c0_101 = arith.constant 0 : index
    %c0_102 = arith.constant 0 : index
    %88 = vector.load %arg1[%c0_99, %c0_100, %c0_101, %c0_102] : memref<1x16x16x128xf32, #tpu.memory_space<vmem>>, vector<1x16x16x128xf32>
    %89 = vector.shape_cast %88 : vector<1x16x16x128xf32> to vector<16x16x128xf32>
    %90 = vector.shape_cast %89 : vector<16x16x128xf32> to vector<256x128xf32>
    %91 = arith.addf %87, %90 : vector<256x128xf32>
    %92 = vector.shape_cast %91 : vector<256x128xf32> to vector<1x16x16x128xf32>
    %c0_103 = arith.constant 0 : index
    %c0_104 = arith.constant 0 : index
    %c0_105 = arith.constant 0 : index
    %c0_106 = arith.constant 0 : index
    %93 = vector.load %arg10[%c0_103, %c0_104, %c0_105, %c0_106] : memref<1x16x16x128xf32, #tpu.memory_space<vmem>>, vector<1x16x16x128xf32>
    tpu.vector_store %arg10[%c0_103, %c0_104, %c0_105, %c0_106], %92 {strides = array<i32>} : memref<1x16x16x128xf32, #tpu.memory_space<vmem>>, vector<1x16x16x128xf32>,
    return
  }
  func.func @transform_0(%arg0: i32) -> (i32, i32, i32, i32) {
    %c0_i32 = arith.constant 0 : i32
    %c0_i32_0 = arith.constant 0 : i32
    %c0_i32_1 = arith.constant 0 : i32
    %c0_i32_2 = arith.constant 0 : i32
    return %arg0, %c0_i32, %c0_i32_0, %c0_i32_1 : i32, i32, i32, i32
  }
  func.func @transform_1(%arg0: i32) -> (i32, i32) {
    %c0_i32 = arith.constant 0 : i32
    %c0_i32_0 = arith.constant 0 : i32
    %c0_i32_1 = arith.constant 0 : i32
    return %c0_i32, %c0_i32_0 : i32, i32
  }
  func.func @transform_2(%arg0: i32) -> (i32, i32) {
    %c0_i32 = arith.constant 0 : i32
    %c0_i32_0 = arith.constant 0 : i32
    %c0_i32_1 = arith.constant 0 : i32
    return %c0_i32, %c0_i32_0 : i32, i32
  }
  func.func @transform_3(%arg0: i32) -> (i32, i32) {
    %c0_i32 = arith.constant 0 : i32
    %c0_i32_0 = arith.constant 0 : i32
    %c0_i32_1 = arith.constant 0 : i32
    return %c0_i32, %c0_i32_0 : i32, i32
  }
  func.func @transform_4(%arg0: i32) -> (i32, i32) {
    %c0_i32 = arith.constant 0 : i32
    %c0_i32_0 = arith.constant 0 : i32
    %c0_i32_1 = arith.constant 0 : i32
    return %c0_i32, %c0_i32_0 : i32, i32
  }
  func.func @transform_5(%arg0: i32) -> (i32, i32) {
    %c0_i32 = arith.constant 0 : i32
    %c0_i32_0 = arith.constant 0 : i32
    %c0_i32_1 = arith.constant 0 : i32
    return %c0_i32, %c0_i32_0 : i32, i32
  }
  func.func @transform_6(%arg0: i32) -> (i32, i32) {
    %c0_i32 = arith.constant 0 : i32
    %c0_i32_0 = arith.constant 0 : i32
    %c0_i32_1 = arith.constant 0 : i32
    return %c0_i32, %c0_i32_0 : i32, i32
  }
  func.func @transform_7(%arg0: i32) -> (i32, i32) {
    %c0_i32 = arith.constant 0 : i32
    %c0_i32_0 = arith.constant 0 : i32
    %c0_i32_1 = arith.constant 0 : i32
    return %c0_i32, %c0_i32_0 : i32, i32
  }
  func.func @transform_8(%arg0: i32) -> (i32, i32) {
    %c0_i32 = arith.constant 0 : i32
    %c0_i32_0 = arith.constant 0 : i32
    %c0_i32_1 = arith.constant 0 : i32
    return %c0_i32, %c0_i32_0 : i32, i32
  }
  func.func @transform_9(%arg0: i32) -> (i32, i32, i32, i32) {
    %c0_i32 = arith.constant 0 : i32
    %c0_i32_0 = arith.constant 0 : i32
    %c0_i32_1 = arith.constant 0 : i32
    %c0_i32_2 = arith.constant 0 : i32
    return %arg0, %c0_i32, %c0_i32_0, %c0_i32_1 : i32, i32, i32, i32
  }
}

</mosaic_0001>

<bundles_post_ra>
// kernel: tpu_custom_call.1
= control target key start
LH: loop header
LB: loop body
LE: loop exit
PB: predicated region body
PF: predicated region fallthrough
CT: control target
= control target key end

     0   :  { %14 = vsyncpa [#allocation6], 0  ;;  %s12804_s0 = inlined_call_operand.hbm [shape: f32[2,16,16,128], index: 0, kind: input, shape index: {}]   ;;  %s12805_s1 = inlined_call_operand.hbm [shape: bf16[1152,128], index: 1, kind: input, shape index: {}]   ;;  %s12806_s2 = inlined_call_operand.vmem [shape: f32[1,128], index: 2, kind: input, shape index: {}]   ;;  %s12807_s3 = inlined_call_operand.hbm [shape: bf16[1152,128], index: 3, kind: input, shape index: {}]   ;;  %s12808_s4 = inlined_call_operand.vmem [shape: f32[1,128], index: 4, kind: input, shape index: {}]   ;;  %s12809_s5 = inlined_call_operand.vmem [shape: f32[128,8], index: 5, kind: input, shape index: {}]   ;;  %s12810_s6 = inlined_call_operand.vmem [shape: f32[1,8], index: 6, kind: input, shape index: {}]   ;;  %s12811_s7 = inlined_call_operand.vmem [shape: f32[8,128], index: 7, kind: input, shape index: {}]   ;;  %s12812_s8 = inlined_call_operand.vmem [shape: f32[1,128], index: 8, kind: input, shape index: {}]   ;;  %s12813_s9 = inlined_call_operand.hbm [shape: f32[2,16,16,128], index: 9, kind: output, shape index: {}]  }
   0x1   :  { %16 = vsyncpa [#allocation6 + $0x1], 0 }
   0x2   :  { %17 = vsyncpa [#allocation9], 0 }
   0x3   :  { %18 = vsyncpa [#allocation7], 0 }
   0x4   :  { %20 = vsyncpa [#allocation7 + $0x1], 0  ;;  %s10146_s30 = smov 0   ;;  %s10148_s10 = smov 0  }
   0x5   :  { %s10150_s11 = smov 0   ;;  %s10152_s12 = smov 0  }
   0x6 LB: > { %s10167_s13 = sadd.s32 4294967295, %s10080_s12   ;;  %s7692_s14 = sadd.s32 4294967294, %s10080_s12   ;;  %s10080_s12 = sphi %s10152_s12, %s12981_s12   ;;  %s10076_s11 = sphi %s10150_s11, %s12980_s11   ;;  %s10072_s10 = sphi %s10148_s10, %s12979_s10   ;;  %s10068_s30 = sphi %s10146_s30, %s12978_s30  }
   0x7   : > { %p46_p0 = scmp.ne.s32.totalorder %s10072_s10, %s10068_s30  ;;  %p12814_p1 = scmp.eq.s32.totalorder %s10167_s13, 0 }
   0x8   : > { %p244_p3 = scmp.eq.s32.totalorder %s7692_s14, 1  ;;  %p7693_p5 = scmp.ge.s32.totalorder %s10080_s12, 1 }
   0x9   : > { %p10176_p4 = por %p12814_p1, %p46_p0  ;;  %p251_p7 = scmp.lt.s32.totalorder %s10080_s12, 3 }
   0xa   : > { %p10181_p6 = por %p244_p3, %p46_p0  ;;  %s10082_s18 = smov [#allocation8]  }
   0xb   : > { %s12844_s15 = scalar_select %p10176_p4, 1, 0 }
   0xc   : > { %s12845_s16 = scalar_select %p10181_p6, 1, 0 }
   0xd   : > { %p10186_p8 = pnand %p7693_p5, %p251_p7  ;;  %s263_s19 = sshll.u32 %s10082_s18, 4  ;;  %s10190_s19 = int_to_ptr.vmem [resolvable:$true] %s263_s19 }
   0xe   : > { %12846 = sst [smem:[#allocation15_spill]] %s12845_s16  ;;  %s10083_s21 = smov [#allocation10]  }
   0xf   : > { %p9651_p9 = pneg %p10186_p8  ;;  %s279_s22 = sshll.u32 %s10083_s21, 4  ;;  %s10201_s22 = int_to_ptr.vmem [resolvable:$true] %s279_s22 }
  0x10   : > { %s9924_s25 = scalar_lea.hbm %s12805_s1, 9216 }
  0x11   : > { %p10197_p11 = pnand %p9651_p9, %p12814_p1  ;;  %p9925_p12 = scmp.ne.s32.totalorder %s12805_s1, %s9924_s25 }
  0x12   : > { %p9931_p5 = scmp.lt.u32.totalorder %s9924_s25, %s12805_s1 }
  0x13   : > { %p9926_p13 = pneg %p10197_p11 }
  0x15   : > { %p9927_p0 = pnand %p9926_p13, %p9925_p12 }
  0x17   : > { %p9928_p3 = pneg %p9927_p0 }
  0x19   : > { %p9933_p7 = pnand %p9931_p5, %p9928_p3 }
  0x1b   : > { %9936 = shalt.err (!%p9933_p7)
}
  0x1c   : > { %s9937_s14 = scalar_lea.vmem %s10190_s19, 9216  ;;  %p9945_p2 = scmp.lt.s32.totalorder %s10190_s19, %s10190_s19 }
  0x1d   : > { %p9938_p9 = scmp.ne.s32.totalorder %s10190_s19, %s9937_s14  ;;  %p9946_p12 = scmp.lt.s32.totalorder %s9937_s14, %s9937_s14 }
  0x1f   : > { %p9940_p10 = pnand %p9938_p9, %p9926_p13  ;;  %p9947_p0 = por %p9946_p12, %p9945_p2 }
  0x21   : > { %p9941_p1 = pneg %p9940_p10 }
  0x23   : > { %p9948_p6 = pnand %p9947_p0, %p9941_p1 }
  0x25   : > { %9951 = shalt.err (!%p9948_p6)
}
  0x26   : > { %s10084_s18 = smov 64   ;;  %s10085_s21 = smov 4  }
  0x27   : > { %9654 = dma.hbm_to_vmem [thread:$0]  (!%p10197_p11), %s12805_s1, 9216, %s10190_s19, [#allocation9], %s10084_s18, %s10084_s18, %s10085_s21  }
  0x28   : > { %s9952_s27 = scalar_lea.hbm %s12807_s3, 9216 }
  0x29   : > { %p9953_p2 = scmp.ne.s32.totalorder %s12807_s3, %s9952_s27  ;;  %p9959_p10 = scmp.lt.u32.totalorder %s9952_s27, %s12807_s3 }
  0x2b   : > { %p9955_p1 = pnand %p9953_p2, %p9926_p13 }
  0x2d   : > { %p9956_p6 = pneg %p9955_p1 }
  0x2f   : > { %p9961_p3 = pnand %p9959_p10, %p9956_p6 }
  0x31   : > { %9964 = shalt.err (!%p9961_p3)
}
  0x32   : > { %s9965_s19 = scalar_lea.vmem %s10201_s22, 9216  ;;  %p9973_p12 = scmp.lt.s32.totalorder %s10201_s22, %s10201_s22 }
  0x33   : > { %p9966_p5 = scmp.ne.s32.totalorder %s10201_s22, %s9965_s19  ;;  %p9974_p0 = scmp.lt.s32.totalorder %s9965_s19, %s9965_s19 }
  0x35   : > { %p9968_p7 = pnand %p9966_p5, %p9926_p13  ;;  %p9975_p2 = por %p9974_p0, %p9973_p12 }
  0x37   : > { %p9969_p9 = pneg %p9968_p7 }
  0x39   : > { %p9976_p1 = pnand %p9975_p2, %p9969_p9 }
  0x3b   : > { %9979 = shalt.err (!%p9976_p1)
}
  0x3c   : > { %9657 = dma.hbm_to_vmem [thread:$0]  (!%p10197_p11), %s12807_s3, 9216, %s10201_s22, [#allocation9], %s10084_s18, %s10084_s18, %s10085_s21  }
  0x3d   : > { %s10256_s24 = sadd.s32 1, %s10080_s12   ;;  %s33_s20 = sadd.s32 1, %s10076_s11 }
  0x3e   : > { %s30_s25 = ssub.s32 %s10080_s12, %s10256_s24  ;;  %p40_p13 = scmp.ne.s32.totalorder %s10076_s11, %s10072_s10 }
  0x3f   : > { %p31_p6 = scmp.eq.s32.totalorder %s30_s25, 0  ;;  %p41_p10 = scmp.eq.s32.totalorder %s10080_s12, 0 }
  0x40   : > { %p12849_p3 = scmp.eq.s32.totalorder %s10167_s13, 1  ;;  %p9668_p7 = scmp.lt.s32.totalorder %s10080_s12, 2 }
  0x41   : > { %s10272_s27 = scalar_select %p31_p6, %s10076_s11, %s33_s20  }
  0x42   : > { %p10266_p5 = por %p12849_p3, %p40_p13  ;;  %p42_p9 = por %p41_p10, %p40_p13 }
  0x43   : > { %s308_s28 = sand.u32 1, %s10076_s11   ;;  %s8066_s22 = sshll.u32 %s10080_s12, 12 }
  0x44   : > { %s12850_s26 = scalar_select %p10266_p5, 1, 0 }
  0x45   : > { %s7697_s29 = sshll.u32 %s308_s28, 8  ;;  %s10279_s14 = scalar_lea.hbm %s12804_s0, %s8066_s22 }
  0x46   : > { %s312_s19 = scalar_lea.vmem [#allocation5], %s7697_s29  ;;  %p10283_p11 = pnand %p9668_p7, %p42_p9 }
  0x47   : > { %s319_s16 = sshll.u32 %s312_s19, 4  ;;  %s10287_s20 = scalar_lea.sflag [#allocation6], %s308_s28  ;;  %s10281_s16 = int_to_ptr.vmem [resolvable:$true] %s319_s16 }
  0x48   : > { %s9980_s25 = scalar_lea.hbm %s10279_s14, 4096  ;;  %p9982_p0 = pneg %p10283_p11 }
  0x49   : > { %p9981_p12 = scmp.ne.s32.totalorder %s10279_s14, %s9980_s25  ;;  %s9985_s18 = scalar_lea.hbm %s12804_s0, 8192 }
  0x4a   : > { %p9986_p13 = scmp.lt.u32.totalorder %s10279_s14, %s12804_s0  ;;  %p9987_p6 = scmp.lt.u32.totalorder %s9985_s18, %s9980_s25 }
  0x4b   : > { %p9983_p2 = pnand %p9982_p0, %p9981_p12  ;;  %p9989_p3 = scmp.lt.u32.totalorder %s9980_s25, %s10279_s14 }
  0x4c   : > { %p9988_p10 = por %p9987_p6, %p9986_p13 }
  0x4d   : > { %p9984_p1 = pneg %p9983_p2 }
  0x4e   : > { %p9990_p7 = por %p9989_p3, %p9988_p10 }
  0x50   : > { %p9991_p9 = pnand %p9990_p7, %p9984_p1 }
  0x52   : > { %9994 = shalt.err (!%p9991_p9)
}
  0x53   : > { %s9995_s28 = scalar_lea.vmem %s10281_s16, 4096  ;;  %s10086_s29 = smov [#allocation5]  }
  0x54   : > { %p9996_p12 = scmp.ne.s32.totalorder %s10281_s16, %s9995_s28  ;;  %s10000_s22 = sshll.u32 %s10086_s29, 4  ;;  %s10001_s22 = int_to_ptr.vmem [resolvable:$false] %s10000_s22 }
  0x55   : > { %s10002_s21 = scalar_lea.vmem %s10001_s22, 8192  ;;  %p10003_p4 = scmp.lt.s32.totalorder %s10281_s16, %s10001_s22 }
  0x56   : > { %p9998_p2 = pnand %p9996_p12, %p9982_p0  ;;  %p10004_p13 = scmp.lt.s32.totalorder %s10002_s21, %s9995_s28 }
  0x58   : > { %p9999_p5 = pneg %p9998_p2  ;;  %p10005_p6 = por %p10004_p13, %p10003_p4 }
  0x5a   : > { %p10006_p10 = pnand %p10005_p6, %p9999_p5 }
  0x5c   : > { %10009 = shalt.err (!%p10006_p10)
}
  0x5d   : > { %s10087_s25 = smov 128   ;;  %s10088_s18 = smov 8  }
  0x5e   : > { %9661 = dma.hbm_to_vmem [thread:$0]  (!%p10283_p11), %s10279_s14, 4096, %s10281_s16, %s10287_s20, %s10087_s25, %s10087_s25, %s10088_s18  }
  0x5f   : > { %331 = sbr.rel (%p10186_p8) target bundleno = 1780 (0x6f4), region = 56 }
  0x66   : > { %s10318_s19 = sand.u32 1, %s10072_s10   ;;  %p12852_p4 = scmp.ne.s32.totalorder %s12844_s15, 0 }
  0x67   : > { %s7701_s28 = sshll.u32 %s10318_s19, 8  ;;  %s334_s29 = scalar_lea.sflag [#allocation6], %s10318_s19 }
  0x68   : > { %s10324_s22 = scalar_lea.vmem [#allocation5], %s7701_s28 }
  0x69   : > { %10055 = dma.done.wait (%p12852_p4), %s334_s29, 4096  }
  0x6a   : > { %10057 = vsyncadd (%p12852_p4), %s334_s29, 4294963200  ;;  %p12853_p5 = scmp.eq.s32.totalorder %s10167_s13, 0 }
  0x6c   : > { %10059 = dma.done.wait (%p12853_p5), [#allocation9], 18432   ;;  %p12854_p8 = pmov %p12853_p5 }
  0x6d   : > { %v10089_v0 = vmov 0   ;;  %v9716_v1 = vld [vmem:[#allocation8 + $0x100] sm:$0xff]   ;;  %v9720_v5 = vld [vmem:[#allocation8 + $0x108] sm:$0xff]   ;;  %v9724_v9 = vld [vmem:[#allocation8 + $0x110] sm:$0xff]   ;;  %vm389_vm0 = vsmask.f32 256 }
  0x6e   : > { %10061 = vsyncadd (%p12854_p8), [#allocation9], 4294948864  ;;  %381 = vst [vmem:[#allocation2] sm:$0xf] %v10089_v0  ;;  %v9717_v2 = vld [vmem:[#allocation8 + $0xc0] sm:$0xff]   ;;  %8132 = vmatprep.subr.bf16.mxu0 %v9716_v1  ;;  %v9721_v6 = vld [vmem:[#allocation8 + $0xc8] sm:$0xff]  }
  0x6f   : > { %382 = vst [vmem:[#allocation2 + $0x4] sm:$0xf] %v10089_v0  ;;  %383 = vst [vmem:[#allocation2 + $0x8] sm:$0x1] %v10089_v0  ;;  %v9718_v3 = vld [vmem:[#allocation8 + $0x40] sm:$0xff]   ;;  %8133 = vmatpush3.bf16.msra.mxu0 %v9717_v2  ;;  %v9722_v7 = vld [vmem:[#allocation8 + $0x48] sm:$0xff]  }
  0x70   : > { %385 = vst [vmem:[#allocation2 + $0xcc] sm:$0xf] %v10089_v0  ;;  %386 = vst [vmem:[#allocation2 + $0xd0] sm:$0xf] %v10089_v0  ;;  %v9719_v4 = vld [vmem:[#allocation8] sm:$0xff]   ;;  %8268 = vmatprep.subr.bf16.mxu1 %v9718_v3  ;;  %8134 = vmatprep.subr.bf16.mxu0 %v9720_v5  ;;  %v9723_v8 = vld [vmem:[#allocation8 + $0x8] sm:$0xff]  }
  0x71   : > { %387 = vst [vmem:[#allocation2 + $0xd4] sm:$0x1] %v10089_v0  ;;  %8269 = vmatpush3.bf16.msra.mxu1 %v9719_v4  ;;  %v9725_v10 = vld [vmem:[#allocation8 + $0xd0] sm:$0xff]   ;;  %vm445_vm1 = vsmask.f32 7938  ;;  %v9728_v13 = vld [vmem:[#allocation8 + $0x118] sm:$0xff]  }
  0x72   : > { %8270 = vmatprep.subr.bf16.mxu1 %v9722_v7  ;;  %v9726_v11 = vld [vmem:[#allocation8 + $0x50] sm:$0xff]   ;;  %v9729_v14 = vld [vmem:[#allocation8 + $0xd8] sm:$0xff]   ;;  %v9732_v17 = vld [vmem:[#allocation8 + $0x120] sm:$0xff]   ;;  %vm388_vm2 = vcmask 1040384   ;;  %v12855_v24 = vmov 0  ;;  %vm952_vm6 = vcmask 1043456  }
  0x73   : > { %8135 = vmatpush3.bf16.msra.mxu0 %v9721_v6  ;;  %v9727_v12 = vld [vmem:[#allocation8 + $0x10] sm:$0xff]   ;;  %v9730_v15 = vld [vmem:[#allocation8 + $0x58] sm:$0xff]   ;;  %v9733_v18 = vld [vmem:[#allocation8 + $0xe0] sm:$0xff]   ;;  %vm629_vm5 = vsmask.f32 4368  ;;  %v12860_v59 = vmov 0 }
  0x74   : > { %8136 = vmatprep.subr.bf16.mxu0 %v9724_v9  ;;  %v9731_v16 = vld [vmem:[#allocation8 + $0x18] sm:$0xff]   ;;  %v9734_v19 = vld [vmem:[#allocation8 + $0x60] sm:$0xff]   ;;  %v9736_v21 = vld [vmem:[#allocation8 + $0x128] sm:$0xff]   ;;  %vm1282_vm7 = vsmask.f32 3328  ;;  %v12863_v3 = vmov 0 }
  0x75   : > { %8271 = vmatpush3.bf16.msra.mxu1 %v9723_v8  ;;  %v9735_v20 = vld [vmem:[#allocation8 + $0x20] sm:$0xff]   ;;  %v9737_v22 = vld [vmem:[#allocation8 + $0xe8] sm:$0xff]   ;;  %vm10335_vm3 = vmand %vm388_vm2, %vm389_vm0  ;;  %vm1283_vm8 = vsmask.f32 7440  ;;  %vm1915_vm12 = vcmask 1042432   ;;  %vm1916_vm13 = vcmask 1046532  }
  0x76   : > { %8272 = vmatprep.subr.bf16.mxu1 %v9726_v11  ;;  %v9738_v23 = vld [vmem:[#allocation8 + $0x68] sm:$0xff]   ;;  %v12856_v24 = vsel %vm10335_vm3, 4294967295, %v12855_v24  ;;  %vm10340_vm4 = vmand %vm388_vm2, %vm445_vm1  ;;  %v9740_v27 = vld [vmem:[#allocation8 + $0x130] sm:$0xff]   ;;  %vm10091_vm15 = vmmov 0   ;;  %s12693_s23 = scalar_lea.vmem [#allocation11], %s7701_s28  ;;  %s8131_s28 = sshll.u32 %s10167_s13, 12 }
  0x77   : > { %8137 = vmatpush3.bf16.msra.mxu0 %v9725_v10  ;;  %12857 = vst [vmem:[#allocation16_spill] sm:$0xff] %v12856_v24  ;;  %v9739_v26 = vld [vmem:[#allocation8 + $0x28] sm:$0xff]   ;;  %v9741_v28 = vld [vmem:[#allocation8 + $0xf0] sm:$0xff]   ;;  %v9744_v31 = vld [vmem:[#allocation8 + $0x138] sm:$0xff]   ;;  %s7600_s20 = sshll.u32 %s12693_s23, 4  ;;  %s12740_s25 = scalar_lea.hbm %s12813_s9, %s8131_s28  ;;  %s12744_s20 = int_to_ptr.vmem [resolvable:$true] %s7600_s20 }
  0x78   : > { %8138 = vmatprep.subr.bf16.mxu0 %v9728_v13  ;;  %v9742_v29 = vld [vmem:[#allocation8 + $0x70] sm:$0xff]   ;;  %v9745_v32 = vld [vmem:[#allocation8 + $0xf8] sm:$0xff]   ;;  %v501_v37 = vld [vmem:[%s10324_s22] sm:$0xff]  ;;  %s7587_s13 = scalar_lea.sflag [#allocation7], %s10318_s19  ;;  %s10010_s18 = scalar_lea.vmem %s12744_s20, 4096 }
  0x79   : > { %8273 = vmatpush3.bf16.msra.mxu1 %v9727_v12  ;;  %v9743_v30 = vld [vmem:[#allocation8 + $0x30] sm:$0xff]   ;;  %v9746_v33 = vld [vmem:[#allocation8 + $0x78] sm:$0xff]   ;;  %v502_v40 = vld [vmem:[%s10324_s22 + $0x8] sm:$0xff]  ;;  %v8067_v41 = vpack.c.bf16 %v501_v37, %v501_v37  ;;  %p10011_p11 = scmp.ne.s32.totalorder %s12744_s20, %s10010_s18  ;;  %p12974_p0 = scmp.ne.s32.totalorder %s12850_s26, 0 }
  0x7a   : > { %8274 = vmatprep.subr.bf16.mxu1 %v9730_v15  ;;  %v9747_v34 = vld [vmem:[#allocation8 + $0x38] sm:$0xff]   ;;  %v394_v35 = vld [vmem:[#allocation2 + $0xc] sm:$0x1]  ;;  %v10350_v42 = vld [vmem:[#allocation8 + $0x140] sm:$0xff]   ;;  %v8068_v43 = vpack.c.bf16 %v502_v40, %v502_v40  ;;  %s10093_s29 = smov [#allocation11]  }
  0x7b   : > { %8139 = vmatpush3.bf16.msra.mxu0 %v9729_v14  ;;  %v450_v36 = vld [vmem:[#allocation2 + $0x14] sm:$0x1]  ;;  %v395_v38 = vsel %vm10335_vm3, 0, %v394_v35  ;;  %v391_v44 = vld [vmem:[#allocation2] sm:$0x1]  ;;  %v632_v46 = vshrl.u32 %v8067_v41, 16  ;;  %vm10360_vm9 = vmor %vm389_vm0, %vm629_vm5  ;;  %p10012_p1 = pnand %p10011_p11, %p12974_p0 }
  0x7c   : > { %8140 = vmatprep.subr.bf16.mxu0 %v9732_v17  ;;  %v451_v39 = vsel %vm10340_vm4, 0, %v450_v36  ;;  %396 = vst [vmem:[#allocation2 + $0xc] sm:$0x1] %v395_v38  ;;  %v447_v45 = vld [vmem:[#allocation2 + $0x8] sm:$0x1]  ;;  %v635_v47 = vshll.u32 %v8067_v41, 16  ;;  %vm10371_vm10 = vmand %vm952_vm6, %vm445_vm1 }
  0x7d   : > { %8275 = vmatpush3.bf16.msra.mxu1 %v9731_v16  ;;  %452 = vst [vmem:[#allocation2 + $0x14] sm:$0x1] %v451_v39  ;;  %v392_v48 = vsel %vm10335_vm3, 0, %v391_v44  ;;  %v448_v49 = vsel %vm10340_vm4, 0, %v447_v45  ;;  %v1229_v50 = vld [vmem:[#allocation2 + $0x4] sm:$0xf]  ;;  %vm10396_vm11 = vmor %vm1282_vm7, %vm1283_vm8  ;;  %p10013_p3 = pneg %p10012_p1 }
  0x7e   : > { %8276 = vmatprep.subr.bf16.mxu1 %v9734_v19  ;;  %v640_v51 = vshrl.u32 %v8068_v43, 16  ;;  %v643_v52 = vshll.u32 %v8068_v43, 16  ;;  %393 = vst [vmem:[#allocation2] sm:$0x1] %v392_v48  ;;  %449 = vst [vmem:[#allocation2 + $0x8] sm:$0x1] %v448_v49 }
  0x7f   : > { %8141 = vmatpush3.bf16.msra.mxu0 %v9733_v18  ;;  %v1295_v53 = vshll.u32 %v1229_v50, 16  ;;  %v1299_v54 = vshrl.u32 %v1229_v50, 16  ;;  %v634_v55 = vrot.slane %v632_v46, 7  ;;  %v397_v56 = vld [vmem:[#allocation2 + $0x18] sm:$0x1]  ;;  %v503_v58 = vld [vmem:[%s10324_s22 + $0x10] sm:$0xff]  ;;  %vm10794_vm14 = vmor %vm1915_vm12, %vm1916_vm13 }
  0x80   : > { %8142 = vmatprep.subr.bf16.mxu0 %v9736_v21  ;;  %v453_v57 = vld [vmem:[#allocation2 + $0x20] sm:$0x1]  ;;  %v12861_v59 = vsel %vm10360_vm9, 4294967295, %v12860_v59  ;;  %v642_v60 = vrot.slane %v640_v51, 7  ;;  %v398_v63 = vsel %vm10335_vm3, 0, %v397_v56  ;;  %v504_v0 = vld [vmem:[%s10324_s22 + $0x18] sm:$0xff]  ;;  %v8069_v5 = vpack.c.bf16 %v503_v58, %v503_v58 }
  0x81   : > { %8277 = vmatpush3.bf16.msra.mxu1 %v9735_v20  ;;  %12862 = vst [vmem:[#allocation17_spill] sm:$0xff] %v12861_v59  ;;  %v10364_v61 = vrot.slane %v1295_v53, 5  ;;  %v1301_v62 = vrot.slane %v1299_v54, 4  ;;  %v637_v1 = vor.u32 %v635_v47, %v634_v55  ;;  %v638_v2 = vrot.slane %v634_v55, 4  ;;  %399 = vst [vmem:[#allocation2 + $0x18] sm:$0x1] %v398_v63 }
  0x82   : > { %8278 = vmatprep.subr.bf16.mxu1 %v9738_v23  ;;  %v12864_v3 = vsel %vm10371_vm10, 4294967295, %v12863_v3  ;;  %v454_v4 = vsel %vm10340_vm4, 0, %v453_v57  ;;  %v505_v6 = vld [vmem:[%s10324_s22 + $0x20] sm:$0xff]  ;;  %v645_v7 = vor.u32 %v643_v52, %v642_v60  ;;  %v647_v8 = vrot.slane %v642_v60, 4  ;;  %v506_v10 = vld [vmem:[%s10324_s22 + $0x28] sm:$0xff]  ;;  %v507_v46 = vld [vmem:[%s10324_s22 + $0x30] sm:$0xff] }
  0x83   : > { %8143 = vmatpush3.bf16.msra.mxu0 %v9737_v22  ;;  %12865 = vst [vmem:[#allocation18_spill] sm:$0xff] %v12864_v3  ;;  %v1302_v9 = vor.u32 %v1301_v62, %v10364_v61  ;;  %455 = vst [vmem:[#allocation2 + $0x20] sm:$0x1] %v454_v4  ;;  %v954_v11 = vld [vmem:[#allocation2 + $0xc] sm:$0xf]  ;;  %v8070_v13 = vpack.c.bf16 %v504_v0, %v504_v0  ;;  %v649_v14 = vshrl.u32 %v8069_v5, 16 }
  0x84   : > { %8144 = vmatprep.subr.bf16.mxu0 %v9740_v27  ;;  %v958_v12 = vld [vmem:[#allocation2 + $0x14] sm:$0x1]  ;;  %v652_v15 = vshll.u32 %v8069_v5, 16  ;;  %v646_v16 = vsel %vm10360_vm9, %v638_v2, %v645_v7  ;;  %v955_v17 = vsel %vm10371_vm10, %v637_v1, %v954_v11  ;;  %v400_v20 = vld [vmem:[#allocation2 + $0x24] sm:$0x1]  ;;  %v10388_v27 = vpack.c.bf16 %v506_v10, %v506_v10  ;;  %s10014_s15 = sshll.u32 %s10093_s29, 4  ;;  %s10015_s15 = int_to_ptr.vmem [resolvable:$false] %s10014_s15 }
  0x85   : > { %8279 = vmatpush3.bf16.msra.mxu1 %v9739_v26  ;;  %v959_v18 = vsel %vm10335_vm3, %v647_v8, %v958_v12  ;;  %v10386_v19 = vrot.slane %v1302_v9, 4  ;;  %v456_v21 = vld [vmem:[#allocation2 + $0x2c] sm:$0x1]  ;;  %956 = vst [vmem:[#allocation2 + $0xc] sm:$0xf] %v955_v17  ;;  %v8071_v26 = vpack.c.bf16 %v505_v6, %v505_v6  ;;  %v12866_v41 = vmov 0  ;;  %p10017_p7 = scmp.lt.s32.totalorder %s12744_s20, %s10015_s15 }
  0x86   : > { %8280 = vmatprep.subr.bf16.mxu1 %v9742_v29  ;;  %957 = vst [vmem:[#allocation2 + $0x10] sm:$0xf] %v646_v16  ;;  %960 = vst [vmem:[#allocation2 + $0x14] sm:$0x1] %v959_v18  ;;  %v1228_v22 = vld [vmem:[#allocation2] sm:$0xf]  ;;  %v10410_v62 = vpack.c.bf16 %v507_v46, %v507_v46 }
  0x87   : > { %8145 = vmatpush3.bf16.msra.mxu0 %v9741_v28  ;;  %v1230_v23 = vld [vmem:[#allocation2 + $0x8] sm:$0x1]  ;;  %v1286_v28 = vshrl.u32 %v1228_v22, 16  ;;  %v1289_v29 = vshll.u32 %v1228_v22, 16  ;;  %v457_v35 = vsel %vm10340_vm4, 0, %v456_v21  ;;  %v12867_v41 = vsel %vm10396_vm11, 4294967295, %v12866_v41 }
  0x88   : > { %8146 = vmatprep.subr.bf16.mxu0 %v9744_v31  ;;  %v651_v31 = vrot.slane %v649_v14, 7  ;;  %v961_v40 = vld [vmem:[#allocation2 + $0x18] sm:$0xf]  ;;  %458 = vst [vmem:[#allocation2 + $0x2c] sm:$0x1] %v457_v35  ;;  %12868 = vst [vmem:[#allocation19_spill] sm:$0xff] %v12867_v41 }
  0x89   : > { %8281 = vmatpush3.bf16.msra.mxu1 %v9743_v30  ;;  %v1305_v30 = vshll.u32 %v1230_v23, 16  ;;  %v1288_v36 = vrot.slane %v1286_v28, 4  ;;  %v1291_v37 = vrot.slane %v1289_v29, 5  ;;  %v666_v45 = vshrl.u32 %v8071_v26, 16  ;;  %v403_v4 = vld [vmem:[#allocation2 + $0x30] sm:$0x1] }
  0x8a   : > { %8282 = vmatprep.subr.bf16.mxu1 %v9746_v33  ;;  %v660_v33 = vshll.u32 %v8070_v13, 16  ;;  %v654_v39 = vor.u32 %v652_v15, %v651_v31  ;;  %v655_v43 = vrot.slane %v651_v31, 4  ;;  %v965_v49 = vld [vmem:[#allocation2 + $0x20] sm:$0x1]  ;;  %v669_v50 = vshll.u32 %v8071_v26, 16  ;;  %v508_v10 = vld [vmem:[%s10324_s22 + $0x38] sm:$0xff] }
  0x8b   : > { %8147 = vmatpush3.bf16.msra.mxu0 %v9745_v32  ;;  %v657_v32 = vshrl.u32 %v8070_v13, 16  ;;  %v1307_v38 = vrot.slane %v1305_v30, 5  ;;  %v1292_v47 = vor.u32 %v1291_v37, %v1288_v36  ;;  %v674_v51 = vshrl.u32 %v10388_v27, 16  ;;  %v459_v5 = vld [vmem:[#allocation2 + $0x38] sm:$0x1]  ;;  %v9750_v18 = vld [vmem:[#allocation2] sm:$0xff]  }
  0x8c   : > { %8967 = vmatprep.subr.bf16.mxu0 %v10350_v42  ;;  %v962_v48 = vsel %vm10371_vm10, %v654_v39, %v961_v40  ;;  %v10404_v54 = vrot.slane %v666_v45, 7  ;;  %v677_v55 = vshll.u32 %v10388_v27, 16  ;;  %v1231_v56 = vld [vmem:[#allocation2 + $0xc] sm:$0xf]  ;;  %v509_v27 = vld [vmem:[%s10324_s22 + $0x40] sm:$0xff]  ;;  %v404_v30 = vsel %vm10335_vm3, 0, %v403_v4 }
  0x8d   : > { %8283 = vmatpush3.bf16.msra.mxu1 %v9747_v34  ;;  %v401_v34 = vsel %vm10335_vm3, 0, %v400_v20  ;;  %v659_v44 = vrot.slane %v657_v32, 7  ;;  %963 = vst [vmem:[#allocation2 + $0x18] sm:$0xf] %v962_v48  ;;  %v1232_v57 = vld [vmem:[#allocation2 + $0x10] sm:$0xf]  ;;  %v1308_v60 = vsel %vm10396_vm11, %v10386_v19, %v1307_v38  ;;  %v10429_v31 = vpack.c.bf16 %v508_v10, %v508_v10 }
  0x8e   : > { %402 = vst [vmem:[#allocation2 + $0x24] sm:$0x1] %v401_v34  ;;  %v1233_v58 = vld [vmem:[#allocation2 + $0x14] sm:$0x1]  ;;  %v1310_v63 = vshrl.u32 %v1231_v56, 16  ;;  %v1313_v0 = vshll.u32 %v1231_v56, 16  ;;  %v671_v19 = vor.u32 %v669_v50, %v10404_v54 }
  0x8f   : > { %v662_v52 = vor.u32 %v660_v33, %v659_v44  ;;  %v664_v53 = vrot.slane %v659_v44, 4  ;;  %v1319_v1 = vshll.u32 %v1232_v57, 16  ;;  %v1323_v2 = vshrl.u32 %v1232_v57, 16  ;;  %v972_v36 = vld [vmem:[#allocation2 + $0x2c] sm:$0x1]  ;;  %v9804_v3 = vld [vmem:[#allocation8 + $0x238] sm:$0xff]  }
  0x90   : > { %v1329_v6 = vshll.u32 %v1233_v58, 16  ;;  %v1293_v7 = vrot.slane %v1292_v47, 4  ;;  %v1312_v11 = vrot.slane %v1310_v63, 4  ;;  %v1315_v12 = vrot.slane %v1313_v0, 5  ;;  %405 = vst [vmem:[#allocation2 + $0x30] sm:$0x1] %v404_v30 }
  0x91   : > { %v663_v8 = vsel %vm10360_vm9, %v655_v43, %v662_v52  ;;  %v966_v9 = vsel %vm10335_vm3, %v664_v53, %v965_v49  ;;  %v1321_v13 = vrot.slane %v1319_v1, 5  ;;  %v1325_v14 = vrot.slane %v1323_v2, 4  ;;  %v9748_v37 = vld [vmem:[#allocation2 + $0xc] sm:$0xff]   ;;  %v406_v44 = vld [vmem:[#allocation2 + $0x3c] sm:$0x1]  ;;  %s10016_s17 = scalar_lea.vmem %s10015_s15, 8192 }
  0x92   : > { %964 = vst [vmem:[#allocation2 + $0x1c] sm:$0xf] %v663_v8  ;;  %967 = vst [vmem:[#allocation2 + $0x20] sm:$0x1] %v966_v9  ;;  %v1331_v16 = vrot.slane %v1329_v6, 5  ;;  %v1298_v17 = vsel %vm10396_vm11, %v1293_v7, %v10364_v61  ;;  %v672_v20 = vrot.slane %v10404_v54, 4  ;;  %v1316_v21 = vor.u32 %v1315_v12, %v1312_v11  ;;  %p10018_p9 = scmp.lt.s32.totalorder %s10016_s17, %s10010_s18 }
  0x93   : > { %v1326_v22 = vor.u32 %v1325_v14, %v1321_v13  ;;  %v7755_v23 = vcombine.low %v1298_v17, %v1308_v60  ;;  %v676_v26 = vrot.slane %v674_v51, 7  ;;  %v460_v61 = vsel %vm10340_vm4, 0, %v459_v5  ;;  %v9753_v60 = vld [vmem:[#allocation8 + $0x148] sm:$0xff]   ;;  %v10448_v9 = vld [vmem:[#allocation8 + $0x150] sm:$0xff]   ;;  %v498_v41 = vld [vmem:[#allocation2 + $0xd4] sm:$0x1] }
  0x94   : > { %v1234_v28 = vld [vmem:[#allocation2 + $0x18] sm:$0xf]  ;;  %v1317_v32 = vrot.slane %v1316_v21, 4  ;;  %461 = vst [vmem:[#allocation2 + $0x38] sm:$0x1] %v460_v61  ;;  %v683_v40 = vshrl.u32 %v10410_v62, 16  ;;  %v10441_v54 = vpack.c.bf16 %v509_v27, %v509_v27  ;;  %p10019_p12 = por %p10018_p9, %p10017_p7 }
  0x95   : > { %v968_v15 = vld [vmem:[#allocation2 + $0x24] sm:$0xf]  ;;  %v1327_v33 = vrot.slane %v1326_v22, 4  ;;  %2923 = vmatprep.mubr.bf16.mxu1 %v7755_v23  ;;  %v1334_v34 = vshrl.u32 %v1234_v28, 16  ;;  %v1337_v35 = vshll.u32 %v1234_v28, 16  ;;  %v679_v38 = vor.u32 %v677_v55, %v676_v26 }
  0x96   : > { %v969_v29 = vsel %vm10371_vm10, %v671_v19, %v968_v15  ;;  %2924 = vmatmul.mubr.bf16.vlgmr.msra.gmra.mrb[0].mxu1 %v9750_v18  ;;  %v681_v39 = vrot.slane %v676_v26, 4  ;;  %v686_v43 = vshll.u32 %v10410_v62, 16  ;;  %v1322_v45 = vsel %vm10396_vm11, %v1317_v32, %v1321_v13  ;;  %v510_v62 = vld [vmem:[%s10324_s22 + $0x48] sm:$0xff]  ;;  %p10020_p2 = pnand %p10019_p12, %p10013_p3 }
  0x97   : > { %970 = vst [vmem:[#allocation2 + $0x24] sm:$0xf] %v969_v29  ;;  %v1332_v46 = vsel %vm10396_vm11, %v1327_v33, %v1331_v16  ;;  %v1336_v47 = vrot.slane %v1334_v34, 4  ;;  %v1339_v48 = vrot.slane %v1337_v35, 5  ;;  %v680_v52 = vsel %vm10360_vm9, %v672_v20, %v679_v38  ;;  %v462_v4 = vld [vmem:[#allocation2 + $0x44] sm:$0x1] }
  0x98   : > { %v7756_v49 = vcombine.low %v1322_v45, %v1332_v46  ;;  %v973_v53 = vsel %vm10335_vm3, %v681_v39, %v972_v36  ;;  %971 = vst [vmem:[#allocation2 + $0x28] sm:$0xf] %v680_v52  ;;  %v685_v63 = vrot.slane %v683_v40, 7  ;;  %v691_v0 = vshrl.u32 %v10429_v31, 16  ;;  %v975_v19 = vld [vmem:[#allocation2 + $0x30] sm:$0xf] }
  0x99   : > { %v1235_v50 = vld [vmem:[#allocation2 + $0x1c] sm:$0xf]  ;;  %v1236_v51 = vld [vmem:[#allocation2 + $0x20] sm:$0x1]  ;;  %v1340_v55 = vor.u32 %v1339_v48, %v1336_v47  ;;  %974 = vst [vmem:[#allocation2 + $0x2c] sm:$0x1] %v973_v53  ;;  %v10451_v14 = vpack.c.bf16 %v510_v62, %v510_v62 }
  0x9a   : > { %v1343_v56 = vshll.u32 %v1235_v50, 16  ;;  %v1347_v57 = vshrl.u32 %v1235_v50, 16  ;;  %v1353_v58 = vshll.u32 %v1236_v51, 16  ;;  %2457 = vmatprep.mubr.bf16.mxu0 %v7756_v49  ;;  %2931 = vmatprep.mubr.bf16.mxu1 %v7756_v49  ;;  %v694_v1 = vshll.u32 %v10429_v31, 16  ;;  %v409_v33 = vld [vmem:[#allocation2 + $0x48] sm:$0x1] }
  0x9b   : > { %v407_v2 = vsel %vm10335_vm3, 0, %v406_v44  ;;  %2458 = vmatmul.mubr.bf16.vlgmr.msra.gmra.mrb[0].mxu0 %v9748_v37  ;;  %v1341_v5 = vrot.slane %v1340_v55, 4  ;;  %v688_v11 = vor.u32 %v686_v43, %v685_v63  ;;  %v689_v12 = vrot.slane %v685_v63, 4  ;;  %v979_v20 = vld [vmem:[#allocation2 + $0x38] sm:$0x1]  ;;  %v9759_v46 = vld [vmem:[#allocation8 + $0x158] sm:$0xff]  }
  0x9c   : > { %v1345_v6 = vrot.slane %v1343_v56, 5  ;;  %v1349_v7 = vrot.slane %v1347_v57, 4  ;;  %v1355_v8 = vrot.slane %v1353_v58, 5  ;;  %408 = vst [vmem:[#allocation2 + $0x3c] sm:$0x1] %v407_v2  ;;  %8968 = vmatpush3.bf16.msra.mxu0 %v10350_v42  ;;  %v693_v13 = vrot.slane %v691_v0, 7 }
  0x9d   : > { %8969 = vmatprep.subr.bf16.mxu0 %v9753_v60  ;;  %v976_v42 = vsel %vm10371_vm10, %v688_v11, %v975_v19  ;;  %v463_v23 = vsel %vm10340_vm4, 0, %v462_v4  ;;  %v700_v29 = vshrl.u32 %v10441_v54, 16  ;;  %v9751_v35 = vld [vmem:[#allocation2 + $0x18] sm:$0xff]   ;;  %v703_v44 = vshll.u32 %v10441_v54, 16  ;;  %v511_v51 = vld [vmem:[%s10324_s22 + $0x50] sm:$0xff]  ;;  %v512_v52 = vld [vmem:[%s10324_s22 + $0x58] sm:$0xff] }
  0x9e   : > { %v1237_v10 = vld [vmem:[#allocation2 + $0x24] sm:$0xf]  ;;  %v1346_v15 = vsel %vm10396_vm11, %v1341_v5, %v1345_v6  ;;  %v1350_v16 = vor.u32 %v1349_v7, %v1345_v6  ;;  %2932 = vmatmul.mubr.bf16.gmra.mrb[4].mxu1 %v9748_v37  ;;  %v696_v21 = vor.u32 %v694_v1, %v693_v13  ;;  %v698_v22 = vrot.slane %v693_v13, 4  ;;  %977 = vst [vmem:[#allocation2 + $0x30] sm:$0xf] %v976_v42  ;;  %v513_v56 = vld [vmem:[%s10324_s22 + $0x60] sm:$0xff] }
  0x9f   : > { %v1358_v17 = vshrl.u32 %v1237_v10, 16  ;;  %v1361_v18 = vshll.u32 %v1237_v10, 16  ;;  %464 = vst [vmem:[#allocation2 + $0x44] sm:$0x1] %v463_v23  ;;  %v1238_v30 = vld [vmem:[#allocation2 + $0x28] sm:$0xf] }
  0xa0   : > { %v1351_v26 = vrot.slane %v1350_v16, 4  ;;  %v1239_v61 = vld [vmem:[#allocation2 + $0x2c] sm:$0x1]  ;;  %8970 = vmatpush3.bf16.msra.mxu0 %v9753_v60  ;;  %v697_v31 = vsel %vm10360_vm9, %v689_v12, %v696_v21  ;;  %v980_v32 = vsel %vm10335_vm3, %v698_v22, %v979_v20  ;;  %v1367_v37 = vshll.u32 %v1238_v30, 16  ;;  %v9763_v57 = vld [vmem:[#allocation8 + $0x80] sm:$0xff]   ;;  %v514_v63 = vld [vmem:[%s10324_s22 + $0x68] sm:$0xff] }
  0xa1   : > { %v1360_v27 = vrot.slane %v1358_v17, 4  ;;  %v1363_v28 = vrot.slane %v1361_v18, 5  ;;  %v1371_v38 = vshrl.u32 %v1238_v30, 16  ;;  %978 = vst [vmem:[#allocation2 + $0x34] sm:$0xf] %v697_v31  ;;  %8971 = vmatprep.subr.bf16.mxu0 %v10448_v9  ;;  %v1377_v40 = vshll.u32 %v1239_v61, 16  ;;  %9015 = vmatprep.subr.bf16.mxu1 %v9763_v57 }
  0xa2   : > { %v1356_v34 = vsel %vm10396_vm11, %v1351_v26, %v1355_v8  ;;  %981 = vst [vmem:[#allocation2 + $0x38] sm:$0x1] %v980_v32  ;;  %v702_v43 = vrot.slane %v700_v29, 7  ;;  %v1369_v48 = vrot.slane %v1367_v37, 5  ;;  %v708_v50 = vshrl.u32 %v10451_v14, 16  ;;  %v9762_v11 = vld [vmem:[#allocation8 + $0x160] sm:$0xff]   ;;  %9016 = vmatpush3.bf16.msra.mxu1 %v9763_v57 }
  0xa3   : > { %v1364_v36 = vor.u32 %v1363_v28, %v1360_v27  ;;  %v10467_v39 = vcombine.low %v1346_v15, %v1356_v34  ;;  %v982_v45 = vld [vmem:[#allocation2 + $0x3c] sm:$0xf]  ;;  %v1373_v49 = vrot.slane %v1371_v38, 4  ;;  %v711_v55 = vshll.u32 %v10451_v14, 16  ;;  %v465_v10 = vld [vmem:[#allocation2 + $0x50] sm:$0x1] }
  0xa4   : > { %v705_v53 = vor.u32 %v703_v44, %v702_v43  ;;  %v1379_v58 = vrot.slane %v1377_v40, 5  ;;  %v710_v60 = vrot.slane %v708_v50, 7  ;;  %v410_v62 = vsel %vm10335_vm3, 0, %v409_v33  ;;  %8972 = vmatpush3.bf16.msra.mxu0 %v10448_v9  ;;  %v9752_v18 = vld [vmem:[#allocation2 + $0x24] sm:$0xff]   ;;  %v412_v28 = vld [vmem:[#allocation2 + $0x54] sm:$0x1] }
  0xa5   : > { %v1365_v47 = vrot.slane %v1364_v36, 4  ;;  %2465 = vmatprep.mubr.bf16.mxu0 %v10467_v39  ;;  %2939 = vmatprep.mubr.bf16.mxu1 %v10467_v39  ;;  %v1374_v54 = vor.u32 %v1373_v49, %v1369_v48  ;;  %v1240_v1 = vld [vmem:[#allocation2 + $0x30] sm:$0xf]  ;;  %v706_v2 = vrot.slane %v702_v43, 4  ;;  %411 = vst [vmem:[#allocation2 + $0x48] sm:$0x1] %v410_v62  ;;  %v8077_v14 = vpack.c.bf16 %v511_v51, %v511_v51 }
  0xa6   : > { %2466 = vmatmul.mubr.bf16.gmra.mrb[4].mxu0 %v9751_v35  ;;  %2940 = vmatmul.mubr.bf16.gmra.mrb[8].mxu1 %v9751_v35  ;;  %v983_v4 = vsel %vm10371_vm10, %v705_v53, %v982_v45  ;;  %v1382_v6 = vshrl.u32 %v1240_v1, 16  ;;  %v1385_v7 = vshll.u32 %v1240_v1, 16  ;;  %v713_v8 = vor.u32 %v711_v55, %v710_v60  ;;  %v986_v27 = vld [vmem:[#allocation2 + $0x44] sm:$0x1]  ;;  %v468_v32 = vld [vmem:[#allocation2 + $0x5c] sm:$0x1] }
  0xa7   : > { %v1370_v0 = vsel %vm10396_vm11, %v1365_v47, %v1369_v48  ;;  %v1375_v5 = vrot.slane %v1374_v54, 4  ;;  %984 = vst [vmem:[#allocation2 + $0x3c] sm:$0xf] %v983_v4  ;;  %8973 = vmatprep.subr.bf16.mxu0 %v9759_v46  ;;  %v8078_v15 = vpack.c.bf16 %v512_v52, %v512_v52  ;;  %v10485_v16 = vpack.c.bf16 %v513_v56, %v513_v56  ;;  %v515_v33 = vld [vmem:[%s10324_s22 + $0x70] sm:$0xff]  ;;  %v9766_v47 = vld [vmem:[#allocation8 + $0x168] sm:$0xff]  }
  0xa8   : > { %v1241_v12 = vld [vmem:[#allocation2 + $0x34] sm:$0xf]  ;;  %v10487_v17 = vpack.c.bf16 %v514_v63, %v514_v63  ;;  %v1384_v19 = vrot.slane %v1382_v6, 4  ;;  %v1387_v20 = vrot.slane %v1385_v7, 5  ;;  %v714_v26 = vsel %vm10360_vm9, %v706_v2, %v713_v8  ;;  %8974 = vmatpush3.bf16.msra.mxu0 %v9759_v46  ;;  %v9767_v54 = vld [vmem:[#allocation8 + $0x88] sm:$0xff]  }
  0xa9   : > { %v1242_v13 = vld [vmem:[#allocation2 + $0x38] sm:$0x1]  ;;  %v1380_v9 = vsel %vm10396_vm11, %v1375_v5, %v1379_v58  ;;  %v1391_v21 = vshll.u32 %v1241_v12, 16  ;;  %v1395_v42 = vshrl.u32 %v1241_v12, 16  ;;  %v715_v61 = vrot.slane %v710_v60, 4  ;;  %8975 = vmatprep.subr.bf16.mxu0 %v9762_v11  ;;  %v516_v46 = vld [vmem:[%s10324_s22 + $0x78] sm:$0xff]  ;;  %9017 = vmatprep.subr.bf16.mxu1 %v9767_v54 }
  0xaa   : > { %v10491_v22 = vcombine.low %v1370_v0, %v1380_v9  ;;  %v1401_v23 = vshll.u32 %v1242_v13, 16  ;;  %v1388_v29 = vor.u32 %v1387_v20, %v1384_v19  ;;  %985 = vst [vmem:[#allocation2 + $0x40] sm:$0xf] %v714_v26  ;;  %v466_v31 = vsel %vm10340_vm4, 0, %v465_v10  ;;  %v9754_v6 = vld [vmem:[#allocation2 + $0x30] sm:$0xff]   ;;  %9018 = vmatpush3.bf16.msra.mxu1 %v9767_v54 }
  0xab   : > { %v1393_v30 = vrot.slane %v1391_v21, 5  ;;  %v1397_v34 = vrot.slane %v1395_v42, 4  ;;  %467 = vst [vmem:[#allocation2 + $0x50] sm:$0x1] %v466_v31  ;;  %v717_v36 = vshrl.u32 %v8077_v14, 16  ;;  %v720_v37 = vshll.u32 %v8077_v14, 16 }
  0xac   : > { %2473 = vmatprep.mubr.bf16.mxu0 %v10491_v22  ;;  %v1403_v35 = vrot.slane %v1401_v23, 5  ;;  %2947 = vmatprep.mubr.bf16.mxu1 %v10491_v22  ;;  %v1389_v38 = vrot.slane %v1388_v29, 4  ;;  %v987_v40 = vsel %vm10335_vm3, %v715_v61, %v986_v27  ;;  %v725_v43 = vshrl.u32 %v8078_v15, 16  ;;  %v989_v45 = vld [vmem:[#allocation2 + $0x48] sm:$0xf] }
  0xad   : > { %v728_v44 = vshll.u32 %v8078_v15, 16  ;;  %v1398_v48 = vor.u32 %v1397_v34, %v1393_v30  ;;  %988 = vst [vmem:[#allocation2 + $0x44] sm:$0x1] %v987_v40  ;;  %v719_v50 = vrot.slane %v717_v36, 7  ;;  %v413_v51 = vsel %vm10335_vm3, 0, %v412_v28  ;;  %8976 = vmatpush3.bf16.msra.mxu0 %v9762_v11  ;;  %v517_v34 = vld [vmem:[%s10324_s22 + $0x80] sm:$0xff] }
  0xae   : > { %2474 = vmatmul.mubr.bf16.gmra.mrb[8].mxu0 %v9752_v18  ;;  %2948 = vmatmul.mubr.bf16.gmra.mrb[12].mxu1 %v9752_v18  ;;  %v1243_v49 = vld [vmem:[#allocation2 + $0x3c] sm:$0xf]  ;;  %v10505_v52 = vpack.c.bf16 %v515_v33, %v515_v33  ;;  %v1394_v53 = vsel %vm10396_vm11, %v1389_v38, %v1393_v30  ;;  %v727_v57 = vrot.slane %v725_v43, 7  ;;  %414 = vst [vmem:[#allocation2 + $0x54] sm:$0x1] %v413_v51  ;;  %v469_v63 = vsel %vm10340_vm4, 0, %v468_v32 }
  0xaf   : > { %v1406_v55 = vshrl.u32 %v1243_v49, 16  ;;  %v1409_v56 = vshll.u32 %v1243_v49, 16  ;;  %8977 = vmatprep.subr.bf16.mxu0 %v9766_v47  ;;  %v1399_v58 = vrot.slane %v1398_v48, 4  ;;  %v722_v60 = vor.u32 %v720_v37, %v719_v50  ;;  %470 = vst [vmem:[#allocation2 + $0x5c] sm:$0x1] %v469_v63  ;;  %v518_v40 = vld [vmem:[%s10324_s22 + $0x88] sm:$0xff] }
  0xb0   : > { %v723_v62 = vrot.slane %v719_v50, 4  ;;  %v730_v2 = vor.u32 %v728_v44, %v727_v57  ;;  %v732_v4 = vrot.slane %v727_v57, 4  ;;  %v734_v10 = vshrl.u32 %v10485_v16, 16  ;;  %v415_v42 = vld [vmem:[#allocation2 + $0x60] sm:$0x1]  ;;  %v9770_v43 = vld [vmem:[#allocation8 + $0x170] sm:$0xff]  }
  0xb1   : > { %v1408_v0 = vrot.slane %v1406_v55, 4  ;;  %v1411_v1 = vrot.slane %v1409_v56, 5  ;;  %v1404_v5 = vsel %vm10396_vm11, %v1399_v58, %v1403_v35  ;;  %v1244_v7 = vld [vmem:[#allocation2 + $0x40] sm:$0xf]  ;;  %v990_v8 = vsel %vm10371_vm10, %v722_v60, %v989_v45  ;;  %8978 = vmatpush3.bf16.msra.mxu0 %v9766_v47  ;;  %v471_v23 = vld [vmem:[#allocation2 + $0x68] sm:$0x1] }
  0xb2   : > { %v10516_v11 = vpack.c.bf16 %v516_v46, %v516_v46  ;;  %v10518_v12 = vcombine.low %v1394_v53, %v1404_v5  ;;  %v1415_v14 = vshll.u32 %v1244_v7, 16  ;;  %v1419_v15 = vshrl.u32 %v1244_v7, 16  ;;  %991 = vst [vmem:[#allocation2 + $0x48] sm:$0xf] %v990_v8  ;;  %v993_v9 = vld [vmem:[#allocation2 + $0x50] sm:$0x1]  ;;  %8979 = vmatprep.subr.bf16.mxu0 %v9770_v43 }
  0xb3   : > { %v1412_v13 = vor.u32 %v1411_v1, %v1408_v0  ;;  %v731_v18 = vsel %vm10360_vm9, %v723_v62, %v730_v2  ;;  %v994_v19 = vsel %vm10335_vm3, %v732_v4, %v993_v9  ;;  %v736_v20 = vrot.slane %v734_v10, 7  ;;  %v9771_v48 = vld [vmem:[#allocation8 + $0x90] sm:$0xff]   ;;  %v9755_v50 = vld [vmem:[#allocation2 + $0x3c] sm:$0xff]  }
  0xb4   : > { %v737_v21 = vshll.u32 %v10485_v16, 16  ;;  %2481 = vmatprep.mubr.bf16.mxu0 %v10518_v12  ;;  %v1245_v26 = vld [vmem:[#allocation2 + $0x44] sm:$0x1]  ;;  %v1417_v28 = vrot.slane %v1415_v14, 5  ;;  %v1421_v29 = vrot.slane %v1419_v15, 4  ;;  %2955 = vmatprep.mubr.bf16.mxu1 %v10518_v12  ;;  %v742_v30 = vshrl.u32 %v10487_v17, 16 }
  0xb5   : > { %v1413_v27 = vrot.slane %v1412_v13, 4  ;;  %992 = vst [vmem:[#allocation2 + $0x4c] sm:$0xf] %v731_v18  ;;  %995 = vst [vmem:[#allocation2 + $0x50] sm:$0x1] %v994_v19  ;;  %v1425_v61 = vshll.u32 %v1245_v26, 16  ;;  %v10542_v60 = vpack.c.bf16 %v517_v34, %v517_v34  ;;  %8980 = vmatpush3.bf16.msra.mxu0 %v9770_v43  ;;  %9019 = vmatprep.subr.bf16.mxu1 %v9771_v48 }
  0xb6   : > { %2482 = vmatmul.mubr.bf16.gmra.mrb[12].mxu0 %v9754_v6  ;;  %2956 = vmatmul.mubr.bf16.gmra.mrb[16].mxu1 %v9754_v6  ;;  %v739_v16 = vor.u32 %v737_v21, %v736_v20  ;;  %v740_v31 = vrot.slane %v736_v20, 4  ;;  %v745_v32 = vshll.u32 %v10487_v17, 16  ;;  %v996_v33 = vld [vmem:[#allocation2 + $0x54] sm:$0xf]  ;;  %v1422_v36 = vor.u32 %v1421_v29, %v1417_v28  ;;  %v1000_v46 = vld [vmem:[#allocation2 + $0x5c] sm:$0x1] }
  0xb7   : > { %v1418_v35 = vsel %vm10396_vm11, %v1413_v27, %v1417_v28  ;;  %v744_v37 = vrot.slane %v742_v30, 7  ;;  %v416_v38 = vsel %vm10335_vm3, 0, %v415_v42  ;;  %v1427_v44 = vrot.slane %v1425_v61, 5  ;;  %v418_v58 = vld [vmem:[#allocation2 + $0x6c] sm:$0x1]  ;;  %9020 = vmatpush3.bf16.msra.mxu1 %v9771_v48  ;;  %v9773_v28 = vld [vmem:[#allocation8 + $0x98] sm:$0xff]  }
  0xb8   : > { %v997_v45 = vsel %vm10371_vm10, %v739_v16, %v996_v33  ;;  %417 = vst [vmem:[#allocation2 + $0x60] sm:$0x1] %v416_v38  ;;  %v472_v17 = vsel %vm10340_vm4, 0, %v471_v23  ;;  %v751_v47 = vshrl.u32 %v10505_v52, 16  ;;  %v1423_v49 = vrot.slane %v1422_v36, 4  ;;  %v519_v36 = vld [vmem:[%s10324_s22 + $0x90] sm:$0xff]  ;;  %9021 = vmatprep.subr.bf16.mxu1 %v9773_v28 }
  0xb9   : > { %v747_v51 = vor.u32 %v745_v32, %v744_v37  ;;  %v749_v53 = vrot.slane %v744_v37, 4  ;;  %998 = vst [vmem:[#allocation2 + $0x54] sm:$0xf] %v997_v45  ;;  %473 = vst [vmem:[#allocation2 + $0x68] sm:$0x1] %v472_v17  ;;  %v754_v55 = vshll.u32 %v10505_v52, 16  ;;  %v10552_v7 = vpack.c.bf16 %v518_v40, %v518_v40 }
  0xba   : > { %v1246_v56 = vld [vmem:[#allocation2 + $0x48] sm:$0xf]  ;;  %v753_v57 = vrot.slane %v751_v47, 7  ;;  %v759_v54 = vshrl.u32 %v10516_v11, 16  ;;  %v1428_v62 = vsel %vm10396_vm11, %v1423_v49, %v1427_v44  ;;  %v762_v19 = vshll.u32 %v10516_v11, 16  ;;  %v520_v49 = vld [vmem:[%s10324_s22 + $0x98] sm:$0xff] }
  0xbb   : > { %v1430_v63 = vshrl.u32 %v1246_v56, 16  ;;  %v1433_v0 = vshll.u32 %v1246_v56, 16  ;;  %v748_v1 = vsel %vm10360_vm9, %v740_v31, %v747_v51  ;;  %v10548_v52 = vcombine.low %v1418_v35, %v1428_v62  ;;  %v474_v20 = vld [vmem:[#allocation2 + $0x74] sm:$0x1]  ;;  %9022 = vmatpush3.bf16.msra.mxu1 %v9773_v28  ;;  %v421_v48 = vld [vmem:[#allocation2 + $0x78] sm:$0x1] }
  0xbc   : > { %v1247_v2 = vld [vmem:[#allocation2 + $0x4c] sm:$0xf]  ;;  %v1248_v4 = vld [vmem:[#allocation2 + $0x50] sm:$0x1]  ;;  %999 = vst [vmem:[#allocation2 + $0x58] sm:$0xf] %v748_v1  ;;  %v1001_v5 = vsel %vm10335_vm3, %v749_v53, %v1000_v46  ;;  %v756_v6 = vor.u32 %v754_v55, %v753_v57  ;;  %v10572_v55 = vpack.c.bf16 %v519_v36, %v519_v36 }
  0xbd   : > { %v1432_v8 = vrot.slane %v1430_v63, 4  ;;  %v1435_v10 = vrot.slane %v1433_v0, 5  ;;  %v1439_v13 = vshll.u32 %v1247_v2, 16  ;;  %v1443_v14 = vshrl.u32 %v1247_v2, 16  ;;  %1002 = vst [vmem:[#allocation2 + $0x5c] sm:$0x1] %v1001_v5  ;;  %2489 = vmatprep.mubr.bf16.mxu0 %v10548_v52  ;;  %2963 = vmatprep.mubr.bf16.mxu1 %v10548_v52 }
  0xbe   : > { %v1449_v15 = vshll.u32 %v1248_v4, 16  ;;  %v757_v9 = vrot.slane %v753_v57, 4  ;;  %v761_v18 = vrot.slane %v759_v54, 7  ;;  %2490 = vmatmul.mubr.bf16.gmra.mrb[16].mxu0 %v9755_v50  ;;  %2964 = vmatmul.mubr.bf16.gmra.mrb[20].mxu1 %v9755_v50  ;;  %v419_v27 = vsel %vm10335_vm3, 0, %v418_v58  ;;  %v9757_v57 = vld [vmem:[#allocation2 + $0x48] sm:$0xff]   ;;  %v521_v4 = vld [vmem:[%s10324_s22 + $0xa0] sm:$0xff] }
  0xbf   : > { %v1436_v21 = vor.u32 %v1435_v10, %v1432_v8  ;;  %v1441_v42 = vrot.slane %v1439_v13, 5  ;;  %v1445_v23 = vrot.slane %v1443_v14, 4  ;;  %v1003_v26 = vld [vmem:[#allocation2 + $0x60] sm:$0xf]  ;;  %420 = vst [vmem:[#allocation2 + $0x6c] sm:$0x1] %v419_v27  ;;  %v10581_v13 = vpack.c.bf16 %v520_v49, %v520_v49 }
  0xc0   : > { %v1451_v29 = vrot.slane %v1449_v15, 5  ;;  %v1249_v30 = vld [vmem:[#allocation2 + $0x54] sm:$0xf]  ;;  %v764_v61 = vor.u32 %v762_v19, %v761_v18  ;;  %v766_v16 = vrot.slane %v761_v18, 4  ;;  %v1004_v31 = vsel %vm10371_vm10, %v756_v6, %v1003_v26  ;;  %v1007_v35 = vld [vmem:[#allocation2 + $0x68] sm:$0x1] }
  0xc1   : > { %v1437_v11 = vrot.slane %v1436_v21, 4  ;;  %v1446_v32 = vor.u32 %v1445_v23, %v1441_v42  ;;  %v1454_v33 = vshrl.u32 %v1249_v30, 16  ;;  %v1457_v34 = vshll.u32 %v1249_v30, 16  ;;  %1005 = vst [vmem:[#allocation2 + $0x60] sm:$0xf] %v1004_v31  ;;  %v9775_v26 = vld [vmem:[#allocation8 + $0x178] sm:$0xff]  }
  0xc2   : > { %v765_v37 = vsel %vm10360_vm9, %v757_v9, %v764_v61  ;;  %v1008_v38 = vsel %vm10335_vm3, %v766_v16, %v1007_v35  ;;  %v475_v40 = vsel %vm10340_vm4, 0, %v474_v20  ;;  %v768_v43 = vshrl.u32 %v10542_v60, 16  ;;  %v480_v35 = vld [vmem:[#allocation2 + $0x8c] sm:$0x1]  ;;  %8981 = vmatprep.subr.bf16.mxu0 %v9775_v26 }
  0xc3   : > { %v1442_v44 = vsel %vm10396_vm11, %v1437_v11, %v1441_v42  ;;  %v1447_v45 = vrot.slane %v1446_v32, 4  ;;  %v1250_v46 = vld [vmem:[#allocation2 + $0x58] sm:$0xf]  ;;  %v1456_v17 = vrot.slane %v1454_v33, 4  ;;  %v1459_v47 = vrot.slane %v1457_v34, 5  ;;  %8982 = vmatpush3.bf16.msra.mxu0 %v9775_v26 }
  0xc4   : > { %1006 = vst [vmem:[#allocation2 + $0x64] sm:$0xf] %v765_v37  ;;  %1009 = vst [vmem:[#allocation2 + $0x68] sm:$0x1] %v1008_v38  ;;  %v1251_v50 = vld [vmem:[#allocation2 + $0x5c] sm:$0x1]  ;;  %v10588_v23 = vpack.c.bf16 %v521_v4, %v521_v4 }
  0xc5   : > { %476 = vst [vmem:[#allocation2 + $0x74] sm:$0x1] %v475_v40  ;;  %v1463_v51 = vshll.u32 %v1250_v46, 16  ;;  %v1467_v53 = vshrl.u32 %v1250_v46, 16  ;;  %v1452_v56 = vsel %vm10396_vm11, %v1447_v45, %v1451_v29  ;;  %v1460_v54 = vor.u32 %v1459_v47, %v1456_v17  ;;  %v477_v42 = vld [vmem:[#allocation2 + $0x80] sm:$0x1] }
  0xc6   : > { %v1473_v58 = vshll.u32 %v1251_v50, 16  ;;  %v770_v62 = vrot.slane %v768_v43, 7  ;;  %v10576_v63 = vcombine.low %v1442_v44, %v1452_v56  ;;  %v771_v2 = vshll.u32 %v10542_v60, 16  ;;  %v1010_v10 = vld [vmem:[#allocation2 + $0x6c] sm:$0xf]  ;;  %v9758_v16 = vld [vmem:[#allocation2 + $0x54] sm:$0xff]  }
  0xc7   : > { %v1465_v0 = vrot.slane %v1463_v51, 5  ;;  %v1469_v1 = vrot.slane %v1467_v53, 4  ;;  %v1461_v5 = vrot.slane %v1460_v54, 4  ;;  %v776_v8 = vshrl.u32 %v10552_v7, 16  ;;  %v424_v34 = vld [vmem:[#allocation2 + $0x84] sm:$0x1] }
  0xc8   : > { %v1475_v6 = vrot.slane %v1473_v58, 5  ;;  %2497 = vmatprep.mubr.bf16.mxu0 %v10576_v63  ;;  %2971 = vmatprep.mubr.bf16.mxu1 %v10576_v63  ;;  %v1252_v15 = vld [vmem:[#allocation2 + $0x60] sm:$0xf]  ;;  %v773_v9 = vor.u32 %v771_v2, %v770_v62  ;;  %v779_v18 = vshll.u32 %v10552_v7, 16  ;;  %v422_v60 = vsel %vm10335_vm3, 0, %v421_v48  ;;  %v9776_v53 = vld [vmem:[#allocation8 + $0xa0] sm:$0xff]  }
  0xc9   : > { %v1470_v14 = vor.u32 %v1469_v1, %v1465_v0  ;;  %2498 = vmatmul.mubr.bf16.gmra.mrb[20].mxu0 %v9757_v57  ;;  %2972 = vmatmul.mubr.bf16.gmra.mrb[24].mxu1 %v9757_v57  ;;  %v1478_v19 = vshrl.u32 %v1252_v15, 16  ;;  %v1481_v20 = vshll.u32 %v1252_v15, 16  ;;  %v778_v21 = vrot.slane %v776_v8, 7  ;;  %423 = vst [vmem:[#allocation2 + $0x78] sm:$0x1] %v422_v60  ;;  %v522_v51 = vld [vmem:[%s10324_s22 + $0xa8] sm:$0xff] }
  0xca   : > { %v1466_v27 = vsel %vm10396_vm11, %v1461_v5, %v1465_v0  ;;  %v774_v7 = vrot.slane %v770_v62, 4  ;;  %v1011_v61 = vsel %vm10371_vm10, %v773_v9, %v1010_v10  ;;  %v478_v50 = vsel %vm10340_vm4, 0, %v477_v42  ;;  %v9777_v62 = vld [vmem:[#allocation8 + $0xa8] sm:$0xff]   ;;  %9023 = vmatprep.subr.bf16.mxu1 %v9776_v53  ;;  %v524_v42 = vld [vmem:[%s10324_s22 + $0xb8] sm:$0xff] }
  0xcb   : > { %v1471_v28 = vrot.slane %v1470_v14, 4  ;;  %v1253_v29 = vld [vmem:[#allocation2 + $0x64] sm:$0xf]  ;;  %v1254_v30 = vld [vmem:[#allocation2 + $0x68] sm:$0x1]  ;;  %v1480_v31 = vrot.slane %v1478_v19, 4  ;;  %v781_v38 = vor.u32 %v779_v18, %v778_v21  ;;  %v10618_v15 = vpack.c.bf16 %v522_v51, %v522_v51  ;;  %9024 = vmatpush3.bf16.msra.mxu1 %v9776_v53 }
  0xcc   : > { %v1483_v11 = vrot.slane %v1481_v20, 5  ;;  %v1487_v32 = vshll.u32 %v1253_v29, 16  ;;  %v1491_v33 = vshrl.u32 %v1253_v29, 16  ;;  %1012 = vst [vmem:[#allocation2 + $0x6c] sm:$0xf] %v1011_v61  ;;  %v1497_v37 = vshll.u32 %v1254_v30, 16  ;;  %9025 = vmatprep.subr.bf16.mxu1 %v9777_v62 }
  0xcd   : > { %v1476_v36 = vsel %vm10396_vm11, %v1471_v28, %v1475_v6  ;;  %v783_v40 = vrot.slane %v778_v21, 4  ;;  %v1014_v43 = vld [vmem:[#allocation2 + $0x74] sm:$0x1]  ;;  %v782_v48 = vsel %vm10360_vm9, %v774_v7, %v781_v38  ;;  %479 = vst [vmem:[#allocation2 + $0x80] sm:$0x1] %v478_v50  ;;  %v785_v54 = vshrl.u32 %v10572_v55, 16 }
  0xce   : > { %v10596_v44 = vcombine.low %v1466_v27, %v1476_v36  ;;  %v1484_v45 = vor.u32 %v1483_v11, %v1480_v31  ;;  %v1489_v46 = vrot.slane %v1487_v32, 5  ;;  %v1493_v17 = vrot.slane %v1491_v33, 4  ;;  %1013 = vst [vmem:[#allocation2 + $0x70] sm:$0xf] %v782_v48  ;;  %v523_v21 = vld [vmem:[%s10324_s22 + $0xb0] sm:$0xff]  ;;  %v9760_v27 = vld [vmem:[#allocation2 + $0x60] sm:$0xff]  }
  0xcf   : > { %v1499_v47 = vrot.slane %v1497_v37, 5  ;;  %v1015_v49 = vsel %vm10335_vm3, %v783_v40, %v1014_v43  ;;  %v788_v58 = vshll.u32 %v10572_v55, 16  ;;  %v793_v0 = vshrl.u32 %v10581_v13, 16  ;;  %v9779_v7 = vld [vmem:[#allocation8 + $0xb0] sm:$0xff]   ;;  %v427_v11 = vld [vmem:[#allocation2 + $0x90] sm:$0x1]  ;;  %9026 = vmatpush3.bf16.msra.mxu1 %v9777_v62 }
  0xd0   : > { %2505 = vmatprep.mubr.bf16.mxu0 %v10596_v44  ;;  %v1485_v56 = vrot.slane %v1484_v45, 4  ;;  %v1494_v57 = vor.u32 %v1493_v17, %v1489_v46  ;;  %2979 = vmatprep.mubr.bf16.mxu1 %v10596_v44  ;;  %1016 = vst [vmem:[#allocation2 + $0x74] sm:$0x1] %v1015_v49  ;;  %v796_v1 = vshll.u32 %v10581_v13, 16  ;;  %v425_v2 = vsel %vm10335_vm3, 0, %v424_v34  ;;  %v9781_v32 = vld [vmem:[#allocation8 + $0x1c0] sm:$0xff]  }
  0xd1   : > { %v481_v4 = vsel %vm10340_vm4, 0, %v480_v35  ;;  %2506 = vmatmul.mubr.bf16.gmra.mrb[24].mxu0 %v9758_v16  ;;  %2980 = vmatmul.mubr.bf16.gmra.mrb[28].mxu1 %v9758_v16  ;;  %v787_v55 = vrot.slane %v785_v54, 7  ;;  %v1017_v8 = vld [vmem:[#allocation2 + $0x78] sm:$0xf]  ;;  %426 = vst [vmem:[#allocation2 + $0x84] sm:$0x1] %v425_v2  ;;  %v8089_v36 = vpack.c.bf16 %v523_v21, %v523_v21  ;;  %v10636_v50 = vpack.c.bf16 %v524_v42, %v524_v42 }
  0xd2   : > { %v1490_v5 = vsel %vm10396_vm11, %v1485_v56, %v1489_v46  ;;  %v1495_v6 = vrot.slane %v1494_v57, 4  ;;  %482 = vst [vmem:[#allocation2 + $0x8c] sm:$0x1] %v481_v4  ;;  %v802_v10 = vshrl.u32 %v10588_v23, 16  ;;  %v795_v14 = vrot.slane %v793_v0, 7  ;;  %8404 = vmatprep.subr.bf16.mxu0 %v9781_v32  ;;  %9027 = vmatprep.subr.bf16.mxu1 %v9779_v7  ;;  %v9780_v51 = vld [vmem:[#allocation8 + $0xb8] sm:$0xff]  }
  0xd3   : > { %v1255_v13 = vld [vmem:[#allocation2 + $0x6c] sm:$0xf]  ;;  %v805_v9 = vshll.u32 %v10588_v23, 16  ;;  %v790_v20 = vor.u32 %v788_v58, %v787_v55  ;;  %v791_v28 = vrot.slane %v787_v55, 4  ;;  %v483_v49 = vld [vmem:[#allocation2 + $0x98] sm:$0x1]  ;;  %9028 = vmatpush3.bf16.msra.mxu1 %v9779_v7 }
  0xd4   : > { %v1500_v18 = vsel %vm10396_vm11, %v1495_v6, %v1499_v47  ;;  %v1502_v60 = vshrl.u32 %v1255_v13, 16  ;;  %v1505_v19 = vshll.u32 %v1255_v13, 16  ;;  %v798_v29 = vor.u32 %v796_v1, %v795_v14  ;;  %v1021_v45 = vld [vmem:[#allocation2 + $0x80] sm:$0x1]  ;;  %v525_v2 = vld [vmem:[%s10324_s22 + $0xc0] sm:$0xff]  ;;  %9029 = vmatprep.subr.bf16.mxu1 %v9780_v51 }
  0xd5   : > { %v10625_v26 = vcombine.low %v1490_v5, %v1500_v18  ;;  %v800_v30 = vrot.slane %v795_v14, 4  ;;  %v1018_v23 = vsel %vm10371_vm10, %v790_v20, %v1017_v8  ;;  %v804_v31 = vrot.slane %v802_v10, 7  ;;  %v1256_v33 = vld [vmem:[#allocation2 + $0x70] sm:$0xf] }
  0xd6   : > { %v1504_v61 = vrot.slane %v1502_v60, 4  ;;  %v1507_v16 = vrot.slane %v1505_v19, 5  ;;  %v799_v35 = vsel %vm10360_vm9, %v791_v28, %v798_v29  ;;  %1019 = vst [vmem:[#allocation2 + $0x78] sm:$0xf] %v1018_v23  ;;  %v1511_v38 = vshll.u32 %v1256_v33, 16  ;;  %v9761_v7 = vld [vmem:[#allocation2 + $0x6c] sm:$0xff]  }
  0xd7   : > { %2513 = vmatprep.mubr.bf16.mxu0 %v10625_v26  ;;  %v1257_v34 = vld [vmem:[#allocation2 + $0x74] sm:$0x1]  ;;  %2987 = vmatprep.mubr.bf16.mxu1 %v10625_v26  ;;  %v1515_v40 = vshrl.u32 %v1256_v33, 16  ;;  %1020 = vst [vmem:[#allocation2 + $0x7c] sm:$0xf] %v799_v35  ;;  %v1022_v46 = vsel %vm10335_vm3, %v800_v30, %v1021_v45  ;;  %v807_v17 = vor.u32 %v805_v9, %v804_v31  ;;  %v810_v47 = vshrl.u32 %v10618_v15, 16 }
  0xd8   : > { %v1508_v37 = vor.u32 %v1507_v16, %v1504_v61  ;;  %v1521_v43 = vshll.u32 %v1257_v34, 16  ;;  %v1024_v48 = vld [vmem:[#allocation2 + $0x84] sm:$0xf]  ;;  %v1513_v56 = vrot.slane %v1511_v38, 5  ;;  %1023 = vst [vmem:[#allocation2 + $0x80] sm:$0x1] %v1022_v46  ;;  %v10649_v20 = vpack.c.bf16 %v525_v2, %v525_v2  ;;  %9030 = vmatpush3.bf16.msra.mxu1 %v9780_v51 }
  0xd9   : > { %2514 = vmatmul.mubr.bf16.gmra.mrb[28].mxu0 %v9760_v27  ;;  %v1517_v57 = vrot.slane %v1515_v40, 4  ;;  %2988 = vmatmul.mubr.bf16.gmra.mrb[32].mxu1 %v9760_v27  ;;  %v808_v54 = vrot.slane %v804_v31, 4  ;;  %v812_v58 = vrot.slane %v810_v47, 7  ;;  %v813_v62 = vshll.u32 %v10618_v15, 16  ;;  %v1028_v6 = vld [vmem:[#allocation2 + $0x8c] sm:$0x1] }
  0xda   : > { %v1509_v53 = vrot.slane %v1508_v37, 4  ;;  %v1025_v0 = vsel %vm10371_vm10, %v807_v17, %v1024_v48  ;;  %v428_v1 = vsel %vm10335_vm3, 0, %v427_v11  ;;  %v1523_v5 = vrot.slane %v1521_v43, 5  ;;  %v430_v31 = vld [vmem:[#allocation2 + $0x9c] sm:$0x1]  ;;  %v526_v11 = vld [vmem:[%s10324_s22 + $0xc8] sm:$0xff] }
  0xdb   : > { %v1518_v4 = vor.u32 %v1517_v57, %v1513_v56  ;;  %1026 = vst [vmem:[#allocation2 + $0x84] sm:$0xf] %v1025_v0  ;;  %429 = vst [vmem:[#allocation2 + $0x90] sm:$0x1] %v428_v1  ;;  %v484_v55 = vsel %vm10340_vm4, 0, %v483_v49  ;;  %v819_v8 = vshrl.u32 %v8089_v36, 16  ;;  %v815_v10 = vor.u32 %v813_v62, %v812_v58 }
  0xdc   : > { %v817_v13 = vrot.slane %v812_v58, 4  ;;  %485 = vst [vmem:[#allocation2 + $0x98] sm:$0x1] %v484_v55  ;;  %v822_v14 = vshll.u32 %v8089_v36, 16  ;;  %v827_v15 = vshrl.u32 %v10636_v50, 16  ;;  %v1514_v9 = vsel %vm10396_vm11, %v1509_v53, %v1513_v56  ;;  %v527_v58 = vld [vmem:[%s10324_s22 + $0xd0] sm:$0xff] }
  0xdd   : > { %v1519_v18 = vrot.slane %v1518_v4, 4  ;;  %v1258_v60 = vld [vmem:[#allocation2 + $0x78] sm:$0xf]  ;;  %v821_v19 = vrot.slane %v819_v8, 7  ;;  %v816_v28 = vsel %vm10360_vm9, %v808_v54, %v815_v10  ;;  %v486_v45 = vld [vmem:[#allocation2 + $0xa4] sm:$0x1]  ;;  %v10665_v49 = vpack.c.bf16 %v526_v11, %v526_v11 }
  0xde   : > { %v1259_v21 = vld [vmem:[#allocation2 + $0x7c] sm:$0xf]  ;;  %v1526_v42 = vshrl.u32 %v1258_v60, 16  ;;  %v1529_v27 = vshll.u32 %v1258_v60, 16  ;;  %v1029_v29 = vsel %vm10335_vm3, %v817_v13, %v1028_v6  ;;  %1027 = vst [vmem:[#allocation2 + $0x88] sm:$0xf] %v816_v28 }
  0xdf   : > { %v1524_v30 = vsel %vm10396_vm11, %v1519_v18, %v1523_v5  ;;  %v1535_v61 = vshll.u32 %v1259_v21, 16  ;;  %v1539_v16 = vshrl.u32 %v1259_v21, 16  ;;  %1030 = vst [vmem:[#allocation2 + $0x8c] sm:$0x1] %v1029_v29  ;;  %v824_v23 = vor.u32 %v822_v14, %v821_v19  ;;  %v1260_v33 = vld [vmem:[#allocation2 + $0x80] sm:$0x1] }
  0xe0   : > { %v10658_v32 = vcombine.low %v1514_v9, %v1524_v30  ;;  %v1528_v34 = vrot.slane %v1526_v42, 4  ;;  %v1531_v35 = vrot.slane %v1529_v27, 5  ;;  %v825_v36 = vrot.slane %v821_v19, 4  ;;  %v433_v8 = vld [vmem:[#allocation2 + $0xa8] sm:$0x1]  ;;  %v9764_v19 = vld [vmem:[#allocation2 + $0x78] sm:$0xff]  }
  0xe1   : > { %v1537_v37 = vrot.slane %v1535_v61, 5  ;;  %v1541_v38 = vrot.slane %v1539_v16, 4  ;;  %v1545_v40 = vshll.u32 %v1260_v33, 16  ;;  %v829_v43 = vrot.slane %v827_v15, 7  ;;  %v489_v28 = vld [vmem:[#allocation2 + $0xb0] sm:$0x1] }
  0xe2   : > { %2521 = vmatprep.mubr.bf16.mxu0 %v10658_v32  ;;  %v1532_v46 = vor.u32 %v1531_v35, %v1528_v34  ;;  %2995 = vmatprep.mubr.bf16.mxu1 %v10658_v32  ;;  %v1261_v17 = vld [vmem:[#allocation2 + $0x84] sm:$0xf]  ;;  %v830_v47 = vshll.u32 %v10636_v50, 16  ;;  %v431_v48 = vsel %vm10335_vm3, 0, %v430_v31  ;;  %v1031_v54 = vld [vmem:[#allocation2 + $0x90] sm:$0xf]  ;;  %v10678_v18 = vpack.c.bf16 %v527_v58, %v527_v58 }
  0xe3   : > { %2522 = vmatmul.mubr.bf16.gmra.mrb[32].mxu0 %v9761_v7  ;;  %v1542_v51 = vor.u32 %v1541_v38, %v1537_v37  ;;  %v1547_v53 = vrot.slane %v1545_v40, 5  ;;  %2996 = vmatmul.mubr.bf16.gmra.mrb[36].mxu1 %v9761_v7  ;;  %v1550_v56 = vshrl.u32 %v1261_v17, 16  ;;  %v1553_v57 = vshll.u32 %v1261_v17, 16  ;;  %432 = vst [vmem:[#allocation2 + $0x9c] sm:$0x1] %v431_v48  ;;  %v528_v16 = vld [vmem:[%s10324_s22 + $0xd8] sm:$0xff] }
  0xe4   : > { %v1533_v62 = vrot.slane %v1532_v46, 4  ;;  %v832_v0 = vor.u32 %v830_v47, %v829_v43  ;;  %v834_v1 = vrot.slane %v829_v43, 4  ;;  %v1032_v50 = vsel %vm10371_vm10, %v824_v23, %v1031_v54  ;;  %v1035_v2 = vld [vmem:[#allocation2 + $0x98] sm:$0x1]  ;;  %v530_v35 = vld [vmem:[%s10324_s22 + $0xe8] sm:$0xff] }
  0xe5   : > { %v1543_v4 = vrot.slane %v1542_v51, 4  ;;  %v1552_v5 = vrot.slane %v1550_v56, 4  ;;  %v1555_v6 = vrot.slane %v1553_v57, 5  ;;  %1033 = vst [vmem:[#allocation2 + $0x90] sm:$0xf] %v1032_v50  ;;  %v487_v55 = vsel %vm10340_vm4, 0, %v486_v45 }
  0xe6   : > { %v1538_v10 = vsel %vm10396_vm11, %v1533_v62, %v1537_v37  ;;  %v1262_v13 = vld [vmem:[#allocation2 + $0x88] sm:$0xf]  ;;  %v1263_v14 = vld [vmem:[#allocation2 + $0x8c] sm:$0x1]  ;;  %v833_v15 = vsel %vm10360_vm9, %v825_v36, %v832_v0  ;;  %v1036_v9 = vsel %vm10335_vm3, %v834_v1, %v1035_v2  ;;  %488 = vst [vmem:[#allocation2 + $0xa4] sm:$0x1] %v487_v55  ;;  %v10698_v47 = vpack.c.bf16 %v528_v16, %v528_v16 }
  0xe7   : > { %v1548_v60 = vsel %vm10396_vm11, %v1543_v4, %v1547_v53  ;;  %v1556_v21 = vor.u32 %v1555_v6, %v1552_v5  ;;  %v1559_v42 = vshll.u32 %v1262_v13, 16  ;;  %v1563_v27 = vshrl.u32 %v1262_v13, 16  ;;  %1034 = vst [vmem:[#allocation2 + $0x94] sm:$0xf] %v833_v15  ;;  %1037 = vst [vmem:[#allocation2 + $0x98] sm:$0x1] %v1036_v9 }
  0xe8   : > { %v10682_v29 = vcombine.low %v1538_v10, %v1548_v60  ;;  %v1569_v30 = vshll.u32 %v1263_v14, 16  ;;  %v836_v7 = vshrl.u32 %v10649_v20, 16  ;;  %v839_v61 = vshll.u32 %v10649_v20, 16  ;;  %v529_v34 = vld [vmem:[%s10324_s22 + $0xe0] sm:$0xff]  ;;  %v531_v36 = vld [vmem:[%s10324_s22 + $0xf0] sm:$0xff] }
  0xe9   : > { %v1557_v23 = vrot.slane %v1556_v21, 4  ;;  %v1561_v31 = vrot.slane %v1559_v42, 5  ;;  %v1565_v11 = vrot.slane %v1563_v27, 4  ;;  %v844_v33 = vshrl.u32 %v10665_v49, 16  ;;  %v9765_v55 = vld [vmem:[#allocation2 + $0x84] sm:$0xff]  }
  0xea   : > { %2529 = vmatprep.mubr.bf16.mxu0 %v10682_v29  ;;  %v1571_v37 = vrot.slane %v1569_v30, 5  ;;  %3003 = vmatprep.mubr.bf16.mxu1 %v10682_v29  ;;  %v838_v38 = vrot.slane %v836_v7, 7  ;;  %v847_v40 = vshll.u32 %v10665_v49, 16  ;;  %v1038_v43 = vld [vmem:[#allocation2 + $0x9c] sm:$0xf]  ;;  %v434_v20 = vsel %vm10335_vm3, 0, %v433_v8 }
  0xeb   : > { %2530 = vmatmul.mubr.bf16.gmra.mrb[36].mxu0 %v9764_v19  ;;  %v1566_v45 = vor.u32 %v1565_v11, %v1561_v31  ;;  %3004 = vmatmul.mubr.bf16.gmra.mrb[40].mxu1 %v9764_v19  ;;  %v846_v46 = vrot.slane %v844_v33, 7  ;;  %435 = vst [vmem:[#allocation2 + $0xa8] sm:$0x1] %v434_v20  ;;  %v490_v17 = vsel %vm10340_vm4, 0, %v489_v28  ;;  %v1562_v48 = vsel %vm10396_vm11, %v1557_v23, %v1561_v31  ;;  %v436_v30 = vld [vmem:[#allocation2 + $0xb4] sm:$0x1] }
  0xec   : > { %v1264_v51 = vld [vmem:[#allocation2 + $0x90] sm:$0xf]  ;;  %v841_v53 = vor.u32 %v839_v61, %v838_v38  ;;  %v842_v49 = vrot.slane %v838_v38, 4  ;;  %491 = vst [vmem:[#allocation2 + $0xb0] sm:$0x1] %v490_v17  ;;  %v853_v56 = vshrl.u32 %v10678_v18, 16  ;;  %v10705_v2 = vpack.c.bf16 %v529_v34, %v529_v34 }
  0xed   : > { %v1567_v57 = vrot.slane %v1566_v45, 4  ;;  %v1574_v54 = vshrl.u32 %v1264_v51, 16  ;;  %v1577_v58 = vshll.u32 %v1264_v51, 16  ;;  %v849_v62 = vor.u32 %v847_v40, %v846_v46  ;;  %v1042_v19 = vld [vmem:[#allocation2 + $0xa4] sm:$0x1] }
  0xee   : > { %v1265_v0 = vld [vmem:[#allocation2 + $0x94] sm:$0xf]  ;;  %v1266_v1 = vld [vmem:[#allocation2 + $0x98] sm:$0x1]  ;;  %v1039_v50 = vsel %vm10371_vm10, %v841_v53, %v1038_v43  ;;  %v10707_v4 = vpack.c.bf16 %v530_v35, %v530_v35  ;;  %v10709_v5 = vpack.c.bf16 %v531_v36, %v531_v36  ;;  %v851_v27 = vrot.slane %v846_v46, 4 }
  0xef   : > { %v1572_v6 = vsel %vm10396_vm11, %v1567_v57, %v1571_v37  ;;  %v1576_v8 = vrot.slane %v1574_v54, 4  ;;  %v1579_v10 = vrot.slane %v1577_v58, 5  ;;  %v1583_v13 = vshll.u32 %v1265_v0, 16  ;;  %1040 = vst [vmem:[#allocation2 + $0x9c] sm:$0xf] %v1039_v50  ;;  %v10724_v37 = vld [vmem:[#allocation8 + $0x200] sm:$0xff]  }
  0xf0   : > { %v10713_v14 = vcombine.low %v1562_v48, %v1572_v6  ;;  %v1587_v15 = vshrl.u32 %v1265_v0, 16  ;;  %v1593_v9 = vshll.u32 %v1266_v1, 16  ;;  %v850_v60 = vsel %vm10360_vm9, %v842_v49, %v849_v62  ;;  %v492_v31 = vld [vmem:[#allocation2 + $0xbc] sm:$0x1]  ;;  %9063 = vmatprep.subr.bf16.mxu1 %v10724_v37  ;;  %v439_v57 = vld [vmem:[#allocation2 + $0xc0] sm:$0x1] }
  0xf1   : > { %v1580_v21 = vor.u32 %v1579_v10, %v1576_v8  ;;  %v1585_v42 = vrot.slane %v1583_v13, 5  ;;  %1041 = vst [vmem:[#allocation2 + $0xa0] sm:$0xf] %v850_v60  ;;  %v855_v28 = vrot.slane %v853_v56, 7  ;;  %v856_v16 = vshll.u32 %v10678_v18, 16 }
  0xf2   : > { %2537 = vmatprep.mubr.bf16.mxu0 %v10713_v14  ;;  %v1589_v7 = vrot.slane %v1587_v15, 4  ;;  %v1595_v61 = vrot.slane %v1593_v9, 5  ;;  %3011 = vmatprep.mubr.bf16.mxu1 %v10713_v14  ;;  %v861_v23 = vshrl.u32 %v10698_v47, 16  ;;  %v1043_v33 = vsel %vm10335_vm3, %v851_v27, %v1042_v19  ;;  %v1045_v36 = vld [vmem:[#allocation2 + $0xa8] sm:$0xf] }
  0xf3   : > { %2538 = vmatmul.mubr.bf16.gmra.mrb[40].mxu0 %v9765_v55  ;;  %v1581_v11 = vrot.slane %v1580_v21, 4  ;;  %3012 = vmatmul.mubr.bf16.gmra.mrb[44].mxu1 %v9765_v55  ;;  %v859_v34 = vrot.slane %v855_v28, 4  ;;  %v864_v35 = vshll.u32 %v10698_v47, 16  ;;  %1044 = vst [vmem:[#allocation2 + $0xa4] sm:$0x1] %v1043_v33  ;;  %v858_v40 = vor.u32 %v856_v16, %v855_v28 }
  0xf4   : > { %v1590_v38 = vor.u32 %v1589_v7, %v1585_v42  ;;  %v863_v43 = vrot.slane %v861_v23, 7  ;;  %v1049_v18 = vld [vmem:[#allocation2 + $0xb0] sm:$0x1]  ;;  %v437_v20 = vsel %vm10335_vm3, 0, %v436_v30  ;;  %v493_v46 = vsel %vm10340_vm4, 0, %v492_v31 }
  0xf5   : > { %v1586_v45 = vsel %vm10396_vm11, %v1581_v11, %v1585_v42  ;;  %438 = vst [vmem:[#allocation2 + $0xb4] sm:$0x1] %v437_v20  ;;  %v870_v17 = vshrl.u32 %v10705_v2, 16  ;;  %v873_v47 = vshll.u32 %v10705_v2, 16  ;;  %v1046_v56 = vsel %vm10371_vm10, %v858_v40, %v1045_v36  ;;  %494 = vst [vmem:[#allocation2 + $0xbc] sm:$0x1] %v493_v46 }
  0xf6   : > { %v1591_v48 = vrot.slane %v1590_v38, 4  ;;  %v1267_v51 = vld [vmem:[#allocation2 + $0x9c] sm:$0xf]  ;;  %v866_v53 = vor.u32 %v864_v35, %v863_v43  ;;  %v868_v49 = vrot.slane %v863_v43, 4  ;;  %v495_v54 = vld [vmem:[#allocation2 + $0xc8] sm:$0x1] }
  0xf7   : > { %v1598_v58 = vshrl.u32 %v1267_v51, 16  ;;  %v1601_v62 = vshll.u32 %v1267_v51, 16  ;;  %1047 = vst [vmem:[#allocation2 + $0xa8] sm:$0xf] %v1046_v56  ;;  %v872_v0 = vrot.slane %v870_v17, 7  ;;  %v878_v1 = vshrl.u32 %v10707_v4, 16 }
  0xf8   : > { %v1596_v50 = vsel %vm10396_vm11, %v1591_v48, %v1595_v61  ;;  %v9768_v2 = vld [vmem:[#allocation2 + $0x90] sm:$0xff]   ;;  %v1268_v6 = vld [vmem:[#allocation2 + $0xa0] sm:$0xf]  ;;  %v867_v55 = vsel %vm10360_vm9, %v859_v34, %v866_v53  ;;  %v1050_v8 = vsel %vm10335_vm3, %v868_v49, %v1049_v18  ;;  %v881_v10 = vshll.u32 %v10707_v4, 16 }
  0xf9   : > { %v10745_v13 = vcombine.low %v1586_v45, %v1596_v50  ;;  %v1600_v15 = vrot.slane %v1598_v58, 4  ;;  %v1603_v9 = vrot.slane %v1601_v62, 5  ;;  %v1607_v60 = vshll.u32 %v1268_v6, 16  ;;  %1048 = vst [vmem:[#allocation2 + $0xac] sm:$0xf] %v867_v55  ;;  %v532_v38 = vld [vmem:[%s10324_s22 + $0xf8] sm:$0xff] }
  0xfa   : > { %1051 = vst [vmem:[#allocation2 + $0xb0] sm:$0x1] %v1050_v8  ;;  %v1611_v19 = vshrl.u32 %v1268_v6, 16  ;;  %v875_v21 = vor.u32 %v873_v47, %v872_v0  ;;  %v876_v42 = vrot.slane %v872_v0, 4  ;;  %v880_v27 = vrot.slane %v878_v1, 7  ;;  %v9769_v50 = vld [vmem:[#allocation2 + $0x9c] sm:$0xff]  }
  0xfb   : > { %2545 = vmatprep.mubr.bf16.mxu0 %v10745_v13  ;;  %v1269_v28 = vld [vmem:[#allocation2 + $0xa4] sm:$0x1]  ;;  %v1604_v30 = vor.u32 %v1603_v9, %v1600_v15  ;;  %v1609_v7 = vrot.slane %v1607_v60, 5  ;;  %3019 = vmatprep.mubr.bf16.mxu1 %v10745_v13  ;;  %v440_v4 = vsel %vm10335_vm3, 0, %v439_v57  ;;  %v496_v61 = vsel %vm10340_vm4, 0, %v495_v54 }
  0xfc   : > { %2546 = vmatmul.mubr.bf16.gmra.mrb[44].mxu0 %v9768_v2  ;;  %v1613_v16 = vrot.slane %v1611_v19, 4  ;;  %v1617_v23 = vshll.u32 %v1269_v28, 16  ;;  %3020 = vmatmul.mubr.bf16.gmra.mrb[48].mxu1 %v9768_v2  ;;  %v883_v31 = vor.u32 %v881_v10, %v880_v27  ;;  %v885_v11 = vrot.slane %v880_v27, 4  ;;  %v1052_v33 = vld [vmem:[#allocation2 + $0xb4] sm:$0xf] }
  0xfd   : > { %441 = vst [vmem:[#allocation2 + $0xc0] sm:$0x1] %v440_v4  ;;  %497 = vst [vmem:[#allocation2 + $0xc8] sm:$0x1] %v496_v61  ;;  %v1605_v34 = vrot.slane %v1604_v30, 4  ;;  %v1053_v35 = vsel %vm10371_vm10, %v875_v21, %v1052_v33  ;;  %v887_v40 = vshrl.u32 %v10709_v5, 16  ;;  %v8098_v57 = vpack.c.bf16 %v532_v38, %v532_v38 }
  0xfe   : > { %v1056_v36 = vld [vmem:[#allocation2 + $0xbc] sm:$0x1]  ;;  %v890_v43 = vshll.u32 %v10709_v5, 16  ;;  %v1614_v18 = vor.u32 %v1613_v16, %v1609_v7  ;;  %v1619_v20 = vrot.slane %v1617_v23, 5  ;;  %v1270_v45 = vld [vmem:[#allocation2 + $0xa8] sm:$0xf]  ;;  %v884_v46 = vsel %vm10360_vm9, %v876_v42, %v883_v31 }
  0xff   : > { %1054 = vst [vmem:[#allocation2 + $0xb4] sm:$0xf] %v1053_v35  ;;  %v1057_v17 = vsel %vm10335_vm3, %v885_v11, %v1056_v36  ;;  %v1622_v47 = vshrl.u32 %v1270_v45, 16  ;;  %v1625_v48 = vshll.u32 %v1270_v45, 16  ;;  %1055 = vst [vmem:[#allocation2 + $0xb8] sm:$0xf] %v884_v46  ;;  %v1610_v53 = vsel %vm10396_vm11, %v1605_v34, %v1609_v7 }
 0x100   : > { %1058 = vst [vmem:[#allocation2 + $0xbc] sm:$0x1] %v1057_v17  ;;  %v10762_v51 = vrot.slane %v887_v40, 7  ;;  %v1615_v5 = vrot.slane %v1614_v18, 4  ;;  %v1271_v49 = vld [vmem:[#allocation2 + $0xac] sm:$0xf] }
 0x101   : > { %v1272_v56 = vld [vmem:[#allocation2 + $0xb0] sm:$0x1]  ;;  %v1624_v54 = vrot.slane %v1622_v47, 4  ;;  %v1627_v58 = vrot.slane %v1625_v48, 5  ;;  %v1631_v62 = vshll.u32 %v1271_v49, 16  ;;  %v1635_v0 = vshrl.u32 %v1271_v49, 16 }
 0x102   : > { %v1620_v1 = vsel %vm10396_vm11, %v1615_v5, %v1619_v20  ;;  %v1641_v2 = vshll.u32 %v1272_v56, 16  ;;  %v892_v6 = vor.u32 %v890_v43, %v10762_v51  ;;  %v893_v19 = vrot.slane %v10762_v51, 4  ;;  %v9772_v18 = vld [vmem:[#allocation2 + $0xa8] sm:$0xff]   ;;  %v1811_v46 = vld [vmem:[#allocation2 + $0x10] sm:$0xf] }
 0x103   : > { %v10769_v55 = vcombine.low %v1610_v53, %v1620_v1  ;;  %v1628_v8 = vor.u32 %v1627_v58, %v1624_v54  ;;  %v1633_v10 = vrot.slane %v1631_v62, 5  ;;  %v1637_v15 = vrot.slane %v1635_v0, 4  ;;  %v1810_v56 = vld [vmem:[#allocation2 + $0xc] sm:$0xe] }
 0x104   : > { %v1059_v9 = vld [vmem:[#allocation2 + $0xc0] sm:$0xf]  ;;  %v1643_v60 = vrot.slane %v1641_v2, 5  ;;  %v895_v21 = vshrl.u32 %v8098_v57, 16  ;;  %v898_v7 = vshll.u32 %v8098_v57, 16  ;;  %v1927_v0 = vrot.slane %v1811_v46, 5 }
 0x105   : > { %v1060_v42 = vsel %vm10371_vm10, %v892_v6, %v1059_v9  ;;  %2553 = vmatprep.mubr.bf16.mxu0 %v10769_v55  ;;  %v1629_v27 = vrot.slane %v1628_v8, 4  ;;  %v1638_v28 = vor.u32 %v1637_v15, %v1633_v10  ;;  %3027 = vmatprep.mubr.bf16.mxu1 %v10769_v55  ;;  %v1063_v51 = vld [vmem:[#allocation2 + $0xc8] sm:$0x1]  ;;  %v1807_v57 = vld [vmem:[#allocation2] sm:$0xe]  ;;  %vm7341_vm0 = vcmask 64512  }
 0x106   : > { %v1273_v30 = vld [vmem:[#allocation2 + $0xb4] sm:$0xf]  ;;  %1061 = vst [vmem:[#allocation2 + $0xc0] sm:$0xf] %v1060_v42  ;;  %2554 = vmatmul.mubr.bf16.gmra.mrb[48].mxu0 %v9769_v50  ;;  %3028 = vmatmul.mubr.bf16.gmra.mrb[52].mxu1 %v9769_v50  ;;  %v1274_v4 = vld [vmem:[#allocation2 + $0xb8] sm:$0xf] }
 0x107   : > { %v1275_v61 = vld [vmem:[#allocation2 + $0xbc] sm:$0x1]  ;;  %v1646_v16 = vshrl.u32 %v1273_v30, 16  ;;  %v1649_v23 = vshll.u32 %v1273_v30, 16  ;;  %v1634_v31 = vsel %vm10396_vm11, %v1629_v27, %v1633_v10  ;;  %v1639_v11 = vrot.slane %v1638_v28, 4 }
 0x108   : > { %v1655_v33 = vshll.u32 %v1274_v4, 16  ;;  %v1659_v34 = vshrl.u32 %v1274_v4, 16  ;;  %v1665_v38 = vshll.u32 %v1275_v61, 16  ;;  %v897_v40 = vrot.slane %v895_v21, 7  ;;  %v1812_v10 = vld [vmem:[#allocation2 + $0x14] sm:$0x1] }
 0x109   : > { %v1648_v35 = vrot.slane %v1646_v16, 4  ;;  %v1651_v36 = vrot.slane %v1649_v23, 5  ;;  %v1644_v43 = vsel %vm10396_vm11, %v1639_v11, %v1643_v60  ;;  %v1814_v15 = vld [vmem:[#allocation2 + $0x1c] sm:$0xf]  ;;  %v1808_v21 = vld [vmem:[#allocation2 + $0x4] sm:$0xf] }
 0x10a   : > { %v1657_v20 = vrot.slane %v1655_v33, 5  ;;  %v1661_v45 = vrot.slane %v1659_v34, 4  ;;  %v10780_v17 = vcombine.low %v1634_v31, %v1644_v43  ;;  %v900_v48 = vor.u32 %v898_v7, %v897_v40  ;;  %v1809_v42 = vld [vmem:[#allocation2 + $0x8] sm:$0x1]  ;;  %v1813_v30 = vld [vmem:[#allocation2 + $0x18] sm:$0xe] }
 0x10b   : > { %v1652_v47 = vor.u32 %v1651_v36, %v1648_v35  ;;  %v1667_v5 = vrot.slane %v1665_v38, 5  ;;  %v902_v49 = vrot.slane %v897_v40, 4  ;;  %v7774_v28 = vrot.slane %v1810_v56, 9  ;;  %v1815_v23 = vld [vmem:[#allocation2 + $0x20] sm:$0x1]  ;;  %v9774_v31 = vld [vmem:[#allocation2 + $0xb4] sm:$0xff]  }
 0x10c   : > { %v1662_v53 = vor.u32 %v1661_v45, %v1657_v20  ;;  %2561 = vmatprep.mubr.bf16.mxu0 %v10780_v17  ;;  %3035 = vmatprep.mubr.bf16.mxu1 %v10780_v17  ;;  %v901_v58 = vsel %vm10360_vm9, %v893_v19, %v900_v48  ;;  %v7773_v7 = vrot.slane %v1807_v57, 9  ;;  %v12869_v4 = vmov 0  ;;  %v1817_v36 = vld [vmem:[#allocation2 + $0x28] sm:$0xf]  ;;  %v1816_v45 = vld [vmem:[#allocation2 + $0x24] sm:$0xe] }
 0x10d   : > { %v1653_v54 = vrot.slane %v1652_v47, 4  ;;  %v1276_v62 = vld [vmem:[#allocation2 + $0xc0] sm:$0xf]  ;;  %1062 = vst [vmem:[#allocation2 + $0xc4] sm:$0xf] %v901_v58  ;;  %v1064_v50 = vsel %vm10335_vm3, %v902_v49, %v1063_v51  ;;  %v12870_v4 = vsel %vm10794_vm14, 4294967295, %v12869_v4  ;;  %v1928_v40 = vsel %vm10794_vm14, %v7774_v28, %v1927_v0 }
 0x10e   : > { %v1663_v1 = vrot.slane %v1662_v53, 4  ;;  %v1670_v2 = vshrl.u32 %v1276_v62, 16  ;;  %v1673_v6 = vshll.u32 %v1276_v62, 16  ;;  %2562 = vmatmul.mubr.bf16.gmra.mrb[52].mxu0 %v9772_v18  ;;  %3036 = vmatmul.mubr.bf16.gmra.mrb[56].mxu1 %v9772_v18  ;;  %1065 = vst [vmem:[#allocation2 + $0xc8] sm:$0x1] %v1064_v50  ;;  %12871 = vst [vmem:[#allocation20_spill] sm:$0xff] %v12870_v4 }
 0x10f   : > { %v1658_v8 = vsel %vm10396_vm11, %v1653_v54, %v1657_v20  ;;  %v1929_v61 = vrot.slane %v1927_v0, 4  ;;  %v1930_v16 = vrot.slane %v1812_v10, 5  ;;  %v1934_v11 = vrot.slane %v1814_v15, 5  ;;  %v1820_v50 = vld [vmem:[#allocation2 + $0x34] sm:$0xf] }
 0x110   : > { %v1668_v9 = vsel %vm10396_vm11, %v1663_v1, %v1667_v5  ;;  %v1672_v60 = vrot.slane %v1670_v2, 4  ;;  %v1675_v19 = vrot.slane %v1673_v6, 5  ;;  %v1920_v33 = vrot.slane %v1808_v21, 5  ;;  %v1818_v5 = vld [vmem:[#allocation2 + $0x2c] sm:$0x1] }
 0x111   : > { %v10792_v27 = vcombine.low %v1658_v8, %v1668_v9  ;;  %v1923_v34 = vrot.slane %v1809_v42, 5  ;;  %v7775_v43 = vrot.slane %v1813_v30, 9  ;;  %v1931_v51 = vsel %vm10794_vm14, %v1929_v61, %v1930_v16  ;;  %v1819_v9 = vld [vmem:[#allocation2 + $0x30] sm:$0xe]  ;;  %v9792_v61 = vld [vmem:[#allocation8 + $0x208] sm:$0xff]  }
 0x112   : > { %v1676_v35 = vor.u32 %v1675_v19, %v1672_v60  ;;  %v1921_v18 = vsel %vm10794_vm14, %v7773_v7, %v1920_v33  ;;  %v1922_v20 = vrot.slane %v1920_v33, 4  ;;  %v1937_v53 = vrot.slane %v1815_v23, 5  ;;  %v1821_v60 = vld [vmem:[#allocation2 + $0x38] sm:$0x1]  ;;  %v1822_v16 = vld [vmem:[#allocation2 + $0x3c] sm:$0xe] }
 0x113   : > { %2569 = vmatprep.mubr.bf16.mxu0 %v10792_v27  ;;  %3043 = vmatprep.mubr.bf16.mxu1 %v10792_v27  ;;  %v1936_v56 = vrot.slane %v1934_v11, 4  ;;  %v1941_v54 = vrot.slane %v1817_v36, 5  ;;  %v7792_v2 = vcombine.low %v1928_v40, %v1931_v51  ;;  %v1935_v10 = vsel %vm10794_vm14, %v7775_v43, %v1934_v11  ;;  %v1823_v23 = vld [vmem:[#allocation2 + $0x40] sm:$0xf]  ;;  %v10829_v51 = vld [vmem:[#allocation2 + $0x58] sm:$0xf] }
 0x114   : > { %v1277_v38 = vld [vmem:[#allocation2 + $0xc4] sm:$0xf]  ;;  %v1924_v57 = vsel %vm10794_vm14, %v1922_v20, %v1923_v34  ;;  %v1677_v58 = vrot.slane %v1676_v35, 4  ;;  %v7776_v15 = vrot.slane %v1816_v45, 9  ;;  %v1944_v42 = vrot.slane %v1818_v5, 5 }
 0x115   : > { %v1278_v46 = vld [vmem:[#allocation2 + $0xc8] sm:$0x1]  ;;  %v1679_v47 = vshll.u32 %v1277_v38, 16  ;;  %v1683_v48 = vshrl.u32 %v1277_v38, 16  ;;  %v7791_v1 = vcombine.low %v1921_v18, %v1924_v57  ;;  %v1938_v19 = vsel %vm10794_vm14, %v1936_v56, %v1937_v53  ;;  %v9778_v11 = vld [vmem:[#allocation2 + $0xc0] sm:$0xff]  }
 0x116   : > { %2570 = vmatmul.mubr.bf16.gmra.mrb[56].mxu0 %v9774_v31  ;;  %v1689_v49 = vshll.u32 %v1278_v46, 16  ;;  %3044 = vmatmul.mubr.bf16.gmra.mrb[60].mxu1 %v9774_v31  ;;  %v1943_v21 = vrot.slane %v1941_v54, 4  ;;  %v1948_v28 = vrot.slane %v1820_v50, 5  ;;  %v10816_v33 = vcombine.low %v1935_v10, %v1938_v19  ;;  %v1824_v18 = vld [vmem:[#allocation2 + $0x44] sm:$0x1]  ;;  %v9795_v46 = vld [vmem:[#allocation8 + $0x210] sm:$0xff]  }
 0x117   : > { %v1681_v62 = vrot.slane %v1679_v47, 5  ;;  %v1685_v0 = vrot.slane %v1683_v48, 4  ;;  %9031 = vmatprep.mubr.bf16.mxu1 %v7791_v1  ;;  %v1942_v34 = vsel %vm10794_vm14, %v7776_v15, %v1941_v54  ;;  %v7777_v35 = vrot.slane %v1819_v9, 9  ;;  %v1826_v45 = vld [vmem:[#allocation2 + $0x4c] sm:$0xf]  ;;  %v9782_v9 = vld [vmem:[#allocation8 + $0x180] sm:$0xff]  }
 0x118   : > { %v1691_v8 = vrot.slane %v1689_v49, 5  ;;  %v1945_v38 = vsel %vm10794_vm14, %v1943_v21, %v1944_v42  ;;  %v1950_v40 = vrot.slane %v1948_v28, 4  ;;  %v1951_v43 = vrot.slane %v1821_v60, 5  ;;  %v1825_v47 = vld [vmem:[#allocation2 + $0x48] sm:$0xe]  ;;  %v9796_v21 = vld [vmem:[#allocation8 + $0x218] sm:$0xff]  }
 0x119   : > { %v1686_v6 = vor.u32 %v1685_v0, %v1681_v62  ;;  %v1682_v30 = vsel %vm10396_vm11, %v1677_v58, %v1681_v62  ;;  %v1955_v20 = vrot.slane %v1823_v23, 5  ;;  %v10827_v48 = vld [vmem:[#allocation2 + $0x50] sm:$0x1]  ;;  %v10831_v53 = vcombine.low %v1942_v34, %v1945_v38  ;;  %v10833_v49 = vld [vmem:[#allocation2 + $0x54] sm:$0xe] }
 0x11a   : > { %v7778_v5 = vrot.slane %v1822_v16, 9  ;;  %v10835_v56 = vld [vmem:[#allocation2 + $0x5c] sm:$0x1]  ;;  %v10837_v57 = vld [vmem:[#allocation2 + $0x60] sm:$0xe]  ;;  %v1949_v54 = vsel %vm10794_vm14, %v7777_v35, %v1948_v28  ;;  %v1952_v58 = vsel %vm10794_vm14, %v1950_v40, %v1951_v43  ;;  %v1958_v62 = vrot.slane %v1824_v18, 5 }
 0x11b   : > { %v1687_v7 = vrot.slane %v1686_v6, 4  ;;  %v1962_v0 = vrot.slane %v1826_v45, 5  ;;  %v10845_v1 = vld [vmem:[#allocation2 + $0x68] sm:$0x1]  ;;  %v1957_v50 = vrot.slane %v1955_v20, 4  ;;  %v1969_v6 = vrot.slane %v10829_v51, 5 }
 0x11c   : > { %v10850_v10 = vld [vmem:[#allocation2 + $0x70] sm:$0xf]  ;;  %v10852_v15 = vld [vmem:[#allocation2 + $0x74] sm:$0x1]  ;;  %v7779_v60 = vrot.slane %v1825_v47, 9  ;;  %v10858_v42 = vcombine.low %v1949_v54, %v1952_v58  ;;  %v9783_v28 = vld [vmem:[#allocation8 + $0x1c8] sm:$0xff]   ;;  %v1956_v34 = vsel %vm10794_vm14, %v7778_v5, %v1955_v20 }
 0x11d   : > { %v1692_v31 = vsel %vm10396_vm11, %v1687_v7, %v1691_v8  ;;  %v10848_v8 = vld [vmem:[#allocation2 + $0x6c] sm:$0xe]  ;;  %v10856_v19 = vld [vmem:[#allocation2 + $0x7c] sm:$0xf]  ;;  %v1964_v16 = vrot.slane %v1962_v0, 4  ;;  %v7780_v23 = vrot.slane %v10833_v49, 9  ;;  %v1959_v35 = vsel %vm10794_vm14, %v1957_v50, %v1958_v62 }
 0x11e   : > { %v10820_v36 = vcombine.low %v1682_v30, %v1692_v31  ;;  %9032 = vmatmul.mubr.bf16.vlgmr.msra.gmra.mrb[64].mxu1 %v7792_v2  ;;  %v1965_v30 = vrot.slane %v10827_v48, 5  ;;  %v1971_v38 = vrot.slane %v1969_v6, 4  ;;  %v10872_v43 = vld [vmem:[#allocation2 + $0x88] sm:$0xf]  ;;  %v10874_v18 = vld [vmem:[#allocation2 + $0x94] sm:$0xf]  ;;  %v1963_v49 = vsel %vm10794_vm14, %v7779_v60, %v1962_v0 }
 0x11f   : > { %9035 = vmatprep.mubr.bf16.mxu1 %v10816_v33  ;;  %9064 = vmatpush3.bf16.msra.mxu1 %v10724_v37  ;;  %v10839_v37 = vld [vmem:[#allocation2 + $0x64] sm:$0xf]  ;;  %v12820_v48 = vrot.slane %v10850_v10, 5  ;;  %v10879_v51 = vld [vmem:[#allocation2 + $0x80] sm:$0x1]  ;;  %v12819_v54 = vrot.slane %v10856_v19, 5  ;;  %v10895_v5 = vcombine.low %v1956_v34, %v1959_v35 }
 0x120   : > { %2577 = vmatprep.mubr.bf16.mxu0 %v10820_v36  ;;  %9065 = vmatprep.subr.bf16.mxu1 %v9792_v61  ;;  %v12818_v7 = vrot.slane %v10839_v37, 5  ;;  %v9784_v45 = vld [vmem:[#allocation8 + $0x188] sm:$0xff]   ;;  %v10890_v62 = vld [vmem:[#allocation2 + $0x8c] sm:$0x1]  ;;  %v10892_v50 = vld [vmem:[#allocation2 + $0x90] sm:$0xe]  ;;  %v1966_v0 = vsel %vm10794_vm14, %v1964_v16, %v1965_v30 }
 0x121   : > { %2578 = vmatmul.mubr.bf16.gmra.mrb[60].mxu0 %v9778_v11  ;;  %v9799_v11 = vld [vmem:[#allocation8 + $0x220] sm:$0xff]   ;;  %v10888_v58 = vld [vmem:[#allocation2 + $0x84] sm:$0xe]  ;;  %v12821_v60 = vrot.slane %v10872_v43, 5  ;;  %v12822_v47 = vrot.slane %v10874_v18, 5  ;;  %v10907_v34 = vcombine.low %v1963_v49, %v1966_v0  ;;  %v1985_v16 = vrot.slane %v12820_v48, 4 }
 0x122   : > { %8983 = vmatprep.mubr.bf16.mxu0 %v7792_v2  ;;  %v10854_v2 = vld [vmem:[#allocation2 + $0x78] sm:$0xe]  ;;  %v10900_v20 = vld [vmem:[#allocation2 + $0x98] sm:$0x1]  ;;  %v10903_v40 = vld [vmem:[#allocation2 + $0x9c] sm:$0xe] }
 0x123   : > { %9066 = vmatpush3.bf16.msra.mxu1 %v9792_v61  ;;  %v1972_v61 = vrot.slane %v10835_v56, 5  ;;  %v9785_v56 = vld [vmem:[#allocation8 + $0x1d0] sm:$0xff]   ;;  %v9800_v31 = vld [vmem:[#allocation8 + $0x228] sm:$0xff]   ;;  %v9787_v49 = vld [vmem:[#allocation8 + $0x1d8] sm:$0xff]   ;;  %v10927_v0 = vrot.slane %v12821_v60, 4  ;;  %v12873_v35 = vrot.slane %v10837_v57, 9 }
 0x124   : > { %9067 = vmatprep.subr.bf16.mxu1 %v9795_v46  ;;  %v10937_v48 = vld [vmem:[#allocation2 + $0xa8] sm:$0xe]  ;;  %v9789_v60 = vld [vmem:[#allocation8 + $0x1e0] sm:$0xff]   ;;  %v10953_v59 = vld [vmem:[#allocation2 + $0xac] sm:$0xf] }
 0x125   : > { %v1973_v30 = vsel %vm10794_vm14, %v1971_v38, %v1972_v61  ;;  %v9788_v61 = vld [vmem:[#allocation8 + $0x198] sm:$0xff]   ;;  %v10958_v57 = vld [vmem:[#allocation2 + $0xb8] sm:$0xf] }
 0x126   : > { %9036 = vmatmul.mubr.bf16.gmra.mrb[68].mxu1 %v10831_v53 }
 0x127   : > { %9039 = vmatprep.mubr.bf16.mxu1 %v10858_v42  ;;  %9068 = vmatpush3.bf16.msra.mxu1 %v9795_v46  ;;  %v1978_v46 = vrot.slane %v12818_v7, 4  ;;  %v10914_v7 = vld [vmem:[#allocation2 + $0xa0] sm:$0xf] }
 0x128   : > { %9069 = vmatprep.subr.bf16.mxu1 %v9796_v21 }
 0x129   : > { %8984 = vmatmul.mubr.bf16.vlgmr.msra.gmra.mrb[64].mxu0 %v10816_v33 }
 0x12a   : > { %8405 = vmatpush3.bf16.msra.mxu0 %v9782_v9  ;;  %8987 = vmatprep.mubr.bf16.mxu0 %v10831_v53  ;;  %v1970_v9 = vsel %vm10794_vm14, %v7780_v23, %v1969_v6  ;;  %v1992_v6 = vrot.slane %v12819_v54, 4  ;;  %v9803_v54 = vld [vmem:[#allocation8 + $0x230] sm:$0xff]   ;;  %v12872_v23 = vrot.slane %v10839_v37, 5  ;;  %v7787_v37 = vrot.slane %v10937_v48, 9 }
 0x12b   : > { %8406 = vmatprep.subr.bf16.mxu0 %v9783_v28  ;;  %9070 = vmatpush3.bf16.msra.mxu1 %v9796_v21  ;;  %v10916_v21 = vld [vmem:[#allocation2 + $0xa4] sm:$0x1]  ;;  %v9786_v28 = vld [vmem:[#allocation8 + $0x190] sm:$0xff]  }
 0x12c   : > { %9071 = vmatprep.subr.bf16.mxu1 %v9799_v11  ;;  %v1977_v38 = vsel %vm10794_vm14, %v12873_v35, %v12872_v23  ;;  %v9793_v35 = vld [vmem:[#allocation8 + $0x1e8] sm:$0xff]  }
 0x12e   : > { %8407 = vmatpush3.bf16.msra.mxu0 %v9784_v45  ;;  %9040 = vmatmul.mubr.bf16.gmra.mrb[72].mxu1 %v10895_v5  ;;  %v10931_v45 = vrot.slane %v12822_v47, 4  ;;  %v10941_v47 = vcombine.low %v1970_v9, %v1973_v30  ;;  %v10955_v9 = vld [vmem:[#allocation2 + $0xb0] sm:$0x1]  ;;  %v499_v30 = vsel %vm10340_vm4, 0, %v498_v41  ;;  %v12878_v41 = vrot.slane %v10852_v15, 5 }
 0x12f   : > { %8408 = vmatprep.subr.bf16.mxu0 %v9785_v56  ;;  %9043 = vmatprep.mubr.bf16.mxu1 %v10907_v34  ;;  %v12874_v56 = vrot.slane %v10845_v1, 5  ;;  %500 = vst [vmem:[#allocation2 + $0xd4] sm:$0x1] %v499_v30  ;;  %v9794_v30 = vld [vmem:[#allocation8 + $0x1a8] sm:$0xff]  }
 0x130   : > { %9072 = vmatpush3.bf16.msra.mxu1 %v9799_v11 }
 0x131   : > { %8988 = vmatmul.mubr.bf16.gmra.mrb[68].mxu0 %v10858_v42  ;;  %9073 = vmatprep.subr.bf16.mxu1 %v9800_v31  ;;  %v1980_v11 = vsel %vm10794_vm14, %v1978_v46, %v12874_v56  ;;  %v12875_v46 = vrot.slane %v10914_v7, 5  ;;  %v12877_v56 = vrot.slane %v10848_v8, 9  ;;  %v9797_v8 = vld [vmem:[#allocation8 + $0x1f0] sm:$0xff]  }
 0x132   : > { %8991 = vmatprep.mubr.bf16.mxu0 %v10895_v5  ;;  %8409 = vmatpush3.bf16.msra.mxu0 %v9786_v28  ;;  %v9790_v28 = vld [vmem:[#allocation8 + $0x1a0] sm:$0xff]   ;;  %v10962_v1 = vcombine.low %v1977_v38, %v1980_v11  ;;  %v1987_v38 = vsel %vm10794_vm14, %v1985_v16, %v12878_v41  ;;  %v1852_v11 = vld [vmem:[#allocation2 + $0xb4] sm:$0xe]  ;;  %v12879_v16 = vrot.slane %v10856_v19, 5 }
 0x133   : > { %8410 = vmatprep.subr.bf16.mxu0 %v9787_v49  ;;  %v2013_v23 = vrot.slane %v12875_v46, 4  ;;  %v2018_v49 = vrot.slane %v10953_v59, 5  ;;  %v2021_v59 = vrot.slane %v10955_v9, 5 }
 0x134   : > { %9074 = vmatpush3.bf16.msra.mxu1 %v9800_v31  ;;  %v12876_v31 = vrot.slane %v10850_v10, 5  ;;  %v1854_v10 = vld [vmem:[#allocation2 + $0xbc] sm:$0x1] }
 0x135   : > { %9075 = vmatprep.subr.bf16.mxu1 %v9803_v54  ;;  %v2020_v46 = vrot.slane %v2018_v49, 4  ;;  %v2028_v19 = vrot.slane %v1854_v10, 5 }
 0x136   : > { %9044 = vmatmul.mubr.bf16.gmra.mrb[76].mxu1 %v10941_v47  ;;  %8411 = vmatpush3.bf16.msra.mxu0 %v9788_v61  ;;  %v1984_v25 = vsel %vm10794_vm14, %v12877_v56, %v12876_v31  ;;  %v2025_v61 = vrot.slane %v10958_v57, 5  ;;  %v12881_v57 = vrot.slane %v10879_v51, 5  ;;  %v9798_v31 = vld [vmem:[#allocation8 + $0x1b0] sm:$0xff]   ;;  %v7788_v56 = vrot.slane %v1852_v11, 9 }
 0x137   : > { %9047 = vmatprep.mubr.bf16.mxu1 %v10962_v1  ;;  %8412 = vmatprep.subr.bf16.mxu0 %v9789_v60  ;;  %v10983_v15 = vcombine.low %v1984_v25, %v1987_v38  ;;  %v12880_v60 = vrot.slane %v10854_v2, 9  ;;  %v9801_v38 = vld [vmem:[#allocation8 + $0x1f8] sm:$0xff]   ;;  %v12882_v2 = vrot.slane %v10872_v43, 5  ;;  %v12883_v51 = vrot.slane %v10888_v58, 9 }
 0x138   : > { %9076 = vmatpush3.bf16.msra.mxu1 %v9803_v54  ;;  %v1994_v54 = vsel %vm10794_vm14, %v1992_v6, %v12881_v57  ;;  %v2027_v41 = vrot.slane %v2025_v61, 4  ;;  %v12885_v58 = vrot.slane %v10874_v18, 5  ;;  %v12886_v11 = vrot.slane %v10892_v50, 9 }
 0x139   : > { %8992 = vmatmul.mubr.bf16.gmra.mrb[72].mxu0 %v10907_v34  ;;  %9077 = vmatprep.subr.bf16.mxu1 %v9804_v3  ;;  %v1991_v9 = vsel %vm10794_vm14, %v12880_v60, %v12879_v16  ;;  %v1998_v6 = vsel %vm10794_vm14, %v12883_v51, %v12882_v2  ;;  %v12888_v18 = vrot.slane %v10914_v7, 5  ;;  %v12889_v50 = vrot.slane %v10903_v40, 9 }
 0x13a   : > { %8995 = vmatprep.mubr.bf16.mxu0 %v10941_v47  ;;  %8413 = vmatpush3.bf16.msra.mxu0 %v9790_v28  ;;  %v10995_v25 = vcombine.low %v1991_v9, %v1994_v54  ;;  %v12884_v28 = vrot.slane %v10890_v62, 5  ;;  %v2005_v62 = vsel %vm10794_vm14, %v12886_v11, %v12885_v58  ;;  %v2019_v7 = vsel %vm10794_vm14, %v7787_v37, %v2018_v49  ;;  %v1855_v37 = vld [vmem:[#allocation2 + $0xc0] sm:$0xe]  ;;  %v1857_v49 = vld [vmem:[#allocation2 + $0xc8] sm:$0x1] }
 0x13b   : > { %8414 = vmatprep.subr.bf16.mxu0 %v9793_v35  ;;  %v9802_v35 = vld [vmem:[#allocation8 + $0x1b8] sm:$0xff]   ;;  %v2022_v40 = vsel %vm10794_vm14, %v2020_v46, %v2021_v59  ;;  %v2026_v54 = vsel %vm10794_vm14, %v7788_v56, %v2025_v61  ;;  %v2029_v48 = vsel %vm10794_vm14, %v2027_v41, %v2028_v19  ;;  %v7789_v46 = vrot.slane %v1855_v37, 9 }
 0x13c   : > { %9078 = vmatpush3.bf16.msra.mxu1 %v9804_v3  ;;  %v2001_v3 = vsel %vm10794_vm14, %v10927_v0, %v12884_v28  ;;  %v11051_v57 = vcombine.low %v2019_v7, %v2022_v40  ;;  %v11061_v59 = vcombine.low %v2026_v54, %v2029_v48 }
 0x13d   : > { %v11012_v43 = vcombine.low %v1998_v6, %v2001_v3  ;;  %v9901_v3 = vld [vmem:[#allocation2 + $0x24] sm:$0xff]  }
 0x13e   : > { %9048 = vmatmul.mubr.bf16.gmra.mrb[80].mxu1 %v10983_v15  ;;  %8415 = vmatpush3.bf16.msra.mxu0 %v9794_v30  ;;  %v12887_v30 = vrot.slane %v10900_v20, 5  ;;  %v12890_v20 = vrot.slane %v10916_v21, 5  ;;  %v442_v21 = vld [vmem:[#allocation2 + $0xcc] sm:$0x1] }
 0x13f   : > { %9051 = vmatprep.mubr.bf16.mxu1 %v10995_v25  ;;  %8416 = vmatprep.subr.bf16.mxu0 %v9797_v8  ;;  %v2012_v8 = vsel %vm10794_vm14, %v12889_v50, %v12888_v18  ;;  %v9902_v18 = vld [vmem:[#allocation2 + $0x30] sm:$0xff]  }
 0x140   : > { %v2008_v0 = vsel %vm10794_vm14, %v10931_v45, %v12887_v30  ;;  %v2015_v16 = vsel %vm10794_vm14, %v2013_v23, %v12890_v20  ;;  %v1856_v45 = vld [vmem:[#allocation2 + $0xc4] sm:$0xf]  ;;  %v443_v23 = vsel %vm10335_vm3, 0, %v442_v21 }
 0x141   : > { %8996 = vmatmul.mubr.bf16.gmra.mrb[76].mxu0 %v10962_v1  ;;  %v11025_v10 = vcombine.low %v2005_v62, %v2008_v0  ;;  %v11041_v60 = vcombine.low %v2012_v8, %v2015_v16  ;;  %v2032_v9 = vrot.slane %v1856_v45, 5  ;;  %444 = vst [vmem:[#allocation2 + $0xcc] sm:$0x1] %v443_v23  ;;  %v9903_v23 = vld [vmem:[#allocation2 + $0x3c] sm:$0xff]  }
 0x142   : > { %8999 = vmatprep.mubr.bf16.mxu0 %v10983_v15  ;;  %8417 = vmatpush3.bf16.msra.mxu0 %v9798_v31 }
 0x143   : > { %8418 = vmatprep.subr.bf16.mxu0 %v9801_v38  ;;  %v2034_v31 = vrot.slane %v2032_v9, 4  ;;  %v2035_v38 = vrot.slane %v1857_v49, 5  ;;  %v2033_v61 = vsel %vm10794_vm14, %v7789_v46, %v2032_v9 }
 0x145   : > { %v2036_v56 = vsel %vm10794_vm14, %v2034_v31, %v2035_v38 }
 0x146   : > { %9052 = vmatmul.mubr.bf16.gmra.mrb[84].mxu1 %v11012_v43  ;;  %8419 = vmatpush3.bf16.msra.mxu0 %v9802_v35  ;;  %v11071_v41 = vcombine.low %v2033_v61, %v2036_v56  ;;  %v1859_v61 = vld [vmem:[#allocation2 + $0xd0] sm:$0xf] }
 0x147   : > { %9055 = vmatprep.mubr.bf16.mxu1 %v11025_v10 }
 0x149   : > { %9000 = vmatmul.mubr.bf16.gmra.mrb[80].mxu0 %v10995_v25 }
 0x14a   : > { %9003 = vmatprep.mubr.bf16.mxu0 %v11012_v43 }
 0x14e   : > { %9056 = vmatmul.mubr.bf16.gmra.mrb[88].mxu1 %v11041_v60 }
 0x14f   : > { %9059 = vmatprep.mubr.bf16.mxu1 %v11051_v57 }
 0x151   : > { %9004 = vmatmul.mubr.bf16.gmra.mrb[84].mxu0 %v11025_v10 }
 0x152   : > { %9007 = vmatprep.mubr.bf16.mxu0 %v11041_v60 }
 0x156   : > { %9060 = vmatmul.mubr.bf16.gmra.mrb[92].mxu1 %v11061_v59 }
 0x157   : > { %9079 = vmatprep.mubr.bf16.mxu1 %v10816_v33  ;;  %v9900_v33 = vld [vmem:[#allocation2 + $0x18] sm:$0xff]  }
 0x159   : > { %9008 = vmatmul.mubr.bf16.gmra.mrb[88].mxu0 %v11051_v57 }
 0x15a   : > { %9011 = vmatprep.mubr.bf16.mxu0 %v11061_v59 }
 0x15e   : > { %9080 = vmatmul.mubr.bf16.vlgmr.msra.gmra.mrb[64].mxu1 %v10831_v53 }
 0x15f   : > { %9083 = vmatprep.mubr.bf16.mxu1 %v10858_v42 }
 0x161   : > { %9012 = vmatmul.mubr.bf16.gmra.mrb[92].mxu0 %v11071_v41 }
 0x162   : > { %3485 = vmatprep.mubr.bf16.mxu0 %v10467_v39 }
 0x166   : > { %9084 = vmatmul.mubr.bf16.gmra.mrb[68].mxu1 %v10895_v5 }
 0x167   : > { %9087 = vmatprep.mubr.bf16.mxu1 %v10907_v34 }
 0x169   : > { %3486 = vmatmul.mubr.bf16.vlgmr.msra.gmra.mrb[96].mxu0 %v9900_v33  ;;  %v8284_v19 = vpop.f32.mrb[0].mxu1  ;;  %v1858_v33 = vld [vmem:[#allocation2 + $0xcc] sm:$0xe] }
 0x16a   : > { %3493 = vmatprep.mubr.bf16.mxu0 %v10491_v22  ;;  %v8285_v2 = vpop.f32.mrb[1].mxu1 }
 0x16b   : > { %v11080_v51 = vadd.f32 %v8285_v2, %v8284_v19  ;;  %v8287_v6 = vpop.f32.mrb[2].mxu1  ;;  %v1860_v19 = vld [vmem:[#allocation2 + $0xd4] sm:$0x1]  ;;  %v9904_v2 = vld [vmem:[#allocation2 + $0x48] sm:$0xff]  }
 0x16c   : > { %v8288_v53 = vpop.f32.mrb[3].mxu1 }
 0x16d   : > { %v11082_v28 = vadd.f32 %v8288_v53, %v8287_v6 }
 0x16e   : > { %9088 = vmatmul.mubr.bf16.gmra.mrb[72].mxu1 %v10941_v47  ;;  %v8148_v42 = vpop.f32.mrb[0].mxu0 }
 0x16f   : > { %v8149_v39 = vpop.f32.mrb[1].mxu0  ;;  %9091 = vmatprep.mubr.bf16.mxu1 %v10962_v1 }
 0x170   : > { %v8151_v5 = vpop.f32.mrb[2].mxu0  ;;  %v11086_v34 = vadd.f32 %v8149_v39, %v8148_v42  ;;  %v7790_v39 = vrot.slane %v1858_v33, 9 }
 0x171   : > { %3494 = vmatmul.mubr.bf16.gmra.mrb[100].mxu0 %v9901_v3  ;;  %v8152_v35 = vpop.f32.mrb[3].mxu0  ;;  %v8290_v22 = vpop.f32.mrb[4].mxu1 }
 0x172   : > { %3501 = vmatprep.mubr.bf16.mxu0 %v10518_v12  ;;  %v8291_v58 = vpop.f32.mrb[5].mxu1  ;;  %v11089_v11 = vadd.f32 %v8152_v35, %v8151_v5 }
 0x173   : > { %v11091_v62 = vadd.f32 %v8291_v58, %v8290_v22  ;;  %v8293_v30 = vpop.f32.mrb[6].mxu1  ;;  %v2042_v22 = vrot.slane %v1860_v19, 5 }
 0x174   : > { %v8294_v47 = vpop.f32.mrb[7].mxu1 }
 0x175   : > { %v11093_v0 = vadd.f32 %v8294_v47, %v8293_v30 }
 0x176   : > { %9092 = vmatmul.mubr.bf16.gmra.mrb[76].mxu1 %v10983_v15 }
 0x177   : > { %9095 = vmatprep.mubr.bf16.mxu1 %v10995_v25 }
 0x179   : > { %v8154_v1 = vpop.f32.mrb[4].mxu0  ;;  %3502 = vmatmul.mubr.bf16.gmra.mrb[104].mxu0 %v9902_v18  ;;  %v8296_v8 = vpop.f32.mrb[8].mxu1 }
 0x17a   : > { %v8155_v50 = vpop.f32.mrb[5].mxu0  ;;  %3509 = vmatprep.mubr.bf16.mxu0 %v10548_v52  ;;  %v8297_v20 = vpop.f32.mrb[9].mxu1 }
 0x17b   : > { %v8157_v12 = vpop.f32.mrb[6].mxu0  ;;  %v11098_v16 = vadd.f32 %v8155_v50, %v8154_v1  ;;  %v11100_v7 = vadd.f32 %v8297_v20, %v8296_v8  ;;  %v8299_v40 = vpop.f32.mrb[10].mxu1  ;;  %v9905_v8 = vld [vmem:[#allocation2 + $0x54] sm:$0xff]  }
 0x17c   : > { %v8158_v45 = vpop.f32.mrb[7].mxu0  ;;  %v8300_v21 = vpop.f32.mrb[11].mxu1 }
 0x17d   : > { %v11102_v9 = vadd.f32 %v8158_v45, %v8157_v12  ;;  %v11104_v15 = vadd.f32 %v8300_v21, %v8299_v40 }
 0x17e   : > { %9096 = vmatmul.mubr.bf16.gmra.mrb[80].mxu1 %v11012_v43 }
 0x17f   : > { %9099 = vmatprep.mubr.bf16.mxu1 %v11025_v10 }
 0x181   : > { %v8160_v25 = vpop.f32.mrb[8].mxu0  ;;  %3510 = vmatmul.mubr.bf16.gmra.mrb[108].mxu0 %v9903_v23  ;;  %v8302_v54 = vpop.f32.mrb[12].mxu1 }
 0x182   : > { %v8161_v52 = vpop.f32.mrb[9].mxu0  ;;  %3517 = vmatprep.mubr.bf16.mxu0 %v10576_v63  ;;  %v8303_v37 = vpop.f32.mrb[13].mxu1  ;;  %v2039_v63 = vrot.slane %v1859_v61, 5 }
 0x183   : > { %v8163_v48 = vpop.f32.mrb[10].mxu0  ;;  %v11109_v49 = vadd.f32 %v8161_v52, %v8160_v25  ;;  %v11111_v31 = vadd.f32 %v8303_v37, %v8302_v54  ;;  %v8305_v38 = vpop.f32.mrb[14].mxu1 }
 0x184   : > { %v8164_v46 = vpop.f32.mrb[11].mxu0  ;;  %v8306_v56 = vpop.f32.mrb[15].mxu1  ;;  %v2041_v35 = vrot.slane %v2039_v63, 4 }
 0x185   : > { %v11113_v43 = vadd.f32 %v8164_v46, %v8163_v48  ;;  %v11115_v10 = vadd.f32 %v8306_v56, %v8305_v38  ;;  %v9906_v46 = vld [vmem:[#allocation2 + $0x60] sm:$0xff]  }
 0x186   : > { %9100 = vmatmul.mubr.bf16.gmra.mrb[84].mxu1 %v11041_v60  ;;  %v2043_v50 = vsel %vm10794_vm14, %v2041_v35, %v2042_v22 }
 0x187   : > { %9103 = vmatprep.mubr.bf16.mxu1 %v11051_v57 }
 0x189   : > { %3518 = vmatmul.mubr.bf16.gmra.mrb[112].mxu0 %v9904_v2  ;;  %v8166_v6 = vpop.f32.mrb[12].mxu0  ;;  %v8308_v53 = vpop.f32.mrb[16].mxu1 }
 0x18a   : > { %3525 = vmatprep.mubr.bf16.mxu0 %v10596_v44  ;;  %v8167_v42 = vpop.f32.mrb[13].mxu0  ;;  %v8309_v5 = vpop.f32.mrb[17].mxu1  ;;  %v2040_v44 = vsel %vm10794_vm14, %v7790_v39, %v2039_v63 }
 0x18b   : > { %v8169_v3 = vpop.f32.mrb[14].mxu0  ;;  %v11120_v58 = vadd.f32 %v8309_v5, %v8308_v53  ;;  %v8311_v60 = vpop.f32.mrb[18].mxu1  ;;  %v11122_v30 = vadd.f32 %v8167_v42, %v8166_v6  ;;  %v7808_v20 = vcombine.low %v2040_v44, %v2043_v50  ;;  %v9907_v5 = vld [vmem:[#allocation2 + $0x6c] sm:$0xff]  }
 0x18c   : > { %v8170_v57 = vpop.f32.mrb[15].mxu0  ;;  %v8312_v47 = vpop.f32.mrb[19].mxu1 }
 0x18d   : > { %v11124_v1 = vadd.f32 %v8312_v47, %v8311_v60  ;;  %v11126_v18 = vadd.f32 %v8170_v57, %v8169_v3 }
 0x18e   : > { %9104 = vmatmul.mubr.bf16.gmra.mrb[88].mxu1 %v11061_v59 }
 0x18f   : > { %9107 = vmatprep.mubr.bf16.mxu1 %v11071_v41 }
 0x191   : > { %3526 = vmatmul.mubr.bf16.gmra.mrb[116].mxu0 %v9905_v8  ;;  %v8172_v12 = vpop.f32.mrb[16].mxu0  ;;  %v8314_v45 = vpop.f32.mrb[20].mxu1 }
 0x192   : > { %3533 = vmatprep.mubr.bf16.mxu0 %v10625_v26  ;;  %v8173_v40 = vpop.f32.mrb[17].mxu0  ;;  %v8315_v21 = vpop.f32.mrb[21].mxu1 }
 0x193   : > { %v8175_v25 = vpop.f32.mrb[18].mxu0  ;;  %v11135_v23 = vadd.f32 %v8315_v21, %v8314_v45  ;;  %v8317_v59 = vpop.f32.mrb[22].mxu1  ;;  %v11137_v41 = vadd.f32 %v8173_v40, %v8172_v12  ;;  %v9908_v45 = vld [vmem:[#allocation2 + $0x78] sm:$0xff]  }
 0x194   : > { %v8176_v52 = vpop.f32.mrb[19].mxu0  ;;  %v8318_v54 = vpop.f32.mrb[23].mxu1 }
 0x195   : > { %v11139_v48 = vadd.f32 %v8318_v54, %v8317_v59  ;;  %v11141_v37 = vadd.f32 %v8176_v52, %v8175_v25 }
 0x196   : > { %9108 = vmatmul.mubr.bf16.gmra.mrb[92].mxu1 %v7808_v20 }
 0x199   : > { %3534 = vmatmul.mubr.bf16.gmra.mrb[120].mxu0 %v9906_v46 }
 0x19a   : > { %3541 = vmatprep.mubr.bf16.mxu0 %v10658_v32 }
 0x19c   : > { %v8178_v26 = vpop.f32.mrb[20].mxu0  ;;  %v8320_v38 = vpop.f32.mrb[24].mxu1 }
 0x19d   : > { %v8179_v61 = vpop.f32.mrb[21].mxu0  ;;  %v8321_v56 = vpop.f32.mrb[25].mxu1 }
 0x19e   : > { %v8181_v33 = vpop.f32.mrb[22].mxu0  ;;  %v11144_v63 = vadd.f32 %v8321_v56, %v8320_v38  ;;  %v8323_v19 = vpop.f32.mrb[26].mxu1  ;;  %v11146_v2 = vadd.f32 %v8179_v61, %v8178_v26 }
 0x19f   : > { %v8182_v6 = vpop.f32.mrb[23].mxu0  ;;  %v8324_v53 = vpop.f32.mrb[27].mxu1 }
 0x1a0   : > { %v11148_v42 = vadd.f32 %v8324_v53, %v8323_v19  ;;  %v11150_v39 = vadd.f32 %v8182_v6, %v8181_v33  ;;  %v9909_v33 = vld [vmem:[#allocation2 + $0x84] sm:$0xff]  }
 0x1a1   : > { %3542 = vmatmul.mubr.bf16.gmra.mrb[124].mxu0 %v9907_v5 }
 0x1a2   : > { %3549 = vmatprep.mubr.bf16.mxu0 %v10682_v29 }
 0x1a4   : > { %v8184_v32 = vpop.f32.mrb[24].mxu0  ;;  %v8326_v3 = vpop.f32.mrb[28].mxu1 }
 0x1a5   : > { %v8185_v35 = vpop.f32.mrb[25].mxu0  ;;  %v8327_v22 = vpop.f32.mrb[29].mxu1 }
 0x1a6   : > { %v8187_v60 = vpop.f32.mrb[26].mxu0  ;;  %v11153_v57 = vadd.f32 %v8327_v22, %v8326_v3  ;;  %v8329_v47 = vpop.f32.mrb[30].mxu1  ;;  %v11155_v44 = vadd.f32 %v8185_v35, %v8184_v32  ;;  %v9910_v22 = vld [vmem:[#allocation2 + $0x90] sm:$0xff]  }
 0x1a7   : > { %v8188_v50 = vpop.f32.mrb[27].mxu0  ;;  %v8330_v8 = vpop.f32.mrb[31].mxu1 }
 0x1a8   : > { %v11157_v12 = vadd.f32 %v8330_v8, %v8329_v47  ;;  %v11159_v20 = vadd.f32 %v8188_v50, %v8187_v60 }
 0x1a9   : > { %3550 = vmatmul.mubr.bf16.gmra.mrb[128].mxu0 %v9908_v45 }
 0x1aa   : > { %3557 = vmatprep.mubr.bf16.mxu0 %v10713_v14 }
 0x1ac   : > { %v8190_v29 = vpop.f32.mrb[28].mxu0  ;;  %v8332_v40 = vpop.f32.mrb[32].mxu1 }
 0x1ad   : > { %v8191_v21 = vpop.f32.mrb[29].mxu0  ;;  %v8333_v25 = vpop.f32.mrb[33].mxu1 }
 0x1ae   : > { %v8193_v59 = vpop.f32.mrb[30].mxu0  ;;  %v11162_v52 = vadd.f32 %v8333_v25, %v8332_v40  ;;  %v8335_v54 = vpop.f32.mrb[34].mxu1  ;;  %v11164_v46 = vadd.f32 %v8191_v21, %v8190_v29  ;;  %v1279_v40 = vld [vmem:[#allocation2 + $0xcc] sm:$0xf] }
 0x1af   : > { %v8194_v26 = vpop.f32.mrb[31].mxu0  ;;  %v8336_v38 = vpop.f32.mrb[35].mxu1 }
 0x1b0   : > { %v11166_v61 = vadd.f32 %v8336_v38, %v8335_v54  ;;  %v11168_v56 = vadd.f32 %v8194_v26, %v8193_v59  ;;  %v1280_v54 = vld [vmem:[#allocation2 + $0xd0] sm:$0xf] }
 0x1b1   : > { %3558 = vmatmul.mubr.bf16.gmra.mrb[132].mxu0 %v9909_v33  ;;  %v9911_v33 = vld [vmem:[#allocation2 + $0x9c] sm:$0xff]  }
 0x1b2   : > { %12891 = vst [vmem:[#allocation21_spill] sm:$0xff] %v11166_v61  ;;  %3565 = vmatprep.mubr.bf16.mxu0 %v10745_v13 }
 0x1b6   : > { %v8196_v14 = vpop.f32.mrb[32].mxu0  ;;  %v8338_v19 = vpop.f32.mrb[36].mxu1 }
 0x1b7   : > { %v8197_v6 = vpop.f32.mrb[33].mxu0  ;;  %v8339_v53 = vpop.f32.mrb[37].mxu1 }
 0x1b8   : > { %v8199_v5 = vpop.f32.mrb[34].mxu0  ;;  %v11171_v32 = vadd.f32 %v8339_v53, %v8338_v19  ;;  %v8341_v3 = vpop.f32.mrb[38].mxu1  ;;  %v11173_v35 = vadd.f32 %v8197_v6, %v8196_v14 }
 0x1b9   : > { %3566 = vmatmul.mubr.bf16.gmra.mrb[136].mxu0 %v9910_v22  ;;  %v8200_v60 = vpop.f32.mrb[35].mxu0  ;;  %v8342_v47 = vpop.f32.mrb[39].mxu1  ;;  %v1707_v22 = vshrl.u32 %v1280_v54, 16 }
 0x1ba   : > { %v11175_v50 = vadd.f32 %v8200_v60, %v8199_v5  ;;  %3573 = vmatprep.mubr.bf16.mxu0 %v10769_v55  ;;  %v11178_v8 = vadd.f32 %v8342_v47, %v8341_v3  ;;  %v1694_v55 = vshrl.u32 %v1279_v40, 16  ;;  %v1697_v5 = vshll.u32 %v1279_v40, 16  ;;  %v9912_v40 = vld [vmem:[#allocation2 + $0xa8] sm:$0xff]  }
 0x1bb   : > { %v1703_v3 = vshll.u32 %v1280_v54, 16 }
 0x1bc   : > { %v1696_v47 = vrot.slane %v1694_v55, 4  ;;  %v9808_v55 = vld [vmem:[#allocation10 + $0x140] sm:$0xff]  }
 0x1bd   : > { %v1705_v4 = vrot.slane %v1703_v3, 5  ;;  %v9809_v3 = vld [vmem:[#allocation10 + $0x108] sm:$0xff]   ;;  %9111 = vmatprep.subr.bf16.mxu1 %v9808_v55 }
 0x1be   : > { %v8202_v13 = vpop.f32.mrb[36].mxu0  ;;  %v8344_v45 = vpop.f32.mrb[40].mxu1  ;;  %9112 = vmatpush3.bf16.msra.mxu1 %v9808_v55 }
 0x1bf   : > { %v8203_v29 = vpop.f32.mrb[37].mxu0  ;;  %v8345_v21 = vpop.f32.mrb[41].mxu1 }
 0x1c0   : > { %v11180_v25 = vadd.f32 %v8203_v29, %v8202_v13  ;;  %v8205_v59 = vpop.f32.mrb[38].mxu0  ;;  %v11182_v26 = vadd.f32 %v8345_v21, %v8344_v45  ;;  %v8347_v38 = vpop.f32.mrb[42].mxu1  ;;  %v9806_v45 = vld [vmem:[#allocation10 + $0x100] sm:$0xff]   ;;  %v1699_v21 = vrot.slane %v1697_v5, 5 }
 0x1c1   : > { %3574 = vmatmul.mubr.bf16.gmra.mrb[140].mxu0 %v9911_v33  ;;  %v8206_v14 = vpop.f32.mrb[39].mxu0  ;;  %v8348_v19 = vpop.f32.mrb[43].mxu1  ;;  %v1709_v33 = vrot.slane %v1707_v22, 4  ;;  %8540 = vmatprep.subr.bf16.mxu0 %v9806_v45 }
 0x1c2   : > { %12892 = vst [vmem:[#allocation22_spill] sm:$0xff] %v11182_v26  ;;  %v11184_v6 = vadd.f32 %v8206_v14, %v8205_v59  ;;  %3581 = vmatprep.mubr.bf16.mxu0 %v10780_v17  ;;  %v11187_v53 = vadd.f32 %v8348_v19, %v8347_v38  ;;  %v9807_v26 = vld [vmem:[#allocation10 + $0xc0] sm:$0xff]   ;;  %v1281_v17 = vld [vmem:[#allocation2 + $0xd4] sm:$0x1]  ;;  %v1700_v22 = vor.u32 %v1699_v21, %v1696_v47 }
 0x1c3   : > { %8541 = vmatpush3.bf16.msra.mxu0 %v9807_v26  ;;  %v9813_v26 = vld [vmem:[#allocation10 + $0xd0] sm:$0xff]   ;;  %v9913_v47 = vld [vmem:[#allocation2 + $0xb4] sm:$0xff]  }
 0x1c4   : > { %12893 = vst [vmem:[#allocation23_spill] sm:$0xff] %v11187_v53  ;;  %8542 = vmatprep.subr.bf16.mxu0 %v9809_v3 }
 0x1c6   : > { %v8208_v60 = vpop.f32.mrb[40].mxu0  ;;  %v8350_v13 = vpop.f32.mrb[44].mxu1 }
 0x1c7   : > { %v8209_v29 = vpop.f32.mrb[41].mxu0  ;;  %v8351_v24 = vpop.f32.mrb[45].mxu1 }
 0x1c8   : > { %v11189_v59 = vadd.f32 %v8209_v29, %v8208_v60  ;;  %v8211_v14 = vpop.f32.mrb[42].mxu0  ;;  %v11191_v61 = vadd.f32 %v8351_v24, %v8350_v13  ;;  %v8353_v38 = vpop.f32.mrb[46].mxu1  ;;  %v1710_v60 = vor.u32 %v1709_v33, %v1705_v4  ;;  %v1713_v29 = vshll.u32 %v1281_v17, 16  ;;  %v9810_v24 = vld [vmem:[#allocation10 + $0xc8] sm:$0xff]  }
 0x1c9   : > { %3582 = vmatmul.mubr.bf16.gmra.mrb[144].mxu0 %v9912_v40  ;;  %v8212_v54 = vpop.f32.mrb[43].mxu0  ;;  %v8354_v19 = vpop.f32.mrb[47].mxu1  ;;  %v9811_v13 = vld [vmem:[#allocation10 + $0x148] sm:$0xff]   ;;  %v1701_v40 = vrot.slane %v1700_v22, 4 }
 0x1ca   : > { %12894 = vst [vmem:[#allocation24_spill] sm:$0xff] %v11191_v61  ;;  %v11193_v53 = vadd.f32 %v8212_v54, %v8211_v14  ;;  %3589 = vmatprep.mubr.bf16.mxu0 %v10792_v27  ;;  %v11196_v5 = vadd.f32 %v8354_v19, %v8353_v38  ;;  %8543 = vmatpush3.bf16.msra.mxu0 %v9810_v24  ;;  %v1711_v61 = vrot.slane %v1710_v60, 4  ;;  %v1715_v14 = vrot.slane %v1713_v29, 5  ;;  %v9812_v27 = vld [vmem:[#allocation10 + $0x110] sm:$0xff]  }
 0x1cb   : > { %9113 = vmatprep.subr.bf16.mxu1 %v9811_v13  ;;  %8544 = vmatprep.subr.bf16.mxu0 %v9812_v27  ;;  %v9814_v60 = vld [vmem:[#allocation10 + $0x150] sm:$0xff]  }
 0x1cc   : > { %9114 = vmatpush3.bf16.msra.mxu1 %v9811_v13  ;;  %v1706_v13 = vsel %vm10396_vm11, %v1701_v40, %v1705_v4 }
 0x1cd   : > { %9115 = vmatprep.subr.bf16.mxu1 %v9814_v60 }
 0x1ce   : > { %8545 = vmatpush3.bf16.msra.mxu0 %v9813_v26  ;;  %v9818_v26 = vld [vmem:[#allocation10 + $0x120] sm:$0xff]  }
 0x1cf   : > { %v8214_v45 = vpop.f32.mrb[44].mxu0  ;;  %v8356_v54 = vpop.f32.mrb[48].mxu1 }
 0x1d0   : > { %v8215_v38 = vpop.f32.mrb[45].mxu0  ;;  %v8357_v19 = vpop.f32.mrb[49].mxu1  ;;  %9116 = vmatpush3.bf16.msra.mxu1 %v9814_v60 }
 0x1d1   : > { %3590 = vmatmul.mubr.bf16.gmra.mrb[148].mxu0 %v9913_v47  ;;  %v11198_v21 = vadd.f32 %v8215_v38, %v8214_v45  ;;  %v8217_v33 = vpop.f32.mrb[46].mxu0  ;;  %v11200_v17 = vadd.f32 %v8357_v19, %v8356_v54  ;;  %v8359_v55 = vpop.f32.mrb[50].mxu1  ;;  %v1716_v45 = vsel %vm10396_vm11, %v1711_v61, %v1715_v14  ;;  %v9815_v54 = vld [vmem:[#allocation10 + $0x118] sm:$0xff]   ;;  %v9819_v47 = vld [vmem:[#allocation10 + $0xe0] sm:$0xff]  }
 0x1d2   : > { %v8218_v3 = vpop.f32.mrb[47].mxu0  ;;  %3597 = vmatprep.mubr.bf16.mxu0 %v10820_v36  ;;  %v8360_v22 = vpop.f32.mrb[51].mxu1  ;;  %v9816_v19 = vld [vmem:[#allocation10 + $0xd8] sm:$0xff]   ;;  %8546 = vmatprep.subr.bf16.mxu0 %v9815_v54  ;;  %v7772_v27 = vcombine.low %v1706_v13, %v1716_v45  ;;  %v9820_v14 = vld [vmem:[#allocation10 + $0x160] sm:$0xff]   ;;  %v9821_v45 = vld [vmem:[#allocation10 + $0x128] sm:$0xff]  }
 0x1d3   : > { %12895 = vst [vmem:[#allocation25_spill] sm:$0xff] %v11200_v17  ;;  %v11203_v29 = vadd.f32 %v8218_v3, %v8217_v33  ;;  %v11209_v38 = vadd.f32 %v8360_v22, %v8359_v55  ;;  %8547 = vmatpush3.bf16.msra.mxu0 %v9816_v19  ;;  %v9817_v36 = vld [vmem:[#allocation10 + $0x158] sm:$0xff]   ;;  %v9914_v33 = vld [vmem:[#allocation2 + $0xc0] sm:$0xff]   ;;  %v9826_v17 = vld [vmem:[#allocation10 + $0x170] sm:$0xff]  }
 0x1d4   : > { %9117 = vmatprep.subr.bf16.mxu1 %v9817_v36  ;;  %8548 = vmatprep.subr.bf16.mxu0 %v9818_v26  ;;  %v9805_v26 = vld [vmem:[#allocation2 + $0xcc] sm:$0xff]  }
 0x1d5   : > { %12897 = vst [vmem:[#allocation26_spill] sm:$0xff] %v11209_v38  ;;  %9118 = vmatpush3.bf16.msra.mxu1 %v9817_v36  ;;  %v9824_v36 = vld [vmem:[#allocation10 + $0x130] sm:$0xff]  }
 0x1d6   : > { %9119 = vmatprep.subr.bf16.mxu1 %v9820_v14 }
 0x1d7   : > { %8549 = vmatpush3.bf16.msra.mxu0 %v9819_v47 }
 0x1d8   : > { %8550 = vmatprep.subr.bf16.mxu0 %v9821_v45 }
 0x1d9   : > { %3598 = vmatmul.mubr.bf16.gmra.mrb[152].mxu0 %v9914_v33  ;;  %v8220_v3 = vpop.f32.mrb[48].mxu0  ;;  %v8362_v4 = vpop.f32.mrb[52].mxu1  ;;  %v9822_v33 = vld [vmem:[#allocation10 + $0xe8] sm:$0xff]   ;;  %9120 = vmatpush3.bf16.msra.mxu1 %v9820_v14 }
 0x1da   : > { %v8221_v40 = vpop.f32.mrb[49].mxu0  ;;  %3605 = vmatprep.mubr.bf16.mxu0 %v7772_v27  ;;  %v8363_v61 = vpop.f32.mrb[53].mxu1  ;;  %v9823_v27 = vld [vmem:[#allocation10 + $0x168] sm:$0xff]  }
 0x1db   : > { %v11211_v55 = vadd.f32 %v8221_v40, %v8220_v3  ;;  %v8223_v22 = vpop.f32.mrb[50].mxu0  ;;  %v11213_v60 = vadd.f32 %v8363_v61, %v8362_v4  ;;  %v8365_v13 = vpop.f32.mrb[54].mxu1  ;;  %8551 = vmatpush3.bf16.msra.mxu0 %v9822_v33  ;;  %9121 = vmatprep.subr.bf16.mxu1 %v9823_v27  ;;  %v9825_v3 = vld [vmem:[#allocation10 + $0xf0] sm:$0xff]  }
 0x1dc   : > { %v8224_v54 = vpop.f32.mrb[51].mxu0  ;;  %v8366_v19 = vpop.f32.mrb[55].mxu1  ;;  %8552 = vmatprep.subr.bf16.mxu0 %v9824_v36  ;;  %v9828_v36 = vld [vmem:[#allocation10 + $0xf8] sm:$0xff]  }
 0x1dd   : > { %12898 = vst [vmem:[#allocation27_spill] sm:$0xff] %v11211_v55  ;;  %12899 = vst [vmem:[#allocation28_spill] sm:$0xff] %v11213_v60  ;;  %v11215_v24 = vadd.f32 %v8224_v54, %v8223_v22  ;;  %v11217_v38 = vadd.f32 %v8366_v19, %v8365_v13  ;;  %9122 = vmatpush3.bf16.msra.mxu1 %v9823_v27 }
 0x1de   : > { %9123 = vmatprep.subr.bf16.mxu1 %v9826_v17 }
 0x1df   : > { %12900 = vst [vmem:[#allocation29_spill] sm:$0xff] %v11215_v24  ;;  %12901 = vst [vmem:[#allocation30_spill] sm:$0xff] %v11217_v38  ;;  %8553 = vmatpush3.bf16.msra.mxu0 %v9825_v3  ;;  %v9827_v38 = vld [vmem:[#allocation10 + $0x138] sm:$0xff]  }
 0x1e0   : > { %8554 = vmatprep.subr.bf16.mxu0 %v9827_v38 }
 0x1e1   : > { %3606 = vmatmul.mubr.bf16.gmra.mrb[156].mxu0 %v9805_v26  ;;  %v8226_v4 = vpop.f32.mrb[52].mxu0  ;;  %v8368_v47 = vpop.f32.mrb[56].mxu1  ;;  %9124 = vmatpush3.bf16.msra.mxu1 %v9826_v17 }
 0x1e2   : > { %v8227_v40 = vpop.f32.mrb[53].mxu0  ;;  %v8369_v61 = vpop.f32.mrb[57].mxu1 }
 0x1e3   : > { %v11219_v22 = vadd.f32 %v8227_v40, %v8226_v4  ;;  %v8229_v54 = vpop.f32.mrb[54].mxu0  ;;  %v11221_v13 = vadd.f32 %v8369_v61, %v8368_v47  ;;  %v8371_v45 = vpop.f32.mrb[58].mxu1  ;;  %8555 = vmatpush3.bf16.msra.mxu0 %v9828_v36 }
 0x1e4   : > { %v8230_v14 = vpop.f32.mrb[55].mxu0  ;;  %v8372_v19 = vpop.f32.mrb[59].mxu1 }
 0x1e5   : > { %12902 = vst [vmem:[#allocation31_spill] sm:$0xff] %v11221_v13  ;;  %v11223_v33 = vadd.f32 %v8230_v14, %v8229_v54  ;;  %v11225_v26 = vadd.f32 %v8372_v19, %v8371_v45 }
 0x1e7   : > { %12903 = vst [vmem:[#allocation32_spill] sm:$0xff] %v11223_v33  ;;  %12904 = vst [vmem:[#allocation33_spill] sm:$0xff] %v11225_v26  ;;  %v9829_v26 = vld [vmem:[#allocation10 + $0x178] sm:$0xff]  }
 0x1e8   : > { %9125 = vmatprep.subr.bf16.mxu1 %v9829_v26 }
 0x1e9   : > { %v8232_v27 = vpop.f32.mrb[56].mxu0  ;;  %v8374_v4 = vpop.f32.mrb[60].mxu1  ;;  %9126 = vmatpush3.bf16.msra.mxu1 %v9829_v26 }
 0x1ea   : > { %v8233_v40 = vpop.f32.mrb[57].mxu0  ;;  %v8375_v24 = vpop.f32.mrb[61].mxu1 }
 0x1eb   : > { %v11227_v47 = vadd.f32 %v8233_v40, %v8232_v27  ;;  %v8235_v61 = vpop.f32.mrb[58].mxu0  ;;  %v11229_v3 = vadd.f32 %v8375_v24, %v8374_v4  ;;  %v8377_v13 = vpop.f32.mrb[62].mxu1 }
 0x1ec   : > { %v8236_v60 = vpop.f32.mrb[59].mxu0  ;;  %v8378_v54 = vpop.f32.mrb[63].mxu1 }
 0x1ed   : > { %v11231_v14 = vadd.f32 %v8236_v60, %v8235_v61  ;;  %v11233_v45 = vadd.f32 %v8378_v54, %v8377_v13 }
 0x1f4   : > { %v8238_v17 = vpop.f32.mrb[60].mxu0 }
 0x1f5   : > { %v8239_v19 = vpop.f32.mrb[61].mxu0 }
 0x1f6   : > { %v11235_v38 = vadd.f32 %v8239_v19, %v8238_v17  ;;  %v8241_v36 = vpop.f32.mrb[62].mxu0 }
 0x1f7   : > { %v8242_v33 = vpop.f32.mrb[63].mxu0 }
 0x1f8   : > { %v11237_v55 = vadd.f32 %v8242_v33, %v8241_v36 }
 0x1fc   : > { %v8985_v24 = vpop.f32.mrb[64].mxu0 }
 0x1fd   : > { %v2629_v27 = vadd.f32 %v8985_v24, %v11098_v16  ;;  %v2620_v4 = vpop.f32.mrb[65].mxu0 }
 0x1fe   : > { %v2621_v60 = vadd.f32 %v11086_v34, %v2620_v4  ;;  %v8986_v40 = vpop.f32.mrb[66].mxu0 }
 0x1ff   : > { %v11242_v13 = vadd.f32 %v11091_v62, %v2629_v27  ;;  %v2632_v61 = vadd.f32 %v8986_v40, %v11102_v9  ;;  %v2623_v54 = vpop.f32.mrb[67].mxu0 }
 0x200   : > { %v11246_v17 = vadd.f32 %v11080_v51, %v2621_v60  ;;  %v2624_v33 = vadd.f32 %v11089_v11, %v2623_v54 }
 0x201   : > { %v11250_v26 = vadd.f32 %v11093_v0, %v2632_v61 }
 0x202   : > { %v11253_v16 = vadd.f32 %v11082_v28, %v2624_v33 }
 0x204   : > { %v8989_v19 = vpop.f32.mrb[68].mxu0 }
 0x205   : > { %v2645_v34 = vadd.f32 %v8989_v19, %v11122_v30  ;;  %v2636_v36 = vpop.f32.mrb[69].mxu0 }
 0x206   : > { %v2637_v62 = vadd.f32 %v11109_v49, %v2636_v36  ;;  %v8990_v24 = vpop.f32.mrb[70].mxu0 }
 0x207   : > { %v11258_v9 = vadd.f32 %v11111_v31, %v2645_v34  ;;  %v2648_v51 = vadd.f32 %v8990_v24, %v11126_v18  ;;  %v2639_v27 = vpop.f32.mrb[71].mxu0 }
 0x208   : > { %v11262_v11 = vadd.f32 %v11100_v7, %v2637_v62  ;;  %v2640_v0 = vadd.f32 %v11113_v43, %v2639_v27  ;;  %v12905_v27 = vld [vmem:[#allocation21_spill] sm:$0xff] }
 0x209   : > { %v11266_v28 = vadd.f32 %v11115_v10, %v2648_v51 }
 0x20a   : > { %v11269_v30 = vadd.f32 %v11104_v15, %v2640_v0 }
 0x20c   : > { %v8993_v4 = vpop.f32.mrb[72].mxu0 }
 0x20d   : > { %v2661_v49 = vadd.f32 %v8993_v4, %v11146_v2  ;;  %v2652_v60 = vpop.f32.mrb[73].mxu0 }
 0x20e   : > { %v2653_v31 = vadd.f32 %v11137_v41, %v2652_v60  ;;  %v8994_v40 = vpop.f32.mrb[74].mxu0 }
 0x20f   : > { %v11274_v18 = vadd.f32 %v11135_v23, %v2661_v49  ;;  %v2664_v7 = vadd.f32 %v8994_v40, %v11150_v39  ;;  %v2655_v61 = vpop.f32.mrb[75].mxu0 }
 0x210   : > { %v11278_v43 = vadd.f32 %v11120_v58, %v2653_v31  ;;  %v2656_v10 = vadd.f32 %v11141_v37, %v2655_v61  ;;  %v12910_v61 = vld [vmem:[#allocation23_spill] sm:$0xff] }
 0x211   : > { %v11282_v15 = vadd.f32 %v11139_v48, %v2664_v7 }
 0x212   : > { %v11285_v2 = vadd.f32 %v11124_v1, %v2656_v10 }
 0x214   : > { %v8997_v54 = vpop.f32.mrb[76].mxu0 }
 0x215   : > { %v2677_v41 = vadd.f32 %v8997_v54, %v11164_v46  ;;  %v2668_v33 = vpop.f32.mrb[77].mxu0 }
 0x216   : > { %v2669_v23 = vadd.f32 %v11155_v44, %v2668_v33  ;;  %v8998_v19 = vpop.f32.mrb[78].mxu0 }
 0x217   : > { %v11290_v39 = vadd.f32 %v11153_v57, %v2677_v41  ;;  %v2680_v58 = vadd.f32 %v8998_v19, %v11168_v56  ;;  %v2671_v34 = vpop.f32.mrb[79].mxu0  ;;  %v12911_v41 = vld [vmem:[#allocation27_spill] sm:$0xff] }
 0x218   : > { %v11294_v37 = vadd.f32 %v11144_v63, %v2669_v23  ;;  %v2672_v48 = vadd.f32 %v11159_v20, %v2671_v34 }
 0x219   : > { %v11298_v1 = vadd.f32 %v11157_v12, %v2680_v58  ;;  %v12914_v58 = vld [vmem:[#allocation32_spill] sm:$0xff] }
 0x21a   : > { %v11301_v46 = vadd.f32 %v11148_v42, %v2672_v48 }
 0x21c   : > { %v9001_v36 = vpop.f32.mrb[80].mxu0 }
 0x21d   : > { %v2693_v44 = vadd.f32 %v9001_v36, %v11180_v25  ;;  %v2684_v62 = vpop.f32.mrb[81].mxu0 }
 0x21e   : > { %v2685_v57 = vadd.f32 %v11173_v35, %v2684_v62  ;;  %v9002_v24 = vpop.f32.mrb[82].mxu0  ;;  %v12918_v62 = vld [vmem:[#allocation30_spill] sm:$0xff] }
 0x21f   : > { %v11306_v56 = vadd.f32 %v11171_v32, %v2693_v44  ;;  %v2696_v63 = vadd.f32 %v9002_v24, %v11184_v6  ;;  %v2687_v51 = vpop.f32.mrb[83].mxu0  ;;  %v12906_v6 = vld [vmem:[#allocation24_spill] sm:$0xff] }
 0x220   : > { %v11310_v20 = vadd.f32 %v11162_v52, %v2685_v57  ;;  %v2688_v12 = vadd.f32 %v11175_v50, %v2687_v51  ;;  %v12908_v50 = vld [vmem:[#allocation22_spill] sm:$0xff] }
 0x221   : > { %v11314_v42 = vadd.f32 %v11178_v8, %v2696_v63 }
 0x222   : > { %v11317_v25 = vadd.f32 %v12905_v27, %v2688_v12 }
 0x224   : > { %v9005_v0 = vpop.f32.mrb[84].mxu0 }
 0x225   : > { %v2709_v35 = vadd.f32 %v9005_v0, %v11198_v21  ;;  %v2700_v4 = vpop.f32.mrb[85].mxu0 }
 0x226   : > { %v2701_v32 = vadd.f32 %v11189_v59, %v2700_v4  ;;  %v9006_v49 = vpop.f32.mrb[86].mxu0 }
 0x227   : > { %v11322_v60 = vadd.f32 %v12906_v6, %v2709_v35  ;;  %v2712_v52 = vadd.f32 %v9006_v49, %v11203_v29  ;;  %v2703_v31 = vpop.f32.mrb[87].mxu0  ;;  %v12912_v29 = vld [vmem:[#allocation28_spill] sm:$0xff] }
 0x228   : > { %v11326_v40 = vadd.f32 %v12908_v50, %v2701_v32  ;;  %v2704_v8 = vadd.f32 %v11193_v53, %v2703_v31  ;;  %v12915_v53 = vld [vmem:[#allocation25_spill] sm:$0xff]  ;;  %v12923_v50 = vld [vmem:[#allocation31_spill] sm:$0xff] }
 0x229   : > { %12907 = vst [vmem:[#allocation21_spill] sm:$0xff] %v11322_v60  ;;  %v11330_v7 = vadd.f32 %v11196_v5, %v2712_v52  ;;  %v12917_v5 = vld [vmem:[#allocation29_spill] sm:$0xff] }
 0x22a   : > { %v11333_v21 = vadd.f32 %v12910_v61, %v2704_v8 }
 0x22b   : > { %12909 = vst [vmem:[#allocation24_spill] sm:$0xff] %v11330_v7 }
 0x22c   : > { %v9009_v10 = vpop.f32.mrb[88].mxu0 }
 0x22d   : > { %v2725_v59 = vadd.f32 %v9009_v10, %v11219_v22  ;;  %v2716_v54 = vpop.f32.mrb[89].mxu0  ;;  %v12920_v22 = vld [vmem:[#allocation26_spill] sm:$0xff] }
 0x22e   : > { %v2717_v33 = vadd.f32 %v12911_v41, %v2716_v54  ;;  %v9010_v23 = vpop.f32.mrb[90].mxu0 }
 0x22f   : > { %v11338_v19 = vadd.f32 %v12912_v29, %v2725_v59  ;;  %v2728_v34 = vadd.f32 %v9010_v23, %v12914_v58  ;;  %v2719_v48 = vpop.f32.mrb[91].mxu0 }
 0x230   : > { %v11342_v36 = vadd.f32 %v12915_v53, %v2717_v33  ;;  %v2720_v44 = vadd.f32 %v12917_v5, %v2719_v48 }
 0x231   : > { %12913 = vst [vmem:[#allocation22_spill] sm:$0xff] %v11338_v19  ;;  %v11346_v57 = vadd.f32 %v12918_v62, %v2728_v34  ;;  %v9081_v24 = vpop.f32.mrb[64].mxu1  ;;  %v11379_v34 = vld [vmem:[%s12806_s2] ss:$0 sm:$0xff] }
 0x232   : > { %12916 = vst [vmem:[#allocation23_spill] sm:$0xff] %v11342_v36  ;;  %v11349_v63 = vadd.f32 %v12920_v22, %v2720_v44  ;;  %v3648_v51 = vpop.f32.mrb[65].mxu1  ;;  %v4312_v36 = vld [vmem:[#allocation2 + $0x2c] sm:$0x1] }
 0x233   : > { %12919 = vst [vmem:[#allocation27_spill] sm:$0xff] %v11346_v57  ;;  %v9082_v12 = vpop.f32.mrb[66].mxu1 }
 0x234   : > { %12921 = vst [vmem:[#allocation28_spill] sm:$0xff] %v11349_v63  ;;  %v9013_v27 = vpop.f32.mrb[92].mxu0  ;;  %v3651_v0 = vpop.f32.mrb[67].mxu1 }
 0x235   : > { %v2741_v35 = vadd.f32 %v9013_v27, %v11235_v38  ;;  %v2732_v4 = vpop.f32.mrb[93].mxu0  ;;  %v12926_v38 = vld [vmem:[#allocation33_spill] sm:$0xff] }
 0x236   : > { %v2733_v32 = vadd.f32 %v11227_v47, %v2732_v4  ;;  %v9014_v49 = vpop.f32.mrb[94].mxu0 }
 0x237   : > { %v11354_v6 = vadd.f32 %v11229_v3, %v2741_v35  ;;  %v2744_v52 = vadd.f32 %v9014_v49, %v11237_v55  ;;  %v2735_v31 = vpop.f32.mrb[95].mxu0 }
 0x238   : > { %v11358_v8 = vadd.f32 %v12923_v50, %v2733_v32  ;;  %v2736_v61 = vadd.f32 %v11231_v14, %v2735_v31 }
 0x239   : > { %12922 = vst [vmem:[#allocation32_spill] sm:$0xff] %v11354_v6  ;;  %v11362_v10 = vadd.f32 %v11233_v45, %v2744_v52  ;;  %v11364_v59 = vpop.f32.mrb[68].mxu1 }
 0x23a   : > { %12924 = vst [vmem:[#allocation25_spill] sm:$0xff] %v11358_v8  ;;  %v11367_v54 = vadd.f32 %v12926_v38, %v2736_v61  ;;  %v11369_v47 = vpop.f32.mrb[69].mxu1 }
 0x23b   : > { %12925 = vst [vmem:[#allocation29_spill] sm:$0xff] %v11362_v10  ;;  %v11371_v3 = vpop.f32.mrb[70].mxu1 }
 0x23c   : > { %12927 = vst [vmem:[#allocation30_spill] sm:$0xff] %v11367_v54  ;;  %v8420_v41 = vpop.f32.mrb[96].mxu0  ;;  %v11373_v55 = vpop.f32.mrb[71].mxu1 }
 0x23d   : > { %v8421_v33 = vpop.f32.mrb[97].mxu0 }
 0x23e   : > { %v8422_v23 = vadd.f32 %v8421_v33, %v8420_v41  ;;  %v8423_v29 = vpop.f32.mrb[98].mxu0 }
 0x23f   : > { %v8424_v58 = vpop.f32.mrb[99].mxu0 }
 0x240   : > { %v9325_v14 = vadd.f32 %v8422_v23, %v11246_v17  ;;  %v8425_v45 = vadd.f32 %v8424_v58, %v8423_v29 }
 0x241   : > { %v11381_v48 = vpop.f32.mrb[72].mxu1 }
 0x242   : > { %v9326_v53 = vadd.f32 %v9325_v14, %v3648_v51  ;;  %v9333_v5 = vadd.f32 %v8425_v45, %v11253_v16  ;;  %v11384_v44 = vpop.f32.mrb[73].mxu1 }
 0x243   : > { %v11386_v62 = vpop.f32.mrb[74].mxu1 }
 0x244   : > { %v3814_v22 = vadd.f32 %v9326_v53, %v11379_v34  ;;  %v9334_v27 = vadd.f32 %v9333_v5, %v3651_v0  ;;  %v8426_v35 = vpop.f32.mrb[100].mxu0  ;;  %v11389_v17 = vpop.f32.mrb[75].mxu1 }
 0x245   : > { %v8427_v4 = vpop.f32.mrb[101].mxu0 }
 0x246   : > { %v3846_v32 = vmax.f32 %v3814_v22, 0.0  ;;  %v3815_v49 = vadd.f32 %v9334_v27, %v11379_v34  ;;  %v8428_v52 = vadd.f32 %v8427_v4, %v8426_v35  ;;  %v8429_v31 = vpop.f32.mrb[102].mxu0 }
 0x247   : > { %v8430_v50 = vpop.f32.mrb[103].mxu0 }
 0x248   : > { %v8099_v51 = vpack.c.bf16 %v3846_v32, %v3846_v32  ;;  %v3847_v61 = vmax.f32 %v3815_v49, 0.0  ;;  %v9321_v16 = vadd.f32 %v8428_v52, %v11242_v13  ;;  %v8431_v38 = vadd.f32 %v8430_v50, %v8429_v31  ;;  %v4294_v13 = vld [vmem:[#allocation2 + $0xc] sm:$0xf] }
 0x249   : > { %v11393_v41 = vpop.f32.mrb[76].mxu1 }
 0x24a   : > { %v3975_v33 = vshrl.u32 %v8099_v51, 16  ;;  %v8100_v23 = vpack.c.bf16 %v3847_v61, %v3847_v61  ;;  %v9322_v0 = vadd.f32 %v9321_v16, %v9081_v24  ;;  %v11395_v29 = vpop.f32.mrb[77].mxu1  ;;  %v9329_v58 = vadd.f32 %v8431_v38, %v11250_v26  ;;  %v4298_v26 = vld [vmem:[#allocation2 + $0x14] sm:$0x1] }
 0x24b   : > { %v11398_v14 = vpop.f32.mrb[78].mxu1  ;;  %v3978_v53 = vshll.u32 %v8099_v51, 16 }
 0x24c   : > { %v3977_v45 = vrot.slane %v3975_v33, 7  ;;  %v3983_v5 = vshrl.u32 %v8100_v23, 16  ;;  %v3816_v22 = vadd.f32 %v9322_v0, %v11379_v34  ;;  %v8432_v27 = vpop.f32.mrb[104].mxu0  ;;  %v11401_v35 = vpop.f32.mrb[79].mxu1  ;;  %v9330_v4 = vadd.f32 %v9329_v58, %v9082_v12 }
 0x24d   : > { %v8433_v32 = vpop.f32.mrb[105].mxu0  ;;  %v3986_v24 = vshll.u32 %v8100_v23, 16 }
 0x24e   : > { %v3980_v49 = vor.u32 %v3978_v53, %v3977_v45  ;;  %v3985_v52 = vrot.slane %v3983_v5, 7  ;;  %v3848_v31 = vmax.f32 %v3816_v22, 0.0  ;;  %v8435_v50 = vpop.f32.mrb[106].mxu0  ;;  %v3981_v61 = vrot.slane %v3977_v45, 4 }
 0x24f   : > { %v3817_v16 = vadd.f32 %v9330_v4, %v11379_v34  ;;  %v8434_v38 = vadd.f32 %v8433_v32, %v8432_v27  ;;  %v8436_v51 = vpop.f32.mrb[107].mxu0 }
 0x250   : > { %v4295_v0 = vsel %vm10371_vm10, %v3980_v49, %v4294_v13  ;;  %v3988_v10 = vor.u32 %v3986_v24, %v3985_v52  ;;  %v3990_v6 = vrot.slane %v3985_v52, 4  ;;  %v8101_v54 = vpack.c.bf16 %v3848_v31, %v3848_v31 }
 0x251   : > { %4296 = vst [vmem:[#allocation2 + $0xc] sm:$0xf] %v4295_v0  ;;  %v3849_v12 = vmax.f32 %v3817_v16, 0.0  ;;  %v9341_v58 = vadd.f32 %v8434_v38, %v11262_v11  ;;  %v8437_v53 = vadd.f32 %v8436_v51, %v8435_v50  ;;  %v11407_v23 = vpop.f32.mrb[80].mxu1 }
 0x252   : > { %v3989_v45 = vsel %vm10360_vm9, %v3981_v61, %v3988_v10  ;;  %v4299_v27 = vsel %vm10335_vm3, %v3990_v6, %v4298_v26  ;;  %v3992_v4 = vshrl.u32 %v8101_v54, 16  ;;  %v11413_v32 = vpop.f32.mrb[81].mxu1  ;;  %v3995_v31 = vshll.u32 %v8101_v54, 16  ;;  %v4301_v10 = vld [vmem:[#allocation2 + $0x18] sm:$0xf] }
 0x253   : > { %4297 = vst [vmem:[#allocation2 + $0x10] sm:$0xf] %v3989_v45  ;;  %4300 = vst [vmem:[#allocation2 + $0x14] sm:$0x1] %v4299_v27  ;;  %v8102_v13 = vpack.c.bf16 %v3849_v12, %v3849_v12  ;;  %v9342_v49 = vadd.f32 %v9341_v58, %v11369_v47  ;;  %v9349_v52 = vadd.f32 %v8437_v53, %v11269_v30  ;;  %v11417_v11 = vpop.f32.mrb[82].mxu1 }
 0x254   : > { %v3994_v24 = vrot.slane %v3992_v4, 7  ;;  %v8438_v50 = vpop.f32.mrb[108].mxu0  ;;  %v11419_v16 = vpop.f32.mrb[83].mxu1  ;;  %v4305_v30 = vld [vmem:[#allocation2 + $0x20] sm:$0x1] }
 0x255   : > { %v4000_v61 = vshrl.u32 %v8102_v13, 16  ;;  %v3818_v6 = vadd.f32 %v9342_v49, %v11379_v34  ;;  %v9350_v26 = vadd.f32 %v9349_v52, %v11373_v55  ;;  %v8439_v38 = vpop.f32.mrb[109].mxu0  ;;  %v4003_v58 = vshll.u32 %v8102_v13, 16 }
 0x256   : > { %v3997_v51 = vor.u32 %v3995_v31, %v3994_v24  ;;  %v8440_v0 = vadd.f32 %v8439_v38, %v8438_v50  ;;  %v8441_v12 = vpop.f32.mrb[110].mxu0  ;;  %v3998_v27 = vrot.slane %v3994_v24, 4 }
 0x257   : > { %v4002_v47 = vrot.slane %v4000_v61, 7  ;;  %v3850_v53 = vmax.f32 %v3818_v6, 0.0  ;;  %v3819_v45 = vadd.f32 %v9350_v26, %v11379_v34  ;;  %v8442_v54 = vpop.f32.mrb[111].mxu0  ;;  %v11431_v6 = vld [vmem:[#allocation10 + $0x80] sm:$0xff]  }
 0x258   : > { %v4302_v4 = vsel %vm10371_vm10, %v3997_v51, %v4301_v10  ;;  %v9337_v8 = vadd.f32 %v8440_v0, %v11258_v9  ;;  %v8443_v49 = vadd.f32 %v8442_v54, %v8441_v12  ;;  %v5147_v57 = vld [vmem:[#allocation2 + $0xc] sm:$0xe]  ;;  %9159 = vmatprep.subr.bf16.mxu1 %v11431_v6 }
 0x259   : > { %4303 = vst [vmem:[#allocation2 + $0x18] sm:$0xf] %v4302_v4  ;;  %v4005_v55 = vor.u32 %v4003_v58, %v4002_v47  ;;  %v4007_v52 = vrot.slane %v4002_v47, 4  ;;  %v8103_v31 = vpack.c.bf16 %v3850_v53, %v3850_v53  ;;  %v3851_v50 = vmax.f32 %v3819_v45, 0.0  ;;  %v11427_v61 = vpop.f32.mrb[84].mxu1 }
 0x25a   : > { %12931 = vst [vmem:[#allocation26_spill] sm:$0xff] %v11427_v61  ;;  %v11429_v13 = vld [vmem:[#allocation2 + $0xc] sm:$0xf]  ;;  %v9338_v24 = vadd.f32 %v9337_v8, %v11364_v59  ;;  %v9345_v26 = vadd.f32 %v8443_v49, %v11266_v28  ;;  %v5148_v10 = vld [vmem:[#allocation2 + $0x10] sm:$0xf]  ;;  %v7951_v9 = vrot.slane %v5147_v57, 9 }
 0x25b   : > { %v5149_v38 = vld [vmem:[#allocation2 + $0x14] sm:$0x1]  ;;  %v11435_v51 = vpop.f32.mrb[85].mxu1  ;;  %v4006_v0 = vsel %vm10360_vm9, %v3998_v27, %v4005_v55  ;;  %v4306_v12 = vsel %vm10335_vm3, %v4007_v52, %v4305_v30  ;;  %v4009_v47 = vshrl.u32 %v8103_v31, 16  ;;  %v4012_v58 = vshll.u32 %v8103_v31, 16 }
 0x25c   : > { %4304 = vst [vmem:[#allocation2 + $0x1c] sm:$0xf] %v4006_v0  ;;  %4307 = vst [vmem:[#allocation2 + $0x20] sm:$0x1] %v4306_v12  ;;  %v8104_v8 = vpack.c.bf16 %v3851_v50, %v3851_v50  ;;  %v3820_v28 = vadd.f32 %v9338_v24, %v11379_v34  ;;  %v9346_v59 = vadd.f32 %v9345_v26, %v11371_v3  ;;  %v8444_v57 = vpop.f32.mrb[112].mxu0  ;;  %v5261_v53 = vrot.slane %v5148_v10, 5 }
 0x25d   : > { %v11444_v45 = vpop.f32.mrb[86].mxu1  ;;  %v4011_v54 = vrot.slane %v4009_v47, 7  ;;  %v8445_v27 = vpop.f32.mrb[113].mxu0  ;;  %v5264_v4 = vrot.slane %v5149_v38, 5  ;;  %v4647_v30 = vshrl.u32 %v11429_v13, 16  ;;  %v4650_v49 = vshll.u32 %v11429_v13, 16 }
 0x25e   : > { %12932 = vst [vmem:[#allocation31_spill] sm:$0xff] %v11444_v45  ;;  %v11448_v55 = vpop.f32.mrb[87].mxu1  ;;  %v4308_v52 = vld [vmem:[#allocation2 + $0x24] sm:$0xf]  ;;  %v4017_v31 = vshrl.u32 %v8104_v8, 16  ;;  %v4020_v50 = vshll.u32 %v8104_v8, 16  ;;  %v3821_v24 = vadd.f32 %v9346_v59, %v11379_v34  ;;  %v8446_v12 = vadd.f32 %v8445_v27, %v8444_v57 }
 0x25f   : > { %v3852_v0 = vmax.f32 %v3820_v28, 0.0  ;;  %v8447_v3 = vpop.f32.mrb[114].mxu0  ;;  %v4014_v26 = vor.u32 %v4012_v58, %v4011_v54  ;;  %v4015_v10 = vrot.slane %v4011_v54, 4  ;;  %v5262_v38 = vsel %vm10794_vm14, %v7951_v9, %v5261_v53 }
 0x260   : > { %v8448_v19 = vpop.f32.mrb[115].mxu0  ;;  %v4019_v63 = vrot.slane %v4017_v31, 7  ;;  %v3853_v13 = vmax.f32 %v3821_v24, 0.0  ;;  %v9357_v8 = vadd.f32 %v8446_v12, %v11278_v43  ;;  %v5263_v28 = vrot.slane %v5261_v53, 4  ;;  %v4315_v31 = vld [vmem:[#allocation2 + $0x30] sm:$0xf] }
 0x261   : > { %v8105_v45 = vpack.c.bf16 %v3852_v0, %v3852_v0  ;;  %v8449_v7 = vadd.f32 %v8448_v19, %v8447_v3  ;;  %v4309_v61 = vsel %vm10371_vm10, %v4014_v26, %v4308_v52  ;;  %v4649_v59 = vrot.slane %v4647_v30, 4  ;;  %v11456_v60 = vpop.f32.mrb[88].mxu1  ;;  %v4572_v52 = vld [vmem:[#allocation2 + $0x10] sm:$0xf] }
 0x262   : > { %4310 = vst [vmem:[#allocation2 + $0x24] sm:$0xf] %v4309_v61  ;;  %v4022_v58 = vor.u32 %v4020_v50, %v4019_v63  ;;  %v4024_v57 = vrot.slane %v4019_v63, 4  ;;  %v11458_v9 = vpop.f32.mrb[89].mxu1  ;;  %v8106_v0 = vpack.c.bf16 %v3853_v13, %v3853_v13  ;;  %v9358_v19 = vadd.f32 %v9357_v8, %v11384_v44 }
 0x263   : > { %v4026_v54 = vshrl.u32 %v8105_v45, 16  ;;  %v4029_v27 = vshll.u32 %v8105_v45, 16  ;;  %v9365_v24 = vadd.f32 %v8449_v7, %v11285_v2  ;;  %v5265_v43 = vsel %vm10794_vm14, %v5263_v28, %v5264_v4  ;;  %v11470_v50 = vpop.f32.mrb[90].mxu1 }
 0x264   : > { %v4023_v53 = vsel %vm10360_vm9, %v4015_v10, %v4022_v58  ;;  %v4313_v61 = vsel %vm10335_vm3, %v4024_v57, %v4312_v36  ;;  %v11468_v30 = vcombine.low %v5262_v38, %v5265_v43  ;;  %v8450_v45 = vpop.f32.mrb[116].mxu0  ;;  %v4034_v44 = vshrl.u32 %v8106_v0, 16  ;;  %v11474_v26 = vpop.f32.mrb[91].mxu1 }
 0x265   : > { %v4028_v63 = vrot.slane %v4026_v54, 7  ;;  %4311 = vst [vmem:[#allocation2 + $0x28] sm:$0xf] %v4023_v53  ;;  %4314 = vst [vmem:[#allocation2 + $0x2c] sm:$0x1] %v4313_v61  ;;  %v4037_v2 = vshll.u32 %v8106_v0, 16  ;;  %v3822_v7 = vadd.f32 %v9358_v19, %v11379_v34  ;;  %v9366_v4 = vadd.f32 %v9365_v24, %v11389_v17 }
 0x266   : > { %12934 = vst [vmem:[#allocation33_spill] sm:$0xff] %v11468_v30  ;;  %v8451_v3 = vpop.f32.mrb[117].mxu0  ;;  %9127 = vmatprep.mubr.bf16.mxu1 %v11468_v30  ;;  %v4652_v13 = vrot.slane %v4650_v49, 5  ;;  %v4036_v8 = vrot.slane %v4034_v44, 7  ;;  %v4656_v57 = vshll.u32 %v4572_v52, 16 }
 0x267   : > { %v4031_v10 = vor.u32 %v4029_v27, %v4028_v63  ;;  %v4032_v36 = vrot.slane %v4028_v63, 4  ;;  %v8452_v12 = vadd.f32 %v8451_v3, %v8450_v45  ;;  %v8453_v38 = vpop.f32.mrb[118].mxu0  ;;  %v3854_v28 = vmax.f32 %v3822_v7, 0.0  ;;  %v4319_v17 = vld [vmem:[#allocation2 + $0x38] sm:$0x1] }
 0x268   : > { %v3823_v58 = vadd.f32 %v9366_v4, %v11379_v34  ;;  %v8454_v54 = vpop.f32.mrb[119].mxu0  ;;  %v4653_v24 = vor.u32 %v4652_v13, %v4649_v59  ;;  %v4660_v27 = vshrl.u32 %v4572_v52, 16  ;;  %v4039_v43 = vor.u32 %v4037_v2, %v4036_v8  ;;  %v4573_v49 = vld [vmem:[#allocation2 + $0x14] sm:$0x1]  ;;  %v5150_v30 = vld [vmem:[#allocation2 + $0x18] sm:$0xe] }
 0x269   : > { %v4316_v0 = vsel %vm10371_vm10, %v4031_v10, %v4315_v31  ;;  %v9353_v19 = vadd.f32 %v8452_v12, %v11274_v18  ;;  %v4041_v53 = vrot.slane %v4036_v8, 4  ;;  %v8107_v61 = vpack.c.bf16 %v3854_v28, %v3854_v28  ;;  %v11481_v45 = vpop.f32.mrb[92].mxu1  ;;  %v4322_v12 = vld [vmem:[#allocation2 + $0x3c] sm:$0xf] }
 0x26a   : > { %4317 = vst [vmem:[#allocation2 + $0x30] sm:$0xf] %v4316_v0  ;;  %v3855_v63 = vmax.f32 %v3823_v58, 0.0  ;;  %12935 = vst [vmem:[#allocation18_spill] sm:$0xff] %v11481_v45  ;;  %v4654_v7 = vrot.slane %v4653_v24, 4  ;;  %v4658_v4 = vrot.slane %v4656_v57, 5  ;;  %v4040_v18 = vsel %vm10360_vm9, %v4032_v36, %v4039_v43 }
 0x26b   : > { %v9354_v44 = vadd.f32 %v9353_v19, %v11381_v48  ;;  %v4662_v3 = vrot.slane %v4660_v27, 4  ;;  %v11484_v31 = vpop.f32.mrb[93].mxu1  ;;  %v4320_v59 = vsel %vm10335_vm3, %v4041_v53, %v4319_v17  ;;  %v4043_v52 = vshrl.u32 %v8107_v61, 16  ;;  %4318 = vst [vmem:[#allocation2 + $0x34] sm:$0xf] %v4040_v18 }
 0x26c   : > { %v4046_v2 = vshll.u32 %v8107_v61, 16  ;;  %v11490_v10 = vpop.f32.mrb[94].mxu1  ;;  %4321 = vst [vmem:[#allocation2 + $0x38] sm:$0x1] %v4320_v59  ;;  %v8108_v48 = vpack.c.bf16 %v3855_v63, %v3855_v63  ;;  %v4659_v28 = vsel %vm10396_vm11, %v4654_v7, %v4658_v4  ;;  %v5151_v57 = vld [vmem:[#allocation2 + $0x1c] sm:$0xf]  ;;  %v8455_v24 = vadd.f32 %v8454_v54, %v8453_v38 }
 0x26d   : > { %12936 = vst [vmem:[#allocation17_spill] sm:$0xff] %v11490_v10  ;;  %v3824_v13 = vadd.f32 %v9354_v44, %v11379_v34  ;;  %v4663_v58 = vor.u32 %v4662_v3, %v4658_v4  ;;  %v8456_v0 = vpop.f32.mrb[120].mxu0  ;;  %v4045_v36 = vrot.slane %v4043_v52, 7  ;;  %v4666_v19 = vshll.u32 %v4573_v49, 16  ;;  %v5152_v17 = vld [vmem:[#allocation2 + $0x20] sm:$0x1] }
 0x26e   : > { %v7952_v27 = vrot.slane %v5150_v30, 9  ;;  %v8457_v43 = vpop.f32.mrb[121].mxu0  ;;  %v4051_v53 = vshrl.u32 %v8108_v48, 16  ;;  %v4054_v61 = vshll.u32 %v8108_v48, 16  ;;  %v11497_v63 = vpop.f32.mrb[95].mxu1  ;;  %v9361_v4 = vadd.f32 %v8455_v24, %v11282_v15 }
 0x26f   : > { %v3856_v18 = vmax.f32 %v3824_v13, 0.0  ;;  %v4664_v59 = vrot.slane %v4663_v58, 4  ;;  %v11495_v10 = vpop.f32.mrb[122].mxu0  ;;  %12938 = vst [vmem:[#allocation16_spill] sm:$0xff] %v11497_v63  ;;  %v4048_v44 = vor.u32 %v4046_v2, %v4045_v36  ;;  %v4049_v45 = vrot.slane %v4045_v36, 4 }
 0x270   : > { %v4668_v7 = vrot.slane %v4666_v19, 5  ;;  %v11500_v3 = vpop.f32.mrb[123].mxu0  ;;  %v4053_v49 = vrot.slane %v4051_v53, 7  ;;  %v5268_v54 = vrot.slane %v5151_v57, 5  ;;  %v5271_v30 = vrot.slane %v5152_v17, 5  ;;  %v9830_v17 = vld [vmem:[#allocation2 + $0xc] sm:$0xff]  }
 0x271   : > { %v8109_v38 = vpack.c.bf16 %v3856_v18, %v3856_v18  ;;  %v4323_v52 = vsel %vm10371_vm10, %v4048_v44, %v4322_v12  ;;  %v4326_v48 = vld [vmem:[#allocation2 + $0x44] sm:$0x1]  ;;  %v9362_v58 = vadd.f32 %v9361_v4, %v11386_v62  ;;  %v8458_v2 = vadd.f32 %v8457_v43, %v8456_v0  ;;  %v4574_v63 = vld [vmem:[#allocation2 + $0x18] sm:$0xf]  ;;  %v4329_v53 = vld [vmem:[#allocation2 + $0x48] sm:$0xf] }
 0x272   : > { %v4669_v13 = vsel %vm10396_vm11, %v4664_v59, %v4668_v7  ;;  %4324 = vst [vmem:[#allocation2 + $0x3c] sm:$0xf] %v4323_v52  ;;  %v4056_v36 = vor.u32 %v4054_v61, %v4053_v49  ;;  %v4058_v19 = vrot.slane %v4053_v49, 4  ;;  %v5269_v12 = vsel %vm10794_vm14, %v7952_v27, %v5268_v54  ;;  %v4575_v59 = vld [vmem:[#allocation2 + $0x1c] sm:$0xf] }
 0x273   : > { %v4060_v15 = vshrl.u32 %v8109_v38, 16  ;;  %v4063_v24 = vshll.u32 %v8109_v38, 16  ;;  %v11507_v18 = vcombine.low %v4659_v28, %v4669_v13  ;;  %v3825_v57 = vadd.f32 %v9362_v58, %v11379_v34  ;;  %v4576_v28 = vld [vmem:[#allocation2 + $0x20] sm:$0x1] }
 0x274   : > { %v5270_v44 = vrot.slane %v5268_v54, 4  ;;  %v4057_v62 = vsel %vm10360_vm9, %v4049_v45, %v4056_v36  ;;  %v4327_v0 = vsel %vm10335_vm3, %v4058_v19, %v4326_v48  ;;  %v9373_v61 = vadd.f32 %v8458_v2, %v11294_v37  ;;  %v11519_v7 = vpop.f32.mrb[124].mxu0  ;;  %v9840_v58 = vld [vmem:[#allocation10 + $0x88] sm:$0xff]  }
 0x275   : > { %12939 = vst [vmem:[#allocation20_spill] sm:$0xff] %v11507_v18  ;;  %v11516_v43 = vrot.slane %v4060_v15, 7  ;;  %4325 = vst [vmem:[#allocation2 + $0x40] sm:$0xf] %v4057_v62  ;;  %5791 = vmatprep.mubr.bf16.mxu0 %v11507_v18  ;;  %v3857_v27 = vmax.f32 %v3825_v57, 0.0  ;;  %v4671_v45 = vshrl.u32 %v4574_v63, 16 }
 0x276   : > { %4328 = vst [vmem:[#allocation2 + $0x44] sm:$0x1] %v4327_v0  ;;  %v5272_v4 = vsel %vm10794_vm14, %v5270_v44, %v5271_v30  ;;  %v4674_v49 = vshll.u32 %v4574_v63, 16  ;;  %v8463_v38 = vpop.f32.mrb[125].mxu0  ;;  %5792 = vmatmul.mubr.bf16.vlgmr.msra.gmra.mrb[160].mxu0 %v9830_v17  ;;  %v9374_v48 = vadd.f32 %v9373_v61, %v11395_v29  ;;  %v4680_v15 = vshll.u32 %v4575_v59, 16 }
 0x277   : > { %v4065_v54 = vor.u32 %v4063_v24, %v11516_v43  ;;  %v4066_v52 = vrot.slane %v11516_v43, 4  ;;  %v11526_v37 = vcombine.low %v5269_v12, %v5272_v4  ;;  %v11529_v13 = vpop.f32.mrb[126].mxu0  ;;  %v8110_v2 = vpack.c.bf16 %v3857_v27, %v3857_v27  ;;  %v5153_v12 = vld [vmem:[#allocation2 + $0x24] sm:$0xe]  ;;  %v5154_v29 = vld [vmem:[#allocation2 + $0x28] sm:$0xf] }
 0x278   : > { %v4673_v36 = vrot.slane %v4671_v45, 4  ;;  %v4676_v19 = vrot.slane %v4674_v49, 5  ;;  %v11531_v30 = vpop.f32.mrb[127].mxu0  ;;  %v3826_v24 = vadd.f32 %v9374_v48, %v11379_v34  ;;  %v4684_v57 = vshrl.u32 %v4575_v59, 16  ;;  %v5155_v61 = vld [vmem:[#allocation2 + $0x2c] sm:$0x1] }
 0x279   : > { %v4330_v63 = vsel %vm10371_vm10, %v4065_v54, %v4329_v53  ;;  %9128 = vmatmul.mubr.bf16.vlgmr.msra.gmra.mrb[96].mxu1 %v11526_v37  ;;  %v4690_v17 = vshll.u32 %v4576_v28, 16  ;;  %v4068_v44 = vshrl.u32 %v8110_v2, 16  ;;  %v4071_v62 = vshll.u32 %v8110_v2, 16  ;;  %v9842_v49 = vld [vmem:[#allocation10 + $0x90] sm:$0xff]  }
 0x27a   : > { %4331 = vst [vmem:[#allocation2 + $0x48] sm:$0xf] %v4330_v63  ;;  %v4677_v0 = vor.u32 %v4676_v19, %v4673_v36  ;;  %v4682_v43 = vrot.slane %v4680_v15, 5  ;;  %9160 = vmatpush3.bf16.msra.mxu1 %v11431_v6  ;;  %v3858_v27 = vmax.f32 %v3826_v24, 0.0  ;;  %v4686_v4 = vrot.slane %v4684_v57, 4 }
 0x27b   : > { %v4692_v45 = vrot.slane %v4690_v17, 5  ;;  %v8461_v53 = vadd.f32 %v11500_v3, %v11495_v10  ;;  %9161 = vmatprep.subr.bf16.mxu1 %v9840_v58  ;;  %v4070_v59 = vrot.slane %v4068_v44, 7  ;;  %v7953_v54 = vrot.slane %v5153_v12, 9  ;;  %v4333_v63 = vld [vmem:[#allocation2 + $0x50] sm:$0x1] }
 0x27c   : > { %v4678_v28 = vrot.slane %v4677_v0, 4  ;;  %v5275_v48 = vrot.slane %v5154_v29, 5  ;;  %v8111_v18 = vpack.c.bf16 %v3858_v27, %v3858_v27  ;;  %v4687_v2 = vor.u32 %v4686_v4, %v4682_v43  ;;  %v11541_v15 = vpop.f32.mrb[128].mxu0  ;;  %v4577_v3 = vld [vmem:[#allocation2 + $0x24] sm:$0xf]  ;;  %v9844_v12 = vld [vmem:[#allocation10 + $0x98] sm:$0xff]  }
 0x27d   : > { %v9381_v36 = vadd.f32 %v8461_v53, %v11301_v46  ;;  %v5278_v19 = vrot.slane %v5155_v61, 5  ;;  %v4073_v6 = vor.u32 %v4071_v62, %v4070_v59  ;;  %v4075_v24 = vrot.slane %v4070_v59, 4  ;;  %v11547_v17 = vpop.f32.mrb[129].mxu0 }
 0x27e   : > { %v4683_v57 = vsel %vm10396_vm11, %v4678_v28, %v4682_v43  ;;  %v5276_v10 = vsel %vm10794_vm14, %v7953_v54, %v5275_v48  ;;  %9162 = vmatpush3.bf16.msra.mxu1 %v9840_v58  ;;  %v4077_v29 = vshrl.u32 %v8111_v18, 16  ;;  %v4080_v44 = vshll.u32 %v8111_v18, 16  ;;  %v11550_v61 = vpop.f32.mrb[130].mxu0  ;;  %v4336_v58 = vld [vmem:[#allocation2 + $0x54] sm:$0xf] }
 0x27f   : > { %v4688_v0 = vrot.slane %v4687_v2, 4  ;;  %v9382_v46 = vadd.f32 %v9381_v36, %v11401_v35  ;;  %9163 = vmatprep.subr.bf16.mxu1 %v9842_v49  ;;  %v4074_v62 = vsel %vm10360_vm9, %v4066_v52, %v4073_v6  ;;  %v4334_v43 = vsel %vm10335_vm3, %v4075_v24, %v4333_v63  ;;  %v11557_v53 = vpop.f32.mrb[131].mxu0  ;;  %v4578_v28 = vld [vmem:[#allocation2 + $0x28] sm:$0xf] }
 0x280   : > { %v5277_v27 = vrot.slane %v5275_v48, 4  ;;  %v8464_v4 = vadd.f32 %v8463_v38, %v11519_v7  ;;  %4332 = vst [vmem:[#allocation2 + $0x4c] sm:$0xf] %v4074_v62  ;;  %4335 = vst [vmem:[#allocation2 + $0x50] sm:$0x1] %v4334_v43  ;;  %v11559_v18 = vrot.slane %v4077_v29, 7 }
 0x281   : > { %v4693_v35 = vsel %vm10396_vm11, %v4688_v0, %v4692_v45  ;;  %v3827_v59 = vadd.f32 %v9382_v46, %v11379_v34  ;;  %v4695_v52 = vshrl.u32 %v4577_v3, 16  ;;  %v4579_v38 = vld [vmem:[#allocation2 + $0x2c] sm:$0x1]  ;;  %v4698_v63 = vshll.u32 %v4577_v3, 16  ;;  %v9831_v45 = vld [vmem:[#allocation2 + $0x18] sm:$0xff]  }
 0x282   : > { %v11564_v54 = vcombine.low %v4683_v57, %v4693_v35  ;;  %v5279_v48 = vsel %vm10794_vm14, %v5277_v27, %v5278_v19  ;;  %v9369_v7 = vadd.f32 %v8464_v4, %v11290_v39  ;;  %9164 = vmatpush3.bf16.msra.mxu1 %v9842_v49  ;;  %v4082_v2 = vor.u32 %v4080_v44, %v11559_v18  ;;  %v9846_v29 = vld [vmem:[#allocation10 + $0xa0] sm:$0xff]   ;;  %v5156_v46 = vld [vmem:[#allocation2 + $0x30] sm:$0xe]  ;;  %v5157_v62 = vld [vmem:[#allocation2 + $0x34] sm:$0xf] }
 0x283   : > { %v3859_v6 = vmax.f32 %v3827_v59, 0.0  ;;  %v11571_v24 = vcombine.low %v5276_v10, %v5279_v48  ;;  %9165 = vmatprep.subr.bf16.mxu1 %v9844_v12  ;;  %v4697_v19 = vrot.slane %v4695_v52, 4  ;;  %v4700_v0 = vrot.slane %v4698_v63, 5  ;;  %v9848_v27 = vld [vmem:[#allocation10 + $0x40] sm:$0xff]  }
 0x284   : > { %5799 = vmatprep.mubr.bf16.mxu0 %v11564_v54  ;;  %v9370_v57 = vadd.f32 %v9369_v7, %v11393_v41  ;;  %v4704_v39 = vshll.u32 %v4578_v28, 16  ;;  %v4337_v49 = vsel %vm10371_vm10, %v4082_v2, %v4336_v58  ;;  %v4708_v44 = vshrl.u32 %v4578_v28, 16  ;;  %v11578_v43 = vpop.f32.mrb[132].mxu0  ;;  %v5158_v52 = vld [vmem:[#allocation2 + $0x38] sm:$0x1]  ;;  %v9851_v7 = vld [vmem:[#allocation10 + $0x48] sm:$0xff]   ;;  %8676 = vmatprep.subr.bf16.mxu0 %v9848_v27 }
 0x285   : > { %v8112_v3 = vpack.c.bf16 %v3859_v6, %v3859_v6  ;;  %5800 = vmatmul.mubr.bf16.gmra.mrb[164].mxu0 %v9831_v45  ;;  %9131 = vmatprep.mubr.bf16.mxu1 %v11571_v24  ;;  %v4714_v10 = vshll.u32 %v4579_v38, 16  ;;  %4338 = vst [vmem:[#allocation2 + $0x54] sm:$0xf] %v4337_v49  ;;  %v4701_v4 = vor.u32 %v4700_v0, %v4697_v19  ;;  %v11583_v58 = vpop.f32.mrb[133].mxu0  ;;  %v9849_v48 = vld [vmem:[#allocation10] sm:$0xff]   ;;  %v9850_v45 = vld [vmem:[#allocation10 + $0xa8] sm:$0xff]  }
 0x286   : > { %v3828_v41 = vadd.f32 %v9370_v57, %v11379_v34  ;;  %v4706_v35 = vrot.slane %v4704_v39, 5  ;;  %v8467_v59 = vadd.f32 %v11531_v30, %v11529_v13  ;;  %9166 = vmatpush3.bf16.msra.mxu1 %v9844_v12  ;;  %v4710_v63 = vrot.slane %v4708_v44, 4  ;;  %v11585_v6 = vpop.f32.mrb[134].mxu0  ;;  %8677 = vmatpush3.bf16.msra.mxu0 %v9849_v48  ;;  %v9852_v12 = vld [vmem:[#allocation10 + $0x8] sm:$0xff]   ;;  %v4340_v44 = vld [vmem:[#allocation2 + $0x5c] sm:$0x1] }
 0x287   : > { %v4085_v28 = vshrl.u32 %v8112_v3, 16  ;;  %v4088_v38 = vshll.u32 %v8112_v3, 16  ;;  %v4716_v2 = vrot.slane %v4714_v10, 5  ;;  %9167 = vmatprep.subr.bf16.mxu1 %v9846_v29  ;;  %v4702_v19 = vrot.slane %v4701_v4, 4  ;;  %v11588_v30 = vpop.f32.mrb[135].mxu0  ;;  %8678 = vmatprep.subr.bf16.mxu0 %v9851_v7 }
 0x288   : > { %v3860_v57 = vmax.f32 %v3828_v41, 0.0  ;;  %v9377_v0 = vadd.f32 %v8467_v59, %v11298_v1  ;;  %v7954_v13 = vrot.slane %v5156_v46, 9  ;;  %v4711_v49 = vor.u32 %v4710_v63, %v4706_v35  ;;  %v4580_v63 = vld [vmem:[#allocation2 + $0x30] sm:$0xf] }
 0x289   : > { %v4087_v39 = vrot.slane %v4085_v28, 7  ;;  %v5282_v36 = vrot.slane %v5157_v62, 5  ;;  %v5285_v3 = vrot.slane %v5158_v52, 5  ;;  %v4707_v27 = vsel %vm10396_vm11, %v4702_v19, %v4706_v35 }
 0x28a   : > { %v8113_v10 = vpack.c.bf16 %v3860_v57, %v3860_v57  ;;  %v9378_v41 = vadd.f32 %v9377_v0, %v11398_v14  ;;  %v8470_v1 = vadd.f32 %v11547_v17, %v11541_v15  ;;  %9168 = vmatpush3.bf16.msra.mxu1 %v9846_v29  ;;  %v4712_v59 = vrot.slane %v4711_v49, 4  ;;  %8679 = vmatpush3.bf16.msra.mxu0 %v9852_v12  ;;  %v4343_v29 = vld [vmem:[#allocation2 + $0x60] sm:$0xf]  ;;  %v4581_v57 = vld [vmem:[#allocation2 + $0x34] sm:$0xf] }
 0x28b   : > { %v4090_v46 = vor.u32 %v4088_v38, %v4087_v39  ;;  %v4092_v4 = vrot.slane %v4087_v39, 4  ;;  %v5283_v48 = vsel %vm10794_vm14, %v7954_v13, %v5282_v36  ;;  %9169 = vmatprep.subr.bf16.mxu1 %v9850_v45  ;;  %v5284_v28 = vrot.slane %v5282_v36, 4  ;;  %v9854_v36 = vld [vmem:[#allocation10 + $0x50] sm:$0xff]   ;;  %v4582_v39 = vld [vmem:[#allocation2 + $0x38] sm:$0x1] }
 0x28c   : > { %v4094_v62 = vshrl.u32 %v8113_v10, 16  ;;  %v4097_v52 = vshll.u32 %v8113_v10, 16  ;;  %v3829_v7 = vadd.f32 %v9378_v41, %v11379_v34  ;;  %v12940_v14 = vrot.slane %v11559_v18, 4  ;;  %v11607_v19 = vpop.f32.mrb[136].mxu0  ;;  %8680 = vmatprep.subr.bf16.mxu0 %v9854_v36 }
 0x28d   : > { %v4341_v17 = vsel %vm10335_vm3, %v4092_v4, %v4340_v44  ;;  %v4717_v35 = vsel %vm10396_vm11, %v4712_v59, %v4716_v2  ;;  %v9389_v38 = vadd.f32 %v8470_v1, %v11310_v20  ;;  %v5286_v12 = vsel %vm10794_vm14, %v5284_v28, %v5285_v3  ;;  %v11615_v49 = vpop.f32.mrb[137].mxu0  ;;  %v9855_v2 = vld [vmem:[#allocation10 + $0x10] sm:$0xff]   ;;  %v9857_v4 = vld [vmem:[#allocation10 + $0x58] sm:$0xff]  }
 0x28e   : > { %v4091_v15 = vsel %vm10360_vm9, %v12940_v14, %v4090_v46  ;;  %4342 = vst [vmem:[#allocation2 + $0x5c] sm:$0x1] %v4341_v17  ;;  %v11609_v0 = vrot.slane %v4094_v62, 7  ;;  %v11611_v18 = vcombine.low %v4707_v27, %v4717_v35  ;;  %v3861_v13 = vmax.f32 %v3829_v7, 0.0  ;;  %9170 = vmatpush3.bf16.msra.mxu1 %v9850_v45  ;;  %v9832_v20 = vld [vmem:[#allocation2 + $0x24] sm:$0xff]   ;;  %v11620_v46 = vpop.f32.mrb[138].mxu0  ;;  %8681 = vmatpush3.bf16.msra.mxu0 %v9855_v2 }
 0x28f   : > { %4339 = vst [vmem:[#allocation2 + $0x58] sm:$0xf] %v4091_v15  ;;  %v11617_v44 = vcombine.low %v5283_v48, %v5286_v12  ;;  %v9390_v10 = vadd.f32 %v9389_v38, %v11413_v32  ;;  %v4719_v41 = vshrl.u32 %v4580_v63, 16  ;;  %v4722_v1 = vshll.u32 %v4580_v63, 16  ;;  %v9856_v27 = vld [vmem:[#allocation10 + $0xb0] sm:$0xff]   ;;  %v11625_v48 = vpop.f32.mrb[139].mxu0  ;;  %8682 = vmatprep.subr.bf16.mxu0 %v9857_v4 }
 0x290   : > { %v4099_v59 = vor.u32 %v4097_v52, %v11609_v0  ;;  %v4100_v3 = vrot.slane %v11609_v0, 4  ;;  %5807 = vmatprep.mubr.bf16.mxu0 %v11611_v18  ;;  %v8114_v45 = vpack.c.bf16 %v3861_v13, %v3861_v13  ;;  %v4728_v62 = vshll.u32 %v4581_v57, 16  ;;  %v5159_v7 = vld [vmem:[#allocation2 + $0x3c] sm:$0xe]  ;;  %v9858_v32 = vld [vmem:[#allocation10 + $0x18] sm:$0xff]   ;;  %9171 = vmatprep.subr.bf16.mxu1 %v9856_v27 }
 0x291   : > { %5808 = vmatmul.mubr.bf16.gmra.mrb[168].mxu0 %v9832_v20  ;;  %9132 = vmatmul.mubr.bf16.gmra.mrb[100].mxu1 %v11617_v44  ;;  %v3830_v28 = vadd.f32 %v9390_v10, %v11379_v34  ;;  %v4721_v63 = vrot.slane %v4719_v41, 4  ;;  %v4724_v14 = vrot.slane %v4722_v1, 5  ;;  %v4732_v15 = vshrl.u32 %v4581_v57, 16  ;;  %v5160_v52 = vld [vmem:[#allocation2 + $0x40] sm:$0xf] }
 0x292   : > { %v4344_v17 = vsel %vm10371_vm10, %v4099_v59, %v4343_v29  ;;  %v4102_v35 = vshrl.u32 %v8114_v45, 16  ;;  %v4105_v38 = vshll.u32 %v8114_v45, 16  ;;  %v4730_v36 = vrot.slane %v4728_v62, 5  ;;  %9172 = vmatpush3.bf16.msra.mxu1 %v9856_v27  ;;  %8683 = vmatpush3.bf16.msra.mxu0 %v9858_v32  ;;  %v4347_v41 = vld [vmem:[#allocation2 + $0x68] sm:$0x1] }
 0x293   : > { %4345 = vst [vmem:[#allocation2 + $0x60] sm:$0xf] %v4344_v17  ;;  %v3862_v0 = vmax.f32 %v3830_v28, 0.0  ;;  %v4725_v13 = vor.u32 %v4724_v14, %v4721_v63  ;;  %v4734_v12 = vrot.slane %v4732_v15, 4  ;;  %v4738_v2 = vshll.u32 %v4582_v39, 16 }
 0x294   : > { %v4104_v20 = vrot.slane %v4102_v35, 7  ;;  %v8473_v34 = vadd.f32 %v11557_v53, %v11550_v61  ;;  %v7955_v57 = vrot.slane %v5159_v7, 9  ;;  %v5289_v10 = vrot.slane %v5160_v52, 5  ;;  %v5161_v63 = vld [vmem:[#allocation2 + $0x44] sm:$0x1]  ;;  %v11636_v14 = vpop.f32.mrb[140].mxu0 }
 0x295   : > { %v8115_v29 = vpack.c.bf16 %v3862_v0, %v3862_v0  ;;  %v4726_v1 = vrot.slane %v4725_v13, 4  ;;  %v4735_v59 = vor.u32 %v4734_v12, %v4730_v36  ;;  %v4740_v45 = vrot.slane %v4738_v2, 5  ;;  %v4583_v27 = vld [vmem:[#allocation2 + $0x3c] sm:$0xf]  ;;  %v11640_v15 = vpop.f32.mrb[141].mxu0 }
 0x296   : > { %v4107_v62 = vor.u32 %v4105_v38, %v4104_v20  ;;  %v4109_v4 = vrot.slane %v4104_v20, 4  ;;  %v9397_v28 = vadd.f32 %v8473_v34, %v11317_v25  ;;  %v5290_v39 = vsel %vm10794_vm14, %v7955_v57, %v5289_v10  ;;  %v4350_v17 = vld [vmem:[#allocation2 + $0x6c] sm:$0xf]  ;;  %v11647_v0 = vpop.f32.mrb[142].mxu0  ;;  %v9860_v13 = vld [vmem:[#allocation10 + $0x60] sm:$0xff]   ;;  %v9862_v57 = vld [vmem:[#allocation10 + $0xb8] sm:$0xff]  }
 0x297   : > { %v4111_v61 = vshrl.u32 %v8115_v29, 16  ;;  %v4114_v53 = vshll.u32 %v8115_v29, 16  ;;  %v4731_v7 = vsel %vm10396_vm11, %v4726_v1, %v4730_v36  ;;  %v4736_v32 = vrot.slane %v4735_v59, 4  ;;  %v9861_v12 = vld [vmem:[#allocation10 + $0x20] sm:$0xff]   ;;  %v11655_v34 = vpop.f32.mrb[143].mxu0  ;;  %v9833_v1 = vld [vmem:[#allocation2 + $0x30] sm:$0xff]   ;;  %8684 = vmatprep.subr.bf16.mxu0 %v9860_v13  ;;  %9173 = vmatprep.subr.bf16.mxu1 %v9862_v57 }
 0x298   : > { %v4108_v52 = vsel %vm10360_vm9, %v4100_v3, %v4107_v62  ;;  %v4348_v25 = vsel %vm10335_vm3, %v4109_v4, %v4347_v41  ;;  %v9398_v35 = vadd.f32 %v9397_v28, %v11419_v16  ;;  %v5291_v38 = vrot.slane %v5289_v10, 4  ;;  %v9863_v16 = vld [vmem:[#allocation10 + $0x68] sm:$0xff]   ;;  %8685 = vmatpush3.bf16.msra.mxu0 %v9861_v12  ;;  %v5163_v13 = vld [vmem:[#allocation2 + $0x4c] sm:$0xf]  ;;  %9174 = vmatpush3.bf16.msra.mxu1 %v9862_v57 }
 0x299   : > { %4346 = vst [vmem:[#allocation2 + $0x64] sm:$0xf] %v4108_v52  ;;  %4349 = vst [vmem:[#allocation2 + $0x68] sm:$0x1] %v4348_v25  ;;  %v11649_v36 = vrot.slane %v4111_v61, 7  ;;  %v4741_v2 = vsel %vm10396_vm11, %v4736_v32, %v4740_v45  ;;  %v5292_v20 = vrot.slane %v5161_v63, 5  ;;  %v8476_v3 = vadd.f32 %v11583_v58, %v11578_v43  ;;  %8686 = vmatprep.subr.bf16.mxu0 %v9863_v16 }
 0x29a   : > { %v11657_v10 = vcombine.low %v4731_v7, %v4741_v2  ;;  %v11662_v41 = vld [vmem:[%s12806_s2] ss:$0 sm:$0xff]  ;;  %v4743_v45 = vshrl.u32 %v4583_v27, 16  ;;  %v4746_v62 = vshll.u32 %v4583_v27, 16  ;;  %v4585_v63 = vld [vmem:[#allocation2 + $0x44] sm:$0x1]  ;;  %v8479_v16 = vadd.f32 %v11588_v30, %v11585_v6 }
 0x29b   : > { %v3831_v29 = vadd.f32 %v11662_v41, %v9398_v35  ;;  %v4584_v59 = vld [vmem:[#allocation2 + $0x40] sm:$0xf]  ;;  %v4116_v43 = vor.u32 %v4114_v53, %v11649_v36  ;;  %v4117_v58 = vrot.slane %v11649_v36, 4  ;;  %v5293_v4 = vsel %vm10794_vm14, %v5291_v38, %v5292_v20  ;;  %v5162_v25 = vld [vmem:[#allocation2 + $0x48] sm:$0xe]  ;;  %v9869_v6 = vld [vmem:[#allocation10 + $0x78] sm:$0xff]  }
 0x29c   : > { %12941 = vst [vmem:[#allocation19_spill] sm:$0xff] %v11657_v10  ;;  %v9385_v28 = vadd.f32 %v8476_v3, %v11306_v56  ;;  %v9864_v61 = vld [vmem:[#allocation10 + $0x28] sm:$0xff]   ;;  %5815 = vmatprep.mubr.bf16.mxu0 %v11657_v10  ;;  %v11671_v32 = vcombine.low %v5290_v39, %v5293_v4  ;;  %v4745_v27 = vrot.slane %v4743_v45, 4  ;;  %v4748_v52 = vrot.slane %v4746_v62, 5  ;;  %v11676_v12 = vpop.f32.mrb[144].mxu0  ;;  %v9866_v2 = vld [vmem:[#allocation10 + $0x70] sm:$0xff]  }
 0x29d   : > { %v3863_v7 = vmax.f32 %v3831_v29, 0.0  ;;  %v4351_v53 = vsel %vm10371_vm10, %v4116_v43, %v4350_v17  ;;  %5816 = vmatmul.mubr.bf16.gmra.mrb[172].mxu0 %v9833_v1  ;;  %v4752_v56 = vshll.u32 %v4584_v59, 16  ;;  %v4756_v38 = vshrl.u32 %v4584_v59, 16  ;;  %v5164_v17 = vld [vmem:[#allocation2 + $0x50] sm:$0x1]  ;;  %v11681_v29 = vpop.f32.mrb[145].mxu0 }
 0x29e   : > { %v9386_v35 = vadd.f32 %v9385_v28, %v11407_v23  ;;  %4352 = vst [vmem:[#allocation2 + $0x6c] sm:$0xf] %v4351_v53  ;;  %9135 = vmatprep.mubr.bf16.mxu1 %v11671_v32  ;;  %v4749_v20 = vor.u32 %v4748_v52, %v4745_v27  ;;  %v4762_v3 = vshll.u32 %v4585_v63, 16  ;;  %v9868_v23 = vld [vmem:[#allocation10 + $0x1c0] sm:$0xff]   ;;  %v7956_v62 = vrot.slane %v5162_v25, 9  ;;  %v11684_v57 = vpop.f32.mrb[146].mxu0  ;;  %8687 = vmatpush3.bf16.msra.mxu0 %v9864_v61 }
 0x29f   : > { %v8116_v39 = vpack.c.bf16 %v3863_v7, %v3863_v7  ;;  %v4754_v59 = vrot.slane %v4752_v56, 5  ;;  %v4758_v45 = vrot.slane %v4756_v38, 4  ;;  %v9867_v43 = vld [vmem:[#allocation10 + $0x30] sm:$0xff]   ;;  %8688 = vmatprep.subr.bf16.mxu0 %v9866_v2  ;;  %8812 = vmatprep.subr.bf16.mxu1 %v9868_v23  ;;  %v9393_v52 = vadd.f32 %v8479_v16, %v11314_v42  ;;  %v11691_v38 = vpop.f32.mrb[147].mxu0  ;;  %v9871_v42 = vld [vmem:[#allocation10 + $0x38] sm:$0xff]  }
 0x2a0   : > { %v3832_v1 = vadd.f32 %v11662_v41, %v9386_v35  ;;  %v4750_v7 = vrot.slane %v4749_v20, 4  ;;  %v4764_v63 = vrot.slane %v4762_v3, 5  ;;  %v5296_v53 = vrot.slane %v5163_v13, 5 }
 0x2a1   : > { %v4119_v4 = vshrl.u32 %v8116_v39, 16  ;;  %v4122_v28 = vshll.u32 %v8116_v39, 16  ;;  %v4759_v27 = vor.u32 %v4758_v45, %v4754_v59  ;;  %v5299_v56 = vrot.slane %v5164_v17, 5  ;;  %v4354_v39 = vld [vmem:[#allocation2 + $0x74] sm:$0x1] }
 0x2a2   : > { %v3864_v30 = vmax.f32 %v3832_v1, 0.0  ;;  %v4755_v25 = vsel %vm10396_vm11, %v4750_v7, %v4754_v59  ;;  %v8482_v61 = vadd.f32 %v11615_v49, %v11607_v19  ;;  %v9394_v3 = vadd.f32 %v9393_v52, %v11417_v11  ;;  %8689 = vmatpush3.bf16.msra.mxu0 %v9867_v43  ;;  %v4586_v59 = vld [vmem:[#allocation2 + $0x48] sm:$0xf]  ;;  %v4587_v11 = vld [vmem:[#allocation2 + $0x4c] sm:$0xf]  ;;  %v9834_v52 = vld [vmem:[#allocation2 + $0x3c] sm:$0xff]  }
 0x2a3   : > { %v4121_v35 = vrot.slane %v4119_v4, 7  ;;  %v4760_v2 = vrot.slane %v4759_v27, 4  ;;  %v5297_v23 = vsel %vm10794_vm14, %v7956_v62, %v5296_v53  ;;  %v5298_v1 = vrot.slane %v5296_v53, 4  ;;  %8690 = vmatprep.subr.bf16.mxu0 %v9869_v6 }
 0x2a4   : > { %v8117_v20 = vpack.c.bf16 %v3864_v30, %v3864_v30  ;;  %v9405_v17 = vadd.f32 %v8482_v61, %v11326_v40  ;;  %v3833_v4 = vadd.f32 %v11662_v41, %v9394_v3  ;;  %v11700_v7 = vpop.f32.mrb[148].mxu0  ;;  %v4357_v30 = vld [vmem:[#allocation2 + $0x78] sm:$0xf]  ;;  %v4780_v61 = vshrl.u32 %v4587_v11, 16 }
 0x2a5   : > { %v4124_v13 = vor.u32 %v4122_v28, %v4121_v35  ;;  %v4126_v16 = vrot.slane %v4121_v35, 4  ;;  %v4765_v45 = vsel %vm10396_vm11, %v4760_v2, %v4764_v63  ;;  %v5300_v28 = vsel %vm10794_vm14, %v5298_v1, %v5299_v56  ;;  %v11712_v6 = vpop.f32.mrb[149].mxu0 }
 0x2a6   : > { %v4128_v19 = vshrl.u32 %v8117_v20, 16  ;;  %v4131_v49 = vshll.u32 %v8117_v20, 16  ;;  %v11708_v43 = vcombine.low %v4755_v25, %v4765_v45  ;;  %v3865_v27 = vmax.f32 %v3833_v4, 0.0  ;;  %v11717_v53 = vpop.f32.mrb[150].mxu0  ;;  %8691 = vmatpush3.bf16.msra.mxu0 %v9871_v42 }
 0x2a7   : > { %v4125_v62 = vsel %vm10360_vm9, %v4117_v58, %v4124_v13  ;;  %v4355_v40 = vsel %vm10335_vm3, %v4126_v16, %v4354_v39  ;;  %v11714_v36 = vcombine.low %v5297_v23, %v5300_v28  ;;  %v9406_v58 = vadd.f32 %v9405_v17, %v11435_v51  ;;  %v11720_v39 = vpop.f32.mrb[151].mxu0  ;;  %v4588_v51 = vld [vmem:[#allocation2 + $0x50] sm:$0x1]  ;;  %v5165_v13 = vld [vmem:[#allocation2 + $0x54] sm:$0xe] }
 0x2a8   : > { %12942 = vst [vmem:[#allocation34_spill] sm:$0xff] %v11708_v43  ;;  %4353 = vst [vmem:[#allocation2 + $0x70] sm:$0xf] %v4125_v62  ;;  %v4130_v63 = vrot.slane %v4128_v19, 7  ;;  %5823 = vmatprep.mubr.bf16.mxu0 %v11708_v43  ;;  %v4767_v35 = vshrl.u32 %v4586_v59, 16  ;;  %v4770_v25 = vshll.u32 %v4586_v59, 16  ;;  %v8118_v3 = vpack.c.bf16 %v3865_v27, %v3865_v27 }
 0x2a9   : > { %4356 = vst [vmem:[#allocation2 + $0x74] sm:$0x1] %v4355_v40  ;;  %v4776_v56 = vshll.u32 %v4587_v11, 16  ;;  %5824 = vmatmul.mubr.bf16.gmra.mrb[176].mxu0 %v9834_v52  ;;  %9136 = vmatmul.mubr.bf16.gmra.mrb[104].mxu1 %v11714_v36  ;;  %v3834_v23 = vadd.f32 %v11662_v41, %v9406_v58  ;;  %v4782_v17 = vrot.slane %v4780_v61, 4  ;;  %v5166_v19 = vld [vmem:[#allocation2 + $0x58] sm:$0xf]  ;;  %v8485_v28 = vadd.f32 %v11625_v48, %v11620_v46 }
 0x2aa   : > { %v4133_v20 = vor.u32 %v4131_v49, %v4130_v63  ;;  %v4134_v2 = vrot.slane %v4130_v63, 4  ;;  %v4769_v16 = vrot.slane %v4767_v35, 4  ;;  %v4772_v42 = vrot.slane %v4770_v25, 5  ;;  %v4361_v25 = vld [vmem:[#allocation2 + $0x80] sm:$0x1] }
 0x2ab   : > { %v4778_v1 = vrot.slane %v4776_v56, 5  ;;  %v4136_v45 = vshrl.u32 %v8118_v3, 16  ;;  %v4139_v4 = vshll.u32 %v8118_v3, 16  ;;  %v3866_v49 = vmax.f32 %v3834_v23, 0.0 }
 0x2ac   : > { %v4358_v59 = vsel %vm10371_vm10, %v4133_v20, %v4357_v30  ;;  %v4773_v11 = vor.u32 %v4772_v42, %v4769_v16  ;;  %v4786_v40 = vshll.u32 %v4588_v51, 16  ;;  %v7957_v52 = vrot.slane %v5165_v13, 9  ;;  %v11728_v35 = vpop.f32.mrb[152].mxu0  ;;  %v5167_v51 = vld [vmem:[#allocation2 + $0x5c] sm:$0x1] }
 0x2ad   : > { %4359 = vst [vmem:[#allocation2 + $0x78] sm:$0xf] %v4358_v59  ;;  %v4783_v62 = vor.u32 %v4782_v17, %v4778_v1  ;;  %v4138_v63 = vrot.slane %v4136_v45, 7  ;;  %v8119_v27 = vpack.c.bf16 %v3866_v49, %v3866_v49  ;;  %v5303_v58 = vrot.slane %v5166_v19, 5  ;;  %v11731_v17 = vpop.f32.mrb[153].mxu0 }
 0x2ae   : > { %v4774_v56 = vrot.slane %v4773_v11, 4  ;;  %v4788_v30 = vrot.slane %v4786_v40, 5  ;;  %v9413_v20 = vadd.f32 %v8485_v28, %v11333_v21  ;;  %v4589_v59 = vld [vmem:[#allocation2 + $0x54] sm:$0xf]  ;;  %v11748_v11 = vpop.f32.mrb[154].mxu0  ;;  %v9835_v40 = vld [vmem:[#allocation2 + $0x48] sm:$0xff]  }
 0x2af   : > { %v4784_v61 = vrot.slane %v4783_v62, 4  ;;  %v4141_v3 = vor.u32 %v4139_v4, %v4138_v63  ;;  %v4143_v23 = vrot.slane %v4138_v63, 4  ;;  %v4145_v16 = vshrl.u32 %v8119_v27, 16 }
 0x2b0   : > { %v4148_v42 = vshll.u32 %v8119_v27, 16  ;;  %v4779_v46 = vsel %vm10396_vm11, %v4774_v56, %v4778_v1  ;;  %v9414_v13 = vadd.f32 %v9413_v20, %v11448_v55  ;;  %v5304_v19 = vsel %vm10794_vm14, %v7957_v52, %v5303_v58  ;;  %v4590_v1 = vld [vmem:[#allocation2 + $0x58] sm:$0xf]  ;;  %v4364_v55 = vld [vmem:[#allocation2 + $0x84] sm:$0xf]  ;;  %v11753_v27 = vpop.f32.mrb[155].mxu0 }
 0x2b1   : > { %v4789_v48 = vsel %vm10396_vm11, %v4784_v61, %v4788_v30  ;;  %v4142_v21 = vsel %vm10360_vm9, %v4134_v2, %v4141_v3  ;;  %v4362_v45 = vsel %vm10335_vm3, %v4143_v23, %v4361_v25  ;;  %v11744_v4 = vrot.slane %v4145_v16, 7  ;;  %v4591_v56 = vld [vmem:[#allocation2 + $0x5c] sm:$0x1]  ;;  %v12944_v3 = vld [vmem:[#allocation21_spill] sm:$0xff] }
 0x2b2   : > { %v11746_v49 = vcombine.low %v4779_v46, %v4789_v48  ;;  %4360 = vst [vmem:[#allocation2 + $0x7c] sm:$0xf] %v4142_v21  ;;  %4363 = vst [vmem:[#allocation2 + $0x80] sm:$0x1] %v4362_v45  ;;  %v3835_v62 = vadd.f32 %v11662_v41, %v9414_v13  ;;  %v5305_v28 = vrot.slane %v5303_v58, 4  ;;  %v5306_v63 = vrot.slane %v5167_v51, 5 }
 0x2b3   : > { %v8488_v2 = vadd.f32 %v11640_v15, %v11636_v14  ;;  %v4150_v52 = vor.u32 %v4148_v42, %v11744_v4  ;;  %v4151_v25 = vrot.slane %v11744_v4, 4  ;;  %v4791_v61 = vshrl.u32 %v4589_v59, 16  ;;  %v5168_v14 = vld [vmem:[#allocation2 + $0x60] sm:$0xe] }
 0x2b4   : > { %12943 = vst [vmem:[#allocation35_spill] sm:$0xff] %v11746_v49  ;;  %5831 = vmatprep.mubr.bf16.mxu0 %v11746_v49  ;;  %v4794_v30 = vshll.u32 %v4589_v59, 16  ;;  %v3867_v20 = vmax.f32 %v3835_v62, 0.0  ;;  %v5307_v58 = vsel %vm10794_vm14, %v5305_v28, %v5306_v63  ;;  %v4800_v16 = vshll.u32 %v4590_v1, 16  ;;  %v11765_v48 = vpop.f32.mrb[156].mxu0  ;;  %v12945_v59 = vld [vmem:[#allocation26_spill] sm:$0xff] }
 0x2b5   : > { %5832 = vmatmul.mubr.bf16.gmra.mrb[180].mxu0 %v9835_v40  ;;  %v9401_v23 = vadd.f32 %v8488_v2, %v12944_v3  ;;  %v4365_v15 = vsel %vm10371_vm10, %v4150_v52, %v4364_v55  ;;  %v11763_v42 = vcombine.low %v5304_v19, %v5307_v58  ;;  %v4793_v51 = vrot.slane %v4791_v61, 4  ;;  %v5169_v62 = vld [vmem:[#allocation2 + $0x64] sm:$0xf]  ;;  %v11768_v40 = vpop.f32.mrb[157].mxu0  ;;  %v5170_v55 = vld [vmem:[#allocation2 + $0x68] sm:$0x1] }
 0x2b6   : > { %v4796_v46 = vrot.slane %v4794_v30, 5  ;;  %4366 = vst [vmem:[#allocation2 + $0x84] sm:$0xf] %v4365_v15  ;;  %v8120_v13 = vpack.c.bf16 %v3867_v20, %v3867_v20  ;;  %v4802_v45 = vrot.slane %v4800_v16, 5  ;;  %v4804_v4 = vshrl.u32 %v4590_v1, 16  ;;  %v11773_v52 = vpop.f32.mrb[158].mxu0 }
 0x2b7   : > { %v9402_v21 = vadd.f32 %v9401_v23, %v12945_v59  ;;  %9139 = vmatprep.mubr.bf16.mxu1 %v11763_v42  ;;  %v4810_v63 = vshll.u32 %v4591_v56, 16  ;;  %v8491_v19 = vadd.f32 %v11655_v34, %v11647_v0  ;;  %v7958_v2 = vrot.slane %v5168_v14, 9  ;;  %v11776_v1 = vpop.f32.mrb[159].mxu0  ;;  %v12946_v16 = vld [vmem:[#allocation24_spill] sm:$0xff]  ;;  %v4592_v34 = vld [vmem:[#allocation2 + $0x60] sm:$0xf] }
 0x2b8   : > { %v4797_v28 = vor.u32 %v4796_v46, %v4793_v51  ;;  %v4153_v61 = vshrl.u32 %v8120_v13, 16  ;;  %v4156_v30 = vshll.u32 %v8120_v13, 16  ;;  %v4806_v58 = vrot.slane %v4804_v4, 4  ;;  %v4368_v14 = vld [vmem:[#allocation2 + $0x8c] sm:$0x1]  ;;  %v12947_v13 = vld [vmem:[#allocation31_spill] sm:$0xff] }
 0x2b9   : > { %v3836_v20 = vadd.f32 %v11662_v41, %v9402_v21  ;;  %v4812_v23 = vrot.slane %v4810_v63, 5  ;;  %v9409_v15 = vadd.f32 %v8491_v19, %v12946_v16  ;;  %v5310_v51 = vrot.slane %v5169_v62, 5 }
 0x2ba   : > { %v4798_v3 = vrot.slane %v4797_v28, 4  ;;  %v4155_v56 = vrot.slane %v4153_v61, 7  ;;  %v4807_v59 = vor.u32 %v4806_v58, %v4802_v45  ;;  %v5313_v0 = vrot.slane %v5170_v55, 5 }
 0x2bb   : > { %v3868_v46 = vmax.f32 %v3836_v20, 0.0  ;;  %v9410_v43 = vadd.f32 %v9409_v15, %v12947_v13  ;;  %v5311_v21 = vsel %vm10794_vm14, %v7958_v2, %v5310_v51  ;;  %v5312_v4 = vrot.slane %v5310_v51, 4  ;;  %v12948_v51 = vld [vmem:[#allocation23_spill] sm:$0xff] }
 0x2bc   : > { %v4803_v49 = vsel %vm10396_vm11, %v4798_v3, %v4802_v45  ;;  %v4158_v28 = vor.u32 %v4156_v30, %v4155_v56  ;;  %v4160_v63 = vrot.slane %v4155_v56, 4  ;;  %v4808_v19 = vrot.slane %v4807_v59, 4  ;;  %v4593_v3 = vld [vmem:[#allocation2 + $0x64] sm:$0xf] }
 0x2bd   : > { %v8121_v10 = vpack.c.bf16 %v3868_v46, %v3868_v46  ;;  %v3837_v62 = vadd.f32 %v11662_v41, %v9410_v43  ;;  %v5314_v55 = vsel %vm10794_vm14, %v5312_v4, %v5313_v0  ;;  %v8494_v61 = vadd.f32 %v11681_v29, %v11676_v12  ;;  %v4594_v29 = vld [vmem:[#allocation2 + $0x68] sm:$0x1]  ;;  %v4371_v46 = vld [vmem:[#allocation2 + $0x90] sm:$0xf] }
 0x2be   : > { %v4815_v20 = vshrl.u32 %v4592_v34, 16  ;;  %v4159_v45 = vsel %vm10360_vm9, %v4151_v25, %v4158_v28  ;;  %v4369_v2 = vsel %vm10335_vm3, %v4160_v63, %v4368_v14  ;;  %v4813_v43 = vsel %vm10396_vm11, %v4808_v19, %v4812_v23  ;;  %v5171_v28 = vld [vmem:[#allocation2 + $0x6c] sm:$0xe] }
 0x2bf   : > { %v4162_v58 = vshrl.u32 %v8121_v10, 16  ;;  %v4165_v30 = vshll.u32 %v8121_v10, 16  ;;  %4367 = vst [vmem:[#allocation2 + $0x88] sm:$0xf] %v4159_v45  ;;  %4370 = vst [vmem:[#allocation2 + $0x8c] sm:$0x1] %v4369_v2  ;;  %v11795_v15 = vcombine.low %v5311_v21, %v5314_v55  ;;  %v9421_v12 = vadd.f32 %v8494_v61, %v12948_v51 }
 0x2c0   : > { %v3869_v16 = vmax.f32 %v3837_v62, 0.0  ;;  %v11798_v25 = vcombine.low %v4803_v49, %v4813_v43  ;;  %v4817_v59 = vrot.slane %v4815_v20, 4  ;;  %v4818_v0 = vshll.u32 %v4592_v34, 16  ;;  %v9836_v10 = vld [vmem:[#allocation2 + $0x54] sm:$0xff]   ;;  %v5172_v55 = vld [vmem:[#allocation2 + $0x70] sm:$0xf] }
 0x2c1   : > { %v4164_v56 = vrot.slane %v4162_v58, 7  ;;  %9140 = vmatmul.mubr.bf16.gmra.mrb[108].mxu1 %v11795_v15  ;;  %v9422_v13 = vadd.f32 %v9421_v12, %v11458_v9  ;;  %v4824_v4 = vshll.u32 %v4593_v3, 16  ;;  %v4828_v23 = vshrl.u32 %v4593_v3, 16  ;;  %v5173_v45 = vld [vmem:[#allocation2 + $0x74] sm:$0x1] }
 0x2c2   : > { %12949 = vst [vmem:[#allocation21_spill] sm:$0xff] %v11798_v25  ;;  %v8122_v14 = vpack.c.bf16 %v3869_v16, %v3869_v16  ;;  %5839 = vmatprep.mubr.bf16.mxu0 %v11798_v25  ;;  %v4820_v19 = vrot.slane %v4818_v0, 5  ;;  %v4834_v62 = vshll.u32 %v4594_v29, 16  ;;  %v8497_v16 = vadd.f32 %v11691_v38, %v11684_v57  ;;  %v4375_v12 = vld [vmem:[#allocation2 + $0x98] sm:$0x1] }
 0x2c3   : > { %v4167_v21 = vor.u32 %v4165_v30, %v4164_v56  ;;  %v4168_v63 = vrot.slane %v4164_v56, 4  ;;  %5840 = vmatmul.mubr.bf16.gmra.mrb[184].mxu0 %v9836_v10  ;;  %v3838_v34 = vadd.f32 %v11662_v41, %v9422_v13  ;;  %v4826_v20 = vrot.slane %v4824_v4, 5  ;;  %v12950_v25 = vld [vmem:[#allocation28_spill] sm:$0xff]  ;;  %v4595_v57 = vld [vmem:[#allocation2 + $0x6c] sm:$0xf] }
 0x2c4   : > { %v4170_v49 = vshrl.u32 %v8122_v14, 16  ;;  %v4173_v61 = vshll.u32 %v8122_v14, 16  ;;  %v4821_v2 = vor.u32 %v4820_v19, %v4817_v59  ;;  %v4830_v58 = vrot.slane %v4828_v23, 4 }
 0x2c5   : > { %v4372_v9 = vsel %vm10371_vm10, %v4167_v21, %v4371_v46  ;;  %v4836_v3 = vrot.slane %v4834_v62, 5  ;;  %v3870_v43 = vmax.f32 %v3838_v34, 0.0  ;;  %v7959_v51 = vrot.slane %v5171_v28, 9 }
 0x2c6   : > { %4373 = vst [vmem:[#allocation2 + $0x90] sm:$0xf] %v4372_v9  ;;  %v4172_v30 = vrot.slane %v4170_v49, 7  ;;  %v4822_v29 = vrot.slane %v4821_v2, 4  ;;  %v4831_v56 = vor.u32 %v4830_v58, %v4826_v20  ;;  %v5317_v0 = vrot.slane %v5172_v55, 5  ;;  %v11828_v2 = vld [vmem:[#allocation2 + $0x60] sm:$0xff]  }
 0x2c7   : > { %v5320_v14 = vrot.slane %v5173_v45, 5  ;;  %v8123_v4 = vpack.c.bf16 %v3870_v43, %v3870_v43  ;;  %v9429_v46 = vadd.f32 %v8497_v16, %v12950_v25  ;;  %v4596_v49 = vld [vmem:[#allocation2 + $0x70] sm:$0xf]  ;;  %v4378_v45 = vld [vmem:[#allocation2 + $0x9c] sm:$0xf]  ;;  %v12951_v43 = vld [vmem:[#allocation22_spill] sm:$0xff] }
 0x2c8   : > { %v4175_v10 = vor.u32 %v4173_v61, %v4172_v30  ;;  %v4177_v13 = vrot.slane %v4172_v30, 4  ;;  %v4827_v59 = vsel %vm10396_vm11, %v4822_v29, %v4826_v20  ;;  %v4832_v23 = vrot.slane %v4831_v56, 4  ;;  %v4597_v16 = vld [vmem:[#allocation2 + $0x74] sm:$0x1]  ;;  %v5174_v29 = vld [vmem:[#allocation2 + $0x78] sm:$0xe] }
 0x2c9   : > { %v5318_v21 = vsel %vm10794_vm14, %v7959_v51, %v5317_v0  ;;  %v5319_v19 = vrot.slane %v5317_v0, 4  ;;  %v4179_v62 = vshrl.u32 %v8123_v4, 16  ;;  %v4182_v55 = vshll.u32 %v8123_v4, 16 }
 0x2ca   : > { %v4176_v38 = vsel %vm10360_vm9, %v4168_v63, %v4175_v10  ;;  %v4376_v28 = vsel %vm10335_vm3, %v4177_v13, %v4375_v12  ;;  %v4837_v25 = vsel %vm10396_vm11, %v4832_v23, %v4836_v3  ;;  %v9430_v61 = vadd.f32 %v9429_v46, %v11474_v26  ;;  %v5175_v46 = vld [vmem:[#allocation2 + $0x7c] sm:$0xf] }
 0x2cb   : > { %4374 = vst [vmem:[#allocation2 + $0x94] sm:$0xf] %v4176_v38  ;;  %4377 = vst [vmem:[#allocation2 + $0x98] sm:$0x1] %v4376_v28  ;;  %v5321_v34 = vsel %vm10794_vm14, %v5319_v19, %v5320_v14  ;;  %v8500_v20 = vadd.f32 %v11712_v6, %v11700_v7  ;;  %v11824_v63 = vrot.slane %v4179_v62, 7  ;;  %v11826_v9 = vcombine.low %v4827_v59, %v4837_v25 }
 0x2cc   : > { %v11830_v58 = vcombine.low %v5318_v21, %v5321_v34  ;;  %v4839_v30 = vshrl.u32 %v4595_v57, 16  ;;  %v3839_v3 = vadd.f32 %v11662_v41, %v9430_v61  ;;  %v4842_v51 = vshll.u32 %v4595_v57, 16  ;;  %v5176_v61 = vld [vmem:[#allocation2 + $0x80] sm:$0x1] }
 0x2cd   : > { %v9417_v26 = vadd.f32 %v8500_v20, %v12951_v43  ;;  %v4848_v12 = vshll.u32 %v4596_v49, 16  ;;  %v4184_v7 = vor.u32 %v4182_v55, %v11824_v63  ;;  %v4185_v6 = vrot.slane %v11824_v63, 4  ;;  %5847 = vmatprep.mubr.bf16.mxu0 %v11826_v9 }
 0x2ce   : > { %9143 = vmatprep.mubr.bf16.mxu1 %v11830_v58  ;;  %v4841_v56 = vrot.slane %v4839_v30, 4  ;;  %v4852_v0 = vshrl.u32 %v4596_v49, 16  ;;  %v3871_v14 = vmax.f32 %v3839_v3, 0.0  ;;  %5848 = vmatmul.mubr.bf16.gmra.mrb[188].mxu0 %v11828_v2  ;;  %v4844_v13 = vrot.slane %v4842_v51, 5  ;;  %v4598_v3 = vld [vmem:[#allocation2 + $0x78] sm:$0xf] }
 0x2cf   : > { %v9418_v10 = vadd.f32 %v9417_v26, %v11456_v60  ;;  %v4850_v4 = vrot.slane %v4848_v12, 5  ;;  %v4379_v59 = vsel %vm10371_vm10, %v4184_v7, %v4378_v45  ;;  %v4858_v21 = vshll.u32 %v4597_v16, 16  ;;  %v12952_v60 = vld [vmem:[#allocation27_spill] sm:$0xff]  ;;  %v4382_v7 = vld [vmem:[#allocation2 + $0xa4] sm:$0x1] }
 0x2d0   : > { %v4854_v23 = vrot.slane %v4852_v0, 4  ;;  %v8503_v19 = vadd.f32 %v11720_v39, %v11717_v53  ;;  %4380 = vst [vmem:[#allocation2 + $0x9c] sm:$0xf] %v4379_v59  ;;  %v8124_v57 = vpack.c.bf16 %v3871_v14, %v3871_v14  ;;  %v4845_v28 = vor.u32 %v4844_v13, %v4841_v56 }
 0x2d1   : > { %v3840_v38 = vadd.f32 %v11662_v41, %v9418_v10  ;;  %v7960_v62 = vrot.slane %v5174_v29, 9  ;;  %v4860_v49 = vrot.slane %v4858_v21, 5  ;;  %v5324_v34 = vrot.slane %v5175_v46, 5 }
 0x2d2   : > { %v4855_v55 = vor.u32 %v4854_v23, %v4850_v4  ;;  %v9425_v25 = vadd.f32 %v8503_v19, %v12952_v60  ;;  %v4187_v20 = vshrl.u32 %v8124_v57, 16  ;;  %v4190_v63 = vshll.u32 %v8124_v57, 16  ;;  %v12953_v19 = vld [vmem:[#allocation25_spill] sm:$0xff] }
 0x2d3   : > { %v3872_v45 = vmax.f32 %v3840_v38, 0.0  ;;  %v4846_v30 = vrot.slane %v4845_v28, 4  ;;  %v5325_v39 = vsel %vm10794_vm14, %v7960_v62, %v5324_v34  ;;  %v5326_v26 = vrot.slane %v5324_v34, 4  ;;  %v4599_v38 = vld [vmem:[#allocation2 + $0x7c] sm:$0xf]  ;;  %v11865_v62 = vld [vmem:[#allocation2 + $0x6c] sm:$0xff]  }
 0x2d4   : > { %v4856_v43 = vrot.slane %v4855_v55, 4  ;;  %v9426_v53 = vadd.f32 %v9425_v25, %v11470_v50  ;;  %v4189_v16 = vrot.slane %v4187_v20, 7  ;;  %v5327_v29 = vrot.slane %v5176_v61, 5  ;;  %v4600_v61 = vld [vmem:[#allocation2 + $0x80] sm:$0x1] }
 0x2d5   : > { %v8125_v51 = vpack.c.bf16 %v3872_v45, %v3872_v45  ;;  %v4851_v12 = vsel %vm10396_vm11, %v4846_v30, %v4850_v4  ;;  %v8506_v14 = vadd.f32 %v11731_v17, %v11728_v35  ;;  %v4863_v50 = vshrl.u32 %v4598_v3, 16 }
 0x2d6   : > { %v4861_v56 = vsel %vm10396_vm11, %v4856_v43, %v4860_v49  ;;  %v3841_v0 = vadd.f32 %v11662_v41, %v9426_v53  ;;  %v4192_v10 = vor.u32 %v4190_v63, %v4189_v16  ;;  %v4194_v13 = vrot.slane %v4189_v16, 4  ;;  %v4385_v49 = vld [vmem:[#allocation2 + $0xa8] sm:$0xf]  ;;  %v5177_v43 = vld [vmem:[#allocation2 + $0x84] sm:$0xe] }
 0x2d7   : > { %v4196_v46 = vshrl.u32 %v8125_v51, 16  ;;  %v4199_v59 = vshll.u32 %v8125_v51, 16  ;;  %v11856_v23 = vcombine.low %v4851_v12, %v4861_v56  ;;  %v5328_v4 = vsel %vm10794_vm14, %v5326_v26, %v5327_v29  ;;  %v5178_v51 = vld [vmem:[#allocation2 + $0x88] sm:$0xf] }
 0x2d8   : > { %v3873_v21 = vmax.f32 %v3841_v0, 0.0  ;;  %v9437_v57 = vadd.f32 %v8506_v14, %v12953_v19  ;;  %v4193_v28 = vsel %vm10360_vm9, %v4185_v6, %v4192_v10  ;;  %v4383_v35 = vsel %vm10335_vm3, %v4194_v13, %v4382_v7 }
 0x2d9   : > { %v4198_v17 = vrot.slane %v4196_v46, 7  ;;  %v11867_v55 = vcombine.low %v5325_v39, %v5328_v4  ;;  %4381 = vst [vmem:[#allocation2 + $0xa0] sm:$0xf] %v4193_v28  ;;  %4384 = vst [vmem:[#allocation2 + $0xa4] sm:$0x1] %v4383_v35  ;;  %5855 = vmatprep.mubr.bf16.mxu0 %v11856_v23  ;;  %v4865_v34 = vrot.slane %v4863_v50, 4  ;;  %v8509_v14 = vadd.f32 %v11753_v27, %v11748_v11 }
 0x2da   : > { %v8126_v60 = vpack.c.bf16 %v3873_v21, %v3873_v21  ;;  %v9438_v25 = vadd.f32 %v9437_v57, %v11484_v31  ;;  %v4866_v20 = vshll.u32 %v4598_v3, 16  ;;  %5856 = vmatmul.mubr.bf16.gmra.mrb[192].mxu0 %v11865_v62  ;;  %v4872_v45 = vshll.u32 %v4599_v38, 16  ;;  %v4389_v50 = vld [vmem:[#allocation2 + $0xb0] sm:$0x1]  ;;  %v12954_v35 = vld [vmem:[#allocation30_spill] sm:$0xff] }
 0x2db   : > { %v4201_v6 = vor.u32 %v4199_v59, %v4198_v17  ;;  %v4202_v63 = vrot.slane %v4198_v17, 4  ;;  %9144 = vmatmul.mubr.bf16.gmra.mrb[112].mxu1 %v11867_v55  ;;  %v4876_v30 = vshrl.u32 %v4599_v38, 16  ;;  %v4882_v29 = vshll.u32 %v4600_v61, 16  ;;  %v5179_v38 = vld [vmem:[#allocation2 + $0x8c] sm:$0x1] }
 0x2dc   : > { %v4204_v53 = vshrl.u32 %v8126_v60, 16  ;;  %v4207_v39 = vshll.u32 %v8126_v60, 16  ;;  %v3842_v26 = vadd.f32 %v11662_v41, %v9438_v25  ;;  %v4868_v16 = vrot.slane %v4866_v20, 5  ;;  %v4601_v25 = vld [vmem:[#allocation2 + $0x84] sm:$0xf] }
 0x2dd   : > { %v4386_v31 = vsel %vm10371_vm10, %v4201_v6, %v4385_v49  ;;  %v4874_v12 = vrot.slane %v4872_v45, 5  ;;  %v4878_v3 = vrot.slane %v4876_v30, 4  ;;  %v4884_v13 = vrot.slane %v4882_v29, 5  ;;  %v4602_v20 = vld [vmem:[#allocation2 + $0x88] sm:$0xf]  ;;  %v12955_v30 = vld [vmem:[#allocation16_spill] sm:$0xff] }
 0x2de   : > { %4387 = vst [vmem:[#allocation2 + $0xa8] sm:$0xf] %v4386_v31  ;;  %v4206_v7 = vrot.slane %v4204_v53, 7  ;;  %v3874_v56 = vmax.f32 %v3842_v26, 0.0  ;;  %v4869_v0 = vor.u32 %v4868_v16, %v4865_v34  ;;  %v7961_v46 = vrot.slane %v5177_v43, 9 }
 0x2df   : > { %v4879_v10 = vor.u32 %v4878_v3, %v4874_v12  ;;  %v5331_v59 = vrot.slane %v5178_v51, 5  ;;  %v9445_v17 = vadd.f32 %v8509_v14, %v12954_v35  ;;  %v5334_v53 = vrot.slane %v5179_v38, 5  ;;  %v11897_v3 = vld [vmem:[#allocation2 + $0x78] sm:$0xff]   ;;  %v4603_v29 = vld [vmem:[#allocation2 + $0x8c] sm:$0x1] }
 0x2e0   : > { %v4209_v21 = vor.u32 %v4207_v39, %v4206_v7  ;;  %v4211_v4 = vrot.slane %v4206_v7, 4  ;;  %v8127_v19 = vpack.c.bf16 %v3874_v56, %v3874_v56  ;;  %v4870_v57 = vrot.slane %v4869_v0, 4 }
 0x2e1   : > { %v4880_v28 = vrot.slane %v4879_v10, 4  ;;  %v5332_v49 = vsel %vm10794_vm14, %v7961_v46, %v5331_v59  ;;  %v5333_v60 = vrot.slane %v5331_v59, 4  ;;  %v9446_v43 = vadd.f32 %v9445_v17, %v12955_v30  ;;  %v5180_v10 = vld [vmem:[#allocation2 + $0x90] sm:$0xe] }
 0x2e2   : > { %v4210_v11 = vsel %vm10360_vm9, %v4202_v63, %v4209_v21  ;;  %v4390_v27 = vsel %vm10335_vm3, %v4211_v4, %v4389_v50  ;;  %v4213_v61 = vshrl.u32 %v8127_v19, 16  ;;  %v4216_v34 = vshll.u32 %v8127_v19, 16  ;;  %v4392_v63 = vld [vmem:[#allocation2 + $0xb4] sm:$0xf] }
 0x2e3   : > { %4388 = vst [vmem:[#allocation2 + $0xac] sm:$0xf] %v4210_v11  ;;  %4391 = vst [vmem:[#allocation2 + $0xb0] sm:$0x1] %v4390_v27  ;;  %v4875_v6 = vsel %vm10396_vm11, %v4870_v57, %v4874_v12  ;;  %v4885_v45 = vsel %vm10396_vm11, %v4880_v28, %v4884_v13  ;;  %v8512_v16 = vadd.f32 %v11768_v40, %v11765_v48  ;;  %v4887_v51 = vshrl.u32 %v4601_v25, 16  ;;  %v12956_v48 = vld [vmem:[#allocation32_spill] sm:$0xff] }
 0x2e4   : > { %v11890_v39 = vrot.slane %v4213_v61, 7  ;;  %v11892_v26 = vcombine.low %v4875_v6, %v4885_v45  ;;  %v3843_v31 = vadd.f32 %v11662_v41, %v9446_v43  ;;  %v5335_v12 = vsel %vm10794_vm14, %v5333_v60, %v5334_v53  ;;  %v5181_v4 = vld [vmem:[#allocation2 + $0x94] sm:$0xf]  ;;  %v12957_v57 = vld [vmem:[#allocation18_spill] sm:$0xff]  ;;  %v12958_v53 = vld [vmem:[#allocation29_spill] sm:$0xff] }
 0x2e5   : > { %v4890_v7 = vshll.u32 %v4601_v25, 16  ;;  %v4896_v56 = vshll.u32 %v4602_v20, 16  ;;  %v11904_v50 = vcombine.low %v5332_v49, %v5335_v12  ;;  %v9433_v40 = vadd.f32 %v8512_v16, %v12956_v48  ;;  %v12959_v12 = vld [vmem:[#allocation17_spill] sm:$0xff]  ;;  %v5186_v33 = vld [vmem:[#allocation2 + $0xa8] sm:$0xe] }
 0x2e6   : > { %v4218_v0 = vor.u32 %v4216_v34, %v11890_v39  ;;  %v4219_v14 = vrot.slane %v11890_v39, 4  ;;  %5863 = vmatprep.mubr.bf16.mxu0 %v11892_v26  ;;  %v3875_v13 = vmax.f32 %v3843_v31, 0.0  ;;  %v4889_v46 = vrot.slane %v4887_v51, 4  ;;  %v5182_v34 = vld [vmem:[#allocation2 + $0x98] sm:$0x1] }
 0x2e7   : > { %5864 = vmatmul.mubr.bf16.gmra.mrb[196].mxu0 %v11897_v3  ;;  %v4892_v59 = vrot.slane %v4890_v7, 5  ;;  %v4898_v21 = vrot.slane %v4896_v56, 5  ;;  %9147 = vmatprep.mubr.bf16.mxu1 %v11904_v50  ;;  %v9434_v38 = vadd.f32 %v9433_v40, %v12957_v57  ;;  %v4900_v28 = vshrl.u32 %v4602_v20, 16  ;;  %v4604_v20 = vld [vmem:[#allocation2 + $0x90] sm:$0xf] }
 0x2e8   : > { %v4393_v19 = vsel %vm10371_vm10, %v4218_v0, %v4392_v63  ;;  %v4906_v35 = vshll.u32 %v4603_v29, 16  ;;  %v8128_v17 = vpack.c.bf16 %v3875_v13, %v3875_v13  ;;  %v8515_v60 = vadd.f32 %v11776_v1, %v11773_v52  ;;  %v4396_v56 = vld [vmem:[#allocation2 + $0xbc] sm:$0x1] }
 0x2e9   : > { %4394 = vst [vmem:[#allocation2 + $0xb4] sm:$0xf] %v4393_v19  ;;  %v4893_v49 = vor.u32 %v4892_v59, %v4889_v46  ;;  %v7962_v25 = vrot.slane %v5180_v10, 9  ;;  %v3844_v11 = vadd.f32 %v11662_v41, %v9434_v38  ;;  %v4902_v27 = vrot.slane %v4900_v28, 4  ;;  %v4605_v19 = vld [vmem:[#allocation2 + $0x94] sm:$0xf] }
 0x2ea   : > { %v4908_v61 = vrot.slane %v4906_v35, 5  ;;  %v5338_v6 = vrot.slane %v5181_v4, 5  ;;  %v4221_v45 = vshrl.u32 %v8128_v17, 16  ;;  %v4224_v30 = vshll.u32 %v8128_v17, 16  ;;  %v4606_v35 = vld [vmem:[#allocation2 + $0x98] sm:$0x1] }
 0x2eb   : > { %v4894_v43 = vrot.slane %v4893_v49, 4  ;;  %v9441_v39 = vadd.f32 %v8515_v60, %v12958_v53  ;;  %v3876_v63 = vmax.f32 %v3844_v11, 0.0  ;;  %v4903_v16 = vor.u32 %v4902_v27, %v4898_v21  ;;  %v5183_v17 = vld [vmem:[#allocation2 + $0x9c] sm:$0xe]  ;;  %v11934_v27 = vld [vmem:[#allocation2 + $0x84] sm:$0xff]  }
 0x2ec   : > { %v5339_v51 = vsel %vm10794_vm14, %v7962_v25, %v5338_v6  ;;  %v5340_v31 = vrot.slane %v5338_v6, 4  ;;  %v4223_v52 = vrot.slane %v4221_v45, 7  ;;  %v5341_v7 = vrot.slane %v5182_v34, 5  ;;  %v4612_v5 = vld [vmem:[#allocation2 + $0xb0] sm:$0x1] }
 0x2ed   : > { %v4899_v1 = vsel %vm10396_vm11, %v4894_v43, %v4898_v21  ;;  %v9442_v29 = vadd.f32 %v9441_v39, %v12959_v12  ;;  %v8129_v0 = vpack.c.bf16 %v3876_v63, %v3876_v63  ;;  %v4904_v48 = vrot.slane %v4903_v16, 4  ;;  %v5185_v39 = vld [vmem:[#allocation2 + $0xa4] sm:$0x1] }
 0x2ee   : > { %v4911_v40 = vshrl.u32 %v4604_v20, 16  ;;  %v4914_v10 = vshll.u32 %v4604_v20, 16  ;;  %v4226_v13 = vor.u32 %v4224_v30, %v4223_v52  ;;  %v4228_v46 = vrot.slane %v4223_v52, 4  ;;  %v5184_v30 = vld [vmem:[#allocation2 + $0xa0] sm:$0xf] }
 0x2ef   : > { %v3845_v59 = vadd.f32 %v11662_v41, %v9442_v29  ;;  %v5342_v4 = vsel %vm10794_vm14, %v5340_v31, %v5341_v7  ;;  %v4230_v57 = vshrl.u32 %v8129_v0, 16  ;;  %v4233_v38 = vshll.u32 %v8129_v0, 16  ;;  %v4399_v41 = vld [vmem:[#allocation2 + $0xc0] sm:$0xf]  ;;  %v4607_v52 = vld [vmem:[#allocation2 + $0x9c] sm:$0xf] }
 0x2f0   : > { %v4909_v21 = vsel %vm10396_vm11, %v4904_v48, %v4908_v61  ;;  %v11926_v28 = vcombine.low %v5339_v51, %v5342_v4  ;;  %v4227_v49 = vsel %vm10360_vm9, %v4219_v14, %v4226_v13  ;;  %v4397_v60 = vsel %vm10335_vm3, %v4228_v46, %v4396_v56  ;;  %v4608_v56 = vld [vmem:[#allocation2 + $0xa0] sm:$0xf]  ;;  %v4403_v48 = vld [vmem:[#allocation2 + $0xc8] sm:$0x1]  ;;  %v4609_v4 = vld [vmem:[#allocation2 + $0xa4] sm:$0x1] }
 0x2f1   : > { %v11932_v25 = vcombine.low %v4899_v1, %v4909_v21  ;;  %v3877_v11 = vmax.f32 %v3845_v59, 0.0  ;;  %4395 = vst [vmem:[#allocation2 + $0xb8] sm:$0xf] %v4227_v49  ;;  %4398 = vst [vmem:[#allocation2 + $0xbc] sm:$0x1] %v4397_v60  ;;  %v4232_v34 = vrot.slane %v4230_v57, 7 }
 0x2f2   : > { %9148 = vmatmul.mubr.bf16.gmra.mrb[116].mxu1 %v11926_v28  ;;  %v4913_v61 = vrot.slane %v4911_v40, 4  ;;  %v4916_v6 = vrot.slane %v4914_v10, 5  ;;  %v4920_v45 = vshll.u32 %v4605_v19, 16  ;;  %v4924_v43 = vshrl.u32 %v4605_v19, 16  ;;  %v4610_v49 = vld [vmem:[#allocation2 + $0xa8] sm:$0xf] }
 0x2f3   : > { %5871 = vmatprep.mubr.bf16.mxu0 %v11932_v25  ;;  %v8130_v14 = vpack.c.bf16 %v3877_v11, %v3877_v11  ;;  %v4930_v53 = vshll.u32 %v4606_v35, 16  ;;  %v7963_v20 = vrot.slane %v5183_v17, 9  ;;  %v4235_v63 = vor.u32 %v4233_v38, %v4232_v34 }
 0x2f4   : > { %v4236_v16 = vrot.slane %v4232_v34, 4  ;;  %5872 = vmatmul.mubr.bf16.gmra.mrb[200].mxu0 %v11934_v27  ;;  %v4917_v51 = vor.u32 %v4916_v6, %v4913_v61  ;;  %v4922_v31 = vrot.slane %v4920_v45, 5  ;;  %v4926_v29 = vrot.slane %v4924_v43, 4  ;;  %v5187_v61 = vld [vmem:[#allocation2 + $0xac] sm:$0xf] }
 0x2f5   : > { %v4238_v1 = vshrl.u32 %v8130_v14, 16  ;;  %v4241_v12 = vshll.u32 %v8130_v14, 16  ;;  %v4932_v7 = vrot.slane %v4930_v53, 5  ;;  %v4400_v0 = vsel %vm10371_vm10, %v4235_v63, %v4399_v41  ;;  %v5188_v43 = vld [vmem:[#allocation2 + $0xb0] sm:$0x1] }
 0x2f6   : > { %v4918_v40 = vrot.slane %v4917_v51, 4  ;;  %v5345_v10 = vrot.slane %v5184_v30, 5  ;;  %v5348_v13 = vrot.slane %v5185_v39, 5  ;;  %4401 = vst [vmem:[#allocation2 + $0xc0] sm:$0xf] %v4400_v0  ;;  %v4927_v59 = vor.u32 %v4926_v29, %v4922_v31  ;;  %v11953_v63 = vld [vmem:[#allocation2 + $0x90] sm:$0xff]  }
 0x2f7   : > { %v4240_v46 = vrot.slane %v4238_v1, 7  ;;  %v4935_v19 = vshrl.u32 %v4607_v52, 16  ;;  %v4938_v57 = vshll.u32 %v4607_v52, 16  ;;  %v4944_v17 = vshll.u32 %v4608_v56, 16  ;;  %v4611_v29 = vld [vmem:[#allocation2 + $0xac] sm:$0xf] }
 0x2f8   : > { %v4923_v38 = vsel %vm10396_vm11, %v4918_v40, %v4922_v31  ;;  %v5346_v21 = vsel %vm10794_vm14, %v7963_v20, %v5345_v10  ;;  %v5347_v35 = vrot.slane %v5345_v10, 4  ;;  %v4928_v11 = vrot.slane %v4927_v59, 4 }
 0x2f9   : > { %v4243_v60 = vor.u32 %v4241_v12, %v4240_v46  ;;  %v4245_v41 = vrot.slane %v4240_v46, 4  ;;  %v4937_v34 = vrot.slane %v4935_v19, 4  ;;  %v4940_v45 = vrot.slane %v4938_v57, 5  ;;  %v5190_v46 = vld [vmem:[#allocation2 + $0xb8] sm:$0xf] }
 0x2fa   : > { %v5349_v6 = vsel %vm10794_vm14, %v5347_v35, %v5348_v13  ;;  %v4946_v30 = vrot.slane %v4944_v17, 5  ;;  %v4948_v14 = vshrl.u32 %v4608_v56, 16  ;;  %v4933_v20 = vsel %vm10396_vm11, %v4928_v11, %v4932_v7  ;;  %v5189_v7 = vld [vmem:[#allocation2 + $0xb4] sm:$0xe] }
 0x2fb   : > { %v4244_v53 = vsel %vm10360_vm9, %v4236_v16, %v4243_v60  ;;  %v4404_v39 = vsel %vm10335_vm3, %v4245_v41, %v4403_v48  ;;  %v11955_v51 = vcombine.low %v5346_v21, %v5349_v6  ;;  %v11957_v31 = vcombine.low %v4923_v38, %v4933_v20  ;;  %v5191_v38 = vld [vmem:[#allocation2 + $0xbc] sm:$0x1] }
 0x2fc   : > { %4402 = vst [vmem:[#allocation2 + $0xc4] sm:$0xf] %v4244_v53  ;;  %4405 = vst [vmem:[#allocation2 + $0xc8] sm:$0x1] %v4404_v39  ;;  %v4941_v52 = vor.u32 %v4940_v45, %v4937_v34  ;;  %v4950_v1 = vrot.slane %v4948_v14, 4  ;;  %v4954_v12 = vshll.u32 %v4609_v4, 16 }
 0x2fd   : > { %9151 = vmatprep.mubr.bf16.mxu1 %v11955_v51  ;;  %v7964_v22 = vrot.slane %v5186_v33, 9  ;;  %v5352_v16 = vrot.slane %v5187_v61, 5  ;;  %v5355_v56 = vrot.slane %v5188_v43, 5  ;;  %v4959_v0 = vshrl.u32 %v4610_v49, 16  ;;  %5879 = vmatprep.mubr.bf16.mxu0 %v11957_v31  ;;  %v4613_v34 = vld [vmem:[#allocation2 + $0xb4] sm:$0xf] }
 0x2fe   : > { %v4942_v48 = vrot.slane %v4941_v52, 4  ;;  %v4951_v40 = vor.u32 %v4950_v1, %v4946_v30  ;;  %v4956_v10 = vrot.slane %v4954_v12, 5  ;;  %v4962_v13 = vshll.u32 %v4610_v49, 16  ;;  %5880 = vmatmul.mubr.bf16.gmra.mrb[204].mxu0 %v11953_v63  ;;  %v4614_v43 = vld [vmem:[#allocation2 + $0xb8] sm:$0xf] }
 0x2ff   : > { %v5353_v59 = vsel %vm10794_vm14, %v7964_v22, %v5352_v16  ;;  %v5354_v4 = vrot.slane %v5352_v16, 4  ;;  %v4961_v19 = vrot.slane %v4959_v0, 4  ;;  %v4968_v57 = vshll.u32 %v4611_v29, 16  ;;  %v4615_v52 = vld [vmem:[#allocation2 + $0xbc] sm:$0x1] }
 0x300   : > { %v4947_v21 = vsel %vm10396_vm11, %v4942_v48, %v4946_v30  ;;  %v4952_v35 = vrot.slane %v4951_v40, 4  ;;  %v4964_v17 = vrot.slane %v4962_v13, 5  ;;  %v4972_v33 = vshrl.u32 %v4611_v29, 16  ;;  %v5192_v22 = vld [vmem:[#allocation2 + $0xc0] sm:$0xe] }
 0x301   : > { %v5356_v60 = vsel %vm10794_vm14, %v5354_v4, %v5355_v56  ;;  %v4970_v49 = vrot.slane %v4968_v57, 5  ;;  %v4978_v41 = vshll.u32 %v4612_v5, 16  ;;  %v7965_v11 = vrot.slane %v5189_v7, 9  ;;  %v11976_v16 = vld [vmem:[#allocation2 + $0x9c] sm:$0xff]  }
 0x302   : > { %v4957_v61 = vsel %vm10396_vm11, %v4952_v35, %v4956_v10  ;;  %v11970_v6 = vcombine.low %v5353_v59, %v5356_v60  ;;  %v4965_v45 = vor.u32 %v4964_v17, %v4961_v19  ;;  %v4974_v14 = vrot.slane %v4972_v33, 4  ;;  %v4616_v10 = vld [vmem:[#allocation2 + $0xc0] sm:$0xf] }
 0x303   : > { %v11972_v53 = vcombine.low %v4947_v21, %v4957_v61  ;;  %v4980_v30 = vrot.slane %v4978_v41, 5  ;;  %v5359_v39 = vrot.slane %v5190_v46, 5  ;;  %v5362_v20 = vrot.slane %v5191_v38, 5  ;;  %v5193_v40 = vld [vmem:[#allocation2 + $0xc4] sm:$0xf] }
 0x304   : > { %9152 = vmatmul.mubr.bf16.gmra.mrb[120].mxu1 %v11970_v6  ;;  %v4966_v1 = vrot.slane %v4965_v45, 4  ;;  %v4975_v12 = vor.u32 %v4974_v14, %v4970_v49  ;;  %v4983_v29 = vshrl.u32 %v4613_v34, 16  ;;  %v4986_v5 = vshll.u32 %v4613_v34, 16  ;;  %v5194_v19 = vld [vmem:[#allocation2 + $0xc8] sm:$0x1] }
 0x305   : > { %5887 = vmatprep.mubr.bf16.mxu0 %v11972_v53  ;;  %v5360_v56 = vsel %vm10794_vm14, %v7965_v11, %v5359_v39  ;;  %v5361_v0 = vrot.slane %v5359_v39, 4  ;;  %v4992_v7 = vshll.u32 %v4614_v43, 16  ;;  %v4996_v48 = vshrl.u32 %v4614_v43, 16  ;;  %v4618_v39 = vld [vmem:[#allocation2 + $0xc8] sm:$0x1] }
 0x306   : > { %v4971_v13 = vsel %vm10396_vm11, %v4966_v1, %v4970_v49  ;;  %v4976_v46 = vrot.slane %v4975_v12, 4  ;;  %v4985_v59 = vrot.slane %v4983_v29, 4  ;;  %v4988_v4 = vrot.slane %v4986_v5, 5  ;;  %5888 = vmatmul.mubr.bf16.gmra.mrb[208].mxu0 %v11976_v16  ;;  %v4617_v49 = vld [vmem:[#allocation2 + $0xc4] sm:$0xf] }
 0x307   : > { %v5363_v57 = vsel %vm10794_vm14, %v5361_v0, %v5362_v20  ;;  %v4994_v38 = vrot.slane %v4992_v7, 5  ;;  %v4998_v21 = vrot.slane %v4996_v48, 4  ;;  %v5002_v35 = vshll.u32 %v4615_v52, 16  ;;  %v5144_v1 = vld [vmem:[#allocation2] sm:$0xe] }
 0x308   : > { %v4981_v17 = vsel %vm10396_vm11, %v4976_v46, %v4980_v30  ;;  %v11987_v33 = vcombine.low %v5360_v56, %v5363_v57  ;;  %v4989_v60 = vor.u32 %v4988_v4, %v4985_v59  ;;  %v7966_v41 = vrot.slane %v5192_v22, 9  ;;  %v5145_v22 = vld [vmem:[#allocation2 + $0x4] sm:$0xf] }
 0x309   : > { %v11989_v11 = vcombine.low %v4971_v13, %v4981_v17  ;;  %v4999_v34 = vor.u32 %v4998_v21, %v4994_v38  ;;  %v5004_v61 = vrot.slane %v5002_v35, 5  ;;  %v5366_v45 = vrot.slane %v5193_v40, 5  ;;  %v5146_v40 = vld [vmem:[#allocation2 + $0x8] sm:$0x1]  ;;  %v4569_v17 = vld [vmem:[#allocation2 + $0x4] sm:$0xf] }
 0x30a   : > { %9155 = vmatprep.mubr.bf16.mxu1 %v11987_v33  ;;  %v4990_v14 = vrot.slane %v4989_v60, 4  ;;  %v5369_v43 = vrot.slane %v5194_v19, 5  ;;  %v5007_v20 = vshrl.u32 %v4616_v10, 16  ;;  %v5010_v52 = vshll.u32 %v4616_v10, 16  ;;  %v11997_v13 = vld [vmem:[#allocation2 + $0xa8] sm:$0xff]  }
 0x30b   : > { %5895 = vmatprep.mubr.bf16.mxu0 %v11989_v11  ;;  %v5000_v30 = vrot.slane %v4999_v34, 4  ;;  %v5367_v12 = vsel %vm10794_vm14, %v7966_v41, %v5366_v45  ;;  %v5368_v29 = vrot.slane %v5366_v45, 4  ;;  %v5016_v5 = vshll.u32 %v4617_v49, 16  ;;  %v4568_v19 = vld [vmem:[#allocation2] sm:$0xf] }
 0x30c   : > { %v4995_v56 = vsel %vm10396_vm11, %v4990_v14, %v4994_v38  ;;  %v5009_v0 = vrot.slane %v5007_v20, 4  ;;  %v5012_v7 = vrot.slane %v5010_v52, 5  ;;  %v5020_v48 = vshrl.u32 %v4617_v49, 16  ;;  %v4570_v45 = vld [vmem:[#allocation2 + $0x8] sm:$0x1] }
 0x30d   : > { %v5005_v10 = vsel %vm10396_vm11, %v5000_v30, %v5004_v61  ;;  %v5370_v46 = vsel %vm10794_vm14, %v5368_v29, %v5369_v43  ;;  %v5018_v59 = vrot.slane %v5016_v5, 5  ;;  %v5026_v4 = vshll.u32 %v4618_v39, 16 }
 0x30e   : > { %v12003_v57 = vcombine.low %v4995_v56, %v5005_v10  ;;  %v12005_v21 = vcombine.low %v5367_v12, %v5370_v46  ;;  %v5013_v38 = vor.u32 %v5012_v7, %v5009_v0  ;;  %v5022_v35 = vrot.slane %v5020_v48, 4  ;;  %5896 = vmatmul.mubr.bf16.gmra.mrb[212].mxu0 %v11997_v13 }
 0x30f   : > { %v7950_v60 = vrot.slane %v5144_v1, 9  ;;  %v5254_v41 = vrot.slane %v5145_v22, 5  ;;  %v5257_v49 = vrot.slane %v5146_v40, 5  ;;  %v4623_v14 = vshrl.u32 %v4568_v19, 16 }
 0x310   : > { %5903 = vmatprep.mubr.bf16.mxu0 %v12003_v57  ;;  %9156 = vmatmul.mubr.bf16.gmra.mrb[124].mxu1 %v12005_v21  ;;  %v5014_v34 = vrot.slane %v5013_v38, 4  ;;  %v5023_v61 = vor.u32 %v5022_v35, %v5018_v59  ;;  %v4626_v43 = vshll.u32 %v4568_v19, 16  ;;  %v4632_v52 = vshll.u32 %v4569_v17, 16  ;;  %v12018_v19 = vld [vmem:[#allocation2 + $0xb4] sm:$0xff]  }
 0x311   : > { %v5255_v39 = vsel %vm10794_vm14, %v7950_v60, %v5254_v41  ;;  %v5256_v20 = vrot.slane %v5254_v41, 4  ;;  %v4636_v30 = vshrl.u32 %v4569_v17, 16  ;;  %v5028_v29 = vrot.slane %v5026_v4, 5  ;;  %v9870_v4 = vld [vmem:[#allocation10 + $0x180] sm:$0xff]   ;;  %v9873_v41 = vld [vmem:[#allocation10 + $0x1c8] sm:$0xff]  }
 0x312   : > { %v5024_v12 = vrot.slane %v5023_v61, 4  ;;  %v4625_v1 = vrot.slane %v4623_v14, 4  ;;  %v4628_v5 = vrot.slane %v4626_v43, 5  ;;  %v4634_v56 = vrot.slane %v4632_v52, 5  ;;  %v9875_v14 = vld [vmem:[#allocation10 + $0x1d0] sm:$0xff]   ;;  %v9877_v52 = vld [vmem:[#allocation10 + $0x1d8] sm:$0xff]  }
 0x313   : > { %v5258_v22 = vsel %vm10794_vm14, %v5256_v20, %v5257_v49  ;;  %v4638_v0 = vrot.slane %v4636_v30, 4  ;;  %v4642_v7 = vshll.u32 %v4570_v45, 16  ;;  %v5019_v48 = vsel %vm10396_vm11, %v5014_v34, %v5018_v59  ;;  %v12960_v59 = vld [vmem:[#allocation33_spill] sm:$0xff]  ;;  %v9876_v20 = vld [vmem:[#allocation10 + $0x190] sm:$0xff]   ;;  %v9878_v30 = vld [vmem:[#allocation10 + $0x198] sm:$0xff]  }
 0x314   : > { %v5029_v40 = vsel %vm10396_vm11, %v5024_v12, %v5028_v29  ;;  %v7968_v10 = vcombine.low %v5255_v39, %v5258_v22  ;;  %v4629_v46 = vor.u32 %v4628_v5, %v4625_v1  ;;  %v9874_v45 = vld [vmem:[#allocation10 + $0x188] sm:$0xff]   ;;  %v9879_v12 = vld [vmem:[#allocation10 + $0x1e0] sm:$0xff]  }
 0x315   : > { %v12020_v38 = vcombine.low %v5019_v48, %v5029_v40  ;;  %v4639_v35 = vor.u32 %v4638_v0, %v4634_v56  ;;  %v4644_v17 = vrot.slane %v4642_v7, 5  ;;  %v12030_v39 = vld [vmem:[#allocation2 + $0xc0] sm:$0xff]   ;;  %v9880_v1 = vld [vmem:[#allocation10 + $0x1a0] sm:$0xff]   ;;  %v9883_v0 = vld [vmem:[#allocation10 + $0x1f0] sm:$0xff]  }
 0x316   : > { %9175 = vmatprep.mubr.bf16.mxu1 %v7968_v10  ;;  %v4630_v60 = vrot.slane %v4629_v46, 4  ;;  %5904 = vmatmul.mubr.bf16.gmra.mrb[216].mxu0 %v12018_v19  ;;  %v9872_v29 = vld [vmem:[#allocation2] sm:$0xff]   ;;  %v12961_v22 = vld [vmem:[#allocation20_spill] sm:$0xff]  ;;  %v9884_v7 = vld [vmem:[#allocation10 + $0x1b0] sm:$0xff]  }
 0x317   : > { %v4640_v49 = vrot.slane %v4639_v35, 4  ;;  %5911 = vmatprep.mubr.bf16.mxu0 %v12020_v38  ;;  %v9881_v5 = vld [vmem:[#allocation10 + $0x1e8] sm:$0xff]   ;;  %v9885_v48 = vld [vmem:[#allocation10 + $0x1f8] sm:$0xff]   ;;  %v9887_v46 = vld [vmem:[#allocation10 + $0x200] sm:$0xff]  }
 0x318   : > { %9176 = vmatmul.mubr.bf16.vlgmr.msra.gmra.mrb[96].mxu1 %v12960_v59  ;;  %v4635_v34 = vsel %vm10396_vm11, %v4630_v60, %v4634_v56  ;;  %v9882_v56 = vld [vmem:[#allocation10 + $0x1a8] sm:$0xff]   ;;  %v9916_v40 = vld [vmem:[#allocation2 + $0xc] sm:$0xff]  }
 0x319   : > { %9179 = vmatprep.mubr.bf16.mxu1 %v11526_v37  ;;  %8813 = vmatpush3.bf16.msra.mxu1 %v9870_v4  ;;  %v4645_v61 = vsel %vm10396_vm11, %v4640_v49, %v4644_v17  ;;  %v9886_v10 = vld [vmem:[#allocation10 + $0x1b8] sm:$0xff]   ;;  %v9917_v4 = vld [vmem:[#allocation2 + $0x18] sm:$0xff]   ;;  %v9918_v35 = vld [vmem:[#allocation2 + $0x24] sm:$0xff]  }
 0x31a   : > { %8814 = vmatprep.subr.bf16.mxu1 %v9873_v41  ;;  %v7932_v43 = vcombine.low %v4635_v34, %v4645_v61  ;;  %v12962_v17 = vld [vmem:[#allocation19_spill] sm:$0xff]  ;;  %v12963_v41 = vld [vmem:[#allocation34_spill] sm:$0xff] }
 0x31b   : > { %v9919_v60 = vld [vmem:[#allocation2 + $0x30] sm:$0xff]  }
 0x31d   : > { %8815 = vmatpush3.bf16.msra.mxu1 %v9874_v45 }
 0x31e   : > { %8816 = vmatprep.subr.bf16.mxu1 %v9875_v14  ;;  %5912 = vmatmul.mubr.bf16.gmra.mrb[220].mxu0 %v12030_v39  ;;  %v9920_v14 = vld [vmem:[#allocation2 + $0x3c] sm:$0xff]  }
 0x31f   : > { %6257 = vmatprep.mubr.bf16.mxu0 %v7932_v43 }
 0x320   : > { %9180 = vmatmul.mubr.bf16.gmra.mrb[100].mxu1 %v11571_v24 }
 0x321   : > { %9183 = vmatprep.mubr.bf16.mxu1 %v11617_v44  ;;  %8817 = vmatpush3.bf16.msra.mxu1 %v9876_v20  ;;  %v12964_v20 = vld [vmem:[#allocation35_spill] sm:$0xff] }
 0x322   : > { %8818 = vmatprep.subr.bf16.mxu1 %v9877_v52  ;;  %v9888_v52 = vld [vmem:[#allocation10 + $0x208] sm:$0xff]  }
 0x325   : > { %8819 = vmatpush3.bf16.msra.mxu1 %v9878_v30  ;;  %v9921_v30 = vld [vmem:[#allocation2 + $0x48] sm:$0xff]  }
 0x326   : > { %8820 = vmatprep.subr.bf16.mxu1 %v9879_v12  ;;  %6258 = vmatmul.mubr.bf16.vlgmr.msra.gmra.mrb[224].mxu0 %v9872_v29  ;;  %v12965_v12 = vld [vmem:[#allocation21_spill] sm:$0xff] }
 0x327   : > { %6265 = vmatprep.mubr.bf16.mxu0 %v12961_v22 }
 0x328   : > { %9184 = vmatmul.mubr.bf16.gmra.mrb[104].mxu1 %v11671_v32 }
 0x329   : > { %9187 = vmatprep.mubr.bf16.mxu1 %v11714_v36  ;;  %8821 = vmatpush3.bf16.msra.mxu1 %v9880_v1  ;;  %v9889_v1 = vld [vmem:[#allocation10 + $0x210] sm:$0xff]  }
 0x32a   : > { %8822 = vmatprep.subr.bf16.mxu1 %v9881_v5 }
 0x32d   : > { %8823 = vmatpush3.bf16.msra.mxu1 %v9882_v56 }
 0x32e   : > { %8824 = vmatprep.subr.bf16.mxu1 %v9883_v0  ;;  %6266 = vmatmul.mubr.bf16.gmra.mrb[228].mxu0 %v9916_v40 }
 0x32f   : > { %6273 = vmatprep.mubr.bf16.mxu0 %v11564_v54 }
 0x330   : > { %9188 = vmatmul.mubr.bf16.gmra.mrb[108].mxu1 %v11763_v42 }
 0x331   : > { %9191 = vmatprep.mubr.bf16.mxu1 %v11795_v15  ;;  %8825 = vmatpush3.bf16.msra.mxu1 %v9884_v7 }
 0x332   : > { %8826 = vmatprep.subr.bf16.mxu1 %v9885_v48  ;;  %v9922_v48 = vld [vmem:[#allocation2 + $0x54] sm:$0xff]  }
 0x335   : > { %8827 = vmatpush3.bf16.msra.mxu1 %v9886_v10 }
 0x336   : > { %9207 = vmatprep.subr.bf16.mxu1 %v9887_v46  ;;  %6274 = vmatmul.mubr.bf16.gmra.mrb[232].mxu0 %v9917_v4 }
 0x337   : > { %6281 = vmatprep.mubr.bf16.mxu0 %v11611_v18 }
 0x338   : > { %9192 = vmatmul.mubr.bf16.gmra.mrb[112].mxu1 %v11830_v58 }
 0x339   : > { %9195 = vmatprep.mubr.bf16.mxu1 %v11867_v55 }
 0x33e   : > { %6282 = vmatmul.mubr.bf16.gmra.mrb[236].mxu0 %v9918_v35 }
 0x33f   : > { %6289 = vmatprep.mubr.bf16.mxu0 %v12962_v17 }
 0x340   : > { %9196 = vmatmul.mubr.bf16.gmra.mrb[116].mxu1 %v11904_v50 }
 0x341   : > { %9199 = vmatprep.mubr.bf16.mxu1 %v11926_v28 }
 0x346   : > { %6290 = vmatmul.mubr.bf16.gmra.mrb[240].mxu0 %v9919_v60 }
 0x347   : > { %6297 = vmatprep.mubr.bf16.mxu0 %v12963_v41 }
 0x348   : > { %9200 = vmatmul.mubr.bf16.gmra.mrb[120].mxu1 %v11955_v51 }
 0x349   : > { %9203 = vmatprep.mubr.bf16.mxu1 %v11970_v6  ;;  %v8556_v49 = vpop.f32.mrb[160].mxu0 }
 0x34a   : > { %v8557_v59 = vpop.f32.mrb[161].mxu0 }
 0x34b   : > { %v12050_v34 = vadd.f32 %v8557_v59, %v8556_v49  ;;  %v8559_v61 = vpop.f32.mrb[162].mxu0 }
 0x34c   : > { %v8560_v45 = vpop.f32.mrb[163].mxu0 }
 0x34d   : > { %v12052_v43 = vadd.f32 %v8560_v45, %v8559_v61  ;;  %v9894_v61 = vld [vmem:[#allocation10 + $0x238] sm:$0xff]  }
 0x34e   : > { %6298 = vmatmul.mubr.bf16.gmra.mrb[244].mxu0 %v9920_v14 }
 0x34f   : > { %6305 = vmatprep.mubr.bf16.mxu0 %v12964_v20 }
 0x350   : > { %9204 = vmatmul.mubr.bf16.gmra.mrb[124].mxu1 %v11987_v33 }
 0x351   : > { %6819 = vmatprep.mubr.bf16.mxu1 %v11564_v54  ;;  %v9890_v54 = vld [vmem:[#allocation10 + $0x218] sm:$0xff]  }
 0x356   : > { %6306 = vmatmul.mubr.bf16.gmra.mrb[248].mxu0 %v9921_v30 }
 0x357   : > { %6313 = vmatprep.mubr.bf16.mxu0 %v12965_v12 }
 0x358   : > { %6820 = vmatmul.mubr.bf16.vlgmr.msra.gmra.mrb[128].mxu1 %v9917_v4  ;;  %v8562_v29 = vpop.f32.mrb[164].mxu0 }
 0x359   : > { %6827 = vmatprep.mubr.bf16.mxu1 %v11611_v18  ;;  %9208 = vmatpush3.bf16.msra.mxu1 %v9887_v46  ;;  %v8563_v5 = vpop.f32.mrb[165].mxu0  ;;  %v9891_v18 = vld [vmem:[#allocation10 + $0x220] sm:$0xff]   ;;  %v9892_v46 = vld [vmem:[#allocation10 + $0x228] sm:$0xff]  }
 0x35a   : > { %9209 = vmatprep.subr.bf16.mxu1 %v9888_v52  ;;  %v12059_v22 = vadd.f32 %v8563_v5, %v8562_v29  ;;  %v8565_v56 = vpop.f32.mrb[166].mxu0 }
 0x35b   : > { %v8566_v0 = vpop.f32.mrb[167].mxu0 }
 0x35c   : > { %v12061_v7 = vadd.f32 %v8566_v0, %v8565_v56 }
 0x35d   : > { %9210 = vmatpush3.bf16.msra.mxu1 %v9888_v52 }
 0x35e   : > { %9211 = vmatprep.subr.bf16.mxu1 %v9889_v1  ;;  %6314 = vmatmul.mubr.bf16.gmra.mrb[252].mxu0 %v9922_v48 }
 0x35f   : > { %6321 = vmatprep.mubr.bf16.mxu0 %v11826_v9 }
 0x360   : > { %6828 = vmatmul.mubr.bf16.gmra.mrb[132].mxu1 %v9918_v35 }
 0x361   : > { %6835 = vmatprep.mubr.bf16.mxu1 %v12962_v17  ;;  %9212 = vmatpush3.bf16.msra.mxu1 %v9889_v1  ;;  %v9893_v17 = vld [vmem:[#allocation10 + $0x230] sm:$0xff]  }
 0x362   : > { %9213 = vmatprep.subr.bf16.mxu1 %v9890_v54 }
 0x364   : > { %v8568_v40 = vpop.f32.mrb[168].mxu0 }
 0x365   : > { %9214 = vmatpush3.bf16.msra.mxu1 %v9890_v54  ;;  %v8569_v10 = vpop.f32.mrb[169].mxu0 }
 0x366   : > { %9215 = vmatprep.subr.bf16.mxu1 %v9891_v18  ;;  %6322 = vmatmul.mubr.bf16.gmra.mrb[0].mxu0 %v11828_v2  ;;  %v12066_v4 = vadd.f32 %v8569_v10, %v8568_v40  ;;  %v8571_v49 = vpop.f32.mrb[170].mxu0 }
 0x367   : > { %6329 = vmatprep.mubr.bf16.mxu0 %v11856_v23  ;;  %v8572_v59 = vpop.f32.mrb[171].mxu0 }
 0x368   : > { %6836 = vmatmul.mubr.bf16.gmra.mrb[136].mxu1 %v9919_v60  ;;  %v12070_v35 = vadd.f32 %v8572_v59, %v8571_v49 }
 0x369   : > { %6843 = vmatprep.mubr.bf16.mxu1 %v12963_v41  ;;  %9216 = vmatpush3.bf16.msra.mxu1 %v9891_v18 }
 0x36a   : > { %9217 = vmatprep.subr.bf16.mxu1 %v9892_v46 }
 0x36d   : > { %9218 = vmatpush3.bf16.msra.mxu1 %v9892_v46 }
 0x36e   : > { %9219 = vmatprep.subr.bf16.mxu1 %v9893_v17  ;;  %6330 = vmatmul.mubr.bf16.gmra.mrb[4].mxu0 %v11865_v62 }
 0x36f   : > { %6337 = vmatprep.mubr.bf16.mxu0 %v11892_v26 }
 0x370   : > { %6844 = vmatmul.mubr.bf16.gmra.mrb[140].mxu1 %v9920_v14  ;;  %v8574_v2 = vpop.f32.mrb[172].mxu0 }
 0x371   : > { %6851 = vmatprep.mubr.bf16.mxu1 %v12964_v20  ;;  %9220 = vmatpush3.bf16.msra.mxu1 %v9893_v17  ;;  %v8575_v60 = vpop.f32.mrb[173].mxu0 }
 0x372   : > { %9221 = vmatprep.subr.bf16.mxu1 %v9894_v61  ;;  %v12075_v41 = vadd.f32 %v8575_v60, %v8574_v2  ;;  %v8577_v45 = vpop.f32.mrb[174].mxu0 }
 0x373   : > { %v8578_v52 = vpop.f32.mrb[175].mxu0 }
 0x374   : > { %v12077_v29 = vadd.f32 %v8578_v52, %v8577_v45  ;;  %v4619_v45 = vld [vmem:[#allocation2 + $0xcc] sm:$0xf] }
 0x375   : > { %9222 = vmatpush3.bf16.msra.mxu1 %v9894_v61 }
 0x376   : > { %6338 = vmatmul.mubr.bf16.gmra.mrb[8].mxu0 %v11897_v3 }
 0x377   : > { %6345 = vmatprep.mubr.bf16.mxu0 %v11932_v25 }
 0x378   : > { %6852 = vmatmul.mubr.bf16.gmra.mrb[144].mxu1 %v9921_v30  ;;  %v9923_v30 = vld [vmem:[#allocation2 + $0x60] sm:$0xff]  }
 0x379   : > { %6859 = vmatprep.mubr.bf16.mxu1 %v12965_v12 }
 0x37c   : > { %v8580_v14 = vpop.f32.mrb[176].mxu0 }
 0x37d   : > { %v8581_v20 = vpop.f32.mrb[177].mxu0 }
 0x37e   : > { %6346 = vmatmul.mubr.bf16.gmra.mrb[12].mxu0 %v11934_v27  ;;  %v12083_v1 = vadd.f32 %v8581_v20, %v8580_v14  ;;  %v8583_v5 = vpop.f32.mrb[178].mxu0  ;;  %v4620_v14 = vld [vmem:[#allocation2 + $0xd0] sm:$0xf] }
 0x37f   : > { %6353 = vmatprep.mubr.bf16.mxu0 %v11957_v31  ;;  %v8584_v56 = vpop.f32.mrb[179].mxu0 }
 0x380   : > { %6860 = vmatmul.mubr.bf16.gmra.mrb[148].mxu1 %v9922_v48  ;;  %v12087_v0 = vadd.f32 %v8584_v56, %v8583_v5  ;;  %v5031_v5 = vshrl.u32 %v4619_v45, 16 }
 0x381   : > { %6867 = vmatprep.mubr.bf16.mxu1 %v11826_v9 }
 0x386   : > { %6354 = vmatmul.mubr.bf16.gmra.mrb[16].mxu0 %v11953_v63 }
 0x387   : > { %6361 = vmatprep.mubr.bf16.mxu0 %v11972_v53 }
 0x388   : > { %6868 = vmatmul.mubr.bf16.gmra.mrb[152].mxu1 %v9923_v30  ;;  %v8586_v12 = vpop.f32.mrb[180].mxu0  ;;  %v5034_v30 = vshll.u32 %v4619_v45, 16 }
 0x389   : > { %6875 = vmatprep.mubr.bf16.mxu1 %v11856_v23  ;;  %v8587_v54 = vpop.f32.mrb[181].mxu0 }
 0x38a   : > { %v12092_v18 = vadd.f32 %v8587_v54, %v8586_v12  ;;  %v8589_v40 = vpop.f32.mrb[182].mxu0  ;;  %v5040_v12 = vshll.u32 %v4620_v14, 16  ;;  %v5033_v54 = vrot.slane %v5031_v5, 4 }
 0x38b   : > { %v8590_v10 = vpop.f32.mrb[183].mxu0 }
 0x38c   : > { %v12094_v48 = vadd.f32 %v8590_v10, %v8589_v40  ;;  %v5042_v40 = vrot.slane %v5040_v12, 5 }
 0x38e   : > { %6362 = vmatmul.mubr.bf16.gmra.mrb[20].mxu0 %v11976_v16 }
 0x38f   : > { %6369 = vmatprep.mubr.bf16.mxu0 %v11989_v11 }
 0x390   : > { %6876 = vmatmul.mubr.bf16.gmra.mrb[156].mxu1 %v11865_v62 }
 0x391   : > { %6883 = vmatprep.mubr.bf16.mxu1 %v11892_v26 }
 0x396   : > { %6370 = vmatmul.mubr.bf16.gmra.mrb[24].mxu0 %v11997_v13  ;;  %v8592_v9 = vpop.f32.mrb[184].mxu0 }
 0x397   : > { %6377 = vmatprep.mubr.bf16.mxu0 %v12003_v57  ;;  %v8593_v23 = vpop.f32.mrb[185].mxu0 }
 0x398   : > { %6884 = vmatmul.mubr.bf16.gmra.mrb[160].mxu1 %v11897_v3  ;;  %v12104_v46 = vadd.f32 %v8593_v23, %v8592_v9  ;;  %v8595_v49 = vpop.f32.mrb[186].mxu0  ;;  %v4621_v9 = vld [vmem:[#allocation2 + $0xd4] sm:$0x1] }
 0x399   : > { %6891 = vmatprep.mubr.bf16.mxu1 %v11932_v25  ;;  %v8596_v59 = vpop.f32.mrb[187].mxu0 }
 0x39a   : > { %v12106_v17 = vadd.f32 %v8596_v59, %v8595_v49 }
 0x39e   : > { %6378 = vmatmul.mubr.bf16.gmra.mrb[28].mxu0 %v12018_v19 }
 0x3a0   : > { %6892 = vmatmul.mubr.bf16.gmra.mrb[164].mxu1 %v11934_v27 }
 0x3a1   : > { %6899 = vmatprep.mubr.bf16.mxu1 %v11957_v31  ;;  %v8598_v62 = vpop.f32.mrb[188].mxu0 }
 0x3a2   : > { %v8599_v26 = vpop.f32.mrb[189].mxu0 }
 0x3a3   : > { %v12111_v61 = vadd.f32 %v8599_v26, %v8598_v62  ;;  %v8601_v3 = vpop.f32.mrb[190].mxu0 }
 0x3a4   : > { %v8602_v2 = vpop.f32.mrb[191].mxu0 }
 0x3a5   : > { %v12113_v60 = vadd.f32 %v8602_v2, %v8601_v3 }
 0x3a8   : > { %6900 = vmatmul.mubr.bf16.gmra.mrb[168].mxu1 %v11953_v63  ;;  %v5044_v63 = vshrl.u32 %v4620_v14, 16 }
 0x3a9   : > { %6907 = vmatprep.mubr.bf16.mxu1 %v11972_v53  ;;  %v5036_v53 = vrot.slane %v5034_v30, 5 }
 0x3aa   : > { %v5046_v10 = vrot.slane %v5044_v63, 4 }
 0x3ab   : > { %v5037_v23 = vor.u32 %v5036_v53, %v5033_v54 }
 0x3ac   : > { %v5047_v49 = vor.u32 %v5046_v10, %v5042_v40 }
 0x3ad   : > { %v8604_v25 = vpop.f32.mrb[192].mxu0 }
 0x3ae   : > { %v8605_v52 = vpop.f32.mrb[193].mxu0  ;;  %v5048_v45 = vrot.slane %v5047_v49, 4 }
 0x3af   : > { %v12118_v27 = vadd.f32 %v8605_v52, %v8604_v25  ;;  %v8607_v31 = vpop.f32.mrb[194].mxu0  ;;  %v5038_v25 = vrot.slane %v5037_v23, 4 }
 0x3b0   : > { %6908 = vmatmul.mubr.bf16.gmra.mrb[172].mxu1 %v11976_v16  ;;  %v8608_v20 = vpop.f32.mrb[195].mxu0 }
 0x3b1   : > { %6915 = vmatprep.mubr.bf16.mxu1 %v11989_v11  ;;  %v12121_v56 = vadd.f32 %v8608_v20, %v8607_v31  ;;  %v5050_v11 = vshll.u32 %v4621_v9, 16 }
 0x3b3   : > { %v5052_v52 = vrot.slane %v5050_v11, 5 }
 0x3b8   : > { %6916 = vmatmul.mubr.bf16.gmra.mrb[176].mxu1 %v11997_v13  ;;  %v5043_v13 = vsel %vm10396_vm11, %v5038_v25, %v5042_v40 }
 0x3b9   : > { %6923 = vmatprep.mubr.bf16.mxu1 %v12003_v57  ;;  %v5053_v57 = vsel %vm10396_vm11, %v5048_v45, %v5052_v52 }
 0x3ba   : > { %v8610_v16 = vpop.f32.mrb[196].mxu0  ;;  %v7949_v14 = vcombine.low %v5043_v13, %v5053_v57 }
 0x3bb   : > { %v8611_v59 = vpop.f32.mrb[197].mxu0 }
 0x3bc   : > { %v12125_v62 = vadd.f32 %v8611_v59, %v8610_v16  ;;  %v8613_v26 = vpop.f32.mrb[198].mxu0 }
 0x3bd   : > { %v8614_v3 = vpop.f32.mrb[199].mxu0 }
 0x3be   : > { %v12127_v2 = vadd.f32 %v8614_v3, %v8613_v26 }
 0x3c0   : > { %6924 = vmatmul.mubr.bf16.gmra.mrb[180].mxu1 %v12018_v19  ;;  %v9895_v19 = vld [vmem:[#allocation2 + $0xcc] sm:$0xff]  }
 0x3c1   : > { %6931 = vmatprep.mubr.bf16.mxu1 %v12020_v38 }
 0x3c7   : > { %v8616_v31 = vpop.f32.mrb[200].mxu0 }
 0x3c8   : > { %v8617_v20 = vpop.f32.mrb[201].mxu0  ;;  %6932 = vmatmul.mubr.bf16.gmra.mrb[184].mxu1 %v12030_v39 }
 0x3c9   : > { %v12136_v5 = vadd.f32 %v8617_v20, %v8616_v31  ;;  %v8619_v30 = vpop.f32.mrb[202].mxu0  ;;  %6939 = vmatprep.mubr.bf16.mxu1 %v7949_v14 }
 0x3ca   : > { %v8620_v12 = vpop.f32.mrb[203].mxu0 }
 0x3cb   : > { %v12138_v63 = vadd.f32 %v8620_v12, %v8619_v30 }
 0x3d0   : > { %6940 = vmatmul.mubr.bf16.gmra.mrb[188].mxu1 %v9895_v19 }
 0x3d1   : > { %9223 = vmatprep.mubr.bf16.mxu1 %v11526_v37  ;;  %v8622_v38 = vpop.f32.mrb[204].mxu0 }
 0x3d2   : > { %v8623_v54 = vpop.f32.mrb[205].mxu0 }
 0x3d3   : > { %v12141_v8 = vadd.f32 %v8623_v54, %v8622_v38  ;;  %v8625_v53 = vpop.f32.mrb[206].mxu0 }
 0x3d4   : > { %v8626_v40 = vpop.f32.mrb[207].mxu0 }
 0x3d5   : > { %v12143_v10 = vadd.f32 %v8626_v40, %v8625_v53  ;;  %v5196_v53 = vld [vmem:[#allocation2 + $0xd0] sm:$0xf] }
 0x3d8   : > { %9224 = vmatmul.mubr.bf16.vlgmr.msra.gmra.mrb[96].mxu1 %v11571_v24 }
 0x3d9   : > { %9227 = vmatprep.mubr.bf16.mxu1 %v11617_v44  ;;  %v8628_v39 = vpop.f32.mrb[208].mxu0 }
 0x3da   : > { %v8629_v9 = vpop.f32.mrb[209].mxu0 }
 0x3db   : > { %v12147_v16 = vadd.f32 %v8629_v9, %v8628_v39  ;;  %v8631_v23 = vpop.f32.mrb[210].mxu0  ;;  %v5197_v9 = vld [vmem:[#allocation2 + $0xd4] sm:$0x1] }
 0x3dc   : > { %v8632_v49 = vpop.f32.mrb[211].mxu0 }
 0x3dd   : > { %v12149_v11 = vadd.f32 %v8632_v49, %v8631_v23 }
 0x3e0   : > { %9228 = vmatmul.mubr.bf16.gmra.mrb[100].mxu1 %v11671_v32 }
 0x3e1   : > { %9231 = vmatprep.mubr.bf16.mxu1 %v11714_v36  ;;  %v8634_v37 = vpop.f32.mrb[212].mxu0 }
 0x3e2   : > { %v8635_v59 = vpop.f32.mrb[213].mxu0 }
 0x3e3   : > { %v12153_v26 = vadd.f32 %v8635_v59, %v8634_v37  ;;  %v8637_v3 = vpop.f32.mrb[214].mxu0 }
 0x3e4   : > { %v8638_v24 = vpop.f32.mrb[215].mxu0 }
 0x3e5   : > { %v12155_v25 = vadd.f32 %v8638_v24, %v8637_v3  ;;  %v5376_v24 = vrot.slane %v5197_v9, 5 }
 0x3e8   : > { %9232 = vmatmul.mubr.bf16.gmra.mrb[104].mxu1 %v11763_v42 }
 0x3e9   : > { %9235 = vmatprep.mubr.bf16.mxu1 %v11795_v15  ;;  %v8640_v44 = vpop.f32.mrb[216].mxu0 }
 0x3ea   : > { %v8641_v45 = vpop.f32.mrb[217].mxu0 }
 0x3eb   : > { %v12159_v52 = vadd.f32 %v8641_v45, %v8640_v44  ;;  %v8643_v13 = vpop.f32.mrb[218].mxu0 }
 0x3ec   : > { %v8644_v32 = vpop.f32.mrb[219].mxu0 }
 0x3ed   : > { %v12161_v57 = vadd.f32 %v8644_v32, %v8643_v13 }
 0x3f0   : > { %9236 = vmatmul.mubr.bf16.gmra.mrb[108].mxu1 %v11830_v58 }
 0x3f1   : > { %9239 = vmatprep.mubr.bf16.mxu1 %v11867_v55  ;;  %v8646_v36 = vpop.f32.mrb[220].mxu0 }
 0x3f2   : > { %v8647_v14 = vpop.f32.mrb[221].mxu0 }
 0x3f3   : > { %v12165_v31 = vadd.f32 %v8647_v14, %v8646_v36  ;;  %v8649_v20 = vpop.f32.mrb[222].mxu0 }
 0x3f4   : > { %v8650_v42 = vpop.f32.mrb[223].mxu0 }
 0x3f5   : > { %v12167_v30 = vadd.f32 %v8650_v42, %v8649_v20 }
 0x3f8   : > { %9240 = vmatmul.mubr.bf16.gmra.mrb[112].mxu1 %v11904_v50  ;;  %v5373_v50 = vrot.slane %v5196_v53, 5 }
 0x3f9   : > { %9243 = vmatprep.mubr.bf16.mxu1 %v11926_v28  ;;  %v8692_v15 = vpop.f32.mrb[224].mxu0  ;;  %v5195_v28 = vld [vmem:[#allocation2 + $0xcc] sm:$0xe] }
 0x3fa   : > { %v8693_v12 = vpop.f32.mrb[225].mxu0  ;;  %v7967_v3 = vrot.slane %v5195_v28, 9 }
 0x3fb   : > { %v8694_v19 = vadd.f32 %v8693_v12, %v8692_v15  ;;  %v8695_v38 = vpop.f32.mrb[226].mxu0 }
 0x3fc   : > { %v8696_v54 = vpop.f32.mrb[227].mxu0 }
 0x3fd   : > { %v12172_v58 = vadd.f32 %v8694_v19, %v12050_v34  ;;  %v8697_v55 = vadd.f32 %v8696_v54, %v8695_v38  ;;  %v5375_v34 = vrot.slane %v5373_v50, 4 }
 0x3ff   : > { %v12175_v40 = vadd.f32 %v8697_v55, %v12052_v43 }
 0x400   : > { %9244 = vmatmul.mubr.bf16.gmra.mrb[116].mxu1 %v11955_v51  ;;  %v5374_v51 = vsel %vm10794_vm14, %v7967_v3, %v5373_v50 }
 0x401   : > { %9247 = vmatprep.mubr.bf16.mxu1 %v11970_v6  ;;  %v8698_v39 = vpop.f32.mrb[228].mxu0  ;;  %v5377_v6 = vsel %vm10794_vm14, %v5375_v34, %v5376_v24 }
 0x402   : > { %v8699_v23 = vpop.f32.mrb[229].mxu0 }
 0x403   : > { %v8700_v49 = vadd.f32 %v8699_v23, %v8698_v39  ;;  %v8701_v37 = vpop.f32.mrb[230].mxu0 }
 0x404   : > { %v8702_v59 = vpop.f32.mrb[231].mxu0 }
 0x405   : > { %v12180_v44 = vadd.f32 %v8700_v49, %v12059_v22  ;;  %v8703_v43 = vadd.f32 %v8702_v59, %v8701_v37  ;;  %v7985_v22 = vcombine.low %v5374_v51, %v5377_v6 }
 0x407   : > { %v12183_v45 = vadd.f32 %v8703_v43, %v12061_v7 }
 0x408   : > { %9248 = vmatmul.mubr.bf16.gmra.mrb[120].mxu1 %v11987_v33 }
 0x409   : > { %9251 = vmatprep.mubr.bf16.mxu1 %v12005_v21  ;;  %v8704_v13 = vpop.f32.mrb[232].mxu0 }
 0x40a   : > { %v8705_v32 = vpop.f32.mrb[233].mxu0 }
 0x40b   : > { %v8706_v36 = vadd.f32 %v8705_v32, %v8704_v13  ;;  %v8707_v14 = vpop.f32.mrb[234].mxu0 }
 0x40c   : > { %v8708_v20 = vpop.f32.mrb[235].mxu0 }
 0x40d   : > { %v12192_v42 = vadd.f32 %v8706_v36, %v12066_v4  ;;  %v8709_v7 = vadd.f32 %v8708_v20, %v8707_v14 }
 0x40f   : > { %v12195_v33 = vadd.f32 %v8709_v7, %v12070_v35 }
 0x410   : > { %9252 = vmatmul.mubr.bf16.gmra.mrb[124].mxu1 %v7985_v22 }
 0x411   : > { %v8710_v21 = vpop.f32.mrb[236].mxu0 }
 0x412   : > { %v8711_v15 = vpop.f32.mrb[237].mxu0 }
 0x413   : > { %v8712_v12 = vadd.f32 %v8711_v15, %v8710_v21  ;;  %v8713_v19 = vpop.f32.mrb[238].mxu0 }
 0x414   : > { %v8714_v47 = vpop.f32.mrb[239].mxu0 }
 0x415   : > { %v12198_v38 = vadd.f32 %v8712_v12, %v12075_v41  ;;  %v8715_v54 = vadd.f32 %v8714_v47, %v8713_v19 }
 0x417   : > { %v12201_v55 = vadd.f32 %v8715_v54, %v12077_v29 }
 0x419   : > { %v8716_v53 = vpop.f32.mrb[240].mxu0 }
 0x41a   : > { %v8717_v4 = vpop.f32.mrb[241].mxu0 }
 0x41b   : > { %v8718_v50 = vadd.f32 %v8717_v4, %v8716_v53  ;;  %v8719_v39 = vpop.f32.mrb[242].mxu0 }
 0x41c   : > { %v8720_v28 = vpop.f32.mrb[243].mxu0 }
 0x41d   : > { %v12204_v35 = vadd.f32 %v8718_v50, %v12083_v1  ;;  %v8721_v9 = vadd.f32 %v8720_v28, %v8719_v39 }
 0x41f   : > { %v12207_v23 = vadd.f32 %v8721_v9, %v12087_v0 }
 0x421   : > { %v8722_v49 = vpop.f32.mrb[244].mxu0 }
 0x422   : > { %v8723_v37 = vpop.f32.mrb[245].mxu0 }
 0x423   : > { %v8724_v41 = vadd.f32 %v8723_v37, %v8722_v49  ;;  %v8725_v59 = vpop.f32.mrb[246].mxu0 }
 0x424   : > { %v8726_v3 = vpop.f32.mrb[247].mxu0 }
 0x425   : > { %v12210_v29 = vadd.f32 %v8724_v41, %v12092_v18  ;;  %v8727_v34 = vadd.f32 %v8726_v3, %v8725_v59 }
 0x427   : > { %v12213_v24 = vadd.f32 %v8727_v34, %v12094_v48 }
 0x429   : > { %v8728_v43 = vpop.f32.mrb[248].mxu0 }
 0x42a   : > { %v8729_v51 = vpop.f32.mrb[249].mxu0 }
 0x42b   : > { %v8828_v1 = vpop.f32.mrb[128].mxu1  ;;  %v8730_v6 = vadd.f32 %v8729_v51, %v8728_v43  ;;  %v8731_v13 = vpop.f32.mrb[250].mxu0 }
 0x42c   : > { %v8829_v32 = vpop.f32.mrb[129].mxu1  ;;  %v8732_v0 = vpop.f32.mrb[251].mxu0 }
 0x42d   : > { %v8830_v36 = vadd.f32 %v8829_v32, %v8828_v1  ;;  %v8831_v14 = vpop.f32.mrb[130].mxu1  ;;  %v12216_v22 = vadd.f32 %v8730_v6, %v12104_v46  ;;  %v8733_v20 = vadd.f32 %v8732_v0, %v8731_v13 }
 0x42e   : > { %v8832_v7 = vpop.f32.mrb[131].mxu1 }
 0x42f   : > { %v8833_v18 = vadd.f32 %v8832_v7, %v8831_v14  ;;  %v12219_v21 = vadd.f32 %v12172_v58, %v8830_v36  ;;  %v12222_v48 = vadd.f32 %v8733_v20, %v12106_v17 }
 0x431   : > { %v12225_v15 = vadd.f32 %v12175_v40, %v8833_v18  ;;  %v8734_v12 = vpop.f32.mrb[252].mxu0 }
 0x432   : > { %v8735_v19 = vpop.f32.mrb[253].mxu0 }
 0x433   : > { %v8834_v47 = vpop.f32.mrb[132].mxu1  ;;  %v8736_v54 = vadd.f32 %v8735_v19, %v8734_v12  ;;  %v8737_v53 = vpop.f32.mrb[254].mxu0 }
 0x434   : > { %v8835_v4 = vpop.f32.mrb[133].mxu1  ;;  %v8738_v46 = vpop.f32.mrb[255].mxu0 }
 0x435   : > { %v8836_v50 = vadd.f32 %v8835_v4, %v8834_v47  ;;  %v8837_v39 = vpop.f32.mrb[134].mxu1  ;;  %v12228_v28 = vadd.f32 %v8736_v54, %v12111_v61  ;;  %v8739_v58 = vadd.f32 %v8738_v46, %v8737_v53  ;;  %v10090_v46 = vmov 0.0|0.0  }
 0x436   : > { %v8838_v9 = vpop.f32.mrb[135].mxu1  ;;  %9295 = vmatprep.subr.bf16.mxu1 %v10090_v46 }
 0x437   : > { %v8839_v49 = vadd.f32 %v8838_v9, %v8837_v39  ;;  %v12231_v17 = vadd.f32 %v12180_v44, %v8836_v50  ;;  %v12234_v40 = vadd.f32 %v8739_v58, %v12113_v60 }
 0x439   : > { %v12237_v37 = vadd.f32 %v12183_v45, %v8839_v49  ;;  %v8740_v41 = vpop.f32.mrb[0].mxu0 }
 0x43a   : > { %v8741_v59 = vpop.f32.mrb[1].mxu0 }
 0x43b   : > { %v8840_v3 = vpop.f32.mrb[136].mxu1  ;;  %v8742_v34 = vadd.f32 %v8741_v59, %v8740_v41  ;;  %v8743_v43 = vpop.f32.mrb[2].mxu0 }
 0x43c   : > { %v8841_v51 = vpop.f32.mrb[137].mxu1  ;;  %v8744_v61 = vpop.f32.mrb[3].mxu0 }
 0x43d   : > { %v8842_v1 = vadd.f32 %v8841_v51, %v8840_v3  ;;  %v8843_v6 = vpop.f32.mrb[138].mxu1  ;;  %v12240_v13 = vadd.f32 %v8742_v34, %v12118_v27  ;;  %v8745_v44 = vadd.f32 %v8744_v61, %v8743_v43 }
 0x43e   : > { %v8844_v32 = vpop.f32.mrb[139].mxu1 }
 0x43f   : > { %v8845_v0 = vadd.f32 %v8844_v32, %v8843_v6  ;;  %v12243_v60 = vadd.f32 %v12192_v42, %v8842_v1  ;;  %v12246_v45 = vadd.f32 %v8745_v44, %v12121_v56  ;;  %v7251_v42 = vld [vmem:[%s12809_s5] sm:$0xff]  ;;  %v7252_v56 = vld [vmem:[%s12809_s5 + $0x8] sm:$0xff] }
 0x440   : > { %v9296_v50 = vpack.c.bf16 %v7252_v56, %v7251_v42 }
 0x441   : > { %v12249_v36 = vadd.f32 %v12195_v33, %v8845_v0  ;;  %v8746_v14 = vpop.f32.mrb[4].mxu0 }
 0x442   : > { %v8747_v20 = vpop.f32.mrb[5].mxu0  ;;  %9297 = vmatpush3.bf16.msra.mxu1 %v9296_v50 }
 0x443   : > { %v8846_v7 = vpop.f32.mrb[140].mxu1  ;;  %v8748_v18 = vadd.f32 %v8747_v20, %v8746_v14  ;;  %v8749_v12 = vpop.f32.mrb[6].mxu0  ;;  %9298 = vmatprep.subr.bf16.mxu1 %v10090_v46 }
 0x444   : > { %v8847_v19 = vpop.f32.mrb[141].mxu1  ;;  %v8750_v27 = vpop.f32.mrb[7].mxu0 }
 0x445   : > { %v8848_v47 = vadd.f32 %v8847_v19, %v8846_v7  ;;  %v8849_v54 = vpop.f32.mrb[142].mxu1  ;;  %v12258_v33 = vadd.f32 %v8748_v18, %v12125_v62  ;;  %v8751_v53 = vadd.f32 %v8750_v27, %v8749_v12 }
 0x446   : > { %v8850_v4 = vpop.f32.mrb[143].mxu1 }
 0x447   : > { %v8851_v39 = vadd.f32 %v8850_v4, %v8849_v54  ;;  %v12262_v58 = vadd.f32 %v12198_v38, %v8848_v47  ;;  %v12265_v9 = vadd.f32 %v8751_v53, %v12127_v2  ;;  %v7253_v2 = vld [vmem:[%s12809_s5 + $0x10] sm:$0xff]  ;;  %v7254_v38 = vld [vmem:[%s12809_s5 + $0x18] sm:$0xff] }
 0x448   : > { %v9299_v32 = vpack.c.bf16 %v7254_v38, %v7253_v2 }
 0x449   : > { %v12268_v49 = vadd.f32 %v12201_v55, %v8851_v39  ;;  %v8752_v62 = vpop.f32.mrb[8].mxu0 }
 0x44a   : > { %v8753_v41 = vpop.f32.mrb[9].mxu0  ;;  %9300 = vmatpush3.bf16.msra.mxu1 %v9299_v32 }
 0x44b   : > { %v8852_v59 = vpop.f32.mrb[144].mxu1  ;;  %v8754_v3 = vadd.f32 %v8753_v41, %v8752_v62  ;;  %v8755_v34 = vpop.f32.mrb[10].mxu0  ;;  %9301 = vmatprep.subr.bf16.mxu1 %v10090_v46 }
 0x44c   : > { %v8853_v43 = vpop.f32.mrb[145].mxu1  ;;  %v8756_v51 = vpop.f32.mrb[11].mxu0 }
 0x44d   : > { %v8854_v61 = vadd.f32 %v8853_v43, %v8852_v59  ;;  %v8855_v1 = vpop.f32.mrb[146].mxu1  ;;  %v12278_v55 = vadd.f32 %v8754_v3, %v12136_v5  ;;  %v8757_v6 = vadd.f32 %v8756_v51, %v8755_v34 }
 0x44e   : > { %v8856_v44 = vpop.f32.mrb[147].mxu1 }
 0x44f   : > { %v8857_v0 = vadd.f32 %v8856_v44, %v8855_v1  ;;  %v12281_v14 = vadd.f32 %v12204_v35, %v8854_v61  ;;  %v12284_v20 = vadd.f32 %v8757_v6, %v12138_v63  ;;  %v7255_v63 = vld [vmem:[%s12809_s5 + $0x20] sm:$0xff]  ;;  %v7256_v35 = vld [vmem:[%s12809_s5 + $0x28] sm:$0xff] }
 0x450   : > { %v9302_v50 = vpack.c.bf16 %v7256_v35, %v7255_v63 }
 0x451   : > { %v12287_v7 = vadd.f32 %v12207_v23, %v8857_v0  ;;  %v8758_v18 = vpop.f32.mrb[12].mxu0 }
 0x452   : > { %v8759_v12 = vpop.f32.mrb[13].mxu0  ;;  %9303 = vmatpush3.bf16.msra.mxu1 %v9302_v50 }
 0x453   : > { %v8858_v5 = vpop.f32.mrb[148].mxu1  ;;  %v8760_v19 = vadd.f32 %v8759_v12, %v8758_v18  ;;  %v8761_v27 = vpop.f32.mrb[14].mxu0  ;;  %9304 = vmatprep.subr.bf16.mxu1 %v10090_v46 }
 0x454   : > { %v8859_v47 = vpop.f32.mrb[149].mxu1  ;;  %v8762_v54 = vpop.f32.mrb[15].mxu0 }
 0x455   : > { %v8860_v42 = vadd.f32 %v8859_v47, %v8858_v5  ;;  %v8861_v56 = vpop.f32.mrb[150].mxu1  ;;  %v12297_v23 = vadd.f32 %v8760_v19, %v12141_v8  ;;  %v8763_v53 = vadd.f32 %v8762_v54, %v8761_v27 }
 0x456   : > { %v8862_v4 = vpop.f32.mrb[151].mxu1 }
 0x457   : > { %v8863_v39 = vadd.f32 %v8862_v4, %v8861_v56  ;;  %v12300_v62 = vadd.f32 %v12210_v29, %v8860_v42  ;;  %v12303_v41 = vadd.f32 %v8763_v53, %v12143_v10  ;;  %v7257_v10 = vld [vmem:[%s12809_s5 + $0x30] sm:$0xff]  ;;  %v7258_v29 = vld [vmem:[%s12809_s5 + $0x38] sm:$0xff] }
 0x458   : > { %v9305_v32 = vpack.c.bf16 %v7258_v29, %v7257_v10 }
 0x459   : > { %v12306_v59 = vadd.f32 %v12213_v24, %v8863_v39  ;;  %v8764_v3 = vpop.f32.mrb[16].mxu0 }
 0x45a   : > { %v8765_v34 = vpop.f32.mrb[17].mxu0  ;;  %9306 = vmatpush3.bf16.msra.mxu1 %v9305_v32 }
 0x45b   : > { %v8864_v8 = vpop.f32.mrb[152].mxu1  ;;  %v8766_v43 = vadd.f32 %v8765_v34, %v8764_v3  ;;  %v8767_v51 = vpop.f32.mrb[18].mxu0  ;;  %9307 = vmatprep.subr.bf16.mxu1 %v10090_v46 }
 0x45c   : > { %v8865_v61 = vpop.f32.mrb[153].mxu1  ;;  %v8768_v1 = vpop.f32.mrb[19].mxu0 }
 0x45d   : > { %v8866_v2 = vadd.f32 %v8865_v61, %v8864_v8  ;;  %v8867_v38 = vpop.f32.mrb[154].mxu1  ;;  %v12316_v24 = vadd.f32 %v8766_v43, %v12147_v16  ;;  %v8769_v6 = vadd.f32 %v8768_v1, %v8767_v51 }
 0x45e   : > { %v8868_v44 = vpop.f32.mrb[155].mxu1 }
 0x45f   : > { %v8869_v0 = vadd.f32 %v8868_v44, %v8867_v38  ;;  %v12319_v18 = vadd.f32 %v12216_v22, %v8866_v2  ;;  %v12322_v12 = vadd.f32 %v8769_v6, %v12149_v11  ;;  %v7259_v11 = vld [vmem:[%s12809_s5 + $0x40] sm:$0xff]  ;;  %v7260_v22 = vld [vmem:[%s12809_s5 + $0x48] sm:$0xff] }
 0x460   : > { %v9308_v50 = vpack.c.bf16 %v7260_v22, %v7259_v11 }
 0x461   : > { %v12325_v5 = vadd.f32 %v12222_v48, %v8869_v0  ;;  %v8770_v19 = vpop.f32.mrb[20].mxu0 }
 0x462   : > { %v8771_v27 = vpop.f32.mrb[21].mxu0  ;;  %9309 = vmatpush3.bf16.msra.mxu1 %v9308_v50 }
 0x463   : > { %v8870_v16 = vpop.f32.mrb[156].mxu1  ;;  %v8772_v47 = vadd.f32 %v8771_v27, %v8770_v19  ;;  %v8773_v54 = vpop.f32.mrb[22].mxu0  ;;  %9310 = vmatprep.subr.bf16.mxu1 %v10090_v46 }
 0x464   : > { %v8871_v42 = vpop.f32.mrb[157].mxu1  ;;  %v8774_v56 = vpop.f32.mrb[23].mxu0 }
 0x465   : > { %v8872_v63 = vadd.f32 %v8871_v42, %v8870_v16  ;;  %v8873_v35 = vpop.f32.mrb[158].mxu1  ;;  %v12335_v48 = vadd.f32 %v8772_v47, %v12153_v26  ;;  %v8775_v53 = vadd.f32 %v8774_v56, %v8773_v54 }
 0x466   : > { %v8874_v4 = vpop.f32.mrb[159].mxu1 }
 0x467   : > { %v8875_v39 = vadd.f32 %v8874_v4, %v8873_v35  ;;  %v12338_v3 = vadd.f32 %v12228_v28, %v8872_v63  ;;  %v12341_v34 = vadd.f32 %v8775_v53, %v12155_v25  ;;  %v7262_v53 = vld [vmem:[%s12809_s5 + $0x58] sm:$0xff] }
 0x469   : > { %v12344_v8 = vadd.f32 %v12234_v40, %v8875_v39  ;;  %v8776_v43 = vpop.f32.mrb[24].mxu0  ;;  %v10092_v39 = vmov 0.0  }
 0x46a   : > { %v8777_v51 = vpop.f32.mrb[25].mxu0  ;;  %9287 = vmatprep.mubr.msk.f32.mxu1 %vm10091_vm15, %v10092_v39  ;;  %9290 = vmatprep.subr.mxu0 %v10092_v39 }
 0x46b   : > { %v8876_v26 = vpop.f32.mrb[160].mxu1  ;;  %v8778_v61 = vadd.f32 %v8777_v51, %v8776_v43  ;;  %v8779_v1 = vpop.f32.mrb[26].mxu0  ;;  %9292 = vmatprep.mubr.msk.f32.mxu0 %vm10091_vm15, %v10092_v39 }
 0x46c   : > { %v8877_v2 = vpop.f32.mrb[161].mxu1  ;;  %v8780_v38 = vpop.f32.mrb[27].mxu0 }
 0x46d   : > { %v8878_v10 = vadd.f32 %v8877_v2, %v8876_v26  ;;  %v8879_v29 = vpop.f32.mrb[162].mxu1  ;;  %v12348_v28 = vadd.f32 %v8778_v61, %v12159_v52  ;;  %v8781_v25 = vadd.f32 %v8780_v38, %v8779_v1  ;;  %v7265_v26 = vld [vmem:[%s12809_s5 + $0x70] sm:$0xff]  ;;  %v7266_v61 = vld [vmem:[%s12809_s5 + $0x78] sm:$0xff] }
 0x46e   : > { %v8880_v6 = vpop.f32.mrb[163].mxu1 }
 0x46f   : > { %v8881_v44 = vadd.f32 %v8880_v6, %v8879_v29  ;;  %v12351_v40 = vadd.f32 %v12240_v13, %v8878_v10  ;;  %v12354_v32 = vadd.f32 %v8781_v25, %v12161_v57  ;;  %v7339_v6 = vld [vmem:[%s12811_s7] sm:$0xff] }
 0x470   : > { %9291 = vmatpush3.msra.mxu0 %v7339_v6 }
 0x471   : > { %v12357_v0 = vadd.f32 %v12246_v45, %v8881_v44  ;;  %v8782_v19 = vpop.f32.mrb[28].mxu0  ;;  %v7261_v45 = vld [vmem:[%s12809_s5 + $0x50] sm:$0xff] }
 0x472   : > { %v8783_v27 = vpop.f32.mrb[29].mxu0  ;;  %v9311_v50 = vpack.c.bf16 %v7262_v53, %v7261_v45 }
 0x473   : > { %v8882_v16 = vpop.f32.mrb[164].mxu1  ;;  %v8784_v47 = vadd.f32 %v8783_v27, %v8782_v19  ;;  %v8785_v54 = vpop.f32.mrb[30].mxu0 }
 0x474   : > { %v8883_v42 = vpop.f32.mrb[165].mxu1  ;;  %v8786_v52 = vpop.f32.mrb[31].mxu0  ;;  %9312 = vmatpush3.bf16.msra.mxu1 %v9311_v50 }
 0x475   : > { %v8884_v56 = vadd.f32 %v8883_v42, %v8882_v16  ;;  %v8885_v63 = vpop.f32.mrb[166].mxu1  ;;  %v12360_v35 = vadd.f32 %v8784_v47, %v12165_v31  ;;  %v8787_v13 = vadd.f32 %v8786_v52, %v8785_v54  ;;  %v7263_v31 = vld [vmem:[%s12809_s5 + $0x60] sm:$0xff]  ;;  %9313 = vmatprep.subr.bf16.mxu1 %v10090_v46 }
 0x476   : > { %v8886_v11 = vpop.f32.mrb[167].mxu1 }
 0x477   : > { %v8887_v22 = vadd.f32 %v8886_v11, %v8885_v63  ;;  %v12363_v57 = vadd.f32 %v12258_v33, %v8884_v56  ;;  %v12372_v4 = vadd.f32 %v8787_v13, %v12167_v30  ;;  %v7264_v33 = vld [vmem:[%s12809_s5 + $0x68] sm:$0xff] }
 0x478   : > { %v9314_v30 = vpack.c.bf16 %v7264_v33, %v7263_v31 }
 0x479   : > { %v12381_v43 = vadd.f32 %v12265_v9, %v8887_v22  ;;  %v9317_v9 = vpack.c.bf16 %v7266_v61, %v7265_v26 }
 0x47a   : > { %9315 = vmatpush3.bf16.msra.mxu1 %v9314_v30 }
 0x47b   : > { %v8888_v51 = vpop.f32.mrb[168].mxu1  ;;  %9316 = vmatprep.subr.bf16.mxu1 %v10090_v46 }
 0x47c   : > { %v8889_v1 = vpop.f32.mrb[169].mxu1 }
 0x47d   : > { %v8890_v2 = vadd.f32 %v8889_v1, %v8888_v51  ;;  %v8891_v38 = vpop.f32.mrb[170].mxu1 }
 0x47e   : > { %v8892_v10 = vpop.f32.mrb[171].mxu1  ;;  %9318 = vmatpush3.bf16.msra.mxu1 %v9317_v9 }
 0x47f   : > { %v8893_v29 = vadd.f32 %v8892_v10, %v8891_v38  ;;  %v12391_v25 = vadd.f32 %v12278_v55, %v8890_v2 }
 0x481   : > { %v12398_v44 = vadd.f32 %v12284_v20, %v8893_v29 }
 0x483   : > { %v8894_v19 = vpop.f32.mrb[172].mxu1 }
 0x484   : > { %v8895_v27 = vpop.f32.mrb[173].mxu1 }
 0x485   : > { %v8896_v16 = vadd.f32 %v8895_v27, %v8894_v19  ;;  %v8897_v47 = vpop.f32.mrb[174].mxu1 }
 0x486   : > { %v8898_v54 = vpop.f32.mrb[175].mxu1 }
 0x487   : > { %v8899_v42 = vadd.f32 %v8898_v54, %v8897_v47  ;;  %v12401_v55 = vadd.f32 %v12297_v23, %v8896_v16 }
 0x489   : > { %v12404_v46 = vadd.f32 %v12303_v41, %v8899_v42  ;;  %v12435_v42 = vld [vmem:[%s12808_s4] ss:$0 sm:$0xff] }
 0x48b   : > { %v8900_v52 = vpop.f32.mrb[176].mxu1 }
 0x48c   : > { %v8901_v56 = vpop.f32.mrb[177].mxu1 }
 0x48d   : > { %v8902_v63 = vadd.f32 %v8901_v56, %v8900_v52  ;;  %v8903_v13 = vpop.f32.mrb[178].mxu1 }
 0x48e   : > { %v8904_v11 = vpop.f32.mrb[179].mxu1 }
 0x48f   : > { %v8905_v20 = vadd.f32 %v8904_v11, %v8903_v13  ;;  %v12407_v22 = vadd.f32 %v12316_v24, %v8902_v63 }
 0x491   : > { %v12410_v45 = vadd.f32 %v12322_v12, %v8905_v20 }
 0x493   : > { %v8906_v53 = vpop.f32.mrb[180].mxu1 }
 0x494   : > { %v8907_v50 = vpop.f32.mrb[181].mxu1 }
 0x495   : > { %v8908_v31 = vadd.f32 %v8907_v50, %v8906_v53  ;;  %v8909_v23 = vpop.f32.mrb[182].mxu1 }
 0x496   : > { %v8910_v33 = vpop.f32.mrb[183].mxu1 }
 0x497   : > { %v8911_v39 = vadd.f32 %v8910_v33, %v8909_v23  ;;  %v12413_v41 = vadd.f32 %v12335_v48, %v8908_v31 }
 0x499   : > { %v12416_v30 = vadd.f32 %v12341_v34, %v8911_v39 }
 0x49b   : > { %v8912_v51 = vpop.f32.mrb[184].mxu1 }
 0x49c   : > { %v8913_v26 = vpop.f32.mrb[185].mxu1 }
 0x49d   : > { %v8914_v61 = vadd.f32 %v8913_v26, %v8912_v51  ;;  %v8915_v24 = vpop.f32.mrb[186].mxu1 }
 0x49e   : > { %v8916_v1 = vpop.f32.mrb[187].mxu1 }
 0x49f   : > { %v8917_v2 = vadd.f32 %v8916_v1, %v8915_v24  ;;  %v12419_v12 = vadd.f32 %v12348_v28, %v8914_v61 }
 0x4a1   : > { %v12422_v38 = vadd.f32 %v12354_v32, %v8917_v2 }
 0x4a3   : > { %v8918_v10 = vpop.f32.mrb[188].mxu1 }
 0x4a4   : > { %v8919_v9 = vpop.f32.mrb[189].mxu1 }
 0x4a5   : > { %v8920_v29 = vadd.f32 %v8919_v9, %v8918_v10  ;;  %v8921_v48 = vpop.f32.mrb[190].mxu1 }
 0x4a6   : > { %v8922_v6 = vpop.f32.mrb[191].mxu1 }
 0x4a7   : > { %v8923_v19 = vadd.f32 %v8922_v6, %v8921_v48  ;;  %v12425_v34 = vadd.f32 %v12360_v35, %v8920_v29 }
 0x4a9   : > { %v12428_v27 = vadd.f32 %v12372_v4, %v8923_v19 }
 0x4ab   : > { %v9225_v16 = vpop.f32.mrb[96].mxu1 }
 0x4ac   : > { %v9449_v47 = vadd.f32 %v12231_v17, %v9225_v16  ;;  %v6982_v28 = vpop.f32.mrb[97].mxu1 }
 0x4ad   : > { %v9452_v54 = vadd.f32 %v12219_v21, %v6982_v28  ;;  %v9226_v32 = vpop.f32.mrb[98].mxu1 }
 0x4ae   : > { %v9455_v52 = vadd.f32 %v12237_v37, %v9226_v32  ;;  %v6985_v56 = vpop.f32.mrb[99].mxu1  ;;  %v12446_v17 = vadd.f32 %v9449_v47, %v12435_v42 }
 0x4af   : > { %v9458_v35 = vadd.f32 %v12225_v15, %v6985_v56  ;;  %v12440_v4 = vadd.f32 %v9452_v54, %v12435_v42 }
 0x4b0   : > { %v12452_v37 = vadd.f32 %v9455_v52, %v12435_v42 }
 0x4b1   : > { %v12443_v63 = vadd.f32 %v9458_v35, %v12435_v42 }
 0x4b3   : > { %v7180_v21 = vadd.f32 %v12443_v63, %v12440_v4  ;;  %v9229_v13 = vpop.f32.mrb[100].mxu1 }
 0x4b4   : > { %v9461_v11 = vadd.f32 %v12262_v58, %v9229_v13  ;;  %v6998_v20 = vpop.f32.mrb[101].mxu1 }
 0x4b5   : > { %v7181_v15 = vadd.f32 %v7180_v21, %v12446_v17  ;;  %v9464_v53 = vadd.f32 %v12243_v60, %v6998_v20  ;;  %v9230_v50 = vpop.f32.mrb[102].mxu1 }
 0x4b6   : > { %v9467_v31 = vadd.f32 %v12268_v49, %v9230_v50  ;;  %v7001_v23 = vpop.f32.mrb[103].mxu1  ;;  %v12467_v61 = vadd.f32 %v9461_v11, %v12435_v42 }
 0x4b7   : > { %v12458_v33 = vadd.f32 %v9464_v53, %v12435_v42  ;;  %v7182_v39 = vadd.f32 %v7181_v15, %v12452_v37  ;;  %v9470_v51 = vadd.f32 %v12249_v36, %v7001_v23 }
 0x4b8   : > { %v12472_v2 = vadd.f32 %v9467_v31, %v12435_v42 }
 0x4b9   : > { %v7183_v58 = vadd.f32 %v7182_v39, %v12458_v33  ;;  %v12464_v26 = vadd.f32 %v9470_v51, %v12435_v42 }
 0x4bb   : > { %v7184_v60 = vadd.f32 %v7183_v58, %v12464_v26  ;;  %v9233_v24 = vpop.f32.mrb[104].mxu1 }
 0x4bc   : > { %v9473_v49 = vadd.f32 %v12300_v62, %v9233_v24  ;;  %v7014_v1 = vpop.f32.mrb[105].mxu1 }
 0x4bd   : > { %v7185_v10 = vadd.f32 %v7184_v60, %v12467_v61  ;;  %v9476_v36 = vadd.f32 %v12281_v14, %v7014_v1  ;;  %v9234_v9 = vpop.f32.mrb[106].mxu1 }
 0x4be   : > { %v9479_v29 = vadd.f32 %v12306_v59, %v9234_v9  ;;  %v7017_v48 = vpop.f32.mrb[107].mxu1  ;;  %v12487_v28 = vadd.f32 %v9473_v49, %v12435_v42 }
 0x4bf   : > { %v12478_v6 = vadd.f32 %v9476_v36, %v12435_v42  ;;  %v7186_v19 = vadd.f32 %v7185_v10, %v12472_v2  ;;  %v9482_v16 = vadd.f32 %v12287_v7, %v7017_v48 }
 0x4c0   : > { %v12492_v52 = vadd.f32 %v9479_v29, %v12435_v42 }
 0x4c1   : > { %v7187_v62 = vadd.f32 %v7186_v19, %v12478_v6  ;;  %v12484_v47 = vadd.f32 %v9482_v16, %v12435_v42 }
 0x4c3   : > { %v7188_v14 = vadd.f32 %v7187_v62, %v12484_v47  ;;  %v9237_v54 = vpop.f32.mrb[108].mxu1 }
 0x4c4   : > { %v9485_v59 = vadd.f32 %v12338_v3, %v9237_v54  ;;  %v7030_v32 = vpop.f32.mrb[109].mxu1 }
 0x4c5   : > { %v7189_v56 = vadd.f32 %v7188_v14, %v12487_v28  ;;  %v9488_v7 = vadd.f32 %v12319_v18, %v7030_v32  ;;  %v9238_v35 = vpop.f32.mrb[110].mxu1 }
 0x4c6   : > { %v9491_v21 = vadd.f32 %v12344_v8, %v9238_v35  ;;  %v7033_v13 = vpop.f32.mrb[111].mxu1  ;;  %v12507_v50 = vadd.f32 %v9485_v59, %v12435_v42 }
 0x4c7   : > { %v12498_v11 = vadd.f32 %v9488_v7, %v12435_v42  ;;  %v7190_v20 = vadd.f32 %v7189_v56, %v12492_v52  ;;  %v9494_v15 = vadd.f32 %v12325_v5, %v7033_v13 }
 0x4c8   : > { %v12512_v39 = vadd.f32 %v9491_v21, %v12435_v42 }
 0x4c9   : > { %v7191_v3 = vadd.f32 %v7190_v20, %v12498_v11  ;;  %v12504_v53 = vadd.f32 %v9494_v15, %v12435_v42 }
 0x4cb   : > { %v7192_v18 = vadd.f32 %v7191_v3, %v12504_v53  ;;  %v9241_v31 = vpop.f32.mrb[112].mxu1 }
 0x4cc   : > { %v9497_v8 = vadd.f32 %v12363_v57, %v9241_v31  ;;  %v7046_v23 = vpop.f32.mrb[113].mxu1 }
 0x4cd   : > { %v7193_v51 = vadd.f32 %v7192_v18, %v12507_v50  ;;  %v9500_v5 = vadd.f32 %v12351_v40, %v7046_v23  ;;  %v9242_v58 = vpop.f32.mrb[114].mxu1 }
 0x4ce   : > { %v9503_v60 = vadd.f32 %v12381_v43, %v9242_v58  ;;  %v7049_v24 = vpop.f32.mrb[115].mxu1  ;;  %v12527_v9 = vadd.f32 %v9497_v8, %v12435_v42 }
 0x4cf   : > { %v12518_v49 = vadd.f32 %v9500_v5, %v12435_v42  ;;  %v7194_v1 = vadd.f32 %v7193_v51, %v12512_v39  ;;  %v9506_v10 = vadd.f32 %v12357_v0, %v7049_v24 }
 0x4d0   : > { %v12532_v19 = vadd.f32 %v9503_v60, %v12435_v42 }
 0x4d1   : > { %v7195_v57 = vadd.f32 %v7194_v1, %v12518_v49  ;;  %v12524_v36 = vadd.f32 %v9506_v10, %v12435_v42 }
 0x4d3   : > { %v7196_v40 = vadd.f32 %v7195_v57, %v12524_v36  ;;  %v9245_v29 = vpop.f32.mrb[116].mxu1 }
 0x4d4   : > { %v9509_v43 = vadd.f32 %v12401_v55, %v9245_v29  ;;  %v7062_v48 = vpop.f32.mrb[117].mxu1 }
 0x4d5   : > { %v7197_v16 = vadd.f32 %v7196_v40, %v12527_v9  ;;  %v9512_v0 = vadd.f32 %v12391_v25, %v7062_v48  ;;  %v9246_v62 = vpop.f32.mrb[118].mxu1 }
 0x4d6   : > { %v9515_v14 = vadd.f32 %v12404_v46, %v9246_v62  ;;  %v7065_v54 = vpop.f32.mrb[119].mxu1  ;;  %v12547_v35 = vadd.f32 %v9509_v43, %v12435_v42 }
 0x4d7   : > { %v12538_v59 = vadd.f32 %v9512_v0, %v12435_v42  ;;  %v7198_v32 = vadd.f32 %v7197_v16, %v12532_v19  ;;  %v9518_v56 = vadd.f32 %v12398_v44, %v7065_v54 }
 0x4d8   : > { %v12552_v20 = vadd.f32 %v9515_v14, %v12435_v42 }
 0x4d9   : > { %v7199_v55 = vadd.f32 %v7198_v32, %v12538_v59  ;;  %v12544_v7 = vadd.f32 %v9518_v56, %v12435_v42 }
 0x4db   : > { %v7200_v25 = vadd.f32 %v7199_v55, %v12544_v7  ;;  %v9249_v21 = vpop.f32.mrb[120].mxu1 }
 0x4dc   : > { %v9521_v46 = vadd.f32 %v12413_v41, %v9249_v21  ;;  %v7078_v13 = vpop.f32.mrb[121].mxu1 }
 0x4dd   : > { %v7201_v15 = vadd.f32 %v7200_v25, %v12547_v35  ;;  %v9524_v44 = vadd.f32 %v12407_v22, %v7078_v13  ;;  %v9250_v3 = vpop.f32.mrb[122].mxu1  ;;  %v7267_v13 = vld [vmem:[%s12810_s6] sm:$0x1] }
 0x4de   : > { %v9527_v18 = vadd.f32 %v12416_v30, %v9250_v3  ;;  %v7081_v31 = vpop.f32.mrb[123].mxu1  ;;  %v12567_v58 = vadd.f32 %v9521_v46, %v12435_v42 }
 0x4df   : > { %v12558_v8 = vadd.f32 %v9524_v44, %v12435_v42  ;;  %v7202_v23 = vadd.f32 %v7201_v15, %v12552_v20  ;;  %v9530_v51 = vadd.f32 %v12410_v45, %v7081_v31 }
 0x4e0   : > { %v12572_v1 = vadd.f32 %v9527_v18, %v12435_v42  ;;  %v7340_v18 = vld [vmem:[%s12812_s8] sm:$0x1] }
 0x4e1   : > { %v7203_v41 = vadd.f32 %v7202_v23, %v12558_v8  ;;  %v12564_v5 = vadd.f32 %v9530_v51, %v12435_v42 }
 0x4e3   : > { %v7204_v22 = vadd.f32 %v7203_v41, %v12564_v5  ;;  %v9253_v60 = vpop.f32.mrb[124].mxu1 }
 0x4e4   : > { %v9533_v30 = vadd.f32 %v12425_v34, %v9253_v60  ;;  %v7094_v24 = vpop.f32.mrb[125].mxu1 }
 0x4e5   : > { %v7205_v10 = vadd.f32 %v7204_v22, %v12567_v58  ;;  %v9536_v45 = vadd.f32 %v12419_v12, %v7094_v24  ;;  %v9254_v57 = vpop.f32.mrb[126].mxu1 }
 0x4e6   : > { %v9539_v40 = vadd.f32 %v12428_v27, %v9254_v57  ;;  %v7097_v29 = vpop.f32.mrb[127].mxu1  ;;  %v12587_v62 = vadd.f32 %v9533_v30, %v12435_v42  ;;  %v7454_v30 = vlaneseq }
 0x4e7   : > { %v12578_v43 = vadd.f32 %v9536_v45, %v12435_v42  ;;  %v7206_v48 = vadd.f32 %v7205_v10, %v12572_v1  ;;  %v9542_v16 = vadd.f32 %v12422_v38, %v7097_v29 }
 0x4e8   : > { %v12591_v27 = vadd.f32 %v9539_v40, %v12435_v42  ;;  %v7455_v24 = vshrl.u32 %v7454_v30, 7 }
 0x4e9   : > { %v7207_v34 = vadd.f32 %v7206_v48, %v12578_v43  ;;  %v12584_v0 = vadd.f32 %v9542_v16, %v12435_v42 }
 0x4ea   : > { %v7456_v10 = vsub.s32 0, %v7455_v24  ;;  %v7512_v24 = vld [vmem:[%s10324_s22 + $0xb0] sm:$0xff] }
 0x4eb   : > { %v7208_v12 = vadd.f32 %v7207_v34, %v12584_v0 }
 0x4ed   : > { %v7209_v14 = vadd.f32 %v7208_v12, %v12587_v62 }
 0x4ef   : > { %v7210_v54 = vadd.f32 %v7209_v14, %v12591_v27 }
 0x4f1   : > { %v7211_v32 = vrot.slane %v7210_v54, 4 }
 0x4f3   : > { %v7212_v56 = vadd.f32 %v7211_v32, %v7210_v54 }
 0x4f5   : > { %v7213_v38 = vrot.slane %v7212_v56, 2 }
 0x4f7   : > { %v7214_v55 = vadd.f32 %v7213_v38, %v7212_v56  ;;  %v7492_v56 = vld [vmem:[%s10324_s22 + $0x10] sm:$0xff]  ;;  %v7491_v38 = vld [vmem:[%s10324_s22 + $0x8] sm:$0xff] }
 0x4f9   : > { %v7215_v25 = vrot.slane %v7214_v55, 1 }
 0x4fb   : > { %v7216_v21 = vadd.f32 %v7215_v25, %v7214_v55  ;;  %v7495_v25 = vld [vmem:[%s10324_s22 + $0x28] sm:$0xff] }
 0x4fd   : > { %v7218_v46 = vmul.f32 0.00390625, %v7216_v21 }
 0x4ff   : > { %9288 = vmatmul.mubr.f32.vlgmr.msra.gmra.mrb[192].mxu1 %v7218_v46 }
 0x5d2   : > { %v7334_v15 = vpop.f32.mrb[192].mxu1 }
 0x5d3   : > { %v7335_v44 = vadd.f32 %v7334_v15, %v7267_v13  ;;  %v9289_v42 = vpop.f32.mrb[193].mxu1  ;;  %v7501_v13 = vld [vmem:[%s10324_s22 + $0x58] sm:$0xff] }
 0x5d4   : > { %v7502_v42 = vld [vmem:[%s10324_s22 + $0x60] sm:$0xff] }
 0x5d5   : > { %v7338_v3 = vmax.f32 %v7335_v44, 0.0  ;;  %v7504_v44 = vld [vmem:[%s10324_s22 + $0x70] sm:$0xff] }
 0x5d7   : > { %9293 = vmatmul.mubr.msk.f32.vlgmr.msra.gmra.mrb[32].mxu0 %vm7341_vm0, %v7338_v3 }
 0x6aa   : > { %v7411_v31 = vpop.f32.mrb[32].mxu0 }
 0x6ab   : > { %v7412_v23 = vadd.f32 %v7411_v31, %v7340_v18  ;;  %v9294_v51 = vpop.f32.mrb[33].mxu0  ;;  %v7503_v18 = vld [vmem:[%s10324_s22 + $0x68] sm:$0xff]  ;;  %v7508_v31 = vld [vmem:[%s10324_s22 + $0x90] sm:$0xff] }
 0x6ac   : > { %v7509_v51 = vld [vmem:[%s10324_s22 + $0x98] sm:$0xff] }
 0x6ad   : > { %v8060_v41 = vmul.f32 -1.442695, %v7412_v23 }
 0x6af   : > { %9896 = vpow2.f32 %v8060_v41  ;;  %v7507_v41 = vld [vmem:[%s10324_s22 + $0x88] sm:$0xff] }
 0x6b9   : > { %v9897_v22 = vpop.eup %9896 }
 0x6ba   : > { %v7418_v60 = vadd.f32 1.0, %v9897_v22 }
 0x6bc   : > { %9898 = vrcp.f32 %v7418_v60 }
 0x6c6   : > { %v9899_v45 = vpop.eup %9898 }
 0x6c7   : > { %v7421_v57 = vmul.f32 0.1, %v9899_v45 }
 0x6c9   : > { %v7457_v40 = vrot.slane %v7421_v57, %v7456_v10  ;;  %v7513_v10 = vld [vmem:[%s10324_s22 + $0xb8] sm:$0xff] }
 0x6cb   : > { %v7458_v29 = vmul.f32 %v7457_v40, %v12440_v4  ;;  %v7459_v48 = vmul.f32 %v7457_v40, %v12443_v63  ;;  %v7460_v16 = vmul.f32 %v7457_v40, %v12446_v17  ;;  %v7461_v34 = vmul.f32 %v7457_v40, %v12452_v37 }
 0x6cc   : > { %v7462_v12 = vmul.f32 %v7457_v40, %v12458_v33  ;;  %v7463_v14 = vmul.f32 %v7457_v40, %v12464_v26  ;;  %v7464_v54 = vmul.f32 %v7457_v40, %v12467_v61  ;;  %v7465_v32 = vmul.f32 %v7457_v40, %v12472_v2  ;;  %v7490_v33 = vld [vmem:[%s10324_s22] sm:$0xff]  ;;  %v7493_v26 = vld [vmem:[%s10324_s22 + $0x18] sm:$0xff] }
 0x6cd   : > { %v7466_v4 = vmul.f32 %v7457_v40, %v12478_v6  ;;  %v7467_v63 = vmul.f32 %v7457_v40, %v12484_v47  ;;  %v7468_v17 = vmul.f32 %v7457_v40, %v12487_v28  ;;  %v7469_v37 = vmul.f32 %v7457_v40, %v12492_v52  ;;  %v7496_v47 = vld [vmem:[%s10324_s22 + $0x30] sm:$0xff]  ;;  %v7494_v28 = vld [vmem:[%s10324_s22 + $0x20] sm:$0xff]  ;;  %v7497_v52 = vld [vmem:[%s10324_s22 + $0x38] sm:$0xff] }
 0x6ce   : > { %v7470_v61 = vmul.f32 %v7457_v40, %v12498_v11  ;;  %v7471_v2 = vmul.f32 %v7457_v40, %v12504_v53  ;;  %v7472_v55 = vmul.f32 %v7457_v40, %v12507_v50  ;;  %v7473_v6 = vmul.f32 %v7457_v40, %v12512_v39  ;;  %v7500_v50 = vld [vmem:[%s10324_s22 + $0x50] sm:$0xff]  ;;  %v7498_v39 = vld [vmem:[%s10324_s22 + $0x40] sm:$0xff] }
 0x6cf   : > { %v12626_v21 = vmul.f32 %v7457_v40, %v12518_v49  ;;  %v12629_v46 = vmul.f32 %v7457_v40, %v12524_v36  ;;  %v12632_v11 = vmul.f32 %v7457_v40, %v12527_v9  ;;  %v12635_v53 = vmul.f32 %v7457_v40, %v12532_v19  ;;  %v7499_v19 = vld [vmem:[%s10324_s22 + $0x48] sm:$0xff] }
 0x6d0   : > { %v12641_v15 = vmul.f32 %v7457_v40, %v12538_v59  ;;  %v12644_v49 = vmul.f32 %v7457_v40, %v12544_v7  ;;  %v12647_v36 = vmul.f32 %v7457_v40, %v12547_v35  ;;  %v12650_v9 = vmul.f32 %v7457_v40, %v12552_v20  ;;  %v7505_v20 = vld [vmem:[%s10324_s22 + $0x78] sm:$0xff] }
 0x6d1   : > { %v12656_v3 = vmul.f32 %v7457_v40, %v12558_v8  ;;  %v12659_v59 = vmul.f32 %v7457_v40, %v12564_v5  ;;  %v12662_v7 = vmul.f32 %v7457_v40, %v12567_v58  ;;  %v12665_v35 = vmul.f32 %v7457_v40, %v12572_v1  ;;  %v7506_v1 = vld [vmem:[%s10324_s22 + $0x80] sm:$0xff] }
 0x6d2   : > { %v12671_v23 = vmul.f32 %v7457_v40, %v12578_v43  ;;  %v12674_v8 = vmul.f32 %v7457_v40, %v12584_v0  ;;  %v12677_v5 = vmul.f32 %v7457_v40, %v12587_v62  ;;  %v12680_v58 = vmul.f32 %v7457_v40, %v12591_v27  ;;  %v7510_v0 = vld [vmem:[%s10324_s22 + $0xa0] sm:$0xff]  ;;  %v7511_v40 = vld [vmem:[%s10324_s22 + $0xa8] sm:$0xff] }
 0x6d3   : > { %v7522_v22 = vadd.f32 %v7490_v33, %v7458_v29  ;;  %v7523_v60 = vadd.f32 %v7491_v38, %v7459_v48  ;;  %v7524_v30 = vadd.f32 %v7492_v56, %v7460_v16  ;;  %v7525_v43 = vadd.f32 %v7493_v26, %v7461_v34  ;;  %v7517_v16 = vld [vmem:[%s10324_s22 + $0xd8] sm:$0xff]  ;;  %v7515_v34 = vld [vmem:[%s10324_s22 + $0xc8] sm:$0xff] }
 0x6d4   : > { %12966 = vst [vmem:[#allocation26_spill] sm:$0xff] %v12671_v23  ;;  %12967 = vst [vmem:[#allocation24_spill] sm:$0xff] %v12674_v8  ;;  %v7526_v45 = vadd.f32 %v7494_v28, %v7462_v12  ;;  %v7527_v62 = vadd.f32 %v7495_v25, %v7463_v14  ;;  %v7528_v57 = vadd.f32 %v7496_v47, %v7464_v54  ;;  %v7520_v12 = vld [vmem:[%s10324_s22 + $0xf0] sm:$0xff] }
 0x6d5   : > { %12968 = vst [vmem:[#allocation31_spill] sm:$0xff] %v12677_v5  ;;  %12969 = vst [vmem:[#allocation23_spill] sm:$0xff] %v12680_v58  ;;  %v7529_v27 = vadd.f32 %v7497_v52, %v7465_v32  ;;  %v7516_v58 = vld [vmem:[%s10324_s22 + $0xd0] sm:$0xff]  ;;  %v7514_v5 = vld [vmem:[%s10324_s22 + $0xc0] sm:$0xff]  ;;  %v7530_v8 = vadd.f32 %v7498_v39, %v7466_v4  ;;  %v7531_v23 = vadd.f32 %v7499_v19, %v7467_v63 }
 0x6d6   : > { %v7532_v29 = vadd.f32 %v7500_v50, %v7468_v17  ;;  %v7533_v48 = vadd.f32 %v7501_v13, %v7469_v37  ;;  %7554 = vst [vmem:[%s12693_s23] sm:$0xff] %v7522_v22  ;;  %7555 = vst [vmem:[%s12693_s23 + $0x8] sm:$0xff] %v7523_v60  ;;  %v7534_v14 = vadd.f32 %v7502_v42, %v7470_v61  ;;  %v7518_v63 = vld [vmem:[%s10324_s22 + $0xe0] sm:$0xff]  ;;  %v7521_v17 = vld [vmem:[%s10324_s22 + $0xf8] sm:$0xff] }
 0x6d7   : > { %7556 = vst [vmem:[%s12693_s23 + $0x10] sm:$0xff] %v7524_v30  ;;  %7557 = vst [vmem:[%s12693_s23 + $0x18] sm:$0xff] %v7525_v43  ;;  %v7535_v54 = vadd.f32 %v7503_v18, %v7471_v2  ;;  %v7536_v32 = vadd.f32 %v7504_v44, %v7472_v55  ;;  %v7537_v4 = vadd.f32 %v7505_v20, %v7473_v6  ;;  %v7519_v37 = vld [vmem:[%s10324_s22 + $0xe8] sm:$0xff] }
 0x6d8   : > { %7558 = vst [vmem:[%s12693_s23 + $0x20] sm:$0xff] %v7526_v45  ;;  %7559 = vst [vmem:[%s12693_s23 + $0x28] sm:$0xff] %v7527_v62  ;;  %v7538_v56 = vadd.f32 %v7506_v1, %v12626_v21  ;;  %v7539_v33 = vadd.f32 %v7507_v41, %v12629_v46  ;;  %v7540_v26 = vadd.f32 %v7508_v31, %v12632_v11 }
 0x6d9   : > { %7560 = vst [vmem:[%s12693_s23 + $0x30] sm:$0xff] %v7528_v57  ;;  %7561 = vst [vmem:[%s12693_s23 + $0x38] sm:$0xff] %v7529_v27  ;;  %v7541_v38 = vadd.f32 %v7509_v51, %v12635_v53  ;;  %v7542_v61 = vadd.f32 %v7510_v0, %v12641_v15  ;;  %v7543_v2 = vadd.f32 %v7511_v40, %v12644_v49 }
 0x6da   : > { %7562 = vst [vmem:[%s12693_s23 + $0x40] sm:$0xff] %v7530_v8  ;;  %7563 = vst [vmem:[%s12693_s23 + $0x48] sm:$0xff] %v7531_v23  ;;  %v7544_v55 = vadd.f32 %v7512_v24, %v12647_v36  ;;  %v7545_v6 = vadd.f32 %v7513_v10, %v12650_v9  ;;  %v7546_v47 = vadd.f32 %v7514_v5, %v12656_v3 }
 0x6db   : > { %7564 = vst [vmem:[%s12693_s23 + $0x50] sm:$0xff] %v7532_v29  ;;  %7565 = vst [vmem:[%s12693_s23 + $0x58] sm:$0xff] %v7533_v48  ;;  %v7547_v28 = vadd.f32 %v7515_v34, %v12659_v59  ;;  %v7548_v52 = vadd.f32 %v7516_v58, %v12662_v7  ;;  %v7549_v25 = vadd.f32 %v7517_v16, %v12665_v35  ;;  %v12970_v21 = vld [vmem:[#allocation26_spill] sm:$0xff]  ;;  %v12971_v11 = vld [vmem:[#allocation24_spill] sm:$0xff] }
 0x6dc   : > { %7566 = vst [vmem:[%s12693_s23 + $0x60] sm:$0xff] %v7534_v14  ;;  %7567 = vst [vmem:[%s12693_s23 + $0x68] sm:$0xff] %v7535_v54  ;;  %v7550_v46 = vadd.f32 %v7518_v63, %v12970_v21  ;;  %v7551_v53 = vadd.f32 %v7519_v37, %v12971_v11  ;;  %v12972_v50 = vld [vmem:[#allocation31_spill] sm:$0xff] }
 0x6dd   : > { %7568 = vst [vmem:[%s12693_s23 + $0x70] sm:$0xff] %v7536_v32  ;;  %7569 = vst [vmem:[%s12693_s23 + $0x78] sm:$0xff] %v7537_v4  ;;  %v7552_v39 = vadd.f32 %v7520_v12, %v12972_v50  ;;  %v12973_v13 = vld [vmem:[#allocation23_spill] sm:$0xff] }
 0x6de   : > { %7570 = vst [vmem:[%s12693_s23 + $0x80] sm:$0xff] %v7538_v56  ;;  %7571 = vst [vmem:[%s12693_s23 + $0x88] sm:$0xff] %v7539_v33  ;;  %v7553_v15 = vadd.f32 %v7521_v17, %v12973_v13 }
 0x6df   : > { %7572 = vst [vmem:[%s12693_s23 + $0x90] sm:$0xff] %v7540_v26  ;;  %7573 = vst [vmem:[%s12693_s23 + $0x98] sm:$0xff] %v7541_v38 }
 0x6e0   : > { %7574 = vst [vmem:[%s12693_s23 + $0xa0] sm:$0xff] %v7542_v61  ;;  %7575 = vst [vmem:[%s12693_s23 + $0xa8] sm:$0xff] %v7543_v2 }
 0x6e1   : > { %7576 = vst [vmem:[%s12693_s23 + $0xb0] sm:$0xff] %v7544_v55  ;;  %7577 = vst [vmem:[%s12693_s23 + $0xb8] sm:$0xff] %v7545_v6 }
 0x6e2   : > { %7578 = vst [vmem:[%s12693_s23 + $0xc0] sm:$0xff] %v7546_v47  ;;  %7579 = vst [vmem:[%s12693_s23 + $0xc8] sm:$0xff] %v7547_v28 }
 0x6e3   : > { %7580 = vst [vmem:[%s12693_s23 + $0xd0] sm:$0xff] %v7548_v52  ;;  %7581 = vst [vmem:[%s12693_s23 + $0xd8] sm:$0xff] %v7549_v25 }
 0x6e4   : > { %7582 = vst [vmem:[%s12693_s23 + $0xe0] sm:$0xff] %v7550_v46  ;;  %7583 = vst [vmem:[%s12693_s23 + $0xe8] sm:$0xff] %v7551_v53 }
 0x6e5   : > { %7584 = vst [vmem:[%s12693_s23 + $0xf0] sm:$0xff] %v7552_v39  ;;  %7585 = vst [vmem:[%s12693_s23 + $0xf8] sm:$0xff] %v7553_v15 }
 0x6e6   : > { %10023 = shalt.err (!%p10020_p2)
}
 0x6e7   : > { %s10024_s14 = scalar_lea.hbm %s12740_s25, 4096  ;;  %s10028_s28 = scalar_lea.hbm %s12813_s9, 8192 }
 0x6e8   : > { %p10025_p13 = scmp.ne.s32.totalorder %s12740_s25, %s10024_s14  ;;  %p10029_p4 = scmp.lt.u32.totalorder %s12740_s25, %s12813_s9 }
 0x6e9   : > { %p10030_p5 = scmp.lt.u32.totalorder %s10028_s28, %s10024_s14  ;;  %p10032_p11 = scmp.lt.u32.totalorder %s10024_s14, %s12740_s25 }
 0x6ea   : > { %p10026_p6 = pnand %p10025_p13, %p12974_p0 }
 0x6eb   : > { %p10031_p8 = por %p10030_p5, %p10029_p4 }
 0x6ec   : > { %p10027_p10 = pneg %p10026_p6 }
 0x6ed   : > { %p10033_p1 = por %p10032_p11, %p10031_p8 }
 0x6ef   : > { %p10034_p3 = pnand %p10033_p1, %p10027_p10 }
 0x6f1   : > { %10037 = shalt.err (!%p10034_p3)
}
 0x6f2   : > { %s10094_s18 = smov 128   ;;  %s10095_s29 = smov 8  }
 0x6f3   : > { %9649 = dma.vmem_to_hbm [thread:$0]  (%p12974_p0), %s12744_s20, 4096, %s12740_s25, %s7587_s13, %s10094_s18, %s10094_s18, %s10095_s29  }
 0x6f4 PF: > { %s12975_s15 = sld [smem:[#allocation15_spill]]  ;;  %s7615_s17 = sand.u32 1, %s10068_s30  }
 0x6f5   : > { %p12977_p9 = scmp.ge.s32.totalorder %s10080_s12, 2  ;;  %s7616_s14 = scalar_lea.sflag [#allocation7], %s7615_s17 }
 0x6fa   : > { %p12976_p7 = scmp.ne.s32.totalorder %s12975_s15, 0 }
 0x6fc   : > { %p9663_p12 = pnand %p12977_p9, %p12976_p7 }
 0x6fe   : > { %10063 = dma.done.wait (!%p9663_p12), %s7616_s14, 4096  }
 0x6ff   : > { %10065 = vsyncadd (!%p9663_p12), %s7616_s14, 4294963200  ;;  %p23_p2 = scmp.ge.s32.totalorder %s10256_s24, 4   ;;  %s12978_s30 = smov %s10072_s10 }
 0x700   : > { %s12979_s10 = smov %s10076_s11  ;;  %s12980_s11 = smov %s10272_s27 }
 0x701   : > { %s12981_s12 = smov %s10256_s24  ;;  %25 = sbr.rel (!%p23_p2) target bundleno = 6 (0x6), region = 111 }
 0x708   :  { %7621 = vsyncpa [#allocation6], 1 }
 0x709   :  { %7623 = vsyncpa [#allocation6 + $0x1], 1 }
 0x70a   :  { %7624 = vsyncpa [#allocation9], 1 }
 0x70b   :  { %7625 = vsyncpa [#allocation7], 1 }
 0x70c   :  { %7627 = vsyncpa [#allocation7 + $0x1], 1 }

</bundles_post_ra>
